<compile_context>
chip_gen: v5e
topology: v5e:2x2
jax: 0.10.0
libtpu: 0.0.40
codegen_flags: <defaults>
</compile_context>

<pallas_src>
import math

import jax
import jax.numpy as jnp
from jax.experimental import pallas as pl
from jax.experimental.pallas import tpu as pltpu


# ----------------------------------------------------------------------------
# small helpers
# ----------------------------------------------------------------------------
def _ru(x, m):
    return (x + m - 1) // m * m


def _pick_row_tile(M):
    """Row-tile for the GEMMs: big enough to amortize per-step overhead, >=2 blocks
    when M allows it (v7x 2-TC sharding), 16-aligned for bf16 sublane packing."""
    if M >= 512:
        return 256
    if M >= 32:
        return _ru(max(M // 2, 16), 16)
    return _ru(M, 16)


def _gemm_tiles(M, Nc):
    tm = _pick_row_tile(M)
    Mp = _ru(M, tm)
    Np0 = _ru(Nc, 128)
    if Np0 <= 1024:
        tn, Np = Np0, Np0            # single lane-dense N block
    else:
        tn = 256                     # minimize N padding for awkward channel counts
        Np = _ru(Nc, 256)
    return tm, Mp, tn, Np


# ----------------------------------------------------------------------------
# Pallas kernels
# ----------------------------------------------------------------------------
def _fused_branch_gemm(x2d, w, b, relu_flag):
    """out[:, n] = (x2d @ w + b)[:, n], ReLU'd where relu_flag[n] == 1.

    Used for the fused (branch1 | branch2_1 | shortcut) 1x1 convolutions.
    x2d: (M, K) bf16, w: (K, Nc) bf16 (BN scale folded), b/flag: (Nc,) f32.
    Returns (M, Nc) bf16.
    """
    M, K = x2d.shape
    Nc = w.shape[1]
    tm, Mp, tn, Np = _gemm_tiles(M, Nc)

    xp = jnp.pad(x2d, ((0, Mp - M), (0, 0)))
    wp = jnp.pad(w, ((0, 0), (0, Np - Nc)))
    bp = jnp.pad(b.reshape(1, Nc), ((0, 0), (0, Np - Nc)))
    fp = jnp.pad(relu_flag.reshape(1, Nc), ((0, 0), (0, Np - Nc)))

    def kernel(x_ref, w_ref, b_ref, f_ref, o_ref):
        acc = jnp.dot(x_ref[...], w_ref[...], preferred_element_type=jnp.float32)
        y = acc + b_ref[...]
        # selective ReLU:  y + f*relu(-y) == relu(y) where f==1, y where f==0
        y = y + f_ref[...] * jnp.maximum(-y, 0.0)
        o_ref[...] = y.astype(o_ref.dtype)

    out = pl.pallas_call(
        kernel,
        out_shape=jax.ShapeDtypeStruct((Mp, Np), jnp.bfloat16),
        grid=(Mp // tm, Np // tn),
        in_specs=[
            pl.BlockSpec((tm, K), lambda i, j: (i, 0)),
            pl.BlockSpec((K, tn), lambda i, j: (0, j)),
            pl.BlockSpec((1, tn), lambda i, j: (0, j)),
            pl.BlockSpec((1, tn), lambda i, j: (0, j)),
        ],
        out_specs=pl.BlockSpec((tm, tn), lambda i, j: (i, j)),
        compiler_params=pltpu.CompilerParams(
            dimension_semantics=("parallel", "parallel")),
    )(xp, wp, bp, fp)
    return out[:M, :Nc]


def _fused_linear_residual(x2d, w, b, sx, scale):
    """out = relu(sx + scale * relu(x2d @ w + b))   -- the 'linear' Conv1 epilogue
    fused with the residual add + final ReLU of the block.

    x2d: (M, K) bf16, w: (K, Nc) bf16 (BN scale folded), b: (Nc,) f32,
    sx: (M, Nc) bf16 shortcut tensor.  Returns (M, Nc) f32.
    """
    M, K = x2d.shape
    Nc = w.shape[1]
    tm, Mp, tn, Np = _gemm_tiles(M, Nc)

    xp = jnp.pad(x2d, ((0, Mp - M), (0, 0)))
    wp = jnp.pad(w, ((0, 0), (0, Np - Nc)))
    bp = jnp.pad(b.reshape(1, Nc), ((0, 0), (0, Np - Nc)))
    sp = jnp.pad(sx, ((0, Mp - M), (0, Np - Nc)))
    scale = float(scale)

    def kernel(x_ref, w_ref, b_ref, s_ref, o_ref):
        acc = jnp.dot(x_ref[...], w_ref[...], preferred_element_type=jnp.float32)
        y = jnp.maximum(acc + b_ref[...], 0.0)                      # Conv+BN+ReLU
        o = jnp.maximum(s_ref[...].astype(jnp.float32) + scale * y, 0.0)
        o_ref[...] = o

    out = pl.pallas_call(
        kernel,
        out_shape=jax.ShapeDtypeStruct((Mp, Np), jnp.float32),
        grid=(Mp // tm, Np // tn),
        in_specs=[
            pl.BlockSpec((tm, K), lambda i, j: (i, 0)),
            pl.BlockSpec((K, tn), lambda i, j: (0, j)),
            pl.BlockSpec((1, tn), lambda i, j: (0, j)),
            pl.BlockSpec((tm, tn), lambda i, j: (i, j)),
        ],
        out_specs=pl.BlockSpec((tm, tn), lambda i, j: (i, j)),
        compiler_params=pltpu.CompilerParams(
            dimension_semantics=("parallel", "parallel")),
    )(xp, wp, bp, sp)
    return out[:M, :Nc]


def _tap_conv_w(x, w, b):
    """1xT convolution along W (SAME padding, stride 1) + bias + ReLU, without
    materializing an im2col tensor: per-tap shifted slices of the activation are
    accumulated against per-tap weight slices inside the kernel.

    x: (N, H, W, C) bf16, w: (T, C, Cout) bf16 (BN scale folded), b: (Cout,) f32.
    Returns (N, H, W, Cout) bf16.
    """
    N, H, W, C = x.shape
    T, _, Cout = w.shape
    pad = (T - 1) // 2
    xp = jnp.pad(x, ((0, 0), (0, 0), (pad, pad), (0, 0)))
    Wp = W + 2 * pad

    L = N * H
    xl = xp.reshape(L, Wp, C)
    if L >= 32:
        tl = min(128, _ru(max(L // 2, 8), 8))     # >=2 line-blocks for 2-TC sharding
    else:
        tl = _ru(L, 8)
    Lp = _ru(L, tl)
    xl = jnp.pad(xl, ((0, Lp - L), (0, 0), (0, 0)))
    b2 = b.reshape(1, Cout)

    def kernel(x_ref, w_ref, b_ref, o_ref):
        acc = jnp.zeros((tl * W, Cout), jnp.float32)
        for t in range(T):                         # static unroll over taps
            xt = x_ref[:, t:t + W, :].reshape(tl * W, C)
            acc = acc + jnp.dot(xt, w_ref[t], preferred_element_type=jnp.float32)
        y = jnp.maximum(acc + b_ref[...], 0.0)
        o_ref[...] = y.reshape(tl, W, Cout).astype(o_ref.dtype)

    out = pl.pallas_call(
        kernel,
        out_shape=jax.ShapeDtypeStruct((Lp, W, Cout), jnp.bfloat16),
        grid=(Lp // tl,),
        in_specs=[
            pl.BlockSpec((tl, Wp, C), lambda i: (i, 0, 0)),
            pl.BlockSpec((T, C, Cout), lambda i: (0, 0, 0)),
            pl.BlockSpec((1, Cout), lambda i: (0, 0)),
        ],
        out_specs=pl.BlockSpec((tl, W, Cout), lambda i: (i, 0, 0)),
        compiler_params=pltpu.CompilerParams(dimension_semantics=("parallel",)),
    )(xl, w, b2)
    return out[:L].reshape(N, H, W, Cout)


def _tap_conv_h(x, w, b):
    """Tx1 convolution along H: reuse the W-tap kernel via an H<->W transpose."""
    xt = jnp.transpose(x, (0, 2, 1, 3))            # (N, W, H, C)
    yt = _tap_conv_w(xt, w, b)                     # taps shift along H
    return jnp.transpose(yt, (0, 2, 1, 3))         # (N, H, W, Cout)


# ----------------------------------------------------------------------------
# deterministic parameters (Conv2d + BatchNorm folded to weight/bias)
# ----------------------------------------------------------------------------
class ParamGen:
    def __init__(self, key):
        self.key = key
        self.i = 0

    def _next(self):
        self.i += 1
        return jax.random.fold_in(self.key, self.i)

    def conv_bn(self, cin, cout, taps):
        """Conv(+bias) + inference BatchNorm folded:  y = x*W' + b', then ReLU."""
        fan_in = cin * taps
        w = jax.random.normal(self._next(), (taps, cin, cout), jnp.float32)
        w = w * math.sqrt(2.0 / fan_in)
        cb = 0.01 * jax.random.normal(self._next(), (cout,), jnp.float32)
        gamma = 1.0 + 0.01 * jax.random.normal(self._next(), (cout,), jnp.float32)
        beta = 0.01 * jax.random.normal(self._next(), (cout,), jnp.float32)
        rmean = 0.01 * jax.random.normal(self._next(), (cout,), jnp.float32)
        rvar = 1.0 + 0.05 * jax.random.uniform(self._next(), (cout,), jnp.float32)
        s = gamma / jnp.sqrt(rvar + 1e-5)
        wf = (w * s).astype(jnp.bfloat16)                       # fold BN scale
        bf = ((cb - rmean) * s + beta).astype(jnp.float32)      # folded bias
        if taps == 1:
            wf = wf[0]                                          # (cin, cout)
        return wf, bf

    def plain_conv1x1(self, cin, cout):
        limit = 1.0 / math.sqrt(cin)
        w = jax.random.uniform(self._next(), (cin, cout), jnp.float32, -limit, limit)
        b = jax.random.uniform(self._next(), (cout,), jnp.float32, -limit, limit)
        return w.astype(jnp.bfloat16), b


# ----------------------------------------------------------------------------
# InceptionResNetC module
# ----------------------------------------------------------------------------
def make_inception_resnet_c(key, in_channel, inch=32, scale=0.1):
    pg = ParamGen(key)
    c_b1 = inch * 6
    c_b21 = inch * 6
    c_b22 = inch * 7
    c_b23 = inch * 8
    c_cat = inch * 14
    out_channel = inch * 67

    w_b1, b_b1 = pg.conv_bn(in_channel, c_b1, 1)        # branch1   1x1
    w_b21, b_b21 = pg.conv_bn(in_channel, c_b21, 1)     # branch2_1 1x1
    w_b22, b_b22 = pg.conv_bn(c_b21, c_b22, 3)          # branch2_2 1x3
    w_b23, b_b23 = pg.conv_bn(c_b22, c_b23, 3)          # branch2_3 3x1
    w_lin, b_lin = pg.conv_bn(c_cat, out_channel, 1)    # linear    1x1

    has_sc = in_channel != out_channel
    if has_sc:
        w_sc, b_sc = pg.plain_conv1x1(in_channel, out_channel)  # shortcut (no BN/ReLU)
        w_first = jnp.concatenate([w_b1, w_b21, w_sc], axis=1)
        b_first = jnp.concatenate([b_b1, b_b21, b_sc], axis=0)
        f_first = jnp.concatenate(
            [jnp.ones((c_b1 + c_b21,), jnp.float32),
             jnp.zeros((out_channel,), jnp.float32)], axis=0)
    else:
        w_first = jnp.concatenate([w_b1, w_b21], axis=1)
        b_first = jnp.concatenate([b_b1, b_b21], axis=0)
        f_first = jnp.ones((c_b1 + c_b21,), jnp.float32)

    def apply(x_nchw):
        x = jnp.transpose(x_nchw, (0, 2, 3, 1)).astype(jnp.bfloat16)   # NCHW -> NHWC
        N, H, W, Cin = x.shape
        M = N * H * W
        x2d = x.reshape(M, Cin)

        # fused (branch1 | branch2_1 | shortcut) 1x1 convs: x read once
        comb = _fused_branch_gemm(x2d, w_first, b_first, f_first)
        o1 = comb[:, :c_b1]
        o21 = comb[:, c_b1:c_b1 + c_b21]
        sx = comb[:, c_b1 + c_b21:] if has_sc else x2d

        # branch2_2 (1x3) and branch2_3 (3x1), tap-accumulated in-kernel
        o22 = _tap_conv_w(o21.reshape(N, H, W, c_b21), w_b22, b_b22)
        o23 = _tap_conv_h(o22, w_b23, b_b23)

        # concat -> linear 1x1 conv fused with residual add + scale + ReLU
        cat = jnp.concatenate([o1.reshape(N, H, W, c_b1), o23], axis=-1)
        out2d = _fused_linear_residual(cat.reshape(M, c_cat), w_lin, b_lin, sx, scale)

        out = out2d.reshape(N, H, W, out_channel)
        return jnp.transpose(out, (0, 3, 1, 2))                        # NHWC -> NCHW

    return jax.jit(apply)


if __name__ == "__main__":
    key = jax.random.PRNGKey(0)
    pkey, xkey = jax.random.split(key)

    in_channel, inch, scale = 64, 8, 0.1            # small shapes for the test
    model = make_inception_resnet_c(pkey, in_channel=in_channel, inch=inch, scale=scale)

    x = jax.random.normal(xkey, (2, in_channel, 16, 16), jnp.float32)  # NCHW input
    out = jax.block_until_ready(model(x))

    assert out.shape == (2, inch * 67, 16, 16), out.shape
    assert bool(jnp.all(jnp.isfinite(out)))
    print("KERNEL_OK")
</pallas_src>

<mosaic_0001>
module attributes {stable_mosaic.version = 11 : i64} {
  func.func @kernel(%arg0: i32, %arg1: i32, %arg2: memref<256x64xbf16, #tpu.memory_space<vmem>>, %arg3: memref<64x640xbf16, #tpu.memory_space<vmem>>, %arg4: memref<1x640xf32, #tpu.memory_space<vmem>>, %arg5: memref<1x640xf32, #tpu.memory_space<vmem>>, %arg6: memref<256x640xbf16, #tpu.memory_space<vmem>>) attributes {dimension_semantics = [#tpu.dimension_semantics<parallel>, #tpu.dimension_semantics<parallel>], iteration_bounds = array<i64: 2, 1>, scalar_prefetch = 0 : i64, scratch_operands = 0 : i64, tpu.core_type = #tpu.core_type<tc>, window_params = [{transform_indices = @transform_0, window_bounds = array<i64: 256, 64>}, {transform_indices = @transform_1, window_bounds = array<i64: 64, 640>}, {transform_indices = @transform_2, window_bounds = array<i64: 1, 640>}, {transform_indices = @transform_3, window_bounds = array<i64: 1, 640>}, {transform_indices = @transform_4, window_bounds = array<i64: 256, 640>}]} {
    %c0 = arith.constant 0 : index
    %c0_0 = arith.constant 0 : index
    %0 = vector.load %arg2[%c0, %c0_0] : memref<256x64xbf16, #tpu.memory_space<vmem>>, vector<256x64xbf16>
    %c0_1 = arith.constant 0 : index
    %c0_2 = arith.constant 0 : index
    %1 = vector.load %arg3[%c0_1, %c0_2] : memref<64x640xbf16, #tpu.memory_space<vmem>>, vector<64x640xbf16>
    %cst = arith.constant dense<0.000000e+00> : vector<256x640xf32>
    %2 = tpu.matmul %0, %1, %cst {dimension_numbers = #tpu.dot_dimension_numbers<[1], [0], [0], [1], [0, 0, 1, 1], [], []>} : vector<256x64xbf16>, vector<64x640xbf16>, vector<256x640xf32> -> vector<256x640xf32>
    %c0_3 = arith.constant 0 : index
    %c0_4 = arith.constant 0 : index
    %3 = vector.load %arg4[%c0_3, %c0_4] : memref<1x640xf32, #tpu.memory_space<vmem>>, vector<1x640xf32>
    %4 = vector.broadcast %3 : vector<1x640xf32> to vector<256x640xf32>
    %5 = arith.addf %2, %4 : vector<256x640xf32>
    %c0_5 = arith.constant 0 : index
    %c0_6 = arith.constant 0 : index
    %6 = vector.load %arg5[%c0_5, %c0_6] : memref<1x640xf32, #tpu.memory_space<vmem>>, vector<1x640xf32>
    %cst_7 = arith.constant 0.000000e+00 : f32
    %7 = vector.broadcast %cst_7 : f32 to vector<256x640xf32>
    %8 = arith.subf %7, %5 : vector<256x640xf32>
    %cst_8 = arith.constant 0.000000e+00 : f32
    %9 = vector.broadcast %cst_8 : f32 to vector<256x640xf32>
    %10 = arith.maximumf %8, %9 : vector<256x640xf32>
    %11 = vector.broadcast %6 : vector<1x640xf32> to vector<256x640xf32>
    %12 = arith.mulf %11, %10 : vector<256x640xf32>
    %13 = arith.addf %5, %12 : vector<256x640xf32>
    %14 = arith.truncf %13 : vector<256x640xf32> to vector<256x640xbf16>
    %c0_9 = arith.constant 0 : index
    %c0_10 = arith.constant 0 : index
    %15 = vector.load %arg6[%c0_9, %c0_10] : memref<256x640xbf16, #tpu.memory_space<vmem>>, vector<256x640xbf16>
    tpu.vector_store %arg6[%c0_9, %c0_10], %14 {strides = array<i32>} : memref<256x640xbf16, #tpu.memory_space<vmem>>, vector<256x640xbf16>,
    return
  }
  func.func @transform_0(%arg0: i32, %arg1: i32) -> (i32, i32) {
    %c0_i32 = arith.constant 0 : i32
    %c0_i32_0 = arith.constant 0 : i32
    return %arg0, %c0_i32 : i32, i32
  }
  func.func @transform_1(%arg0: i32, %arg1: i32) -> (i32, i32) {
    %c0_i32 = arith.constant 0 : i32
    %c0_i32_0 = arith.constant 0 : i32
    return %c0_i32, %arg1 : i32, i32
  }
  func.func @transform_2(%arg0: i32, %arg1: i32) -> (i32, i32) {
    %c0_i32 = arith.constant 0 : i32
    %c0_i32_0 = arith.constant 0 : i32
    return %c0_i32, %arg1 : i32, i32
  }
  func.func @transform_3(%arg0: i32, %arg1: i32) -> (i32, i32) {
    %c0_i32 = arith.constant 0 : i32
    %c0_i32_0 = arith.constant 0 : i32
    return %c0_i32, %arg1 : i32, i32
  }
  func.func @transform_4(%arg0: i32, %arg1: i32) -> (i32, i32) {
    %c0_i32 = arith.constant 0 : i32
    return %arg0, %arg1 : i32, i32
  }
}

module attributes {stable_mosaic.version = 11 : i64} {
  func.func @kernel(%arg0: i32, %arg1: memref<16x18x48xbf16, #tpu.memory_space<vmem>>, %arg2: memref<3x48x56xbf16, #tpu.memory_space<vmem>>, %arg3: memref<1x56xf32, #tpu.memory_space<vmem>>, %arg4: memref<16x16x56xbf16, #tpu.memory_space<vmem>>) attributes {dimension_semantics = [#tpu.dimension_semantics<parallel>], iteration_bounds = array<i64: 2>, scalar_prefetch = 0 : i64, scratch_operands = 0 : i64, tpu.core_type = #tpu.core_type<tc>, window_params = [{transform_indices = @transform_0, window_bounds = array<i64: 16, 18, 48>}, {pipeline_mode = #tpu.pipeline_mode<synchronous>, transform_indices = @transform_1, window_bounds = array<i64: 3, 48, 56>}, {pipeline_mode = #tpu.pipeline_mode<synchronous>, transform_indices = @transform_2, window_bounds = array<i64: 1, 56>}, {transform_indices = @transform_3, window_bounds = array<i64: 16, 16, 56>}]} {
    %cst = arith.constant 0.000000e+00 : f32
    %0 = vector.broadcast %cst : f32 to vector<256x56xf32>
    %c0 = arith.constant 0 : index
    %c0_0 = arith.constant 0 : index
    %c0_1 = arith.constant 0 : index
    %1 = vector.load %arg1[%c0, %c0_0, %c0_1] : memref<16x18x48xbf16, #tpu.memory_space<vmem>>, vector<16x16x48xbf16>
    %2 = vector.shape_cast %1 : vector<16x16x48xbf16> to vector<256x48xbf16>
    %c0_2 = arith.constant 0 : index
    %c0_3 = arith.constant 0 : index
    %c0_4 = arith.constant 0 : index
    %3 = vector.load %arg2[%c0_2, %c0_3, %c0_4] : memref<3x48x56xbf16, #tpu.memory_space<vmem>>, vector<1x48x56xbf16>
    %4 = vector.shape_cast %3 : vector<1x48x56xbf16> to vector<48x56xbf16>
    %cst_5 = arith.constant dense<0.000000e+00> : vector<256x56xf32>
    %5 = tpu.matmul %2, %4, %cst_5 {dimension_numbers = #tpu.dot_dimension_numbers<[1], [0], [0], [1], [0, 0, 1, 1], [], []>} : vector<256x48xbf16>, vector<48x56xbf16>, vector<256x56xf32> -> vector<256x56xf32>
    %6 = arith.addf %0, %5 : vector<256x56xf32>
    %c0_6 = arith.constant 0 : index
    %c1 = arith.constant 1 : index
    %c0_7 = arith.constant 0 : index
    %7 = vector.load %arg1[%c0_6, %c1, %c0_7] : memref<16x18x48xbf16, #tpu.memory_space<vmem>>, vector<16x16x48xbf16>
    %8 = vector.shape_cast %7 : vector<16x16x48xbf16> to vector<256x48xbf16>
    %c1_8 = arith.constant 1 : index
    %c0_9 = arith.constant 0 : index
    %c0_10 = arith.constant 0 : index
    %9 = vector.load %arg2[%c1_8, %c0_9, %c0_10] : memref<3x48x56xbf16, #tpu.memory_space<vmem>>, vector<1x48x56xbf16>
    %10 = vector.shape_cast %9 : vector<1x48x56xbf16> to vector<48x56xbf16>
    %cst_11 = arith.constant dense<0.000000e+00> : vector<256x56xf32>
    %11 = tpu.matmul %8, %10, %cst_11 {dimension_numbers = #tpu.dot_dimension_numbers<[1], [0], [0], [1], [0, 0, 1, 1], [], []>} : vector<256x48xbf16>, vector<48x56xbf16>, vector<256x56xf32> -> vector<256x56xf32>
    %12 = arith.addf %6, %11 : vector<256x56xf32>
    %c0_12 = arith.constant 0 : index
    %c2 = arith.constant 2 : index
    %c0_13 = arith.constant 0 : index
    %13 = vector.load %arg1[%c0_12, %c2, %c0_13] : memref<16x18x48xbf16, #tpu.memory_space<vmem>>, vector<16x16x48xbf16>
    %14 = vector.shape_cast %13 : vector<16x16x48xbf16> to vector<256x48xbf16>
    %c2_14 = arith.constant 2 : index
    %c0_15 = arith.constant 0 : index
    %c0_16 = arith.constant 0 : index
    %15 = vector.load %arg2[%c2_14, %c0_15, %c0_16] : memref<3x48x56xbf16, #tpu.memory_space<vmem>>, vector<1x48x56xbf16>
    %16 = vector.shape_cast %15 : vector<1x48x56xbf16> to vector<48x56xbf16>
    %cst_17 = arith.constant dense<0.000000e+00> : vector<256x56xf32>
    %17 = tpu.matmul %14, %16, %cst_17 {dimension_numbers = #tpu.dot_dimension_numbers<[1], [0], [0], [1], [0, 0, 1, 1], [], []>} : vector<256x48xbf16>, vector<48x56xbf16>, vector<256x56xf32> -> vector<256x56xf32>
    %18 = arith.addf %12, %17 : vector<256x56xf32>
    %c0_18 = arith.constant 0 : index
    %c0_19 = arith.constant 0 : index
    %19 = vector.load %arg3[%c0_18, %c0_19] : memref<1x56xf32, #tpu.memory_space<vmem>>, vector<1x56xf32>
    %20 = vector.broadcast %19 : vector<1x56xf32> to vector<256x56xf32>
    %21 = arith.addf %18, %20 : vector<256x56xf32>
    %cst_20 = arith.constant 0.000000e+00 : f32
    %22 = vector.broadcast %cst_20 : f32 to vector<256x56xf32>
    %23 = arith.maximumf %21, %22 : vector<256x56xf32>
    %24 = vector.shape_cast %23 : vector<256x56xf32> to vector<16x16x56xf32>
    %25 = arith.truncf %24 : vector<16x16x56xf32> to vector<16x16x56xbf16>
    %c0_21 = arith.constant 0 : index
    %c0_22 = arith.constant 0 : index
    %c0_23 = arith.constant 0 : index
    %26 = vector.load %arg4[%c0_21, %c0_22, %c0_23] : memref<16x16x56xbf16, #tpu.memory_space<vmem>>, vector<16x16x56xbf16>
    tpu.vector_store %arg4[%c0_21, %c0_22, %c0_23], %25 {strides = array<i32>} : memref<16x16x56xbf16, #tpu.memory_space<vmem>>, vector<16x16x56xbf16>,
    return
  }
  func.func @transform_0(%arg0: i32) -> (i32, i32, i32) {
    %c0_i32 = arith.constant 0 : i32
    %c0_i32_0 = arith.constant 0 : i32
    %c0_i32_1 = arith.constant 0 : i32
    return %arg0, %c0_i32, %c0_i32_0 : i32, i32, i32
  }
  func.func @transform_1(%arg0: i32) -> (i32, i32, i32) {
    %c0_i32 = arith.constant 0 : i32
    %c0_i32_0 = arith.constant 0 : i32
    %c0_i32_1 = arith.constant 0 : i32
    %c0_i32_2 = arith.constant 0 : i32
    return %c0_i32, %c0_i32_0, %c0_i32_1 : i32, i32, i32
  }
  func.func @transform_2(%arg0: i32) -> (i32, i32) {
    %c0_i32 = arith.constant 0 : i32
    %c0_i32_0 = arith.constant 0 : i32
    %c0_i32_1 = arith.constant 0 : i32
    return %c0_i32, %c0_i32_0 : i32, i32
  }
  func.func @transform_3(%arg0: i32) -> (i32, i32, i32) {
    %c0_i32 = arith.constant 0 : i32
    %c0_i32_0 = arith.constant 0 : i32
    %c0_i32_1 = arith.constant 0 : i32
    return %arg0, %c0_i32, %c0_i32_0 : i32, i32, i32
  }
}

module attributes {stable_mosaic.version = 11 : i64} {
  func.func @kernel(%arg0: i32, %arg1: memref<16x18x56xbf16, #tpu.memory_space<vmem>>, %arg2: memref<3x56x64xbf16, #tpu.memory_space<vmem>>, %arg3: memref<1x64xf32, #tpu.memory_space<vmem>>, %arg4: memref<16x16x64xbf16, #tpu.memory_space<vmem>>) attributes {dimension_semantics = [#tpu.dimension_semantics<parallel>], iteration_bounds = array<i64: 2>, scalar_prefetch = 0 : i64, scratch_operands = 0 : i64, tpu.core_type = #tpu.core_type<tc>, window_params = [{transform_indices = @transform_0, window_bounds = array<i64: 16, 18, 56>}, {pipeline_mode = #tpu.pipeline_mode<synchronous>, transform_indices = @transform_1, window_bounds = array<i64: 3, 56, 64>}, {pipeline_mode = #tpu.pipeline_mode<synchronous>, transform_indices = @transform_2, window_bounds = array<i64: 1, 64>}, {transform_indices = @transform_3, window_bounds = array<i64: 16, 16, 64>}]} {
    %cst = arith.constant 0.000000e+00 : f32
    %0 = vector.broadcast %cst : f32 to vector<256x64xf32>
    %c0 = arith.constant 0 : index
    %c0_0 = arith.constant 0 : index
    %c0_1 = arith.constant 0 : index
    %1 = vector.load %arg1[%c0, %c0_0, %c0_1] : memref<16x18x56xbf16, #tpu.memory_space<vmem>>, vector<16x16x56xbf16>
    %2 = vector.shape_cast %1 : vector<16x16x56xbf16> to vector<256x56xbf16>
    %c0_2 = arith.constant 0 : index
    %c0_3 = arith.constant 0 : index
    %c0_4 = arith.constant 0 : index
    %3 = vector.load %arg2[%c0_2, %c0_3, %c0_4] : memref<3x56x64xbf16, #tpu.memory_space<vmem>>, vector<1x56x64xbf16>
    %4 = vector.shape_cast %3 : vector<1x56x64xbf16> to vector<56x64xbf16>
    %cst_5 = arith.constant dense<0.000000e+00> : vector<256x64xf32>
    %5 = tpu.matmul %2, %4, %cst_5 {dimension_numbers = #tpu.dot_dimension_numbers<[1], [0], [0], [1], [0, 0, 1, 1], [], []>} : vector<256x56xbf16>, vector<56x64xbf16>, vector<256x64xf32> -> vector<256x64xf32>
    %6 = arith.addf %0, %5 : vector<256x64xf32>
    %c0_6 = arith.constant 0 : index
    %c1 = arith.constant 1 : index
    %c0_7 = arith.constant 0 : index
    %7 = vector.load %arg1[%c0_6, %c1, %c0_7] : memref<16x18x56xbf16, #tpu.memory_space<vmem>>, vector<16x16x56xbf16>
    %8 = vector.shape_cast %7 : vector<16x16x56xbf16> to vector<256x56xbf16>
    %c1_8 = arith.constant 1 : index
    %c0_9 = arith.constant 0 : index
    %c0_10 = arith.constant 0 : index
    %9 = vector.load %arg2[%c1_8, %c0_9, %c0_10] : memref<3x56x64xbf16, #tpu.memory_space<vmem>>, vector<1x56x64xbf16>
    %10 = vector.shape_cast %9 : vector<1x56x64xbf16> to vector<56x64xbf16>
    %cst_11 = arith.constant dense<0.000000e+00> : vector<256x64xf32>
    %11 = tpu.matmul %8, %10, %cst_11 {dimension_numbers = #tpu.dot_dimension_numbers<[1], [0], [0], [1], [0, 0, 1, 1], [], []>} : vector<256x56xbf16>, vector<56x64xbf16>, vector<256x64xf32> -> vector<256x64xf32>
    %12 = arith.addf %6, %11 : vector<256x64xf32>
    %c0_12 = arith.constant 0 : index
    %c2 = arith.constant 2 : index
    %c0_13 = arith.constant 0 : index
    %13 = vector.load %arg1[%c0_12, %c2, %c0_13] : memref<16x18x56xbf16, #tpu.memory_space<vmem>>, vector<16x16x56xbf16>
    %14 = vector.shape_cast %13 : vector<16x16x56xbf16> to vector<256x56xbf16>
    %c2_14 = arith.constant 2 : index
    %c0_15 = arith.constant 0 : index
    %c0_16 = arith.constant 0 : index
    %15 = vector.load %arg2[%c2_14, %c0_15, %c0_16] : memref<3x56x64xbf16, #tpu.memory_space<vmem>>, vector<1x56x64xbf16>
    %16 = vector.shape_cast %15 : vector<1x56x64xbf16> to vector<56x64xbf16>
    %cst_17 = arith.constant dense<0.000000e+00> : vector<256x64xf32>
    %17 = tpu.matmul %14, %16, %cst_17 {dimension_numbers = #tpu.dot_dimension_numbers<[1], [0], [0], [1], [0, 0, 1, 1], [], []>} : vector<256x56xbf16>, vector<56x64xbf16>, vector<256x64xf32> -> vector<256x64xf32>
    %18 = arith.addf %12, %17 : vector<256x64xf32>
    %c0_18 = arith.constant 0 : index
    %c0_19 = arith.constant 0 : index
    %19 = vector.load %arg3[%c0_18, %c0_19] : memref<1x64xf32, #tpu.memory_space<vmem>>, vector<1x64xf32>
    %20 = vector.broadcast %19 : vector<1x64xf32> to vector<256x64xf32>
    %21 = arith.addf %18, %20 : vector<256x64xf32>
    %cst_20 = arith.constant 0.000000e+00 : f32
    %22 = vector.broadcast %cst_20 : f32 to vector<256x64xf32>
    %23 = arith.maximumf %21, %22 : vector<256x64xf32>
    %24 = vector.shape_cast %23 : vector<256x64xf32> to vector<16x16x64xf32>
    %25 = arith.truncf %24 : vector<16x16x64xf32> to vector<16x16x64xbf16>
    %c0_21 = arith.constant 0 : index
    %c0_22 = arith.constant 0 : index
    %c0_23 = arith.constant 0 : index
    %26 = vector.load %arg4[%c0_21, %c0_22, %c0_23] : memref<16x16x64xbf16, #tpu.memory_space<vmem>>, vector<16x16x64xbf16>
    tpu.vector_store %arg4[%c0_21, %c0_22, %c0_23], %25 {strides = array<i32>} : memref<16x16x64xbf16, #tpu.memory_space<vmem>>, vector<16x16x64xbf16>,
    return
  }
  func.func @transform_0(%arg0: i32) -> (i32, i32, i32) {
    %c0_i32 = arith.constant 0 : i32
    %c0_i32_0 = arith.constant 0 : i32
    %c0_i32_1 = arith.constant 0 : i32
    return %arg0, %c0_i32, %c0_i32_0 : i32, i32, i32
  }
  func.func @transform_1(%arg0: i32) -> (i32, i32, i32) {
    %c0_i32 = arith.constant 0 : i32
    %c0_i32_0 = arith.constant 0 : i32
    %c0_i32_1 = arith.constant 0 : i32
    %c0_i32_2 = arith.constant 0 : i32
    return %c0_i32, %c0_i32_0, %c0_i32_1 : i32, i32, i32
  }
  func.func @transform_2(%arg0: i32) -> (i32, i32) {
    %c0_i32 = arith.constant 0 : i32
    %c0_i32_0 = arith.constant 0 : i32
    %c0_i32_1 = arith.constant 0 : i32
    return %c0_i32, %c0_i32_0 : i32, i32
  }
  func.func @transform_3(%arg0: i32) -> (i32, i32, i32) {
    %c0_i32 = arith.constant 0 : i32
    %c0_i32_0 = arith.constant 0 : i32
    %c0_i32_1 = arith.constant 0 : i32
    return %arg0, %c0_i32, %c0_i32_0 : i32, i32, i32
  }
}

module attributes {stable_mosaic.version = 11 : i64} {
  func.func @kernel(%arg0: i32, %arg1: i32, %arg2: memref<256x112xbf16, #tpu.memory_space<vmem>>, %arg3: memref<112x640xbf16, #tpu.memory_space<vmem>>, %arg4: memref<1x640xf32, #tpu.memory_space<vmem>>, %arg5: memref<256x640xbf16, #tpu.memory_space<vmem>>, %arg6: memref<256x640xf32, #tpu.memory_space<vmem>>) attributes {dimension_semantics = [#tpu.dimension_semantics<parallel>, #tpu.dimension_semantics<parallel>], iteration_bounds = array<i64: 2, 1>, scalar_prefetch = 0 : i64, scratch_operands = 0 : i64, tpu.core_type = #tpu.core_type<tc>, window_params = [{transform_indices = @transform_0, window_bounds = array<i64: 256, 112>}, {transform_indices = @transform_1, window_bounds = array<i64: 112, 640>}, {transform_indices = @transform_2, window_bounds = array<i64: 1, 640>}, {transform_indices = @transform_3, window_bounds = array<i64: 256, 640>}, {transform_indices = @transform_4, window_bounds = array<i64: 256, 640>}]} {
    %c0 = arith.constant 0 : index
    %c0_0 = arith.constant 0 : index
    %0 = vector.load %arg2[%c0, %c0_0] : memref<256x112xbf16, #tpu.memory_space<vmem>>, vector<256x112xbf16>
    %c0_1 = arith.constant 0 : index
    %c0_2 = arith.constant 0 : index
    %1 = vector.load %arg3[%c0_1, %c0_2] : memref<112x640xbf16, #tpu.memory_space<vmem>>, vector<112x640xbf16>
    %cst = arith.constant dense<0.000000e+00> : vector<256x640xf32>
    %2 = tpu.matmul %0, %1, %cst {dimension_numbers = #tpu.dot_dimension_numbers<[1], [0], [0], [1], [0, 0, 1, 1], [], []>} : vector<256x112xbf16>, vector<112x640xbf16>, vector<256x640xf32> -> vector<256x640xf32>
    %c0_3 = arith.constant 0 : index
    %c0_4 = arith.constant 0 : index
    %3 = vector.load %arg4[%c0_3, %c0_4] : memref<1x640xf32, #tpu.memory_space<vmem>>, vector<1x640xf32>
    %4 = vector.broadcast %3 : vector<1x640xf32> to vector<256x640xf32>
    %5 = arith.addf %2, %4 : vector<256x640xf32>
    %cst_5 = arith.constant 0.000000e+00 : f32
    %6 = vector.broadcast %cst_5 : f32 to vector<256x640xf32>
    %7 = arith.maximumf %5, %6 : vector<256x640xf32>
    %c0_6 = arith.constant 0 : index
    %c0_7 = arith.constant 0 : index
    %8 = vector.load %arg5[%c0_6, %c0_7] : memref<256x640xbf16, #tpu.memory_space<vmem>>, vector<256x640xbf16>
    %9 = arith.extf %8 : vector<256x640xbf16> to vector<256x640xf32>
    %cst_8 = arith.constant 1.000000e-01 : f32
    %10 = vector.broadcast %cst_8 : f32 to vector<256x640xf32>
    %11 = arith.mulf %10, %7 : vector<256x640xf32>
    %12 = arith.addf %9, %11 : vector<256x640xf32>
    %cst_9 = arith.constant 0.000000e+00 : f32
    %13 = vector.broadcast %cst_9 : f32 to vector<256x640xf32>
    %14 = arith.maximumf %12, %13 : vector<256x640xf32>
    %c0_10 = arith.constant 0 : index
    %c0_11 = arith.constant 0 : index
    %15 = vector.load %arg6[%c0_10, %c0_11] : memref<256x640xf32, #tpu.memory_space<vmem>>, vector<256x640xf32>
    tpu.vector_store %arg6[%c0_10, %c0_11], %14 {strides = array<i32>} : memref<256x640xf32, #tpu.memory_space<vmem>>, vector<256x640xf32>,
    return
  }
  func.func @transform_0(%arg0: i32, %arg1: i32) -> (i32, i32) {
    %c0_i32 = arith.constant 0 : i32
    %c0_i32_0 = arith.constant 0 : i32
    return %arg0, %c0_i32 : i32, i32
  }
  func.func @transform_1(%arg0: i32, %arg1: i32) -> (i32, i32) {
    %c0_i32 = arith.constant 0 : i32
    %c0_i32_0 = arith.constant 0 : i32
    return %c0_i32, %arg1 : i32, i32
  }
  func.func @transform_2(%arg0: i32, %arg1: i32) -> (i32, i32) {
    %c0_i32 = arith.constant 0 : i32
    %c0_i32_0 = arith.constant 0 : i32
    return %c0_i32, %arg1 : i32, i32
  }
  func.func @transform_3(%arg0: i32, %arg1: i32) -> (i32, i32) {
    %c0_i32 = arith.constant 0 : i32
    return %arg0, %arg1 : i32, i32
  }
  func.func @transform_4(%arg0: i32, %arg1: i32) -> (i32, i32) {
    %c0_i32 = arith.constant 0 : i32
    return %arg0, %arg1 : i32, i32
  }
}

</mosaic_0001>

<bundles_post_ra>
// kernel: apply.4
= control target key start
LH: loop header
LB: loop body
LE: loop exit
PB: predicated region body
PF: predicated region fallthrough
CT: control target
= control target key end

     0   :  { %9 = vsyncpa [#allocation3], 0  ;;  %s3339_s0 = inlined_call_operand.vmem [shape: bf16[512,64], index: 0, kind: input, shape index: {}]   ;;  %s3340_s1 = inlined_call_operand.hbm [shape: bf16[64,640], index: 1, kind: input, shape index: {}]   ;;  %s3341_s2 = inlined_call_operand.hbm [shape: f32[1,640], index: 2, kind: input, shape index: {}]   ;;  %s3342_s3 = inlined_call_operand.hbm [shape: f32[1,640], index: 3, kind: input, shape index: {}]   ;;  %s3343_s4 = inlined_call_operand.vmem [shape: bf16[512,640], index: 4, kind: output, shape index: {}]  }
   0x1   :  { %10 = vsyncpa [#allocation5], 0  ;;  %s2512_s15 = smov 0   ;;  %s2514_s16 = smov 0  }
   0x2   :  { %s2516_s17 = smov 0  }
   0x3 LB: > { %s196_s20 = sshll.u32 %s3341_s2, 4  ;;  %s2009_s21 = sadd.s32 4294967295, %s2480_s17   ;;  %s2480_s17 = sphi %s2516_s17, %s16_s17   ;;  %s2476_s16 = sphi %s2514_s16, %s3358_s16   ;;  %s2472_s15 = sphi %s2512_s15, %s3357_s15   ;;  %s197_s20 = int_to_ptr.hbm [resolvable:$true] %s196_s20 }
   0x4   : > { %p2011_p0 = scmp.ge.s32.totalorder %s2480_s17, 1  ;;  %p165_p1 = scmp.lt.s32.totalorder %s2480_s17, 3 }
   0x5   : > { %p2533_p2 = scmp.eq.s32.totalorder %s2009_s21, 0  ;;  %s2482_s24 = smov [#allocation4]  }
   0x6   : > { %p2537_p3 = pnand %p2011_p0, %p165_p1  ;;  %s198_s25 = sshll.u32 %s2482_s24, 4  ;;  %s199_s25 = int_to_ptr.vmem [resolvable:$true] %s198_s25 }
   0x7   : > { %s28_s27 = sadd.s32 1, %s2476_s16  ;;  %s179_s30 = sshll.u32 %s3340_s1, 4  ;;  %s180_s30 = int_to_ptr.hbm [resolvable:$true] %s179_s30 }
   0x8   : > { %p2311_p4 = pneg %p2537_p3  ;;  %p30_p6 = scmp.ge.s32.totalorder %s28_s27, 2 }
   0x9   : > { %s2483_s5 = smov [#allocation2]   ;;  %s210_s9 = sshll.u32 %s3342_s3, 4  ;;  %s211_s9 = int_to_ptr.hbm [resolvable:$true] %s210_s9 }
   0xa   : > { %p2545_p5 = pnand %p2533_p2, %p2311_p4  ;;  %s3360_s27 = smov (%p30_p6, %s28_s27), 0 }
   0xb   : > { %s181_s6 = sshll.u32 %s2483_s5, 4  ;;  %s2484_s10 = smov 320   ;;  %s182_s6 = int_to_ptr.vmem [resolvable:$true] %s181_s6 }
   0xc   : > { %2317 = dma.hbm_to_vmem [thread:$0]  (!%p2545_p5), %s197_s20, 80, %s199_s25, [#allocation5]  }
   0xd   : > { %s2485_s11 = smov 20   ;;  %s2486_s12 = smov [#allocation6]  }
   0xe   : > { %2314 = dma.hbm_to_vmem [thread:$0]  (!%p2545_p5), %s180_s30, 2560, %s182_s6, [#allocation3], %s2484_s10, %s2484_s10, %s2485_s11  }
   0xf   : > { %s212_s13 = sshll.u32 %s2486_s12, 4  ;;  %234 = sbr.rel (%p2537_p3) target bundleno = 500 (0x1f4), region = 36  ;;  %s213_s13 = int_to_ptr.vmem [resolvable:$true] %s212_s13 }
  0x10   : > { %2320 = dma.hbm_to_vmem [thread:$0]  (!%p2545_p5), %s211_s9, 80, %s213_s13, [#allocation5]  }
  0x14   : > { %2463 = dma.done.wait (%p2533_p2), [#allocation3], 2560  }
  0x15   : > { %2465 = vsyncadd (%p2533_p2), [#allocation3], 4294964736 }
  0x16   : > { %2467 = dma.done.wait (%p2533_p2), [#allocation5], 160  }
  0x17   : > { %2469 = vsyncadd (%p2533_p2), [#allocation5], 4294967136  ;;  %s2020_s14 = sshll.u32 %s2472_s15, 5  ;;  %v2150_v0 = vld [vmem:[#allocation2 + $0x78] sm:$0xf]  ;;  %vm550_vm0 = vcmask 523264  }
  0x18   : > { %p277_p7 = scmp.lt.s32.totalorder %s2020_s14, 63  ;;  %v2283_v1 = vld [vmem:[#allocation2 + $0x88] sm:$0xf0]  ;;  %v2130_v2 = vld [vmem:[#allocation2 + $0x50] sm:$0xf] }
  0x19   : > { %v2151_v3 = vor.u32 %v2283_v1, %v2150_v0  ;;  %v2278_v4 = vld [vmem:[#allocation2 + $0x60] sm:$0xf0]  ;;  %v2110_v6 = vld [vmem:[#allocation2 + $0x28] sm:$0xf]  ;;  %v2273_v7 = vld [vmem:[#allocation2 + $0x38] sm:$0xf0] }
  0x1a   : > { %s3362_s14 = smov (!%p277_p7, %s2020_s14), 63  ;;  %v2131_v5 = vor.u32 %v2278_v4, %v2130_v2  ;;  %v2111_v8 = vor.u32 %v2273_v7, %v2110_v6  ;;  %v2090_v9 = vld [vmem:[#allocation2] sm:$0xf]  ;;  %v2268_v10 = vld [vmem:[#allocation2 + $0x10] sm:$0xf0] }
  0x1b   : > { %603 = vmatpush.bf16.msra.mxu0 %v2151_v3  ;;  %2286 = vmatpush.bf16.msra.mxu1 %v2151_v3  ;;  %s2021_s18 = sshll.u32 %s3362_s14, 2  ;;  %v2158_v11 = vld [vmem:[#allocation2 + $0x80] sm:$0xf]  ;;  %v2284_v12 = vld [vmem:[#allocation2 + $0x90] sm:$0xf0]  ;;  %v2091_v15 = vor.u32 %v2268_v10, %v2090_v9  ;;  %s2298_s21 = smul.u32 20, %s3362_s14 }
  0x1c   : > { %2287 = vmatpush.bf16.msra.mxu2 %v2151_v3  ;;  %2288 = vmatpush.bf16.msra.mxu3 %v2151_v3  ;;  %s2581_s20 = scalar_lea.vmem %s3339_s0, %s2021_s18  ;;  %v2282_v13 = vld [vmem:[#allocation2 + $0x84] sm:$0xf]  ;;  %v2160_v14 = vld [vmem:[#allocation2 + $0x94] sm:$0xf0]  ;;  %v2281_v18 = vld [vmem:[#allocation2 + $0x7c] sm:$0xf]  ;;  %v2159_v20 = vor.u32 %v2284_v12, %v2158_v11 }
  0x1d   : > { %v2584_v16 = vld [vmem:[%s2581_s20] sm:$0xff]  ;;  %v2152_v19 = vld [vmem:[#allocation2 + $0x8c] sm:$0xf0]  ;;  %v2163_v21 = vor.u32 %v2282_v13, %v2160_v14  ;;  %v2166_v22 = vld [vmem:[#allocation2 + $0x88] sm:$0xf]  ;;  %s2877_s24 = scalar_lea.vmem %s3343_s4, %s2298_s21 }
  0x1e   : > { %v2587_v17 = vld [vmem:[%s2581_s20 + $0x20] sm:$0xff]  ;;  %v2285_v23 = vld [vmem:[#allocation2 + $0x98] sm:$0xf0]  ;;  %v2138_v24 = vld [vmem:[#allocation2 + $0x58] sm:$0xf]  ;;  %v2155_v30 = vor.u32 %v2281_v18, %v2152_v19 }
  0x1f   : > { %604 = vmatpush.bf16.msra.mxu0 %v2131_v5  ;;  %2289 = vmatpush.bf16.msra.mxu1 %v2131_v5  ;;  %v2279_v25 = vld [vmem:[#allocation2 + $0x68] sm:$0xf0]  ;;  %v2277_v26 = vld [vmem:[#allocation2 + $0x5c] sm:$0xf]  ;;  %v2140_v27 = vld [vmem:[#allocation2 + $0x6c] sm:$0xf0]  ;;  %v2167_v31 = vor.u32 %v2285_v23, %v2166_v22 }
  0x20   : > { %2290 = vmatpush.bf16.msra.mxu2 %v2131_v5  ;;  %2291 = vmatpush.bf16.msra.mxu3 %v2131_v5  ;;  %v2590_v28 = vld [vmem:[%s2581_s20 + $0x40] sm:$0xff]  ;;  %v2276_v32 = vld [vmem:[#allocation2 + $0x54] sm:$0xf]  ;;  %v2139_v33 = vor.u32 %v2279_v25, %v2138_v24  ;;  %v2143_v34 = vor.u32 %v2277_v26, %v2140_v27  ;;  %v2132_v35 = vld [vmem:[#allocation2 + $0x64] sm:$0xf0] }
  0x21   : > { %v2262_v29 = vld [vmem:[%s2581_s20 + $0x60] sm:$0xff]  ;;  %v2280_v37 = vld [vmem:[#allocation2 + $0x70] sm:$0xf0]  ;;  %v2118_v38 = vld [vmem:[#allocation2 + $0x30] sm:$0xf]  ;;  %v2135_v41 = vor.u32 %v2276_v32, %v2132_v35 }
  0x22   : > { %v2146_v36 = vld [vmem:[#allocation2 + $0x60] sm:$0xf]  ;;  %v2274_v39 = vld [vmem:[#allocation2 + $0x40] sm:$0xf0]  ;;  %v2272_v40 = vld [vmem:[#allocation2 + $0x34] sm:$0xf] }
  0x23   : > { %605 = vmatpush.bf16.msra.mxu0 %v2111_v8  ;;  %2292 = vmatpush.bf16.msra.mxu1 %v2111_v8  ;;  %v2147_v42 = vor.u32 %v2280_v37, %v2146_v36  ;;  %v2120_v43 = vld [vmem:[#allocation2 + $0x44] sm:$0xf0]  ;;  %v2271_v44 = vld [vmem:[#allocation2 + $0x2c] sm:$0xf]  ;;  %v2119_v45 = vor.u32 %v2274_v39, %v2118_v38  ;;  %v2112_v47 = vld [vmem:[#allocation2 + $0x3c] sm:$0xf0] }
  0x24   : > { %2293 = vmatpush.bf16.msra.mxu2 %v2111_v8  ;;  %2294 = vmatpush.bf16.msra.mxu3 %v2111_v8  ;;  %v2123_v46 = vor.u32 %v2272_v40, %v2120_v43  ;;  %v2126_v48 = vld [vmem:[#allocation2 + $0x38] sm:$0xf]  ;;  %v2275_v49 = vld [vmem:[#allocation2 + $0x48] sm:$0xf0]  ;;  %v2115_v50 = vor.u32 %v2271_v44, %v2112_v47  ;;  %v2098_v56 = vld [vmem:[#allocation2 + $0x8] sm:$0xf] }
  0x25   : > { %v2127_v51 = vor.u32 %v2275_v49, %v2126_v48  ;;  %v2251_v52 = vld [vmem:[%s2581_s20 + $0x8] sm:$0xff]  ;;  %v2269_v57 = vld [vmem:[#allocation2 + $0x18] sm:$0xf0]  ;;  %v2100_v60 = vld [vmem:[#allocation2 + $0x1c] sm:$0xf0] }
  0x26   : > { %v2602_v53 = vld [vmem:[%s2581_s20 + $0x28] sm:$0xff]  ;;  %v2099_v59 = vor.u32 %v2269_v57, %v2098_v56  ;;  %v2266_v61 = vld [vmem:[#allocation2 + $0x4] sm:$0xf]  ;;  %v2092_v62 = vld [vmem:[#allocation2 + $0x14] sm:$0xf0] }
  0x27   : > { %606 = vmatpush.bf16.msra.mxu0 %v2091_v15  ;;  %2295 = vmatpush.bf16.msra.mxu1 %v2091_v15  ;;  %v2605_v54 = vld [vmem:[%s2581_s20 + $0x48] sm:$0xff]  ;;  %v2095_v0 = vor.u32 %v2266_v61, %v2092_v62  ;;  %v2106_v1 = vld [vmem:[#allocation2 + $0x10] sm:$0xf]  ;;  %v2270_v2 = vld [vmem:[#allocation2 + $0x20] sm:$0xf0] }
  0x28   : > { %2296 = vmatpush.bf16.msra.mxu2 %v2091_v15  ;;  %2297 = vmatpush.bf16.msra.mxu3 %v2091_v15  ;;  %v2263_v55 = vld [vmem:[%s2581_s20 + $0x68] sm:$0xff]  ;;  %v2107_v3 = vor.u32 %v2270_v2, %v2106_v1  ;;  %v2252_v4 = vld [vmem:[%s2581_s20 + $0x10] sm:$0xff]  ;;  %v2253_v8 = vld [vmem:[%s2581_s20 + $0x18] sm:$0xff] }
  0x29   : > { %v2267_v58 = vld [vmem:[#allocation2 + $0xc] sm:$0xf]  ;;  %v2616_v5 = vld [vmem:[%s2581_s20 + $0x30] sm:$0xff]  ;;  %v2630_v9 = vld [vmem:[%s2581_s20 + $0x38] sm:$0xff] }
  0x2a   : > { %2168 = vmatmul.msk.bf16.vlgmr.msra.gmra.mxu0 %vm550_vm0, %v2584_v16  ;;  %2172 = vmatmul.msk.bf16.vlgmr.msra.gmra.mxu1 %vm550_vm0, %v2587_v17  ;;  %v2103_v63 = vor.u32 %v2267_v58, %v2100_v60  ;;  %v2619_v6 = vld [vmem:[%s2581_s20 + $0x50] sm:$0xff]  ;;  %v2633_v10 = vld [vmem:[%s2581_s20 + $0x58] sm:$0xff]  ;;  %v2662_v12 = vld [vmem:[#allocation4] sm:$0x1f] }
  0x2b   : > { %2176 = vmatmul.msk.bf16.vlgmr.msra.gmra.mxu2 %vm550_vm0, %v2590_v28  ;;  %2180 = vmatmul.msk.bf16.vlgmr.msra.gmra.mxu3 %vm550_vm0, %v2262_v29  ;;  %v2264_v7 = vld [vmem:[%s2581_s20 + $0x70] sm:$0xff]  ;;  %v2265_v11 = vld [vmem:[%s2581_s20 + $0x78] sm:$0xff]  ;;  %v2665_v13 = vperm.slane %v2662_v12, 0  ;;  %v2669_v15 = vld [vmem:[#allocation6] sm:$0x1f] }
  0x2c   : > { %781 = vmatpush.bf16.msrb.mxu2 %v2159_v20  ;;  %870 = vmatpush.bf16.msrb.mxu3 %v2163_v21  ;;  %v2673_v19 = vperm.slane %v2669_v15, 0 }
  0x2d   : > { %692 = vmatpush.bf16.msrb.mxu1 %v2155_v30  ;;  %959 = vmatpush.bf16.msrb.mxu0 %v2167_v31 }
  0x30   : > { %782 = vmatpush.bf16.msrb.mxu2 %v2139_v33  ;;  %871 = vmatpush.bf16.msrb.mxu3 %v2143_v34 }
  0x31   : > { %693 = vmatpush.bf16.msrb.mxu1 %v2135_v41  ;;  %960 = vmatpush.bf16.msrb.mxu0 %v2147_v42 }
  0x34   : > { %783 = vmatpush.bf16.msrb.mxu2 %v2119_v45  ;;  %872 = vmatpush.bf16.msrb.mxu3 %v2123_v46 }
  0x35   : > { %694 = vmatpush.bf16.msrb.mxu1 %v2115_v50  ;;  %961 = vmatpush.bf16.msrb.mxu0 %v2127_v51 }
  0x38   : > { %784 = vmatpush.bf16.msrb.mxu2 %v2099_v59  ;;  %873 = vmatpush.bf16.msrb.mxu3 %v2103_v63 }
  0x39   : > { %695 = vmatpush.bf16.msrb.mxu1 %v2095_v0  ;;  %962 = vmatpush.bf16.msrb.mxu0 %v2107_v3 }
  0x3a   : > { %2169 = vmatmul.msk.bf16.gmra.mxu0 %vm550_vm0, %v2251_v52  ;;  %2173 = vmatmul.msk.bf16.gmra.mxu1 %vm550_vm0, %v2602_v53 }
  0x3b   : > { %2177 = vmatmul.msk.bf16.gmra.mxu2 %vm550_vm0, %v2605_v54  ;;  %2181 = vmatmul.msk.bf16.gmra.mxu3 %vm550_vm0, %v2263_v55 }
  0x4a   : > { %2170 = vmatmul.msk.bf16.gmra.mxu0 %vm550_vm0, %v2252_v4  ;;  %2174 = vmatmul.msk.bf16.gmra.mxu1 %vm550_vm0, %v2616_v5 }
  0x4b   : > { %2178 = vmatmul.msk.bf16.gmra.mxu2 %vm550_vm0, %v2619_v6  ;;  %2182 = vmatmul.msk.bf16.gmra.mxu3 %vm550_vm0, %v2264_v7 }
  0x5a   : > { %2171 = vmatmul.msk.bf16.gmra.mxu0 %vm550_vm0, %v2253_v8  ;;  %2175 = vmatmul.msk.bf16.gmra.mxu1 %vm550_vm0, %v2630_v9 }
  0x5b   : > { %2179 = vmatmul.msk.bf16.gmra.mxu2 %vm550_vm0, %v2633_v10  ;;  %2183 = vmatmul.msk.bf16.gmra.mxu3 %vm550_vm0, %v2265_v11 }
  0x6a   : > { %2184 = vmatmul.msk.bf16.vlgmr.msrb.gmra.mxu1 %vm550_vm0, %v2584_v16  ;;  %2232 = vmatmul.msk.bf16.vlgmr.msrb.gmra.mxu0 %vm550_vm0, %v2584_v16 }
  0x6b   : > { %2200 = vmatmul.msk.bf16.vlgmr.msrb.gmra.mxu2 %vm550_vm0, %v2584_v16  ;;  %2216 = vmatmul.msk.bf16.vlgmr.msrb.gmra.mxu3 %vm550_vm0, %v2584_v16 }
  0x7a   : > { %2185 = vmatmul.msk.bf16.gmra.mxu1 %vm550_vm0, %v2251_v52  ;;  %2233 = vmatmul.msk.bf16.gmra.mxu0 %vm550_vm0, %v2251_v52 }
  0x7b   : > { %2201 = vmatmul.msk.bf16.gmra.mxu2 %vm550_vm0, %v2251_v52  ;;  %2217 = vmatmul.msk.bf16.gmra.mxu3 %vm550_vm0, %v2251_v52 }
  0x8a   : > { %2186 = vmatmul.msk.bf16.gmra.mxu1 %vm550_vm0, %v2252_v4  ;;  %2234 = vmatmul.msk.bf16.gmra.mxu0 %vm550_vm0, %v2252_v4 }
  0x8b   : > { %2202 = vmatmul.msk.bf16.gmra.mxu2 %vm550_vm0, %v2252_v4  ;;  %2218 = vmatmul.msk.bf16.gmra.mxu3 %vm550_vm0, %v2252_v4 }
  0x9a   : > { %2187 = vmatmul.msk.bf16.gmra.mxu1 %vm550_vm0, %v2253_v8  ;;  %2235 = vmatmul.msk.bf16.gmra.mxu0 %vm550_vm0, %v2253_v8 }
  0x9b   : > { %2203 = vmatmul.msk.bf16.gmra.mxu2 %vm550_vm0, %v2253_v8  ;;  %2219 = vmatmul.msk.bf16.gmra.mxu3 %vm550_vm0, %v2253_v8 }
  0xa7   : > { %v2667_v14 = vpop.f32.mrf.mxu0  ;;  %v628_v16 = vpop.f32.mrf.mxu1 }
  0xa8   : > { %v629_v18 = vadd.f32 %v628_v16, %v2665_v13 }
  0xaa   : > { %v1085_v20 = vsub.f32 0.0, %v629_v18  ;;  %2188 = vmatmul.msk.bf16.gmra.mxu1 %vm550_vm0, %v2587_v17  ;;  %2236 = vmatmul.msk.bf16.gmra.mxu0 %vm550_vm0, %v2587_v17 }
  0xab   : > { %2204 = vmatmul.msk.bf16.gmra.mxu2 %vm550_vm0, %v2587_v17  ;;  %2220 = vmatmul.msk.bf16.gmra.mxu3 %vm550_vm0, %v2587_v17 }
  0xac   : > { %v1245_v21 = vmax.f32 %v1085_v20, 0.0 }
  0xae   : > { %v1416_v22 = vmul.f32 %v2673_v19, %v1245_v21  ;;  %v648_v23 = vpop.f32.mrf.mxu2  ;;  %v668_v24 = vpop.f32.mrf.mxu3 }
  0xaf   : > { %v649_v25 = vadd.f32 %v648_v23, %v2665_v13  ;;  %v669_v26 = vadd.f32 %v668_v24, %v2665_v13  ;;  %v2686_v27 = vpop.f32.mrf.mxu0  ;;  %v630_v29 = vpop.f32.mrf.mxu1 }
  0xb0   : > { %v2688_v30 = vadd.f32 %v1416_v22, %v629_v18  ;;  %v631_v31 = vadd.f32 %v630_v29, %v2665_v13 }
  0xb1   : > { %v1125_v32 = vsub.f32 0.0, %v649_v25  ;;  %v1165_v33 = vsub.f32 0.0, %v669_v26 }
  0xb2   : > { %v1090_v34 = vsub.f32 0.0, %v631_v31 }
  0xb3   : > { %v1285_v17 = vmax.f32 %v1125_v32, 0.0  ;;  %v1325_v35 = vmax.f32 %v1165_v33, 0.0 }
  0xb4   : > { %v1250_v36 = vmax.f32 %v1090_v34, 0.0 }
  0xb5   : > { %v1456_v37 = vmul.f32 %v2673_v19, %v1285_v17  ;;  %v1496_v38 = vmul.f32 %v2673_v19, %v1325_v35 }
  0xb6   : > { %v1421_v39 = vmul.f32 %v2673_v19, %v1250_v36  ;;  %v650_v40 = vpop.f32.mrf.mxu2  ;;  %v670_v41 = vpop.f32.mrf.mxu3 }
  0xb7   : > { %v2694_v42 = vadd.f32 %v1456_v37, %v649_v25  ;;  %v2696_v43 = vadd.f32 %v1496_v38, %v669_v26  ;;  %v651_v44 = vadd.f32 %v650_v40, %v2665_v13  ;;  %v671_v45 = vadd.f32 %v670_v41, %v2665_v13  ;;  %v2700_v46 = vpop.f32.mrf.mxu0  ;;  %v633_v47 = vpop.f32.mrf.mxu1 }
  0xb8   : > { %v2702_v48 = vadd.f32 %v1421_v39, %v631_v31  ;;  %v634_v49 = vadd.f32 %v633_v47, %v2665_v13 }
  0xb9   : > { %v1130_v50 = vsub.f32 0.0, %v651_v44  ;;  %v1170_v51 = vsub.f32 0.0, %v671_v45 }
  0xba   : > { %v1095_v52 = vsub.f32 0.0, %v634_v49  ;;  %2189 = vmatmul.msk.bf16.gmra.mxu1 %vm550_vm0, %v2602_v53  ;;  %2237 = vmatmul.msk.bf16.gmra.mxu0 %vm550_vm0, %v2602_v53 }
  0xbb   : > { %v1290_v55 = vmax.f32 %v1130_v50, 0.0  ;;  %v1330_v56 = vmax.f32 %v1170_v51, 0.0  ;;  %2205 = vmatmul.msk.bf16.gmra.mxu2 %vm550_vm0, %v2602_v53  ;;  %2221 = vmatmul.msk.bf16.gmra.mxu3 %vm550_vm0, %v2602_v53 }
  0xbc   : > { %v1255_v57 = vmax.f32 %v1095_v52, 0.0 }
  0xbd   : > { %v1461_v58 = vmul.f32 %v2673_v19, %v1290_v55  ;;  %v1501_v59 = vmul.f32 %v2673_v19, %v1330_v56 }
  0xbe   : > { %v1426_v60 = vmul.f32 %v2673_v19, %v1255_v57  ;;  %v653_v61 = vpop.f32.mrf.mxu2  ;;  %v673_v62 = vpop.f32.mrf.mxu3 }
  0xbf   : > { %v2716_v63 = vadd.f32 %v1461_v58, %v651_v44  ;;  %v2718_v0 = vadd.f32 %v1501_v59, %v671_v45  ;;  %v654_v1 = vadd.f32 %v653_v61, %v2665_v13  ;;  %v674_v2 = vadd.f32 %v673_v62, %v2665_v13  ;;  %v2722_v3 = vpop.f32.mrf.mxu0  ;;  %v635_v53 = vpop.f32.mrf.mxu1 }
  0xc0   : > { %v2724_v4 = vadd.f32 %v1426_v60, %v634_v49  ;;  %v636_v7 = vadd.f32 %v635_v53, %v2665_v13 }
  0xc1   : > { %v1135_v8 = vsub.f32 0.0, %v654_v1  ;;  %v1175_v11 = vsub.f32 0.0, %v674_v2 }
  0xc2   : > { %v1100_v16 = vsub.f32 0.0, %v636_v7 }
  0xc3   : > { %v1295_v18 = vmax.f32 %v1135_v8, 0.0  ;;  %v1335_v20 = vmax.f32 %v1175_v11, 0.0 }
  0xc4   : > { %v1260_v21 = vmax.f32 %v1100_v16, 0.0 }
  0xc5   : > { %v1466_v22 = vmul.f32 %v2673_v19, %v1295_v18  ;;  %v1506_v23 = vmul.f32 %v2673_v19, %v1335_v20 }
  0xc6   : > { %v1431_v24 = vmul.f32 %v2673_v19, %v1260_v21  ;;  %v655_v25 = vpop.f32.mrf.mxu2  ;;  %v675_v26 = vpop.f32.mrf.mxu3 }
  0xc7   : > { %v2730_v29 = vadd.f32 %v1466_v22, %v654_v1  ;;  %v2732_v31 = vadd.f32 %v1506_v23, %v674_v2  ;;  %v656_v32 = vadd.f32 %v655_v25, %v2665_v13  ;;  %v676_v33 = vadd.f32 %v675_v26, %v2665_v13  ;;  %v2736_v34 = vpop.f32.mrf.mxu0  ;;  %v638_v17 = vpop.f32.mrf.mxu1 }
  0xc8   : > { %v2738_v35 = vadd.f32 %v1431_v24, %v636_v7  ;;  %v639_v36 = vadd.f32 %v638_v17, %v2665_v13 }
  0xc9   : > { %v1140_v37 = vsub.f32 0.0, %v656_v32  ;;  %v1180_v38 = vsub.f32 0.0, %v676_v33 }
  0xca   : > { %v1105_v39 = vsub.f32 0.0, %v639_v36  ;;  %2190 = vmatmul.msk.bf16.gmra.mxu1 %vm550_vm0, %v2616_v5  ;;  %2238 = vmatmul.msk.bf16.gmra.mxu0 %vm550_vm0, %v2616_v5 }
  0xcb   : > { %v1300_v40 = vmax.f32 %v1140_v37, 0.0  ;;  %v1340_v41 = vmax.f32 %v1180_v38, 0.0  ;;  %2206 = vmatmul.msk.bf16.gmra.mxu2 %vm550_vm0, %v2616_v5  ;;  %2222 = vmatmul.msk.bf16.gmra.mxu3 %vm550_vm0, %v2616_v5  ;;  %v2779_v37 = vadd.f32 %v2667_v14, %v2665_v13 }
  0xcc   : > { %v1265_v44 = vmax.f32 %v1105_v39, 0.0 }
  0xcd   : > { %v1471_v45 = vmul.f32 %v2673_v19, %v1300_v40  ;;  %v1511_v47 = vmul.f32 %v2673_v19, %v1340_v41 }
  0xce   : > { %v1436_v49 = vmul.f32 %v2673_v19, %v1265_v44  ;;  %v658_v50 = vpop.f32.mrf.mxu2  ;;  %v678_v51 = vpop.f32.mrf.mxu3 }
  0xcf   : > { %v2752_v52 = vadd.f32 %v1471_v45, %v656_v32  ;;  %v2754_v55 = vadd.f32 %v1511_v47, %v676_v33  ;;  %v659_v56 = vadd.f32 %v658_v50, %v2665_v13  ;;  %v679_v57 = vadd.f32 %v678_v51, %v2665_v13  ;;  %v2758_v58 = vpop.f32.mrf.mxu0  ;;  %v640_v5 = vpop.f32.mrf.mxu1 }
  0xd0   : > { %v2760_v59 = vadd.f32 %v1436_v49, %v639_v36  ;;  %v641_v60 = vadd.f32 %v640_v5, %v2665_v13  ;;  %v1045_v45 = vsub.f32 0.0, %v2779_v37 }
  0xd1   : > { %3347 = vst [vmem:[#allocation9_spill] sm:$0xff] %v2754_v55  ;;  %v1145_v61 = vsub.f32 0.0, %v659_v56  ;;  %v1185_v62 = vsub.f32 0.0, %v679_v57 }
  0xd2   : > { %v1110_v1 = vsub.f32 0.0, %v641_v60 }
  0xd3   : > { %v1305_v2 = vmax.f32 %v1145_v61, 0.0  ;;  %v1345_v53 = vmax.f32 %v1185_v62, 0.0  ;;  %v2803_v61 = vadd.f32 %v2686_v27, %v2665_v13  ;;  %v2817_v27 = vadd.f32 %v2700_v46, %v2665_v13 }
  0xd4   : > { %v1270_v7 = vmax.f32 %v1110_v1, 0.0 }
  0xd5   : > { %v1476_v8 = vmul.f32 %v2673_v19, %v1305_v2  ;;  %v1516_v11 = vmul.f32 %v2673_v19, %v1345_v53 }
  0xd6   : > { %v1441_v16 = vmul.f32 %v2673_v19, %v1270_v7  ;;  %v660_v18 = vpop.f32.mrf.mxu2  ;;  %v680_v20 = vpop.f32.mrf.mxu3  ;;  %v1205_v7 = vmax.f32 %v1045_v45, 0.0 }
  0xd7   : > { %v2766_v21 = vadd.f32 %v1476_v8, %v659_v56  ;;  %v2768_v22 = vadd.f32 %v1516_v11, %v679_v57  ;;  %v661_v23 = vadd.f32 %v660_v18, %v2665_v13  ;;  %v681_v24 = vadd.f32 %v680_v20, %v2665_v13  ;;  %v2772_v25 = vpop.f32.mrf.mxu0  ;;  %v643_v26 = vpop.f32.mrf.mxu1 }
  0xd8   : > { %v2774_v32 = vadd.f32 %v1441_v16, %v641_v60  ;;  %v644_v33 = vadd.f32 %v643_v26, %v2665_v13  ;;  %v1050_v18 = vsub.f32 0.0, %v2803_v61 }
  0xd9   : > { %3348 = vst [vmem:[#allocation10_spill] sm:$0xff] %v2768_v22  ;;  %v1150_v17 = vsub.f32 0.0, %v661_v23  ;;  %v1190_v36 = vsub.f32 0.0, %v681_v24 }
  0xda   : > { %v1115_v38 = vsub.f32 0.0, %v644_v33  ;;  %2191 = vmatmul.msk.bf16.gmra.mxu1 %vm550_vm0, %v2630_v9  ;;  %2239 = vmatmul.msk.bf16.gmra.mxu0 %vm550_vm0, %v2630_v9 }
  0xdb   : > { %v1310_v39 = vmax.f32 %v1150_v17, 0.0  ;;  %v1350_v40 = vmax.f32 %v1190_v36, 0.0  ;;  %2207 = vmatmul.msk.bf16.gmra.mxu2 %vm550_vm0, %v2630_v9  ;;  %2223 = vmatmul.msk.bf16.gmra.mxu3 %vm550_vm0, %v2630_v9  ;;  %v1376_v17 = vmul.f32 %v2673_v19, %v1205_v7 }
  0xdc   : > { %v1275_v41 = vmax.f32 %v1115_v38, 0.0 }
  0xdd   : > { %v1481_v44 = vmul.f32 %v2673_v19, %v1310_v39  ;;  %v1521_v14 = vmul.f32 %v2673_v19, %v1350_v40 }
  0xde   : > { %v1446_v47 = vmul.f32 %v2673_v19, %v1275_v41  ;;  %v663_v49 = vpop.f32.mrf.mxu2  ;;  %v683_v50 = vpop.f32.mrf.mxu3 }
  0xdf   : > { %v2793_v51 = vadd.f32 %v1481_v44, %v661_v23  ;;  %v2795_v56 = vadd.f32 %v1521_v14, %v681_v24  ;;  %v664_v57 = vadd.f32 %v663_v49, %v2665_v13  ;;  %v684_v5 = vadd.f32 %v683_v50, %v2665_v13  ;;  %v2799_v9 = vpop.f32.mrf.mxu0  ;;  %v645_v60 = vpop.f32.mrf.mxu1 }
  0xe0   : > { %v2805_v62 = vadd.f32 %v1446_v47, %v644_v33  ;;  %v646_v1 = vadd.f32 %v645_v60, %v2665_v13  ;;  %v2810_v23 = vperm.slane %v2662_v12, 1  ;;  %v2813_v24 = vperm.slane %v2662_v12, 4 }
  0xe1   : > { %3349 = vst [vmem:[#allocation11_spill] sm:$0xff] %v2795_v56  ;;  %v1155_v2 = vsub.f32 0.0, %v664_v57  ;;  %v1195_v53 = vsub.f32 0.0, %v684_v5  ;;  %v1210_v47 = vmax.f32 %v1050_v18, 0.0  ;;  %v2853_v18 = vperm.slane %v2662_v12, 2 }
  0xe2   : > { %v1120_v8 = vsub.f32 0.0, %v646_v1 }
  0xe3   : > { %v1315_v11 = vmax.f32 %v1155_v2, 0.0  ;;  %v1355_v16 = vmax.f32 %v1195_v53, 0.0  ;;  %v1055_v2 = vsub.f32 0.0, %v2817_v27 }
  0xe4   : > { %v1280_v20 = vmax.f32 %v1120_v8, 0.0  ;;  %v2839_v8 = vperm.slane %v2669_v15, 1 }
  0xe5   : > { %v1486_v26 = vmul.f32 %v2673_v19, %v1315_v11  ;;  %v1526_v33 = vmul.f32 %v2673_v19, %v1355_v16 }
  0xe6   : > { %v1451_v36 = vmul.f32 %v2673_v19, %v1280_v20  ;;  %v665_v38 = vpop.f32.mrf.mxu2  ;;  %v685_v39 = vpop.f32.mrf.mxu3  ;;  %v2856_v20 = vperm.slane %v2662_v12, 3 }
  0xe7   : > { %v2823_v40 = vadd.f32 %v1486_v26, %v664_v57  ;;  %v2825_v41 = vadd.f32 %v1526_v33, %v684_v5  ;;  %v666_v44 = vadd.f32 %v665_v38, %v2665_v13  ;;  %v686_v14 = vadd.f32 %v685_v39, %v2665_v13  ;;  %v697_v46 = vpop.f32.mrf.mxu1  ;;  %v964_v45 = vpop.f32.mrf.mxu0 }
  0xe8   : > { %v2829_v49 = vadd.f32 %v1451_v36, %v646_v1  ;;  %v698_v50 = vadd.f32 %v697_v46, %v2810_v23  ;;  %v965_v60 = vadd.f32 %v964_v45, %v2813_v24  ;;  %v2836_v57 = vadd.f32 %v2722_v3, %v2665_v13 }
  0xe9   : > { %3350 = vst [vmem:[#allocation12_spill] sm:$0xff] %v2825_v41  ;;  %v1160_v5 = vsub.f32 0.0, %v666_v44  ;;  %v1200_v53 = vsub.f32 0.0, %v686_v14  ;;  %v2842_v1 = vperm.slane %v2669_v15, 4  ;;  %v1536_v36 = vadd.f32 %v1376_v17, %v2779_v37 }
  0xea   : > { %v1046_v7 = vsub.f32 0.0, %v698_v50  ;;  %v1049_v11 = vsub.f32 0.0, %v965_v60  ;;  %2192 = vmatmul.msk.bf16.gmra.mxu1 %vm550_vm0, %v2590_v28  ;;  %2240 = vmatmul.msk.bf16.gmra.mxu0 %vm550_vm0, %v2590_v28  ;;  %v1381_v38 = vmul.f32 %v2673_v19, %v1210_v47  ;;  %v1215_v45 = vmax.f32 %v1055_v2, 0.0 }
  0xeb   : > { %v1320_v16 = vmax.f32 %v1160_v5, 0.0  ;;  %v1360_v3 = vmax.f32 %v1200_v53, 0.0  ;;  %2208 = vmatmul.msk.bf16.gmra.mxu2 %vm550_vm0, %v2590_v28  ;;  %2224 = vmatmul.msk.bf16.gmra.mxu3 %vm550_vm0, %v2590_v28  ;;  %v1060_v28 = vsub.f32 0.0, %v2836_v57 }
  0xec   : > { %v1206_v26 = vmax.f32 %v1046_v7, 0.0  ;;  %v1209_v33 = vmax.f32 %v1049_v11, 0.0 }
  0xed   : > { %v1491_v39 = vmul.f32 %v2673_v19, %v1320_v16  ;;  %v1531_v46 = vmul.f32 %v2673_v19, %v1360_v3 }
  0xee   : > { %v1377_v5 = vmul.f32 %v2839_v8, %v1206_v26  ;;  %v1380_v53 = vmul.f32 %v2842_v1, %v1209_v33  ;;  %v786_v12 = vpop.f32.mrf.mxu2  ;;  %v875_v41 = vpop.f32.mrf.mxu3  ;;  %v2883_v33 = vperm.slane %v2669_v15, 3 }
  0xef   : > { %v2866_v7 = vadd.f32 %v1491_v39, %v666_v44  ;;  %v2868_v11 = vadd.f32 %v1531_v46, %v686_v14  ;;  %v787_v37 = vadd.f32 %v786_v12, %v2853_v18  ;;  %v876_v17 = vadd.f32 %v875_v41, %v2856_v20  ;;  %v699_v47 = vpop.f32.mrf.mxu1  ;;  %v966_v16 = vpop.f32.mrf.mxu0 }
  0xf0   : > { %v1537_v3 = vadd.f32 %v1377_v5, %v698_v50  ;;  %v1540_v2 = vadd.f32 %v1380_v53, %v965_v60  ;;  %v700_v56 = vadd.f32 %v699_v47, %v2810_v23  ;;  %v967_v26 = vadd.f32 %v966_v16, %v2813_v24 }
  0xf1   : > { %3351 = vst [vmem:[#allocation13_spill] sm:$0xff] %v2868_v11  ;;  %v1047_v44 = vsub.f32 0.0, %v787_v37  ;;  %v2880_v14 = vperm.slane %v2669_v15, 2  ;;  %v1048_v41 = vsub.f32 0.0, %v876_v17  ;;  %v1541_v16 = vadd.f32 %v1381_v38, %v2803_v61 }
  0xf2   : > { %v1696_v50 = vpack.c.bf16 %v1537_v3, %v1536_v36  ;;  %v1698_v60 = vpack.c.bf16 %v1540_v2, %v1540_v2  ;;  %v1051_v39 = vsub.f32 0.0, %v700_v56  ;;  %v1054_v46 = vsub.f32 0.0, %v967_v26 }
  0xf3   : > { %v1207_v5 = vmax.f32 %v1047_v44, 0.0  ;;  %v1208_v53 = vmax.f32 %v1048_v41, 0.0  ;;  %v2889_v11 = vadd.f32 %v2736_v34, %v2665_v13  ;;  %v1386_v36 = vmul.f32 %v2673_v19, %v1215_v45 }
  0xf4   : > { %1792 = vst [vmem:[%s2877_s24] sm:$0xff] %v1696_v50  ;;  %v1211_v12 = vmax.f32 %v1051_v39, 0.0  ;;  %v1214_v47 = vmax.f32 %v1054_v46, 0.0  ;;  %v1220_v3 = vmax.f32 %v1060_v28, 0.0 }
  0xf5   : > { %1794 = vst [vmem:[%s2877_s24 + $0x10] sm:$0xf] %v1698_v60  ;;  %v1378_v22 = vmul.f32 %v2880_v14, %v1207_v5  ;;  %v1379_v15 = vmul.f32 %v2883_v33, %v1208_v53 }
  0xf6   : > { %v1382_v2 = vmul.f32 %v2839_v8, %v1211_v12  ;;  %v1385_v44 = vmul.f32 %v2842_v1, %v1214_v47  ;;  %v788_v41 = vpop.f32.mrf.mxu2  ;;  %v877_v50 = vpop.f32.mrf.mxu3  ;;  %v1065_v12 = vsub.f32 0.0, %v2889_v11 }
  0xf7   : > { %v1538_v39 = vadd.f32 %v1378_v22, %v787_v37  ;;  %v1539_v61 = vadd.f32 %v1379_v15, %v876_v17  ;;  %v789_v38 = vadd.f32 %v788_v41, %v2853_v18  ;;  %v878_v34 = vadd.f32 %v877_v50, %v2856_v20  ;;  %v702_v60 = vpop.f32.mrf.mxu1  ;;  %v969_v46 = vpop.f32.mrf.mxu0 }
  0xf8   : > { %v1542_v5 = vadd.f32 %v1382_v2, %v700_v56  ;;  %v1545_v53 = vadd.f32 %v1385_v44, %v967_v26  ;;  %v703_v45 = vadd.f32 %v702_v60, %v2810_v23  ;;  %v970_v28 = vadd.f32 %v969_v46, %v2813_v24 }
  0xf9   : > { %v1697_v47 = vpack.c.bf16 %v1539_v61, %v1538_v39  ;;  %v1052_v55 = vsub.f32 0.0, %v789_v38  ;;  %v1053_v22 = vsub.f32 0.0, %v878_v34  ;;  %v1546_v44 = vadd.f32 %v1386_v36, %v2817_v27 }
  0xfa   : > { %v1699_v37 = vpack.c.bf16 %v1542_v5, %v1541_v16  ;;  %v1701_v17 = vpack.c.bf16 %v1545_v53, %v1545_v53  ;;  %v1056_v15 = vsub.f32 0.0, %v703_v45  ;;  %v1059_v41 = vsub.f32 0.0, %v970_v28  ;;  %2193 = vmatmul.msk.bf16.gmra.mxu1 %vm550_vm0, %v2605_v54  ;;  %2241 = vmatmul.msk.bf16.gmra.mxu0 %vm550_vm0, %v2605_v54 }
  0xfb   : > { %1793 = vst [vmem:[%s2877_s24 + $0x8] sm:$0xff] %v1697_v47  ;;  %v1212_v56 = vmax.f32 %v1052_v55, 0.0  ;;  %v1213_v26 = vmax.f32 %v1053_v22, 0.0  ;;  %2209 = vmatmul.msk.bf16.gmra.mxu2 %vm550_vm0, %v2605_v54  ;;  %2225 = vmatmul.msk.bf16.gmra.mxu3 %vm550_vm0, %v2605_v54  ;;  %v2915_v50 = vadd.f32 %v2758_v58, %v2665_v13  ;;  %v1391_v61 = vmul.f32 %v2673_v19, %v1220_v3 }
  0xfc   : > { %1795 = vst [vmem:[%s2877_s24 + $0x14] sm:$0xff] %v1699_v37  ;;  %v1216_v16 = vmax.f32 %v1056_v15, 0.0  ;;  %v1219_v2 = vmax.f32 %v1059_v41, 0.0  ;;  %v1225_v60 = vmax.f32 %v1065_v12, 0.0 }
  0xfd   : > { %1797 = vst [vmem:[%s2877_s24 + $0x24] sm:$0xf] %v1701_v17  ;;  %v1383_v39 = vmul.f32 %v2880_v14, %v1212_v56  ;;  %v1384_v55 = vmul.f32 %v2883_v33, %v1213_v26  ;;  %v1070_v41 = vsub.f32 0.0, %v2915_v50 }
  0xfe   : > { %v1387_v46 = vmul.f32 %v2839_v8, %v1216_v16  ;;  %v1390_v54 = vmul.f32 %v2842_v1, %v1219_v2  ;;  %v791_v5 = vpop.f32.mrf.mxu2  ;;  %v880_v53 = vpop.f32.mrf.mxu3 }
  0xff   : > { %v1543_v47 = vadd.f32 %v1383_v39, %v789_v38  ;;  %v1544_v27 = vadd.f32 %v1384_v55, %v878_v34  ;;  %v792_v36 = vadd.f32 %v791_v5, %v2853_v18  ;;  %v881_v58 = vadd.f32 %v880_v53, %v2856_v20  ;;  %v704_v22 = vpop.f32.mrf.mxu1  ;;  %v971_v37 = vpop.f32.mrf.mxu0 }
 0x100   : > { %v1547_v17 = vadd.f32 %v1387_v46, %v703_v45  ;;  %v1550_v15 = vadd.f32 %v1390_v54, %v970_v28  ;;  %v705_v3 = vadd.f32 %v704_v22, %v2810_v23  ;;  %v972_v12 = vadd.f32 %v971_v37, %v2813_v24 }
 0x101   : > { %v1700_v56 = vpack.c.bf16 %v1544_v27, %v1543_v47  ;;  %v1057_v38 = vsub.f32 0.0, %v792_v36  ;;  %v1058_v34 = vsub.f32 0.0, %v881_v58  ;;  %v1551_v46 = vadd.f32 %v1391_v61, %v2836_v57 }
 0x102   : > { %v1702_v26 = vpack.c.bf16 %v1547_v17, %v1546_v44  ;;  %v1704_v16 = vpack.c.bf16 %v1550_v15, %v1550_v15  ;;  %v1061_v2 = vsub.f32 0.0, %v705_v3  ;;  %v1064_v39 = vsub.f32 0.0, %v972_v12 }
 0x103   : > { %1796 = vst [vmem:[%s2877_s24 + $0x1c] sm:$0xff] %v1700_v56  ;;  %v1217_v55 = vmax.f32 %v1057_v38, 0.0  ;;  %v1218_v5 = vmax.f32 %v1058_v34, 0.0  ;;  %v1396_v47 = vmul.f32 %v2673_v19, %v1225_v60  ;;  %v1230_v27 = vmax.f32 %v1070_v41, 0.0 }
 0x104   : > { %1798 = vst [vmem:[%s2877_s24 + $0x28] sm:$0xff] %v1702_v26  ;;  %v1221_v45 = vmax.f32 %v1061_v2, 0.0  ;;  %v1224_v28 = vmax.f32 %v1064_v39, 0.0  ;;  %v2943_v2 = vadd.f32 %v2772_v25, %v2665_v13 }
 0x105   : > { %1800 = vst [vmem:[%s2877_s24 + $0x38] sm:$0xf] %v1704_v16  ;;  %v1388_v54 = vmul.f32 %v2880_v14, %v1217_v55  ;;  %v1389_v53 = vmul.f32 %v2883_v33, %v1218_v5 }
 0x106   : > { %v1392_v44 = vmul.f32 %v2839_v8, %v1221_v45  ;;  %v1395_v22 = vmul.f32 %v2842_v1, %v1224_v28  ;;  %v793_v37 = vpop.f32.mrf.mxu2  ;;  %v882_v17 = vpop.f32.mrf.mxu3 }
 0x107   : > { %v1548_v15 = vadd.f32 %v1388_v54, %v792_v36  ;;  %v1549_v56 = vadd.f32 %v1389_v53, %v881_v58  ;;  %v794_v38 = vadd.f32 %v793_v37, %v2853_v18  ;;  %v883_v57 = vadd.f32 %v882_v17, %v2856_v20  ;;  %v707_v61 = vpop.f32.mrf.mxu1  ;;  %v974_v34 = vpop.f32.mrf.mxu0 }
 0x108   : > { %v1552_v26 = vadd.f32 %v1392_v44, %v705_v3  ;;  %v1555_v16 = vadd.f32 %v1395_v22, %v972_v12  ;;  %v708_v60 = vadd.f32 %v707_v61, %v2810_v23  ;;  %v975_v41 = vadd.f32 %v974_v34, %v2813_v24 }
 0x109   : > { %v1703_v36 = vpack.c.bf16 %v1549_v56, %v1548_v15  ;;  %v1062_v58 = vsub.f32 0.0, %v794_v38  ;;  %v1063_v39 = vsub.f32 0.0, %v883_v57  ;;  %v1075_v54 = vsub.f32 0.0, %v2943_v2 }
 0x10a   : > { %v1705_v55 = vpack.c.bf16 %v1552_v26, %v1551_v46  ;;  %v1707_v5 = vpack.c.bf16 %v1555_v16, %v1555_v16  ;;  %v1066_v45 = vsub.f32 0.0, %v708_v60  ;;  %v1069_v28 = vsub.f32 0.0, %v975_v41  ;;  %2194 = vmatmul.msk.bf16.gmra.mxu1 %vm550_vm0, %v2619_v6  ;;  %2242 = vmatmul.msk.bf16.gmra.mxu0 %vm550_vm0, %v2619_v6 }
 0x10b   : > { %1799 = vst [vmem:[%s2877_s24 + $0x30] sm:$0xff] %v1703_v36  ;;  %v1222_v3 = vmax.f32 %v1062_v58, 0.0  ;;  %v1223_v12 = vmax.f32 %v1063_v39, 0.0  ;;  %2210 = vmatmul.msk.bf16.gmra.mxu2 %vm550_vm0, %v2619_v6  ;;  %2226 = vmatmul.msk.bf16.gmra.mxu3 %vm550_vm0, %v2619_v6  ;;  %v1556_v22 = vadd.f32 %v1396_v47, %v2889_v11  ;;  %v1401_v37 = vmul.f32 %v2673_v19, %v1230_v27 }
 0x10c   : > { %1801 = vst [vmem:[%s2877_s24 + $0x3c] sm:$0xff] %v1705_v55  ;;  %v1226_v25 = vmax.f32 %v1066_v45, 0.0  ;;  %v1229_v46 = vmax.f32 %v1069_v28, 0.0  ;;  %v1235_v55 = vmax.f32 %v1075_v54, 0.0 }
 0x10d   : > { %1803 = vst [vmem:[%s2877_s24 + $0x4c] sm:$0xf] %v1707_v5  ;;  %v1393_v53 = vmul.f32 %v2880_v14, %v1222_v3  ;;  %v1394_v44 = vmul.f32 %v2883_v33, %v1223_v12 }
 0x10e   : > { %v1397_v17 = vmul.f32 %v2839_v8, %v1226_v25  ;;  %v1400_v15 = vmul.f32 %v2842_v1, %v1229_v46  ;;  %v796_v56 = vpop.f32.mrf.mxu2  ;;  %v885_v6 = vpop.f32.mrf.mxu3 }
 0x10f   : > { %v1553_v61 = vadd.f32 %v1393_v53, %v794_v38  ;;  %v1554_v34 = vadd.f32 %v1394_v44, %v883_v57  ;;  %v797_v26 = vadd.f32 %v796_v56, %v2853_v18  ;;  %v886_v16 = vadd.f32 %v885_v6, %v2856_v20  ;;  %v709_v36 = vpop.f32.mrf.mxu1  ;;  %v976_v58 = vpop.f32.mrf.mxu0 }
 0x110   : > { %v1557_v39 = vadd.f32 %v1397_v17, %v708_v60  ;;  %v1560_v11 = vadd.f32 %v1400_v15, %v975_v41  ;;  %v710_v47 = vadd.f32 %v709_v36, %v2810_v23  ;;  %v977_v27 = vadd.f32 %v976_v58, %v2813_v24 }
 0x111   : > { %v1706_v5 = vpack.c.bf16 %v1554_v34, %v1553_v61  ;;  %v1067_v45 = vsub.f32 0.0, %v797_v26  ;;  %v1068_v38 = vsub.f32 0.0, %v886_v16  ;;  %v2971_v41 = vadd.f32 %v2799_v9, %v2665_v13 }
 0x112   : > { %v1708_v57 = vpack.c.bf16 %v1557_v39, %v1556_v22  ;;  %v1710_v28 = vpack.c.bf16 %v1560_v11, %v1560_v11  ;;  %v1071_v3 = vsub.f32 0.0, %v710_v47  ;;  %v1074_v12 = vsub.f32 0.0, %v977_v27 }
 0x113   : > { %1802 = vst [vmem:[%s2877_s24 + $0x44] sm:$0xff] %v1706_v5  ;;  %v1227_v25 = vmax.f32 %v1067_v45, 0.0  ;;  %v1228_v46 = vmax.f32 %v1068_v38, 0.0  ;;  %v1561_v22 = vadd.f32 %v1401_v37, %v2915_v50  ;;  %v1406_v17 = vmul.f32 %v2673_v19, %v1235_v55 }
 0x114   : > { %1804 = vst [vmem:[%s2877_s24 + $0x50] sm:$0xff] %v1708_v57  ;;  %v1231_v53 = vmax.f32 %v1071_v3, 0.0  ;;  %v1234_v60 = vmax.f32 %v1074_v12, 0.0  ;;  %v1080_v55 = vsub.f32 0.0, %v2971_v41 }
 0x115   : > { %1806 = vst [vmem:[%s2877_s24 + $0x60] sm:$0xf] %v1710_v28  ;;  %v1398_v54 = vmul.f32 %v2880_v14, %v1227_v25  ;;  %v1399_v44 = vmul.f32 %v2883_v33, %v1228_v46 }
 0x116   : > { %v1402_v15 = vmul.f32 %v2839_v8, %v1231_v53  ;;  %v1405_v56 = vmul.f32 %v2842_v1, %v1234_v60  ;;  %v798_v6 = vpop.f32.mrf.mxu2  ;;  %v887_v61 = vpop.f32.mrf.mxu3  ;;  %v1240_v46 = vmax.f32 %v1080_v55, 0.0 }
 0x117   : > { %v1558_v34 = vadd.f32 %v1398_v54, %v797_v26  ;;  %v1559_v36 = vadd.f32 %v1399_v44, %v886_v16  ;;  %v799_v13 = vadd.f32 %v798_v6, %v2853_v18  ;;  %v888_v9 = vadd.f32 %v887_v61, %v2856_v20  ;;  %v712_v58 = vpop.f32.mrf.mxu1  ;;  %v979_v39 = vpop.f32.mrf.mxu0 }
 0x118   : > { %v1562_v11 = vadd.f32 %v1402_v15, %v710_v47  ;;  %v1565_v5 = vadd.f32 %v1405_v56, %v977_v27  ;;  %v713_v50 = vadd.f32 %v712_v58, %v2810_v23  ;;  %v980_v37 = vadd.f32 %v979_v39, %v2813_v24 }
 0x119   : > { %v1709_v45 = vpack.c.bf16 %v1559_v36, %v1558_v34  ;;  %v1072_v38 = vsub.f32 0.0, %v799_v13  ;;  %v1073_v26 = vsub.f32 0.0, %v888_v9  ;;  %v1566_v54 = vadd.f32 %v1406_v17, %v2943_v2 }
 0x11a   : > { %v1711_v16 = vpack.c.bf16 %v1562_v11, %v1561_v22  ;;  %v1713_v57 = vpack.c.bf16 %v1565_v5, %v1565_v5  ;;  %v1076_v28 = vsub.f32 0.0, %v713_v50  ;;  %v1079_v3 = vsub.f32 0.0, %v980_v37  ;;  %2195 = vmatmul.msk.bf16.gmra.mxu1 %vm550_vm0, %v2633_v10  ;;  %2243 = vmatmul.msk.bf16.gmra.mxu0 %vm550_vm0, %v2633_v10 }
 0x11b   : > { %1805 = vst [vmem:[%s2877_s24 + $0x58] sm:$0xff] %v1709_v45  ;;  %v1232_v47 = vmax.f32 %v1072_v38, 0.0  ;;  %v1233_v27 = vmax.f32 %v1073_v26, 0.0  ;;  %2211 = vmatmul.msk.bf16.gmra.mxu2 %vm550_vm0, %v2633_v10  ;;  %2227 = vmatmul.msk.bf16.gmra.mxu3 %vm550_vm0, %v2633_v10  ;;  %v1411_v5 = vmul.f32 %v2673_v19, %v1240_v46 }
 0x11c   : > { %1807 = vst [vmem:[%s2877_s24 + $0x64] sm:$0xff] %v1711_v16  ;;  %v1236_v12 = vmax.f32 %v1076_v28, 0.0  ;;  %v1239_v25 = vmax.f32 %v1079_v3, 0.0 }
 0x11d   : > { %1809 = vst [vmem:[%s2877_s24 + $0x74] sm:$0xf] %v1713_v57  ;;  %v1403_v53 = vmul.f32 %v2880_v14, %v1232_v47  ;;  %v1404_v60 = vmul.f32 %v2883_v33, %v1233_v27  ;;  %v1571_v19 = vadd.f32 %v1411_v5, %v2971_v41 }
 0x11e   : > { %v1407_v44 = vmul.f32 %v2839_v8, %v1236_v12  ;;  %v1410_v22 = vmul.f32 %v2842_v1, %v1239_v25  ;;  %v801_v15 = vpop.f32.mrf.mxu2  ;;  %v890_v56 = vpop.f32.mrf.mxu3 }
 0x11f   : > { %v1563_v6 = vadd.f32 %v1403_v53, %v799_v13  ;;  %v1564_v61 = vadd.f32 %v1404_v60, %v888_v9  ;;  %v802_v10 = vadd.f32 %v801_v15, %v2853_v18  ;;  %v891_v34 = vadd.f32 %v890_v56, %v2856_v20  ;;  %v714_v36 = vpop.f32.mrf.mxu1  ;;  %v981_v58 = vpop.f32.mrf.mxu0 }
 0x120   : > { %v1567_v39 = vadd.f32 %v1407_v44, %v713_v50  ;;  %v1570_v11 = vadd.f32 %v1410_v22, %v980_v37  ;;  %v715_v2 = vadd.f32 %v714_v36, %v2810_v23  ;;  %v982_v17 = vadd.f32 %v981_v58, %v2813_v24 }
 0x121   : > { %v1712_v55 = vpack.c.bf16 %v1564_v61, %v1563_v6  ;;  %v1077_v13 = vsub.f32 0.0, %v802_v10  ;;  %v1078_v9 = vsub.f32 0.0, %v891_v34 }
 0x122   : > { %v1714_v45 = vpack.c.bf16 %v1567_v39, %v1566_v54  ;;  %v1716_v38 = vpack.c.bf16 %v1570_v11, %v1570_v11  ;;  %v1081_v26 = vsub.f32 0.0, %v715_v2  ;;  %v1084_v16 = vsub.f32 0.0, %v982_v17 }
 0x123   : > { %1808 = vst [vmem:[%s2877_s24 + $0x6c] sm:$0xff] %v1712_v55  ;;  %v1237_v57 = vmax.f32 %v1077_v13, 0.0  ;;  %v1238_v28 = vmax.f32 %v1078_v9, 0.0  ;;  %v2356_v55 = vld [vmem:[%s2581_s20 + $0x60] sm:$0xff] }
 0x124   : > { %1810 = vst [vmem:[%s2877_s24 + $0x78] sm:$0xff] %v1714_v45  ;;  %v1241_v50 = vmax.f32 %v1081_v26, 0.0  ;;  %v1244_v37 = vmax.f32 %v1084_v16, 0.0 }
 0x125   : > { %1812 = vst [vmem:[%s2877_s24 + $0x88] sm:$0xf] %v1716_v38  ;;  %v1408_v3 = vmul.f32 %v2880_v14, %v1237_v57  ;;  %v1409_v47 = vmul.f32 %v2883_v33, %v1238_v28 }
 0x126   : > { %v1412_v27 = vmul.f32 %v2839_v8, %v1241_v50  ;;  %v1415_v12 = vmul.f32 %v2842_v1, %v1244_v37  ;;  %v803_v25 = vpop.f32.mrf.mxu2  ;;  %v892_v46 = vpop.f32.mrf.mxu3 }
 0x127   : > { %v1568_v53 = vadd.f32 %v1408_v3, %v802_v10  ;;  %v1569_v60 = vadd.f32 %v1409_v47, %v891_v34  ;;  %v804_v54 = vadd.f32 %v803_v25, %v2853_v18  ;;  %v893_v44 = vadd.f32 %v892_v46, %v2856_v20  ;;  %v717_v22 = vpop.f32.mrf.mxu1  ;;  %v984_v15 = vpop.f32.mrf.mxu0 }
 0x128   : > { %v1572_v56 = vadd.f32 %v1412_v27, %v715_v2  ;;  %v1575_v6 = vadd.f32 %v1415_v12, %v982_v17  ;;  %v718_v41 = vadd.f32 %v717_v22, %v2810_v23  ;;  %v985_v61 = vadd.f32 %v984_v15, %v2813_v24 }
 0x129   : > { %v1715_v36 = vpack.c.bf16 %v1569_v60, %v1568_v53  ;;  %v1082_v58 = vsub.f32 0.0, %v804_v54  ;;  %v1083_v39 = vsub.f32 0.0, %v893_v44 }
 0x12a   : > { %v1717_v10 = vpack.c.bf16 %v1572_v56, %v1571_v19  ;;  %v1719_v34 = vpack.c.bf16 %v1575_v6, %v1575_v6  ;;  %v1086_v11 = vsub.f32 0.0, %v718_v41  ;;  %v1089_v5 = vsub.f32 0.0, %v985_v61  ;;  %2196 = vmatmul.msk.bf16.gmra.mxu1 %vm550_vm0, %v2356_v55  ;;  %2244 = vmatmul.msk.bf16.gmra.mxu0 %vm550_vm0, %v2356_v55 }
 0x12b   : > { %1811 = vst [vmem:[%s2877_s24 + $0x80] sm:$0xff] %v1715_v36  ;;  %v1242_v2 = vmax.f32 %v1082_v58, 0.0  ;;  %v1243_v17 = vmax.f32 %v1083_v39, 0.0  ;;  %2212 = vmatmul.msk.bf16.gmra.mxu2 %vm550_vm0, %v2356_v55  ;;  %2228 = vmatmul.msk.bf16.gmra.mxu3 %vm550_vm0, %v2356_v55 }
 0x12c   : > { %1813 = vst [vmem:[%s2877_s24 + $0x8c] sm:$0xff] %v1717_v10  ;;  %v1246_v13 = vmax.f32 %v1086_v11, 0.0  ;;  %v1249_v9 = vmax.f32 %v1089_v5, 0.0 }
 0x12d   : > { %1815 = vst [vmem:[%s2877_s24 + $0x9c] sm:$0xf] %v1719_v34  ;;  %v1413_v45 = vmul.f32 %v2880_v14, %v1242_v2  ;;  %v1414_v38 = vmul.f32 %v2883_v33, %v1243_v17 }
 0x12e   : > { %v1417_v26 = vmul.f32 %v2839_v8, %v1246_v13  ;;  %v1420_v16 = vmul.f32 %v2842_v1, %v1249_v9  ;;  %v806_v57 = vpop.f32.mrf.mxu2  ;;  %v895_v28 = vpop.f32.mrf.mxu3 }
 0x12f   : > { %v1573_v50 = vadd.f32 %v1413_v45, %v804_v54  ;;  %v1574_v37 = vadd.f32 %v1414_v38, %v893_v44  ;;  %v807_v3 = vadd.f32 %v806_v57, %v2853_v18  ;;  %v896_v47 = vadd.f32 %v895_v28, %v2856_v20  ;;  %v719_v19 = vpop.f32.mrf.mxu1  ;;  %v986_v27 = vpop.f32.mrf.mxu0 }
 0x130   : > { %v1577_v12 = vadd.f32 %v1417_v26, %v718_v41  ;;  %v1580_v25 = vadd.f32 %v1420_v16, %v985_v61  ;;  %v720_v46 = vadd.f32 %v719_v19, %v2810_v23  ;;  %v987_v53 = vadd.f32 %v986_v27, %v2813_v24 }
 0x131   : > { %v1718_v60 = vpack.c.bf16 %v1574_v37, %v1573_v50  ;;  %v1087_v22 = vsub.f32 0.0, %v807_v3  ;;  %v1088_v15 = vsub.f32 0.0, %v896_v47 }
 0x132   : > { %v1720_v54 = vpack.c.bf16 %v1577_v12, %v2688_v30  ;;  %v1722_v44 = vpack.c.bf16 %v1580_v25, %v1580_v25  ;;  %v1091_v56 = vsub.f32 0.0, %v720_v46  ;;  %v1094_v6 = vsub.f32 0.0, %v987_v53  ;;  %v2357_v12 = vld [vmem:[%s2581_s20 + $0x68] sm:$0xff] }
 0x133   : > { %1814 = vst [vmem:[%s2877_s24 + $0x94] sm:$0xff] %v1718_v60  ;;  %v1247_v36 = vmax.f32 %v1087_v22, 0.0  ;;  %v1248_v58 = vmax.f32 %v1088_v15, 0.0 }
 0x134   : > { %1816 = vst [vmem:[%s2877_s24 + $0xa0] sm:$0xff] %v1720_v54  ;;  %v1251_v39 = vmax.f32 %v1091_v56, 0.0  ;;  %v1254_v41 = vmax.f32 %v1094_v6, 0.0 }
 0x135   : > { %1818 = vst [vmem:[%s2877_s24 + $0xb0] sm:$0xf] %v1722_v44  ;;  %v1418_v61 = vmul.f32 %v2880_v14, %v1247_v36  ;;  %v1419_v10 = vmul.f32 %v2883_v33, %v1248_v58 }
 0x136   : > { %v1422_v34 = vmul.f32 %v2839_v8, %v1251_v39  ;;  %v1425_v11 = vmul.f32 %v2842_v1, %v1254_v41  ;;  %v808_v5 = vpop.f32.mrf.mxu2  ;;  %v897_v30 = vpop.f32.mrf.mxu3 }
 0x137   : > { %v1578_v55 = vadd.f32 %v1418_v61, %v807_v3  ;;  %v1579_v2 = vadd.f32 %v1419_v10, %v896_v47  ;;  %v809_v17 = vadd.f32 %v808_v5, %v2853_v18  ;;  %v898_v13 = vadd.f32 %v897_v30, %v2856_v20  ;;  %v722_v9 = vpop.f32.mrf.mxu1  ;;  %v989_v45 = vpop.f32.mrf.mxu0 }
 0x138   : > { %v1582_v38 = vadd.f32 %v1422_v34, %v720_v46  ;;  %v1585_v26 = vadd.f32 %v1425_v11, %v987_v53  ;;  %v723_v16 = vadd.f32 %v722_v9, %v2810_v23  ;;  %v990_v57 = vadd.f32 %v989_v45, %v2813_v24 }
 0x139   : > { %v1721_v28 = vpack.c.bf16 %v1579_v2, %v1578_v55  ;;  %v1092_v50 = vsub.f32 0.0, %v809_v17  ;;  %v1093_v37 = vsub.f32 0.0, %v898_v13 }
 0x13a   : > { %v1723_v3 = vpack.c.bf16 %v1582_v38, %v2702_v48  ;;  %v1725_v47 = vpack.c.bf16 %v1585_v26, %v1585_v26  ;;  %v1096_v19 = vsub.f32 0.0, %v723_v16  ;;  %v1099_v27 = vsub.f32 0.0, %v990_v57  ;;  %2197 = vmatmul.msk.bf16.gmra.mxu1 %vm550_vm0, %v2357_v12  ;;  %2245 = vmatmul.msk.bf16.gmra.mxu0 %vm550_vm0, %v2357_v12 }
 0x13b   : > { %1817 = vst [vmem:[%s2877_s24 + $0xa8] sm:$0xff] %v1721_v28  ;;  %v1252_v25 = vmax.f32 %v1092_v50, 0.0  ;;  %v1253_v46 = vmax.f32 %v1093_v37, 0.0  ;;  %2213 = vmatmul.msk.bf16.gmra.mxu2 %vm550_vm0, %v2357_v12  ;;  %2229 = vmatmul.msk.bf16.gmra.mxu3 %vm550_vm0, %v2357_v12 }
 0x13c   : > { %1819 = vst [vmem:[%s2877_s24 + $0xb4] sm:$0xff] %v1723_v3  ;;  %v1256_v53 = vmax.f32 %v1096_v19, 0.0  ;;  %v1259_v60 = vmax.f32 %v1099_v27, 0.0 }
 0x13d   : > { %1821 = vst [vmem:[%s2877_s24 + $0xc4] sm:$0xf] %v1725_v47  ;;  %v1423_v48 = vmul.f32 %v2880_v14, %v1252_v25  ;;  %v1424_v22 = vmul.f32 %v2883_v33, %v1253_v46 }
 0x13e   : > { %v1427_v15 = vmul.f32 %v2839_v8, %v1256_v53  ;;  %v1430_v54 = vmul.f32 %v2842_v1, %v1259_v60  ;;  %v811_v44 = vpop.f32.mrf.mxu2  ;;  %v900_v56 = vpop.f32.mrf.mxu3 }
 0x13f   : > { %v1583_v6 = vadd.f32 %v1423_v48, %v809_v17  ;;  %v1584_v36 = vadd.f32 %v1424_v22, %v898_v13  ;;  %v812_v58 = vadd.f32 %v811_v44, %v2853_v18  ;;  %v901_v39 = vadd.f32 %v900_v56, %v2856_v20  ;;  %v724_v41 = vpop.f32.mrf.mxu1  ;;  %v991_v61 = vpop.f32.mrf.mxu0 }
 0x140   : > { %v1587_v10 = vadd.f32 %v1427_v15, %v723_v16  ;;  %v1590_v34 = vadd.f32 %v1430_v54, %v990_v57  ;;  %v725_v11 = vadd.f32 %v724_v41, %v2810_v23  ;;  %v992_v5 = vadd.f32 %v991_v61, %v2813_v24  ;;  %v2358_v41 = vld [vmem:[%s2581_s20 + $0x70] sm:$0xff] }
 0x141   : > { %v1724_v30 = vpack.c.bf16 %v1584_v36, %v1583_v6  ;;  %v1097_v55 = vsub.f32 0.0, %v812_v58  ;;  %v1098_v2 = vsub.f32 0.0, %v901_v39 }
 0x142   : > { %v1726_v17 = vpack.c.bf16 %v1587_v10, %v2724_v4  ;;  %v1728_v13 = vpack.c.bf16 %v1590_v34, %v1590_v34  ;;  %v1101_v9 = vsub.f32 0.0, %v725_v11  ;;  %v1104_v45 = vsub.f32 0.0, %v992_v5 }
 0x143   : > { %1820 = vst [vmem:[%s2877_s24 + $0xbc] sm:$0xff] %v1724_v30  ;;  %v1257_v38 = vmax.f32 %v1097_v55, 0.0  ;;  %v1258_v26 = vmax.f32 %v1098_v2, 0.0 }
 0x144   : > { %1822 = vst [vmem:[%s2877_s24 + $0xc8] sm:$0xff] %v1726_v17  ;;  %v1261_v28 = vmax.f32 %v1101_v9, 0.0  ;;  %v1264_v16 = vmax.f32 %v1104_v45, 0.0 }
 0x145   : > { %1824 = vst [vmem:[%s2877_s24 + $0xd8] sm:$0xf] %v1728_v13  ;;  %v1428_v57 = vmul.f32 %v2880_v14, %v1257_v38  ;;  %v1429_v50 = vmul.f32 %v2883_v33, %v1258_v26 }
 0x146   : > { %v1432_v37 = vmul.f32 %v2839_v8, %v1261_v28  ;;  %v1435_v3 = vmul.f32 %v2842_v1, %v1264_v16  ;;  %v813_v47 = vpop.f32.mrf.mxu2  ;;  %v902_v4 = vpop.f32.mrf.mxu3 }
 0x147   : > { %v1588_v19 = vadd.f32 %v1428_v57, %v812_v58  ;;  %v1589_v27 = vadd.f32 %v1429_v50, %v901_v39  ;;  %v814_v12 = vadd.f32 %v813_v47, %v2853_v18  ;;  %v903_v25 = vadd.f32 %v902_v4, %v2856_v20  ;;  %v727_v46 = vpop.f32.mrf.mxu1  ;;  %v994_v53 = vpop.f32.mrf.mxu0 }
 0x148   : > { %v1592_v60 = vadd.f32 %v1432_v37, %v725_v11  ;;  %v1595_v48 = vadd.f32 %v1435_v3, %v992_v5  ;;  %v728_v22 = vadd.f32 %v727_v46, %v2810_v23  ;;  %v995_v15 = vadd.f32 %v994_v53, %v2813_v24 }
 0x149   : > { %v1727_v54 = vpack.c.bf16 %v1589_v27, %v1588_v19  ;;  %v1102_v44 = vsub.f32 0.0, %v814_v12  ;;  %v1103_v56 = vsub.f32 0.0, %v903_v25 }
 0x14a   : > { %v1729_v6 = vpack.c.bf16 %v1592_v60, %v2738_v35  ;;  %v1731_v36 = vpack.c.bf16 %v1595_v48, %v1595_v48  ;;  %v1106_v58 = vsub.f32 0.0, %v728_v22  ;;  %v1109_v39 = vsub.f32 0.0, %v995_v15  ;;  %2198 = vmatmul.msk.bf16.gmra.mxu1 %vm550_vm0, %v2358_v41  ;;  %2246 = vmatmul.msk.bf16.gmra.mxu0 %vm550_vm0, %v2358_v41 }
 0x14b   : > { %1823 = vst [vmem:[%s2877_s24 + $0xd0] sm:$0xff] %v1727_v54  ;;  %v1262_v61 = vmax.f32 %v1102_v44, 0.0  ;;  %v1263_v10 = vmax.f32 %v1103_v56, 0.0  ;;  %2214 = vmatmul.msk.bf16.gmra.mxu2 %vm550_vm0, %v2358_v41  ;;  %2230 = vmatmul.msk.bf16.gmra.mxu3 %vm550_vm0, %v2358_v41 }
 0x14c   : > { %1825 = vst [vmem:[%s2877_s24 + $0xdc] sm:$0xff] %v1729_v6  ;;  %v1266_v34 = vmax.f32 %v1106_v58, 0.0  ;;  %v1269_v11 = vmax.f32 %v1109_v39, 0.0 }
 0x14d   : > { %1827 = vst [vmem:[%s2877_s24 + $0xec] sm:$0xf] %v1731_v36  ;;  %v1433_v35 = vmul.f32 %v2880_v14, %v1262_v61  ;;  %v1434_v5 = vmul.f32 %v2883_v33, %v1263_v10 }
 0x14e   : > { %v1437_v30 = vmul.f32 %v2839_v8, %v1266_v34  ;;  %v1440_v55 = vmul.f32 %v2842_v1, %v1269_v11  ;;  %v816_v2 = vpop.f32.mrf.mxu2  ;;  %v905_v17 = vpop.f32.mrf.mxu3 }
 0x14f   : > { %v1593_v13 = vadd.f32 %v1433_v35, %v814_v12  ;;  %v1594_v9 = vadd.f32 %v1434_v5, %v903_v25  ;;  %v817_v45 = vadd.f32 %v816_v2, %v2853_v18  ;;  %v906_v38 = vadd.f32 %v905_v17, %v2856_v20  ;;  %v729_v26 = vpop.f32.mrf.mxu1  ;;  %v996_v28 = vpop.f32.mrf.mxu0 }
 0x150   : > { %v1597_v16 = vadd.f32 %v1437_v30, %v728_v22  ;;  %v1600_v57 = vadd.f32 %v1440_v55, %v995_v15  ;;  %v730_v50 = vadd.f32 %v729_v26, %v2810_v23  ;;  %v997_v37 = vadd.f32 %v996_v28, %v2813_v24 }
 0x151   : > { %v1730_v3 = vpack.c.bf16 %v1594_v9, %v1593_v13  ;;  %v1107_v47 = vsub.f32 0.0, %v817_v45  ;;  %v1108_v4 = vsub.f32 0.0, %v906_v38 }
 0x152   : > { %v1732_v19 = vpack.c.bf16 %v1597_v16, %v2760_v59  ;;  %v1734_v27 = vpack.c.bf16 %v1600_v57, %v1600_v57  ;;  %v1111_v12 = vsub.f32 0.0, %v730_v50  ;;  %v1114_v25 = vsub.f32 0.0, %v997_v37 }
 0x153   : > { %1826 = vst [vmem:[%s2877_s24 + $0xe4] sm:$0xff] %v1730_v3  ;;  %v1267_v46 = vmax.f32 %v1107_v47, 0.0  ;;  %v1268_v53 = vmax.f32 %v1108_v4, 0.0 }
 0x154   : > { %1828 = vst [vmem:[%s2877_s24 + $0xf0] sm:$0xff] %v1732_v19  ;;  %v1271_v60 = vmax.f32 %v1111_v12, 0.0  ;;  %v1274_v48 = vmax.f32 %v1114_v25, 0.0 }
 0x155   : > { %1830 = vst [vmem:[%s2877_s24 + $0x100] sm:$0xf] %v1734_v27  ;;  %v1438_v22 = vmul.f32 %v2880_v14, %v1267_v46  ;;  %v1439_v15 = vmul.f32 %v2883_v33, %v1268_v53 }
 0x156   : > { %v1442_v54 = vmul.f32 %v2839_v8, %v1271_v60  ;;  %v1445_v44 = vmul.f32 %v2842_v1, %v1274_v48  ;;  %v818_v56 = vpop.f32.mrf.mxu2  ;;  %v907_v59 = vpop.f32.mrf.mxu3 }
 0x157   : > { %v1598_v6 = vadd.f32 %v1438_v22, %v817_v45  ;;  %v1599_v36 = vadd.f32 %v1439_v15, %v906_v38  ;;  %v819_v58 = vadd.f32 %v818_v56, %v2853_v18  ;;  %v908_v39 = vadd.f32 %v907_v59, %v2856_v20  ;;  %v732_v41 = vpop.f32.mrf.mxu1  ;;  %v999_v61 = vpop.f32.mrf.mxu0  ;;  %v2359_v45 = vld [vmem:[%s2581_s20 + $0x78] sm:$0xff] }
 0x158   : > { %v1602_v10 = vadd.f32 %v1442_v54, %v730_v50  ;;  %v1605_v34 = vadd.f32 %v1445_v44, %v997_v37  ;;  %v733_v11 = vadd.f32 %v732_v41, %v2810_v23  ;;  %v1000_v35 = vadd.f32 %v999_v61, %v2813_v24 }
 0x159   : > { %v1733_v5 = vpack.c.bf16 %v1599_v36, %v1598_v6  ;;  %v1112_v30 = vsub.f32 0.0, %v819_v58  ;;  %v1113_v55 = vsub.f32 0.0, %v908_v39 }
 0x15a   : > { %v1735_v2 = vpack.c.bf16 %v1602_v10, %v2774_v32  ;;  %v1737_v17 = vpack.c.bf16 %v1605_v34, %v1605_v34  ;;  %v1116_v13 = vsub.f32 0.0, %v733_v11  ;;  %v1119_v9 = vsub.f32 0.0, %v1000_v35  ;;  %2199 = vmatmul.msk.bf16.gmra.mxu1 %vm550_vm0, %v2359_v45  ;;  %2247 = vmatmul.msk.bf16.gmra.mxu0 %vm550_vm0, %v2359_v45 }
 0x15b   : > { %1829 = vst [vmem:[%s2877_s24 + $0xf8] sm:$0xff] %v1733_v5  ;;  %v1272_v38 = vmax.f32 %v1112_v30, 0.0  ;;  %v1273_v26 = vmax.f32 %v1113_v55, 0.0  ;;  %2215 = vmatmul.msk.bf16.gmra.mxu2 %vm550_vm0, %v2359_v45  ;;  %2231 = vmatmul.msk.bf16.gmra.mxu3 %vm550_vm0, %v2359_v45 }
 0x15c   : > { %1831 = vst [vmem:[%s2877_s24 + $0x104] sm:$0xff] %v1735_v2  ;;  %v1276_v28 = vmax.f32 %v1116_v13, 0.0  ;;  %v1279_v16 = vmax.f32 %v1119_v9, 0.0 }
 0x15d   : > { %1833 = vst [vmem:[%s2877_s24 + $0x114] sm:$0xf] %v1737_v17  ;;  %v1443_v32 = vmul.f32 %v2880_v14, %v1272_v38  ;;  %v1444_v57 = vmul.f32 %v2883_v33, %v1273_v26 }
 0x15e   : > { %v1447_v50 = vmul.f32 %v2839_v8, %v1276_v28  ;;  %v1450_v37 = vmul.f32 %v2842_v1, %v1279_v16  ;;  %v821_v3 = vpop.f32.mrf.mxu2  ;;  %v910_v47 = vpop.f32.mrf.mxu3 }
 0x15f   : > { %v1603_v4 = vadd.f32 %v1443_v32, %v819_v58  ;;  %v1604_v19 = vadd.f32 %v1444_v57, %v908_v39  ;;  %v822_v27 = vadd.f32 %v821_v3, %v2853_v18  ;;  %v911_v12 = vadd.f32 %v910_v47, %v2856_v20  ;;  %v734_v25 = vpop.f32.mrf.mxu1  ;;  %v1001_v46 = vpop.f32.mrf.mxu0 }
 0x160   : > { %v1607_v53 = vadd.f32 %v1447_v50, %v733_v11  ;;  %v1610_v60 = vadd.f32 %v1450_v37, %v1000_v35  ;;  %v735_v48 = vadd.f32 %v734_v25, %v2810_v23  ;;  %v1002_v22 = vadd.f32 %v1001_v46, %v2813_v24 }
 0x161   : > { %v1736_v15 = vpack.c.bf16 %v1604_v19, %v1603_v4  ;;  %v1117_v54 = vsub.f32 0.0, %v822_v27  ;;  %v1118_v44 = vsub.f32 0.0, %v911_v12 }
 0x162   : > { %v1738_v56 = vpack.c.bf16 %v1607_v53, %v2805_v62  ;;  %v1740_v59 = vpack.c.bf16 %v1610_v60, %v1610_v60  ;;  %v1121_v6 = vsub.f32 0.0, %v735_v48  ;;  %v1124_v36 = vsub.f32 0.0, %v1002_v22 }
 0x163   : > { %1832 = vst [vmem:[%s2877_s24 + $0x10c] sm:$0xff] %v1736_v15  ;;  %v1277_v58 = vmax.f32 %v1117_v54, 0.0  ;;  %v1278_v39 = vmax.f32 %v1118_v44, 0.0 }
 0x164   : > { %1834 = vst [vmem:[%s2877_s24 + $0x118] sm:$0xff] %v1738_v56  ;;  %v1281_v41 = vmax.f32 %v1121_v6, 0.0  ;;  %v1284_v61 = vmax.f32 %v1124_v36, 0.0 }
 0x165   : > { %1836 = vst [vmem:[%s2877_s24 + $0x128] sm:$0xf] %v1740_v59  ;;  %v1448_v10 = vmul.f32 %v2880_v14, %v1277_v58  ;;  %v1449_v34 = vmul.f32 %v2883_v33, %v1278_v39 }
 0x166   : > { %v1452_v11 = vmul.f32 %v2839_v8, %v1281_v41  ;;  %v1455_v35 = vmul.f32 %v2842_v1, %v1284_v61  ;;  %v823_v5 = vpop.f32.mrf.mxu2  ;;  %v912_v62 = vpop.f32.mrf.mxu3 }
 0x167   : > { %v1608_v30 = vadd.f32 %v1448_v10, %v822_v27  ;;  %v1609_v55 = vadd.f32 %v1449_v34, %v911_v12  ;;  %v824_v2 = vadd.f32 %v823_v5, %v2853_v18  ;;  %v913_v17 = vadd.f32 %v912_v62, %v2856_v20  ;;  %v737_v13 = vpop.f32.mrf.mxu1  ;;  %v1004_v9 = vpop.f32.mrf.mxu0 }
 0x168   : > { %v1612_v45 = vadd.f32 %v1452_v11, %v735_v48  ;;  %v1615_v38 = vadd.f32 %v1455_v35, %v1002_v22  ;;  %v738_v26 = vadd.f32 %v737_v13, %v2810_v23  ;;  %v1005_v28 = vadd.f32 %v1004_v9, %v2813_v24 }
 0x169   : > { %v1739_v16 = vpack.c.bf16 %v1609_v55, %v1608_v30  ;;  %v1122_v32 = vsub.f32 0.0, %v824_v2  ;;  %v1123_v57 = vsub.f32 0.0, %v913_v17 }
 0x16a   : > { %v1741_v50 = vpack.c.bf16 %v1612_v45, %v2829_v49  ;;  %v1743_v37 = vpack.c.bf16 %v1615_v38, %v1615_v38  ;;  %v1126_v3 = vsub.f32 0.0, %v738_v26  ;;  %v1129_v47 = vsub.f32 0.0, %v1005_v28 }
 0x16b   : > { %1835 = vst [vmem:[%s2877_s24 + $0x120] sm:$0xff] %v1739_v16  ;;  %v1282_v4 = vmax.f32 %v1122_v32, 0.0  ;;  %v1283_v19 = vmax.f32 %v1123_v57, 0.0 }
 0x16c   : > { %1837 = vst [vmem:[%s2877_s24 + $0x12c] sm:$0xff] %v1741_v50  ;;  %v1286_v27 = vmax.f32 %v1126_v3, 0.0  ;;  %v1289_v12 = vmax.f32 %v1129_v47, 0.0 }
 0x16d   : > { %1839 = vst [vmem:[%s2877_s24 + $0x13c] sm:$0xf] %v1743_v37  ;;  %v1453_v25 = vmul.f32 %v2880_v14, %v1282_v4  ;;  %v1454_v46 = vmul.f32 %v2883_v33, %v1283_v19 }
 0x16e   : > { %v1457_v53 = vmul.f32 %v2839_v8, %v1286_v27  ;;  %v1460_v60 = vmul.f32 %v2842_v1, %v1289_v12  ;;  %v826_v48 = vpop.f32.mrf.mxu2  ;;  %v915_v49 = vpop.f32.mrf.mxu3 }
 0x16f   : > { %v1613_v22 = vadd.f32 %v1453_v25, %v824_v2  ;;  %v1614_v15 = vadd.f32 %v1454_v46, %v913_v17  ;;  %v827_v54 = vadd.f32 %v826_v48, %v2853_v18  ;;  %v916_v44 = vadd.f32 %v915_v49, %v2856_v20  ;;  %v739_v56 = vpop.f32.mrf.mxu1  ;;  %v1006_v59 = vpop.f32.mrf.mxu0 }
 0x170   : > { %v1617_v6 = vadd.f32 %v1457_v53, %v738_v26  ;;  %v1620_v36 = vadd.f32 %v1460_v60, %v1005_v28  ;;  %v740_v58 = vadd.f32 %v739_v56, %v2810_v23  ;;  %v1007_v39 = vadd.f32 %v1006_v59, %v2813_v24 }
 0x171   : > { %v1742_v41 = vpack.c.bf16 %v1614_v15, %v1613_v22  ;;  %v1127_v61 = vsub.f32 0.0, %v827_v54  ;;  %v1128_v10 = vsub.f32 0.0, %v916_v44 }
 0x172   : > { %v1744_v34 = vpack.c.bf16 %v1617_v6, %v2694_v42  ;;  %v1746_v11 = vpack.c.bf16 %v1620_v36, %v1620_v36  ;;  %v1131_v35 = vsub.f32 0.0, %v740_v58  ;;  %v1134_v5 = vsub.f32 0.0, %v1007_v39 }
 0x173   : > { %1838 = vst [vmem:[%s2877_s24 + $0x134] sm:$0xff] %v1742_v41  ;;  %v1287_v62 = vmax.f32 %v1127_v61, 0.0  ;;  %v1288_v30 = vmax.f32 %v1128_v10, 0.0 }
 0x174   : > { %1840 = vst [vmem:[%s2877_s24 + $0x140] sm:$0xff] %v1744_v34  ;;  %v1291_v55 = vmax.f32 %v1131_v35, 0.0  ;;  %v1294_v2 = vmax.f32 %v1134_v5, 0.0 }
 0x175   : > { %1842 = vst [vmem:[%s2877_s24 + $0x150] sm:$0xf] %v1746_v11  ;;  %v1458_v17 = vmul.f32 %v2880_v14, %v1287_v62  ;;  %v1459_v13 = vmul.f32 %v2883_v33, %v1288_v30 }
 0x176   : > { %v1462_v9 = vmul.f32 %v2839_v8, %v1291_v55  ;;  %v1465_v45 = vmul.f32 %v2842_v1, %v1294_v2  ;;  %v828_v38 = vpop.f32.mrf.mxu2  ;;  %v917_v42 = vpop.f32.mrf.mxu3 }
 0x177   : > { %v1618_v26 = vadd.f32 %v1458_v17, %v827_v54  ;;  %v1619_v28 = vadd.f32 %v1459_v13, %v916_v44  ;;  %v829_v16 = vadd.f32 %v828_v38, %v2853_v18  ;;  %v918_v32 = vadd.f32 %v917_v42, %v2856_v20  ;;  %v742_v57 = vpop.f32.mrf.mxu1  ;;  %v1009_v50 = vpop.f32.mrf.mxu0 }
 0x178   : > { %v1622_v37 = vadd.f32 %v1462_v9, %v740_v58  ;;  %v1625_v3 = vadd.f32 %v1465_v45, %v1007_v39  ;;  %v743_v47 = vadd.f32 %v742_v57, %v2810_v23  ;;  %v1010_v4 = vadd.f32 %v1009_v50, %v2813_v24 }
 0x179   : > { %v1745_v19 = vpack.c.bf16 %v1619_v28, %v1618_v26  ;;  %v1132_v27 = vsub.f32 0.0, %v829_v16  ;;  %v1133_v12 = vsub.f32 0.0, %v918_v32 }
 0x17a   : > { %v1747_v25 = vpack.c.bf16 %v1622_v37, %v2716_v63  ;;  %v1749_v46 = vpack.c.bf16 %v1625_v3, %v1625_v3  ;;  %v1136_v53 = vsub.f32 0.0, %v743_v47  ;;  %v1139_v60 = vsub.f32 0.0, %v1010_v4 }
 0x17b   : > { %1841 = vst [vmem:[%s2877_s24 + $0x148] sm:$0xff] %v1745_v19  ;;  %v1292_v48 = vmax.f32 %v1132_v27, 0.0  ;;  %v1293_v49 = vmax.f32 %v1133_v12, 0.0 }
 0x17c   : > { %1843 = vst [vmem:[%s2877_s24 + $0x154] sm:$0xff] %v1747_v25  ;;  %v1296_v22 = vmax.f32 %v1136_v53, 0.0  ;;  %v1299_v15 = vmax.f32 %v1139_v60, 0.0 }
 0x17d   : > { %1845 = vst [vmem:[%s2877_s24 + $0x164] sm:$0xf] %v1749_v46  ;;  %v1463_v54 = vmul.f32 %v2880_v14, %v1292_v48  ;;  %v1464_v44 = vmul.f32 %v2883_v33, %v1293_v49 }
 0x17e   : > { %v1467_v56 = vmul.f32 %v2839_v8, %v1296_v22  ;;  %v1470_v59 = vmul.f32 %v2842_v1, %v1299_v15  ;;  %v831_v6 = vpop.f32.mrf.mxu2  ;;  %v920_v63 = vpop.f32.mrf.mxu3 }
 0x17f   : > { %v1623_v36 = vadd.f32 %v1463_v54, %v829_v16  ;;  %v1624_v58 = vadd.f32 %v1464_v44, %v918_v32  ;;  %v832_v39 = vadd.f32 %v831_v6, %v2853_v18  ;;  %v921_v41 = vadd.f32 %v920_v63, %v2856_v20  ;;  %v744_v61 = vpop.f32.mrf.mxu1  ;;  %v1011_v10 = vpop.f32.mrf.mxu0 }
 0x180   : > { %v1627_v34 = vadd.f32 %v1467_v56, %v743_v47  ;;  %v1630_v11 = vadd.f32 %v1470_v59, %v1010_v4  ;;  %v745_v35 = vadd.f32 %v744_v61, %v2810_v23  ;;  %v1012_v5 = vadd.f32 %v1011_v10, %v2813_v24 }
 0x181   : > { %v1748_v62 = vpack.c.bf16 %v1624_v58, %v1623_v36  ;;  %v1137_v30 = vsub.f32 0.0, %v832_v39  ;;  %v1138_v55 = vsub.f32 0.0, %v921_v41 }
 0x182   : > { %v1750_v2 = vpack.c.bf16 %v1627_v34, %v2730_v29  ;;  %v1752_v17 = vpack.c.bf16 %v1630_v11, %v1630_v11  ;;  %v1141_v13 = vsub.f32 0.0, %v745_v35  ;;  %v1144_v9 = vsub.f32 0.0, %v1012_v5 }
 0x183   : > { %1844 = vst [vmem:[%s2877_s24 + $0x15c] sm:$0xff] %v1748_v62  ;;  %v1297_v45 = vmax.f32 %v1137_v30, 0.0  ;;  %v1298_v38 = vmax.f32 %v1138_v55, 0.0 }
 0x184   : > { %1846 = vst [vmem:[%s2877_s24 + $0x168] sm:$0xff] %v1750_v2  ;;  %v1301_v42 = vmax.f32 %v1141_v13, 0.0  ;;  %v1304_v26 = vmax.f32 %v1144_v9, 0.0 }
 0x185   : > { %1848 = vst [vmem:[%s2877_s24 + $0x178] sm:$0xf] %v1752_v17  ;;  %v1468_v28 = vmul.f32 %v2880_v14, %v1297_v45  ;;  %v1469_v16 = vmul.f32 %v2883_v33, %v1298_v38 }
 0x186   : > { %v1472_v32 = vmul.f32 %v2839_v8, %v1301_v42  ;;  %v1475_v57 = vmul.f32 %v2842_v1, %v1304_v26  ;;  %v833_v50 = vpop.f32.mrf.mxu2  ;;  %v922_v29 = vpop.f32.mrf.mxu3 }
 0x187   : > { %v1628_v37 = vadd.f32 %v1468_v28, %v832_v39  ;;  %v1629_v3 = vadd.f32 %v1469_v16, %v921_v41  ;;  %v834_v47 = vadd.f32 %v833_v50, %v2853_v18  ;;  %v923_v4 = vadd.f32 %v922_v29, %v2856_v20  ;;  %v747_v19 = vpop.f32.mrf.mxu1  ;;  %v1014_v27 = vpop.f32.mrf.mxu0 }
 0x188   : > { %v1632_v12 = vadd.f32 %v1472_v32, %v745_v35  ;;  %v1635_v25 = vadd.f32 %v1475_v57, %v1012_v5  ;;  %v748_v46 = vadd.f32 %v747_v19, %v2810_v23  ;;  %v1015_v53 = vadd.f32 %v1014_v27, %v2813_v24 }
 0x189   : > { %v1751_v60 = vpack.c.bf16 %v1629_v3, %v1628_v37  ;;  %v1142_v48 = vsub.f32 0.0, %v834_v47  ;;  %v1143_v49 = vsub.f32 0.0, %v923_v4 }
 0x18a   : > { %v1753_v22 = vpack.c.bf16 %v1632_v12, %v2752_v52  ;;  %v1755_v15 = vpack.c.bf16 %v1635_v25, %v1635_v25  ;;  %v1146_v54 = vsub.f32 0.0, %v748_v46  ;;  %v1149_v44 = vsub.f32 0.0, %v1015_v53 }
 0x18b   : > { %1847 = vst [vmem:[%s2877_s24 + $0x170] sm:$0xff] %v1751_v60  ;;  %v1302_v56 = vmax.f32 %v1142_v48, 0.0  ;;  %v1303_v59 = vmax.f32 %v1143_v49, 0.0 }
 0x18c   : > { %1849 = vst [vmem:[%s2877_s24 + $0x17c] sm:$0xff] %v1753_v22  ;;  %v1306_v6 = vmax.f32 %v1146_v54, 0.0  ;;  %v1309_v63 = vmax.f32 %v1149_v44, 0.0 }
 0x18d   : > { %1851 = vst [vmem:[%s2877_s24 + $0x18c] sm:$0xf] %v1755_v15  ;;  %v1473_v36 = vmul.f32 %v2880_v14, %v1302_v56  ;;  %v1474_v58 = vmul.f32 %v2883_v33, %v1303_v59 }
 0x18e   : > { %v1477_v39 = vmul.f32 %v2839_v8, %v1306_v6  ;;  %v1480_v41 = vmul.f32 %v2842_v1, %v1309_v63  ;;  %v836_v61 = vpop.f32.mrf.mxu2  ;;  %v925_v52 = vpop.f32.mrf.mxu3 }
 0x18f   : > { %v1633_v10 = vadd.f32 %v1473_v36, %v834_v47  ;;  %v1634_v34 = vadd.f32 %v1474_v58, %v923_v4  ;;  %v837_v11 = vadd.f32 %v836_v61, %v2853_v18  ;;  %v926_v35 = vadd.f32 %v925_v52, %v2856_v20  ;;  %v749_v5 = vpop.f32.mrf.mxu1  ;;  %v1016_v62 = vpop.f32.mrf.mxu0 }
 0x190   : > { %v1637_v30 = vadd.f32 %v1477_v39, %v748_v46  ;;  %v1640_v55 = vadd.f32 %v1480_v41, %v1015_v53  ;;  %v750_v2 = vadd.f32 %v749_v5, %v2810_v23  ;;  %v1017_v17 = vadd.f32 %v1016_v62, %v2813_v24 }
 0x191   : > { %v1754_v13 = vpack.c.bf16 %v1634_v34, %v1633_v10  ;;  %v1147_v9 = vsub.f32 0.0, %v837_v11  ;;  %v1148_v45 = vsub.f32 0.0, %v926_v35 }
 0x192   : > { %v1756_v38 = vpack.c.bf16 %v1637_v30, %v2766_v21  ;;  %v1758_v42 = vpack.c.bf16 %v1640_v55, %v1640_v55  ;;  %v1151_v26 = vsub.f32 0.0, %v750_v2  ;;  %v1154_v28 = vsub.f32 0.0, %v1017_v17 }
 0x193   : > { %1850 = vst [vmem:[%s2877_s24 + $0x184] sm:$0xff] %v1754_v13  ;;  %v1307_v16 = vmax.f32 %v1147_v9, 0.0  ;;  %v1308_v32 = vmax.f32 %v1148_v45, 0.0 }
 0x194   : > { %1852 = vst [vmem:[%s2877_s24 + $0x190] sm:$0xff] %v1756_v38  ;;  %v1311_v57 = vmax.f32 %v1151_v26, 0.0  ;;  %v1314_v50 = vmax.f32 %v1154_v28, 0.0 }
 0x195   : > { %1854 = vst [vmem:[%s2877_s24 + $0x1a0] sm:$0xf] %v1758_v42  ;;  %v1478_v29 = vmul.f32 %v2880_v14, %v1307_v16  ;;  %v1479_v37 = vmul.f32 %v2883_v33, %v1308_v32 }
 0x196   : > { %v1482_v3 = vmul.f32 %v2839_v8, %v1311_v57  ;;  %v1485_v47 = vmul.f32 %v2842_v1, %v1314_v50  ;;  %v838_v4 = vpop.f32.mrf.mxu2  ;;  %v927_v21 = vpop.f32.mrf.mxu3 }
 0x197   : > { %v1638_v19 = vadd.f32 %v1478_v29, %v837_v11  ;;  %v1639_v27 = vadd.f32 %v1479_v37, %v926_v35  ;;  %v839_v12 = vadd.f32 %v838_v4, %v2853_v18  ;;  %v928_v25 = vadd.f32 %v927_v21, %v2856_v20  ;;  %v752_v46 = vpop.f32.mrf.mxu1  ;;  %v1019_v53 = vpop.f32.mrf.mxu0 }
 0x198   : > { %v1642_v60 = vadd.f32 %v1482_v3, %v750_v2  ;;  %v1645_v48 = vadd.f32 %v1485_v47, %v1017_v17  ;;  %v753_v49 = vadd.f32 %v752_v46, %v2810_v23  ;;  %v1020_v22 = vadd.f32 %v1019_v53, %v2813_v24 }
 0x199   : > { %v1757_v15 = vpack.c.bf16 %v1639_v27, %v1638_v19  ;;  %v1152_v54 = vsub.f32 0.0, %v839_v12  ;;  %v1153_v44 = vsub.f32 0.0, %v928_v25 }
 0x19a   : > { %v1759_v56 = vpack.c.bf16 %v1642_v60, %v2793_v51  ;;  %v1761_v59 = vpack.c.bf16 %v1645_v48, %v1645_v48  ;;  %v1156_v6 = vsub.f32 0.0, %v753_v49  ;;  %v1159_v63 = vsub.f32 0.0, %v1020_v22 }
 0x19b   : > { %1853 = vst [vmem:[%s2877_s24 + $0x198] sm:$0xff] %v1757_v15  ;;  %v1312_v36 = vmax.f32 %v1152_v54, 0.0  ;;  %v1313_v58 = vmax.f32 %v1153_v44, 0.0 }
 0x19c   : > { %1855 = vst [vmem:[%s2877_s24 + $0x1a4] sm:$0xff] %v1759_v56  ;;  %v1316_v39 = vmax.f32 %v1156_v6, 0.0  ;;  %v1319_v41 = vmax.f32 %v1159_v63, 0.0 }
 0x19d   : > { %1857 = vst [vmem:[%s2877_s24 + $0x1b4] sm:$0xf] %v1761_v59  ;;  %v1483_v61 = vmul.f32 %v2880_v14, %v1312_v36  ;;  %v1484_v52 = vmul.f32 %v2883_v33, %v1313_v58 }
 0x19e   : > { %v1487_v10 = vmul.f32 %v2839_v8, %v1316_v39  ;;  %v1490_v34 = vmul.f32 %v2842_v1, %v1319_v41  ;;  %v841_v11 = vpop.f32.mrf.mxu2  ;;  %v930_v51 = vpop.f32.mrf.mxu3 }
 0x19f   : > { %v1643_v35 = vadd.f32 %v1483_v61, %v839_v12  ;;  %v1644_v5 = vadd.f32 %v1484_v52, %v928_v25  ;;  %v842_v62 = vadd.f32 %v841_v11, %v2853_v18  ;;  %v931_v30 = vadd.f32 %v930_v51, %v2856_v20  ;;  %v754_v55 = vpop.f32.mrf.mxu1  ;;  %v1021_v2 = vpop.f32.mrf.mxu0 }
 0x1a0   : > { %v1647_v17 = vadd.f32 %v1487_v10, %v753_v49  ;;  %v1650_v13 = vadd.f32 %v1490_v34, %v1020_v22  ;;  %v755_v9 = vadd.f32 %v754_v55, %v2810_v23  ;;  %v1022_v45 = vadd.f32 %v1021_v2, %v2813_v24 }
 0x1a1   : > { %v1760_v38 = vpack.c.bf16 %v1644_v5, %v1643_v35  ;;  %v1157_v42 = vsub.f32 0.0, %v842_v62  ;;  %v1158_v26 = vsub.f32 0.0, %v931_v30 }
 0x1a2   : > { %v1762_v28 = vpack.c.bf16 %v1647_v17, %v2823_v40  ;;  %v1764_v16 = vpack.c.bf16 %v1650_v13, %v1650_v13  ;;  %v1161_v32 = vsub.f32 0.0, %v755_v9  ;;  %v1164_v57 = vsub.f32 0.0, %v1022_v45 }
 0x1a3   : > { %1856 = vst [vmem:[%s2877_s24 + $0x1ac] sm:$0xff] %v1760_v38  ;;  %v1317_v50 = vmax.f32 %v1157_v42, 0.0  ;;  %v1318_v29 = vmax.f32 %v1158_v26, 0.0 }
 0x1a4   : > { %1858 = vst [vmem:[%s2877_s24 + $0x1b8] sm:$0xff] %v1762_v28  ;;  %v1321_v37 = vmax.f32 %v1161_v32, 0.0  ;;  %v1324_v3 = vmax.f32 %v1164_v57, 0.0 }
 0x1a5   : > { %1860 = vst [vmem:[%s2877_s24 + $0x1c8] sm:$0xf] %v1764_v16  ;;  %v1488_v47 = vmul.f32 %v2880_v14, %v1317_v50  ;;  %v1489_v4 = vmul.f32 %v2883_v33, %v1318_v29 }
 0x1a6   : > { %v1492_v21 = vmul.f32 %v2839_v8, %v1321_v37  ;;  %v1495_v19 = vmul.f32 %v2842_v1, %v1324_v3  ;;  %v843_v27 = vpop.f32.mrf.mxu2  ;;  %v932_v40 = vpop.f32.mrf.mxu3 }
 0x1a7   : > { %v1648_v12 = vadd.f32 %v1488_v47, %v842_v62  ;;  %v1649_v25 = vadd.f32 %v1489_v4, %v931_v30  ;;  %v844_v46 = vadd.f32 %v843_v27, %v2853_v18  ;;  %v933_v53 = vadd.f32 %v932_v40, %v2856_v20  ;;  %v757_v60 = vpop.f32.mrf.mxu1  ;;  %v1024_v48 = vpop.f32.mrf.mxu0 }
 0x1a8   : > { %v1652_v49 = vadd.f32 %v1492_v21, %v755_v9  ;;  %v1655_v22 = vadd.f32 %v1495_v19, %v1022_v45  ;;  %v758_v15 = vadd.f32 %v757_v60, %v2810_v23  ;;  %v1025_v54 = vadd.f32 %v1024_v48, %v2813_v24 }
 0x1a9   : > { %v1763_v44 = vpack.c.bf16 %v1649_v25, %v1648_v12  ;;  %v1162_v56 = vsub.f32 0.0, %v844_v46  ;;  %v1163_v59 = vsub.f32 0.0, %v933_v53 }
 0x1aa   : > { %v1765_v6 = vpack.c.bf16 %v1652_v49, %v2866_v7  ;;  %v1767_v63 = vpack.c.bf16 %v1655_v22, %v1655_v22  ;;  %v1166_v36 = vsub.f32 0.0, %v758_v15  ;;  %v1169_v58 = vsub.f32 0.0, %v1025_v54 }
 0x1ab   : > { %1859 = vst [vmem:[%s2877_s24 + $0x1c0] sm:$0xff] %v1763_v44  ;;  %v1322_v39 = vmax.f32 %v1162_v56, 0.0  ;;  %v1323_v41 = vmax.f32 %v1163_v59, 0.0 }
 0x1ac   : > { %1861 = vst [vmem:[%s2877_s24 + $0x1cc] sm:$0xff] %v1765_v6  ;;  %v1326_v61 = vmax.f32 %v1166_v36, 0.0  ;;  %v1329_v52 = vmax.f32 %v1169_v58, 0.0 }
 0x1ad   : > { %1863 = vst [vmem:[%s2877_s24 + $0x1dc] sm:$0xf] %v1767_v63  ;;  %v1493_v10 = vmul.f32 %v2880_v14, %v1322_v39  ;;  %v1494_v34 = vmul.f32 %v2883_v33, %v1323_v41 }
 0x1ae   : > { %v1497_v11 = vmul.f32 %v2839_v8, %v1326_v61  ;;  %v1500_v51 = vmul.f32 %v2842_v1, %v1329_v52  ;;  %v846_v35 = vpop.f32.mrf.mxu2  ;;  %v935_v7 = vpop.f32.mrf.mxu3 }
 0x1af   : > { %v1653_v5 = vadd.f32 %v1493_v10, %v844_v46  ;;  %v1654_v62 = vadd.f32 %v1494_v34, %v933_v53  ;;  %v847_v30 = vadd.f32 %v846_v35, %v2853_v18  ;;  %v936_v55 = vadd.f32 %v935_v7, %v2856_v20  ;;  %v759_v2 = vpop.f32.mrf.mxu1  ;;  %v1026_v17 = vpop.f32.mrf.mxu0 }
 0x1b0   : > { %v1657_v13 = vadd.f32 %v1497_v11, %v758_v15  ;;  %v1660_v9 = vadd.f32 %v1500_v51, %v1025_v54  ;;  %v760_v45 = vadd.f32 %v759_v2, %v2810_v23  ;;  %v1027_v38 = vadd.f32 %v1026_v17, %v2813_v24 }
 0x1b1   : > { %v1766_v42 = vpack.c.bf16 %v1654_v62, %v1653_v5  ;;  %v1167_v26 = vsub.f32 0.0, %v847_v30  ;;  %v1168_v28 = vsub.f32 0.0, %v936_v55 }
 0x1b2   : > { %v1768_v16 = vpack.c.bf16 %v1657_v13, %v2696_v43  ;;  %v1770_v32 = vpack.c.bf16 %v1660_v9, %v1660_v9  ;;  %v1171_v57 = vsub.f32 0.0, %v760_v45  ;;  %v1174_v50 = vsub.f32 0.0, %v1027_v38 }
 0x1b3   : > { %1862 = vst [vmem:[%s2877_s24 + $0x1d4] sm:$0xff] %v1766_v42  ;;  %v1327_v29 = vmax.f32 %v1167_v26, 0.0  ;;  %v1328_v37 = vmax.f32 %v1168_v28, 0.0 }
 0x1b4   : > { %1864 = vst [vmem:[%s2877_s24 + $0x1e0] sm:$0xff] %v1768_v16  ;;  %v1331_v3 = vmax.f32 %v1171_v57, 0.0  ;;  %v1334_v47 = vmax.f32 %v1174_v50, 0.0 }
 0x1b5   : > { %1866 = vst [vmem:[%s2877_s24 + $0x1f0] sm:$0xf] %v1770_v32  ;;  %v1498_v4 = vmul.f32 %v2880_v14, %v1327_v29  ;;  %v1499_v21 = vmul.f32 %v2883_v33, %v1328_v37 }
 0x1b6   : > { %v1502_v19 = vmul.f32 %v2839_v8, %v1331_v3  ;;  %v1505_v27 = vmul.f32 %v2842_v1, %v1334_v47  ;;  %v848_v40 = vpop.f32.mrf.mxu2  ;;  %v937_v43 = vpop.f32.mrf.mxu3 }
 0x1b7   : > { %v1658_v12 = vadd.f32 %v1498_v4, %v847_v30  ;;  %v1659_v25 = vadd.f32 %v1499_v21, %v936_v55  ;;  %v849_v46 = vadd.f32 %v848_v40, %v2853_v18  ;;  %v938_v53 = vadd.f32 %v937_v43, %v2856_v20  ;;  %v762_v60 = vpop.f32.mrf.mxu1  ;;  %v1029_v48 = vpop.f32.mrf.mxu0 }
 0x1b8   : > { %v1662_v49 = vadd.f32 %v1502_v19, %v760_v45  ;;  %v1665_v22 = vadd.f32 %v1505_v27, %v1027_v38  ;;  %v763_v15 = vadd.f32 %v762_v60, %v2810_v23  ;;  %v1030_v54 = vadd.f32 %v1029_v48, %v2813_v24 }
 0x1b9   : > { %v1769_v44 = vpack.c.bf16 %v1659_v25, %v1658_v12  ;;  %v1172_v56 = vsub.f32 0.0, %v849_v46  ;;  %v1173_v59 = vsub.f32 0.0, %v938_v53 }
 0x1ba   : > { %v1771_v6 = vpack.c.bf16 %v1662_v49, %v2718_v0  ;;  %v1773_v63 = vpack.c.bf16 %v1665_v22, %v1665_v22  ;;  %v1176_v36 = vsub.f32 0.0, %v763_v15  ;;  %v1179_v58 = vsub.f32 0.0, %v1030_v54 }
 0x1bb   : > { %1865 = vst [vmem:[%s2877_s24 + $0x1e8] sm:$0xff] %v1769_v44  ;;  %v1332_v39 = vmax.f32 %v1172_v56, 0.0  ;;  %v1333_v41 = vmax.f32 %v1173_v59, 0.0  ;;  %v3352_v56 = vld [vmem:[#allocation9_spill] sm:$0xff] }
 0x1bc   : > { %1867 = vst [vmem:[%s2877_s24 + $0x1f4] sm:$0xff] %v1771_v6  ;;  %v1336_v61 = vmax.f32 %v1176_v36, 0.0  ;;  %v1339_v52 = vmax.f32 %v1179_v58, 0.0 }
 0x1bd   : > { %1869 = vst [vmem:[%s2877_s24 + $0x204] sm:$0xf] %v1773_v63  ;;  %v1503_v10 = vmul.f32 %v2880_v14, %v1332_v39  ;;  %v1504_v34 = vmul.f32 %v2883_v33, %v1333_v41 }
 0x1be   : > { %v1507_v11 = vmul.f32 %v2839_v8, %v1336_v61  ;;  %v1510_v51 = vmul.f32 %v2842_v1, %v1339_v52  ;;  %v851_v35 = vpop.f32.mrf.mxu2  ;;  %v940_v0 = vpop.f32.mrf.mxu3 }
 0x1bf   : > { %v1663_v7 = vadd.f32 %v1503_v10, %v849_v46  ;;  %v1664_v5 = vadd.f32 %v1504_v34, %v938_v53  ;;  %v852_v62 = vadd.f32 %v851_v35, %v2853_v18  ;;  %v941_v30 = vadd.f32 %v940_v0, %v2856_v20  ;;  %v764_v55 = vpop.f32.mrf.mxu1  ;;  %v1031_v2 = vpop.f32.mrf.mxu0 }
 0x1c0   : > { %v1667_v17 = vadd.f32 %v1507_v11, %v763_v15  ;;  %v1670_v13 = vadd.f32 %v1510_v51, %v1030_v54  ;;  %v765_v9 = vadd.f32 %v764_v55, %v2810_v23  ;;  %v1032_v45 = vadd.f32 %v1031_v2, %v2813_v24 }
 0x1c1   : > { %v1772_v38 = vpack.c.bf16 %v1664_v5, %v1663_v7  ;;  %v1177_v42 = vsub.f32 0.0, %v852_v62  ;;  %v1178_v26 = vsub.f32 0.0, %v941_v30 }
 0x1c2   : > { %v1774_v28 = vpack.c.bf16 %v1667_v17, %v2732_v31  ;;  %v1776_v16 = vpack.c.bf16 %v1670_v13, %v1670_v13  ;;  %v1181_v32 = vsub.f32 0.0, %v765_v9  ;;  %v1184_v57 = vsub.f32 0.0, %v1032_v45 }
 0x1c3   : > { %1868 = vst [vmem:[%s2877_s24 + $0x1fc] sm:$0xff] %v1772_v38  ;;  %v1337_v50 = vmax.f32 %v1177_v42, 0.0  ;;  %v1338_v29 = vmax.f32 %v1178_v26, 0.0  ;;  %v3353_v26 = vld [vmem:[#allocation10_spill] sm:$0xff] }
 0x1c4   : > { %1870 = vst [vmem:[%s2877_s24 + $0x208] sm:$0xff] %v1774_v28  ;;  %v1341_v37 = vmax.f32 %v1181_v32, 0.0  ;;  %v1344_v3 = vmax.f32 %v1184_v57, 0.0 }
 0x1c5   : > { %1872 = vst [vmem:[%s2877_s24 + $0x218] sm:$0xf] %v1776_v16  ;;  %v1508_v47 = vmul.f32 %v2880_v14, %v1337_v50  ;;  %v1509_v4 = vmul.f32 %v2883_v33, %v1338_v29 }
 0x1c6   : > { %v1512_v21 = vmul.f32 %v2839_v8, %v1341_v37  ;;  %v1515_v19 = vmul.f32 %v2842_v1, %v1344_v3  ;;  %v853_v27 = vpop.f32.mrf.mxu2  ;;  %v942_v31 = vpop.f32.mrf.mxu3 }
 0x1c7   : > { %v1668_v40 = vadd.f32 %v1508_v47, %v852_v62  ;;  %v1669_v43 = vadd.f32 %v1509_v4, %v941_v30  ;;  %v854_v12 = vadd.f32 %v853_v27, %v2853_v18  ;;  %v943_v25 = vadd.f32 %v942_v31, %v2856_v20  ;;  %v767_v46 = vpop.f32.mrf.mxu1  ;;  %v1034_v53 = vpop.f32.mrf.mxu0 }
 0x1c8   : > { %v1672_v60 = vadd.f32 %v1512_v21, %v765_v9  ;;  %v1675_v48 = vadd.f32 %v1515_v19, %v1032_v45  ;;  %v768_v49 = vadd.f32 %v767_v46, %v2810_v23  ;;  %v1035_v22 = vadd.f32 %v1034_v53, %v2813_v24 }
 0x1c9   : > { %v1775_v15 = vpack.c.bf16 %v1669_v43, %v1668_v40  ;;  %v1182_v54 = vsub.f32 0.0, %v854_v12  ;;  %v1183_v44 = vsub.f32 0.0, %v943_v25 }
 0x1ca   : > { %v1777_v59 = vpack.c.bf16 %v1672_v60, %v3352_v56  ;;  %v1779_v6 = vpack.c.bf16 %v1675_v48, %v1675_v48  ;;  %v1186_v63 = vsub.f32 0.0, %v768_v49  ;;  %v1189_v36 = vsub.f32 0.0, %v1035_v22  ;;  %v3354_v56 = vld [vmem:[#allocation11_spill] sm:$0xff] }
 0x1cb   : > { %1871 = vst [vmem:[%s2877_s24 + $0x210] sm:$0xff] %v1775_v15  ;;  %v1342_v58 = vmax.f32 %v1182_v54, 0.0  ;;  %v1343_v39 = vmax.f32 %v1183_v44, 0.0 }
 0x1cc   : > { %1873 = vst [vmem:[%s2877_s24 + $0x21c] sm:$0xff] %v1777_v59  ;;  %v1346_v41 = vmax.f32 %v1186_v63, 0.0  ;;  %v1349_v61 = vmax.f32 %v1189_v36, 0.0 }
 0x1cd   : > { %1875 = vst [vmem:[%s2877_s24 + $0x22c] sm:$0xf] %v1779_v6  ;;  %v1513_v52 = vmul.f32 %v2880_v14, %v1342_v58  ;;  %v1514_v10 = vmul.f32 %v2883_v33, %v1343_v39 }
 0x1ce   : > { %v1517_v34 = vmul.f32 %v2839_v8, %v1346_v41  ;;  %v1520_v11 = vmul.f32 %v2842_v1, %v1349_v61  ;;  %v856_v51 = vpop.f32.mrf.mxu2  ;;  %v945_v35 = vpop.f32.mrf.mxu3 }
 0x1cf   : > { %v1673_v0 = vadd.f32 %v1513_v52, %v854_v12  ;;  %v1674_v7 = vadd.f32 %v1514_v10, %v943_v25  ;;  %v857_v5 = vadd.f32 %v856_v51, %v2853_v18  ;;  %v946_v62 = vadd.f32 %v945_v35, %v2856_v20  ;;  %v769_v30 = vpop.f32.mrf.mxu1  ;;  %v1036_v55 = vpop.f32.mrf.mxu0 }
 0x1d0   : > { %v1677_v2 = vadd.f32 %v1517_v34, %v768_v49  ;;  %v1680_v17 = vadd.f32 %v1520_v11, %v1035_v22  ;;  %v770_v13 = vadd.f32 %v769_v30, %v2810_v23  ;;  %v1037_v9 = vadd.f32 %v1036_v55, %v2813_v24 }
 0x1d1   : > { %v1778_v45 = vpack.c.bf16 %v1674_v7, %v1673_v0  ;;  %v1187_v38 = vsub.f32 0.0, %v857_v5  ;;  %v1188_v42 = vsub.f32 0.0, %v946_v62 }
 0x1d2   : > { %v1780_v28 = vpack.c.bf16 %v1677_v2, %v3353_v26  ;;  %v1782_v16 = vpack.c.bf16 %v1680_v17, %v1680_v17  ;;  %v1191_v32 = vsub.f32 0.0, %v770_v13  ;;  %v1194_v57 = vsub.f32 0.0, %v1037_v9  ;;  %v3355_v26 = vld [vmem:[#allocation12_spill] sm:$0xff] }
 0x1d3   : > { %1874 = vst [vmem:[%s2877_s24 + $0x224] sm:$0xff] %v1778_v45  ;;  %v1347_v50 = vmax.f32 %v1187_v38, 0.0  ;;  %v1348_v29 = vmax.f32 %v1188_v42, 0.0 }
 0x1d4   : > { %1876 = vst [vmem:[%s2877_s24 + $0x230] sm:$0xff] %v1780_v28  ;;  %v1351_v37 = vmax.f32 %v1191_v32, 0.0  ;;  %v1354_v3 = vmax.f32 %v1194_v57, 0.0 }
 0x1d5   : > { %1878 = vst [vmem:[%s2877_s24 + $0x240] sm:$0xf] %v1782_v16  ;;  %v1518_v47 = vmul.f32 %v2880_v14, %v1347_v50  ;;  %v1519_v4 = vmul.f32 %v2883_v33, %v1348_v29 }
 0x1d6   : > { %v1522_v21 = vmul.f32 %v2839_v8, %v1351_v37  ;;  %v1525_v19 = vmul.f32 %v2842_v1, %v1354_v3  ;;  %v858_v27 = vpop.f32.mrf.mxu2  ;;  %v947_v31 = vpop.f32.mrf.mxu3 }
 0x1d7   : > { %v1678_v40 = vadd.f32 %v1518_v47, %v857_v5  ;;  %v1679_v43 = vadd.f32 %v1519_v4, %v946_v62  ;;  %v859_v12 = vadd.f32 %v858_v27, %v2853_v18  ;;  %v948_v25 = vadd.f32 %v947_v31, %v2856_v20  ;;  %v772_v46 = vpop.f32.mrf.mxu1  ;;  %v1039_v53 = vpop.f32.mrf.mxu0 }
 0x1d8   : > { %v1682_v60 = vadd.f32 %v1522_v21, %v770_v13  ;;  %v1685_v48 = vadd.f32 %v1525_v19, %v1037_v9  ;;  %v773_v49 = vadd.f32 %v772_v46, %v2810_v23  ;;  %v1040_v22 = vadd.f32 %v1039_v53, %v2813_v24 }
 0x1d9   : > { %v1781_v15 = vpack.c.bf16 %v1679_v43, %v1678_v40  ;;  %v1192_v54 = vsub.f32 0.0, %v859_v12  ;;  %v1193_v44 = vsub.f32 0.0, %v948_v25 }
 0x1da   : > { %v1783_v59 = vpack.c.bf16 %v1682_v60, %v3354_v56  ;;  %v1785_v6 = vpack.c.bf16 %v1685_v48, %v1685_v48  ;;  %v1196_v63 = vsub.f32 0.0, %v773_v49  ;;  %v1199_v36 = vsub.f32 0.0, %v1040_v22  ;;  %v3356_v48 = vld [vmem:[#allocation13_spill] sm:$0xff] }
 0x1db   : > { %1877 = vst [vmem:[%s2877_s24 + $0x238] sm:$0xff] %v1781_v15  ;;  %v1352_v58 = vmax.f32 %v1192_v54, 0.0  ;;  %v1353_v39 = vmax.f32 %v1193_v44, 0.0 }
 0x1dc   : > { %1879 = vst [vmem:[%s2877_s24 + $0x244] sm:$0xff] %v1783_v59  ;;  %v1356_v41 = vmax.f32 %v1196_v63, 0.0  ;;  %v1359_v61 = vmax.f32 %v1199_v36, 0.0 }
 0x1dd   : > { %1881 = vst [vmem:[%s2877_s24 + $0x254] sm:$0xf] %v1785_v6  ;;  %v1523_v52 = vmul.f32 %v2880_v14, %v1352_v58  ;;  %v1524_v10 = vmul.f32 %v2883_v33, %v1353_v39 }
 0x1de   : > { %v1527_v34 = vmul.f32 %v2839_v8, %v1356_v41  ;;  %v1530_v11 = vmul.f32 %v2842_v1, %v1359_v61  ;;  %v861_v51 = vpop.f32.mrf.mxu2  ;;  %v950_v35 = vpop.f32.mrf.mxu3 }
 0x1df   : > { %v1683_v0 = vadd.f32 %v1523_v52, %v859_v12  ;;  %v1684_v7 = vadd.f32 %v1524_v10, %v948_v25  ;;  %v862_v5 = vadd.f32 %v861_v51, %v2853_v18  ;;  %v951_v62 = vadd.f32 %v950_v35, %v2856_v20  ;;  %v774_v30 = vpop.f32.mrf.mxu1  ;;  %v1041_v55 = vpop.f32.mrf.mxu0 }
 0x1e0   : > { %v1687_v2 = vadd.f32 %v1527_v34, %v773_v49  ;;  %v1690_v17 = vadd.f32 %v1530_v11, %v1040_v22  ;;  %v775_v13 = vadd.f32 %v774_v30, %v2810_v23  ;;  %v1042_v9 = vadd.f32 %v1041_v55, %v2813_v24 }
 0x1e1   : > { %v1784_v45 = vpack.c.bf16 %v1684_v7, %v1683_v0  ;;  %v1197_v38 = vsub.f32 0.0, %v862_v5  ;;  %v1198_v42 = vsub.f32 0.0, %v951_v62 }
 0x1e2   : > { %v1786_v28 = vpack.c.bf16 %v1687_v2, %v3355_v26  ;;  %v1788_v16 = vpack.c.bf16 %v1690_v17, %v1690_v17  ;;  %v1201_v32 = vsub.f32 0.0, %v775_v13  ;;  %v1204_v57 = vsub.f32 0.0, %v1042_v9 }
 0x1e3   : > { %1880 = vst [vmem:[%s2877_s24 + $0x24c] sm:$0xff] %v1784_v45  ;;  %v1357_v50 = vmax.f32 %v1197_v38, 0.0  ;;  %v1358_v29 = vmax.f32 %v1198_v42, 0.0 }
 0x1e4   : > { %1882 = vst [vmem:[%s2877_s24 + $0x258] sm:$0xff] %v1786_v28  ;;  %v1361_v37 = vmax.f32 %v1201_v32, 0.0  ;;  %v1364_v3 = vmax.f32 %v1204_v57, 0.0 }
 0x1e5   : > { %1884 = vst [vmem:[%s2877_s24 + $0x268] sm:$0xf] %v1788_v16  ;;  %v1528_v47 = vmul.f32 %v2880_v14, %v1357_v50  ;;  %v1529_v23 = vmul.f32 %v2883_v33, %v1358_v29 }
 0x1e6   : > { %v1532_v24 = vmul.f32 %v2839_v8, %v1361_v37  ;;  %v1535_v4 = vmul.f32 %v2842_v1, %v1364_v3  ;;  %v863_v21 = vpop.f32.mrf.mxu2  ;;  %v952_v19 = vpop.f32.mrf.mxu3 }
 0x1e7   : > { %v1688_v27 = vadd.f32 %v1528_v47, %v862_v5  ;;  %v1689_v31 = vadd.f32 %v1529_v23, %v951_v62  ;;  %v864_v40 = vadd.f32 %v863_v21, %v2853_v18  ;;  %v953_v43 = vadd.f32 %v952_v19, %v2856_v20 }
 0x1e8   : > { %v1692_v12 = vadd.f32 %v1532_v24, %v775_v13  ;;  %v1695_v25 = vadd.f32 %v1535_v4, %v1042_v9 }
 0x1e9   : > { %v1787_v46 = vpack.c.bf16 %v1689_v31, %v1688_v27  ;;  %v1202_v53 = vsub.f32 0.0, %v864_v40  ;;  %v1203_v60 = vsub.f32 0.0, %v953_v43 }
 0x1ea   : > { %v1789_v8 = vpack.c.bf16 %v1692_v12, %v3356_v48  ;;  %v1791_v49 = vpack.c.bf16 %v1695_v25, %v1695_v25 }
 0x1eb   : > { %1883 = vst [vmem:[%s2877_s24 + $0x260] sm:$0xff] %v1787_v46  ;;  %v1362_v1 = vmax.f32 %v1202_v53, 0.0  ;;  %v1363_v22 = vmax.f32 %v1203_v60, 0.0 }
 0x1ec   : > { %1885 = vst [vmem:[%s2877_s24 + $0x26c] sm:$0xff] %v1789_v8 }
 0x1ed   : > { %1887 = vst [vmem:[%s2877_s24 + $0x27c] sm:$0xf] %v1791_v49  ;;  %v1533_v15 = vmul.f32 %v2880_v14, %v1362_v1  ;;  %v1534_v18 = vmul.f32 %v2883_v33, %v1363_v22 }
 0x1ef   : > { %v1693_v54 = vadd.f32 %v1533_v15, %v864_v40  ;;  %v1694_v20 = vadd.f32 %v1534_v18, %v953_v43 }
 0x1f1   : > { %v1790_v44 = vpack.c.bf16 %v1694_v20, %v1693_v54 }
 0x1f3   : > { %1886 = vst [vmem:[%s2877_s24 + $0x274] sm:$0xff] %v1790_v44 }
 0x1f4 PF: > { %s16_s17 = sadd.s32 1, %s2480_s17   ;;  %s3357_s15 = smov %s2476_s16 }
 0x1f5   : > { %p13_p8 = scmp.ge.s32.totalorder %s16_s17, 4   ;;  %s3358_s16 = smov %s3360_s27 }
 0x1f7   :  { %15 = sbr.rel (!%p13_p8) target bundleno = 3 (0x3), region = 82 }
 0x1fc   :  { %1921 = vsyncpa [#allocation3], 1 }
 0x1fd   :  { %1923 = vsyncpa [#allocation3 + $0x1], 1 }
 0x1fe   :  { %1924 = vsyncpa [#allocation5], 1 }

// kernel: apply.5
= control target key start
LH: loop header
LB: loop body
LE: loop exit
PB: predicated region body
PF: predicated region fallthrough
CT: control target
= control target key end

     0   :  { %s1924_s12 = smov 0   ;;  %s2450_s0 = inlined_call_operand.vmem [shape: bf16[32,18,48], index: 0, kind: input, shape index: {}]   ;;  %s2451_s1 = inlined_call_operand.vmem [shape: bf16[3,48,56], index: 1, kind: input, shape index: {}]   ;;  %s2452_s2 = inlined_call_operand.vmem [shape: f32[1,56], index: 2, kind: input, shape index: {}]   ;;  %s2453_s3 = inlined_call_operand.vmem [shape: bf16[32,16,56], index: 3, kind: output, shape index: {}]  }
   0x1 LB: > { %s1663_s13 = sadd.s32 4294967295, %s1902_s12   ;;  %p1667_p0 = scmp.ge.s32.totalorder %s1902_s12, 1  ;;  %s1902_s12 = sphi %s1924_s12, %s13_s12  }
   0x2   : > { %p139_p1 = scmp.lt.s32.totalorder %s1902_s12, 3 }
   0x4   : > { %p140_p2 = pnand %p1667_p0, %p139_p1 }
   0x5   : > { %s1668_s20 = sshll.u32 (!%p140_p2), %s1663_s13, 4 }
   0x6   : > { %143 = sbr.rel (%p140_p2) target bundleno = 361 (0x169), region = 32  ;;  %p166_p3 = scmp.lt.s32.totalorder (!%p140_p2), %s1668_s20, 31 }
   0xb   : > { %v1870_v0 = vld [vmem:[%s2451_s1 + $0x10] sm:$0xff]  ;;  %v1938_v1 = vld [vmem:[%s2451_s1 + $0x40] sm:$0xff]  ;;  %v1873_v2 = vld [vmem:[%s2451_s1 + $0x28] sm:$0xff]  ;;  %s2459_s20 = smov (!%p166_p3, %s1668_s20), 31  ;;  %vm1115_vm0 = vcmask 1042432   ;;  %vm1116_vm1 = vcmask 1046532  }
   0xc   : > { %983 = vmatpush.bf16.msra.mxu1 %v1870_v0  ;;  %1356 = vmatpush.bf16.msra.mxu2 %v1938_v1  ;;  %v1947_v3 = vld [vmem:[%s2451_s1 + $0x8] sm:$0xff]  ;;  %v1952_v4 = vld [vmem:[%s2451_s1 + $0x38] sm:$0xff]  ;;  %v1872_v5 = vld [vmem:[%s2451_s1 + $0x20] sm:$0xff]  ;;  %s1886_s27 = smul.u32 12, %s2459_s20  ;;  %vm234_vm2 = vsmask.f32 3328 }
   0xd   : > { %748 = vmatpush.bf16.msra.mxu0 %v1873_v2  ;;  %1877 = vmatpush.bf16.msra.mxu3 %v1873_v2  ;;  %v1965_v6 = vld [vmem:[%s2451_s1] sm:$0xff]  ;;  %v1970_v7 = vld [vmem:[%s2451_s1 + $0x30] sm:$0xff]  ;;  %v1871_v8 = vld [vmem:[%s2451_s1 + $0x18] sm:$0xff]  ;;  %vm235_vm3 = vsmask.f32 7440  ;;  %vm694_vm4 = vcmask 392192  }
   0xe   : > { %s1975_s7 = scalar_lea.vmem %s2450_s0, %s1886_s27  ;;  %vm1984_vm5 = vmor %vm1115_vm0, %vm1116_vm1  ;;  %s1851_s13 = sshll.u32 %s2459_s20, 3  ;;  %vm1572_vm7 = vcmask 453632  }
   0xf   : > { %v1852_v9 = vld [vmem:[%s1975_s7] sm:$0xff]  ;;  %v218_v11 = vld [vmem:[%s1975_s7 + $0x8] sm:$0x1]  ;;  %v204_v21 = vld [vmem:[%s1975_s7 + $0x90] sm:$0xf]  ;;  %s2248_s16 = scalar_lea.vmem %s2453_s3, %s1851_s13 }
  0x10   : > { %984 = vmatpush.bf16.msra.mxu1 %v1947_v3  ;;  %1357 = vmatpush.bf16.msra.mxu2 %v1952_v4  ;;  %v181_v10 = vld [vmem:[%s1975_s7 + $0x4] sm:$0xf]  ;;  %v1067_v12 = vld [vmem:[%s1975_s7] sm:$0xe]  ;;  %v1123_v15 = vrot.slane %v218_v11, 5  ;;  %v257_v24 = vshll.u32 %v218_v11, 16  ;;  %vm2005_vm6 = vmor %vm234_vm2, %vm235_vm3 }
  0x11   : > { %749 = vmatpush.bf16.msra.mxu0 %v1872_v5  ;;  %1878 = vmatpush.bf16.msra.mxu3 %v1872_v5  ;;  %v1120_v14 = vrot.slane %v181_v10, 5  ;;  %v180_v16 = vld [vmem:[%s1975_s7] sm:$0xf]  ;;  %v1799_v17 = vrot.slane %v1067_v12, 9  ;;  %v247_v20 = vshll.u32 %v181_v10, 16  ;;  %v251_v23 = vshrl.u32 %v181_v10, 16 }
  0x12   : > { %v238_v18 = vshrl.u32 %v180_v16, 16  ;;  %v241_v19 = vshll.u32 %v180_v16, 16  ;;  %v1993_v25 = vld [vmem:[%s1975_s7 + $0x94] sm:$0xf]  ;;  %v526_v26 = vshrl.u32 %v204_v21, 16  ;;  %v259_v35 = vrot.slane %v257_v24, 5 }
  0x13   : > { %v1122_v22 = vrot.slane %v1120_v14, 4  ;;  %v1121_v27 = vsel %vm1984_vm5, %v1799_v17, %v1120_v14  ;;  %v249_v30 = vrot.slane %v247_v20, 5  ;;  %v1998_v31 = vld [vmem:[%s1975_s7 + $0x98] sm:$0x1]  ;;  %v253_v34 = vrot.slane %v251_v23, 4  ;;  %v1853_v24 = vld [vmem:[%s1975_s7 + $0xc] sm:$0xff] }
  0x14   : > { %985 = vmatpush.bf16.msra.mxu1 %v1965_v6  ;;  %1358 = vmatpush.bf16.msra.mxu2 %v1970_v7  ;;  %v240_v28 = vrot.slane %v238_v18, 4  ;;  %v243_v29 = vrot.slane %v241_v19, 5  ;;  %v1237_v33 = vunpack.c.l.b16 %v1121_v27  ;;  %v528_v38 = vrot.slane %v526_v26, 4  ;;  %v183_v48 = vld [vmem:[%s1975_s7 + $0x10] sm:$0xf] }
  0x15   : > { %750 = vmatpush.bf16.msra.mxu0 %v1871_v8  ;;  %1879 = vmatpush.bf16.msra.mxu3 %v1871_v8  ;;  %v1124_v32 = vsel %vm1984_vm5, %v1122_v22, %v1123_v15  ;;  %v529_v39 = vshll.u32 %v204_v21, 16  ;;  %v254_v41 = vor.u32 %v253_v34, %v249_v30  ;;  %v535_v42 = vshll.u32 %v1993_v25, 16  ;;  %v1068_v49 = vld [vmem:[%s1975_s7 + $0xc] sm:$0xe]  ;;  %v219_v53 = vld [vmem:[%s1975_s7 + $0x14] sm:$0x1] }
  0x16   : > { %v1238_v36 = vunpack.c.l.b16 %v1124_v32  ;;  %v244_v37 = vor.u32 %v243_v29, %v240_v28  ;;  %v539_v43 = vshrl.u32 %v1993_v25, 16  ;;  %v545_v44 = vshll.u32 %v1998_v31, 16  ;;  %v182_v57 = vld [vmem:[%s1975_s7 + $0xc] sm:$0xf]  ;;  %v206_v15 = vld [vmem:[%s1975_s7 + $0x9c] sm:$0xf] }
  0x17   : > { %1783 = vmatmul.msk.bf16.vlgmr.msra.gmra.mxu1 %vm694_vm4, %v1852_v9  ;;  %v531_v47 = vrot.slane %v529_v39, 5  ;;  %v255_v50 = vrot.slane %v254_v41, 4  ;;  %v537_v51 = vrot.slane %v535_v42, 5  ;;  %v1800_v61 = vrot.slane %v1068_v49, 9  ;;  %v2031_v19 = vld [vmem:[%s1975_s7 + $0xa0] sm:$0xf] }
  0x18   : > { %v1269_v45 = vpack.c.b16 %v1238_v36, %v1237_v33  ;;  %v245_v46 = vrot.slane %v244_v37, 4  ;;  %v541_v52 = vrot.slane %v539_v43, 4  ;;  %v547_v56 = vrot.slane %v545_v44, 5  ;;  %v2038_v33 = vld [vmem:[%s1975_s7 + $0xa4] sm:$0x1] }
  0x19   : > { %1880 = vmatpush.bf16.msrb.mxu3 %v1870_v0  ;;  %v532_v55 = vor.u32 %v531_v47, %v528_v38  ;;  %v260_v58 = vsel %vm2005_vm6, %v255_v50, %v259_v35  ;;  %v1127_v0 = vrot.slane %v183_v48, 5  ;;  %v1130_v2 = vrot.slane %v219_v53, 5  ;;  %v185_v36 = vld [vmem:[%s1975_s7 + $0x1c] sm:$0xf]  ;;  %v220_v39 = vld [vmem:[%s1975_s7 + $0x20] sm:$0x1] }
  0x1a   : > { %1833 = vmatmul.msk.bf16.vlgmr.msra.gmra.mxu2 %vm694_vm4, %v1269_v45  ;;  %v250_v54 = vsel %vm2005_vm6, %v245_v46, %v249_v30  ;;  %v542_v60 = vor.u32 %v541_v52, %v537_v51  ;;  %v629_v62 = vunpack.c.l.b16 %v260_v58  ;;  %v262_v5 = vshrl.u32 %v182_v57, 16  ;;  %v1069_v45 = vld [vmem:[%s1975_s7 + $0x18] sm:$0xe] }
  0x1b   : > { %v628_v59 = vunpack.c.l.b16 %v250_v54  ;;  %v533_v63 = vrot.slane %v532_v55, 4  ;;  %v265_v8 = vshll.u32 %v182_v57, 16  ;;  %v271_v9 = vshll.u32 %v183_v48, 16  ;;  %v184_v54 = vld [vmem:[%s1975_s7 + $0x18] sm:$0xf] }
  0x1c   : > { %v1128_v12 = vsel %vm1984_vm5, %v1800_v61, %v1127_v0  ;;  %v1129_v14 = vrot.slane %v1127_v0, 4  ;;  %v264_v18 = vrot.slane %v262_v5, 4  ;;  %v275_v27 = vshrl.u32 %v183_v48, 16 }
  0x1d   : > { %1881 = vmatpush.bf16.msrb.mxu3 %v1947_v3  ;;  %v543_v3 = vrot.slane %v542_v60, 4  ;;  %v660_v10 = vpack.c.b16 %v629_v62, %v628_v59  ;;  %v538_v11 = vsel %vm2005_vm6, %v533_v63, %v537_v51  ;;  %v267_v22 = vrot.slane %v265_v8, 5 }
  0x1e   : > { %v652_v17 = vunpack.c.l.b16 %v538_v11  ;;  %v1131_v21 = vsel %vm1984_vm5, %v1129_v14, %v1130_v2  ;;  %v273_v23 = vrot.slane %v271_v9, 5  ;;  %v281_v28 = vshll.u32 %v219_v53, 16  ;;  %v208_v14 = vld [vmem:[%s1975_s7 + $0xa8] sm:$0xf] }
  0x1f   : > { %v548_v16 = vsel %vm2005_vm6, %v543_v3, %v547_v56  ;;  %1691 = vmatmul.msk.bf16.vlgmr.msra.gmra.mxu0 %vm694_vm4, %v660_v10  ;;  %v1240_v26 = vunpack.c.l.b16 %v1131_v21  ;;  %v550_v29 = vshrl.u32 %v206_v15, 16  ;;  %v268_v32 = vor.u32 %v267_v22, %v264_v18 }
  0x20   : > { %v653_v20 = vunpack.c.l.b16 %v548_v16  ;;  %v553_v34 = vshll.u32 %v206_v15, 16  ;;  %v559_v35 = vshll.u32 %v2031_v19, 16  ;;  %v277_v37 = vrot.slane %v275_v27, 4  ;;  %v2062_v15 = vld [vmem:[%s1975_s7 + $0xac] sm:$0xf] }
  0x21   : > { %1882 = vmatpush.bf16.msrb.mxu3 %v1965_v6  ;;  %v1239_v6 = vunpack.c.l.b16 %v1128_v12  ;;  %v552_v38 = vrot.slane %v550_v29, 4  ;;  %v269_v41 = vrot.slane %v268_v32, 4  ;;  %v563_v44 = vshrl.u32 %v2031_v19, 16 }
  0x22   : > { %v672_v30 = vpack.c.b16 %v653_v20, %v652_v17  ;;  %v555_v42 = vrot.slane %v553_v34, 5  ;;  %v561_v43 = vrot.slane %v559_v35, 5  ;;  %v278_v46 = vor.u32 %v277_v37, %v273_v23 }
  0x23   : > { %v283_v47 = vrot.slane %v281_v28, 5  ;;  %v569_v48 = vshll.u32 %v2038_v33, 16  ;;  %v1134_v49 = vrot.slane %v185_v36, 5  ;;  %v1270_v50 = vpack.c.b16 %v1240_v26, %v1239_v6 }
  0x24   : > { %1703 = vmatmul.msk.bf16.vlgmr.msra.gmra.mxu3 %vm694_vm4, %v672_v30  ;;  %v274_v51 = vsel %vm2005_vm6, %v269_v41, %v273_v23  ;;  %v556_v52 = vor.u32 %v555_v42, %v552_v38  ;;  %v565_v53 = vrot.slane %v563_v44, 4  ;;  %v279_v55 = vrot.slane %v278_v46, 4  ;;  %v186_v38 = vld [vmem:[%s1975_s7 + $0x24] sm:$0xf] }
  0x25   : > { %1883 = vmatpush.bf16.msra.mxu3 %v1938_v1  ;;  %v630_v56 = vunpack.c.l.b16 %v274_v51  ;;  %v1801_v57 = vrot.slane %v1069_v45, 9  ;;  %v1137_v58 = vrot.slane %v220_v39, 5  ;;  %v571_v61 = vrot.slane %v569_v48, 5 }
  0x26   : > { %v557_v59 = vrot.slane %v556_v52, 4  ;;  %v566_v60 = vor.u32 %v565_v53, %v561_v43  ;;  %v1136_v62 = vrot.slane %v1134_v49, 4  ;;  %v284_v1 = vsel %vm2005_vm6, %v279_v55, %v283_v47 }
  0x27   : > { %1784 = vmatmul.msk.bf16.gmra.mxu1 %vm694_vm4, %v1853_v24  ;;  %v286_v63 = vshrl.u32 %v184_v54, 16  ;;  %v289_v0 = vshll.u32 %v184_v54, 16  ;;  %v295_v2 = vshll.u32 %v185_v36, 16  ;;  %v631_v3 = vunpack.c.l.b16 %v284_v1  ;;  %v2070_v24 = vld [vmem:[%s1975_s7 + $0xb0] sm:$0x1] }
  0x28   : > { %v562_v5 = vsel %vm2005_vm6, %v557_v59, %v561_v43  ;;  %v567_v8 = vrot.slane %v566_v60, 4  ;;  %v1135_v10 = vsel %vm1984_vm5, %v1801_v57, %v1134_v49  ;;  %v299_v6 = vshrl.u32 %v185_v36, 16  ;;  %v187_v49 = vld [vmem:[%s1975_s7 + $0x28] sm:$0xf]  ;;  %v221_v57 = vld [vmem:[%s1975_s7 + $0x2c] sm:$0x1] }
  0x29   : > { %1884 = vmatpush.bf16.msra.mxu3 %v1952_v4  ;;  %v654_v9 = vunpack.c.l.b16 %v562_v5  ;;  %v288_v11 = vrot.slane %v286_v63, 4  ;;  %v291_v12 = vrot.slane %v289_v0, 5  ;;  %v661_v16 = vpack.c.b16 %v631_v3, %v630_v56  ;;  %v210_v1 = vld [vmem:[%s1975_s7 + $0xb4] sm:$0xf] }
  0x2a   : > { %1834 = vmatmul.msk.bf16.gmra.mxu2 %vm694_vm4, %v1270_v50  ;;  %v572_v4 = vsel %vm2005_vm6, %v567_v8, %v571_v61  ;;  %v297_v17 = vrot.slane %v295_v2, 5  ;;  %v1138_v20 = vsel %vm1984_vm5, %v1136_v62, %v1137_v58  ;;  %v305_v22 = vshll.u32 %v220_v39, 16  ;;  %v1854_v39 = vld [vmem:[%s1975_s7 + $0x18] sm:$0xff]  ;;  %v1070_v58 = vld [vmem:[%s1975_s7 + $0x24] sm:$0xe] }
  0x2b   : > { %v655_v18 = vunpack.c.l.b16 %v572_v4  ;;  %v292_v21 = vor.u32 %v291_v12, %v288_v11  ;;  %v301_v23 = vrot.slane %v299_v6, 4  ;;  %v574_v26 = vshrl.u32 %v208_v14, 16  ;;  %v2091_v2 = vld [vmem:[%s1975_s7 + $0xb8] sm:$0xf] }
  0x2c   : > { %v577_v27 = vshll.u32 %v208_v14, 16  ;;  %v583_v28 = vshll.u32 %v2062_v15, 16  ;;  %v307_v32 = vrot.slane %v305_v22, 5  ;;  %v587_v34 = vshrl.u32 %v2062_v15, 16 }
  0x2d   : > { %1885 = vmatpush.bf16.msra.mxu3 %v1970_v7  ;;  %v673_v29 = vpack.c.b16 %v655_v18, %v654_v9  ;;  %v293_v30 = vrot.slane %v292_v21, 4  ;;  %v302_v35 = vor.u32 %v301_v23, %v297_v17  ;;  %v576_v36 = vrot.slane %v574_v26, 4 }
  0x2e   : > { %v579_v37 = vrot.slane %v577_v27, 5  ;;  %v585_v7 = vrot.slane %v583_v28, 5  ;;  %v1241_v41 = vunpack.c.l.b16 %v1135_v10  ;;  %v1242_v42 = vunpack.c.l.b16 %v1138_v20 }
  0x2f   : > { %1692 = vmatmul.msk.bf16.gmra.mxu0 %vm694_vm4, %v661_v16  ;;  %v589_v43 = vrot.slane %v587_v34, 4  ;;  %v593_v44 = vshll.u32 %v2070_v24, 16  ;;  %v298_v45 = vsel %vm2005_vm6, %v293_v30, %v297_v17  ;;  %v303_v46 = vrot.slane %v302_v35, 4 }
  0x30   : > { %v580_v47 = vor.u32 %v579_v37, %v576_v36  ;;  %v310_v50 = vshrl.u32 %v186_v38, 16  ;;  %v1271_v54 = vpack.c.b16 %v1242_v42, %v1241_v41  ;;  %v632_v55 = vunpack.c.l.b16 %v298_v45  ;;  %v1855_v42 = vld [vmem:[%s1975_s7 + $0x24] sm:$0xff] }
  0x31   : > { %v590_v48 = vor.u32 %v589_v43, %v585_v7  ;;  %v308_v51 = vsel %vm2005_vm6, %v303_v46, %v307_v32  ;;  %v595_v53 = vrot.slane %v593_v44, 5  ;;  %v1141_v60 = vrot.slane %v187_v49, 5  ;;  %v188_v44 = vld [vmem:[%s1975_s7 + $0x30] sm:$0xf] }
  0x32   : > { %v581_v52 = vrot.slane %v580_v47, 4  ;;  %v633_v59 = vunpack.c.l.b16 %v308_v51  ;;  %v313_v61 = vshll.u32 %v186_v38, 16  ;;  %v319_v62 = vshll.u32 %v187_v49, 16  ;;  %v189_v47 = vld [vmem:[%s1975_s7 + $0x34] sm:$0xf] }
  0x33   : > { %v591_v56 = vrot.slane %v590_v48, 4  ;;  %v312_v0 = vrot.slane %v310_v50, 4  ;;  %v323_v9 = vshrl.u32 %v187_v49, 16  ;;  %v1802_v10 = vrot.slane %v1070_v58, 9 }
  0x34   : > { %1704 = vmatmul.msk.bf16.gmra.mxu3 %vm694_vm4, %v673_v29  ;;  %v586_v63 = vsel %vm2005_vm6, %v581_v52, %v585_v7  ;;  %v315_v5 = vrot.slane %v313_v61, 5  ;;  %v321_v8 = vrot.slane %v319_v62, 5  ;;  %v1144_v11 = vrot.slane %v221_v57, 5  ;;  %v2099_v29 = vld [vmem:[%s1975_s7 + $0xbc] sm:$0x1] }
  0x35   : > { %v596_v3 = vsel %vm2005_vm6, %v591_v56, %v595_v53  ;;  %v598_v12 = vshrl.u32 %v210_v1, 16  ;;  %v601_v14 = vshll.u32 %v210_v1, 16  ;;  %v662_v16 = vpack.c.b16 %v633_v59, %v632_v55  ;;  %v222_v62 = vld [vmem:[%s1975_s7 + $0x38] sm:$0x1]  ;;  %v1071_v1 = vld [vmem:[%s1975_s7 + $0x30] sm:$0xe] }
  0x36   : > { %v1143_v4 = vrot.slane %v1141_v60, 4  ;;  %v325_v17 = vrot.slane %v323_v9, 4  ;;  %v607_v6 = vshll.u32 %v2091_v2, 16  ;;  %v656_v18 = vunpack.c.l.b16 %v586_v63 }
  0x37   : > { %1785 = vmatmul.msk.bf16.gmra.mxu1 %vm694_vm4, %v1854_v39  ;;  %v657_v20 = vunpack.c.l.b16 %v596_v3  ;;  %v316_v21 = vor.u32 %v315_v5, %v312_v0  ;;  %v611_v22 = vshrl.u32 %v2091_v2, 16  ;;  %v329_v26 = vshll.u32 %v221_v57, 16 }
  0x38   : > { %v326_v23 = vor.u32 %v325_v17, %v321_v8  ;;  %v600_v27 = vrot.slane %v598_v12, 4  ;;  %v603_v28 = vrot.slane %v601_v14, 5  ;;  %v609_v30 = vrot.slane %v607_v6, 5 }
  0x39   : > { %v613_v32 = vrot.slane %v611_v22, 4  ;;  %v674_v34 = vpack.c.b16 %v657_v20, %v656_v18  ;;  %v1142_v35 = vsel %vm1984_vm5, %v1802_v10, %v1141_v60  ;;  %v1145_v36 = vsel %vm1984_vm5, %v1143_v4, %v1144_v11  ;;  %v1856_v22 = vld [vmem:[%s1975_s7 + $0x30] sm:$0xff] }
  0x3a   : > { %1835 = vmatmul.msk.bf16.gmra.mxu2 %vm694_vm4, %v1271_v54  ;;  %v317_v37 = vrot.slane %v316_v21, 4  ;;  %v327_v7 = vrot.slane %v326_v23, 4  ;;  %v331_v38 = vrot.slane %v329_v26, 5  ;;  %v604_v39 = vor.u32 %v603_v28, %v600_v27  ;;  %v190_v28 = vld [vmem:[%s1975_s7 + $0x3c] sm:$0xf] }
  0x3b   : > { %v617_v41 = vshll.u32 %v2099_v29, 16  ;;  %v614_v43 = vor.u32 %v613_v32, %v609_v30  ;;  %v1243_v45 = vunpack.c.l.b16 %v1142_v35  ;;  %v1244_v46 = vunpack.c.l.b16 %v1145_v36 }
  0x3c   : > { %v322_v48 = vsel %vm2005_vm6, %v317_v37, %v321_v8  ;;  %v332_v49 = vsel %vm2005_vm6, %v327_v7, %v331_v38  ;;  %v605_v50 = vrot.slane %v604_v39, 4  ;;  %v334_v52 = vshrl.u32 %v188_v44, 16 }
  0x3d   : > { %v619_v51 = vrot.slane %v617_v41, 5  ;;  %v615_v53 = vrot.slane %v614_v43, 4  ;;  %v337_v54 = vshll.u32 %v188_v44, 16  ;;  %v343_v55 = vshll.u32 %v189_v47, 16 }
  0x3e   : > { %v347_v56 = vshrl.u32 %v189_v47, 16  ;;  %v1272_v57 = vpack.c.b16 %v1244_v46, %v1243_v45  ;;  %v1148_v58 = vrot.slane %v189_v47, 5  ;;  %v634_v59 = vunpack.c.l.b16 %v322_v48  ;;  %v223_v45 = vld [vmem:[%s1975_s7 + $0x44] sm:$0x1]  ;;  %v1072_v46 = vld [vmem:[%s1975_s7 + $0x3c] sm:$0xe] }
  0x3f   : > { %1693 = vmatmul.msk.bf16.gmra.mxu0 %vm694_vm4, %v662_v16  ;;  %v635_v60 = vunpack.c.l.b16 %v332_v49  ;;  %v610_v61 = vsel %vm2005_vm6, %v605_v50, %v609_v30  ;;  %v336_v63 = vrot.slane %v334_v52, 4  ;;  %v620_v0 = vsel %vm2005_vm6, %v615_v53, %v619_v51 }
  0x40   : > { %v339_v3 = vrot.slane %v337_v54, 5  ;;  %v345_v5 = vrot.slane %v343_v55, 5  ;;  %v349_v8 = vrot.slane %v347_v56, 4  ;;  %v1803_v9 = vrot.slane %v1071_v1, 9  ;;  %v1857_v1 = vld [vmem:[%s1975_s7 + $0x3c] sm:$0xff] }
  0x41   : > { %v1150_v10 = vrot.slane %v1148_v58, 4  ;;  %v1151_v11 = vrot.slane %v222_v62, 5  ;;  %v663_v12 = vpack.c.b16 %v635_v60, %v634_v59  ;;  %v658_v14 = vunpack.c.l.b16 %v610_v61  ;;  %v1864_v60 = vld [vmem:[%s1975_s7 + $0x90] sm:$0xff]  ;;  %v193_v61 = vld [vmem:[%s1975_s7 + $0x4c] sm:$0xf] }
  0x42   : > { %v659_v16 = vunpack.c.l.b16 %v620_v0  ;;  %v340_v4 = vor.u32 %v339_v3, %v336_v63  ;;  %v350_v17 = vor.u32 %v349_v8, %v345_v5  ;;  %v353_v6 = vshll.u32 %v222_v62, 16  ;;  %v192_v62 = vld [vmem:[%s1975_s7 + $0x48] sm:$0xf] }
  0x43   : > { %v1149_v18 = vsel %vm1984_vm5, %v1803_v9, %v1148_v58  ;;  %v1152_v20 = vsel %vm1984_vm5, %v1150_v10, %v1151_v11  ;;  %v358_v35 = vshrl.u32 %v190_v28, 16  ;;  %v361_v36 = vshll.u32 %v190_v28, 16 }
  0x44   : > { %1705 = vmatmul.msk.bf16.gmra.mxu3 %vm694_vm4, %v674_v34  ;;  %v675_v21 = vpack.c.b16 %v659_v16, %v658_v14  ;;  %v341_v23 = vrot.slane %v340_v4, 4  ;;  %v351_v26 = vrot.slane %v350_v17, 4  ;;  %v355_v27 = vrot.slane %v353_v6, 5  ;;  %v191_v34 = vld [vmem:[%s1975_s7 + $0x40] sm:$0xf] }
  0x45   : > { %v1245_v30 = vunpack.c.l.b16 %v1149_v18  ;;  %v1246_v32 = vunpack.c.l.b16 %v1152_v20  ;;  %v367_v38 = vshll.u32 %v191_v34, 16  ;;  %v371_v39 = vshrl.u32 %v191_v34, 16  ;;  %v224_v17 = vld [vmem:[%s1975_s7 + $0x50] sm:$0x1]  ;;  %v1073_v18 = vld [vmem:[%s1975_s7 + $0x48] sm:$0xe] }
  0x46   : > { %v346_v37 = vsel %vm2005_vm6, %v341_v23, %v345_v5  ;;  %v356_v7 = vsel %vm2005_vm6, %v351_v26, %v355_v27  ;;  %v360_v47 = vrot.slane %v358_v35, 4  ;;  %v363_v48 = vrot.slane %v361_v36, 5 }
  0x47   : > { %1786 = vmatmul.msk.bf16.gmra.mxu1 %vm694_vm4, %v1855_v42  ;;  %v1273_v41 = vpack.c.b16 %v1246_v32, %v1245_v30  ;;  %v1155_v42 = vrot.slane %v191_v34, 5  ;;  %v636_v43 = vunpack.c.l.b16 %v346_v37  ;;  %v637_v44 = vunpack.c.l.b16 %v356_v7 }
  0x48   : > { %v369_v49 = vrot.slane %v367_v38, 5  ;;  %v373_v50 = vrot.slane %v371_v39, 4  ;;  %v1804_v51 = vrot.slane %v1072_v46, 9  ;;  %v1158_v53 = vrot.slane %v223_v45, 5  ;;  %v194_v46 = vld [vmem:[%s1975_s7 + $0x54] sm:$0xf] }
  0x49   : > { %v1157_v52 = vrot.slane %v1155_v42, 4  ;;  %v664_v54 = vpack.c.b16 %v637_v44, %v636_v43  ;;  %v364_v55 = vor.u32 %v363_v48, %v360_v47  ;;  %v382_v9 = vshrl.u32 %v192_v62, 16  ;;  %v1865_v43 = vld [vmem:[%s1975_s7 + $0x9c] sm:$0xff]  ;;  %v1858_v44 = vld [vmem:[%s1975_s7 + $0x48] sm:$0xff] }
  0x4a   : > { %1836 = vmatmul.msk.bf16.gmra.mxu2 %vm694_vm4, %v1272_v57  ;;  %v374_v56 = vor.u32 %v373_v50, %v369_v49  ;;  %v377_v57 = vshll.u32 %v223_v45, 16  ;;  %v1156_v58 = vsel %vm1984_vm5, %v1804_v51, %v1155_v42  ;;  %v385_v10 = vshll.u32 %v192_v62, 16  ;;  %v195_v45 = vld [vmem:[%s1975_s7 + $0x58] sm:$0xf] }
  0x4b   : > { %v1159_v59 = vsel %vm1984_vm5, %v1157_v52, %v1158_v53  ;;  %v365_v63 = vrot.slane %v364_v55, 4  ;;  %v1247_v5 = vunpack.c.l.b16 %v1156_v58  ;;  %v391_v11 = vshll.u32 %v193_v61, 16 }
  0x4c   : > { %v375_v0 = vrot.slane %v374_v56, 4  ;;  %v379_v3 = vrot.slane %v377_v57, 5  ;;  %v1248_v8 = vunpack.c.l.b16 %v1159_v59  ;;  %v1162_v6 = vrot.slane %v193_v61, 5  ;;  %v1074_v59 = vld [vmem:[%s1975_s7 + $0x54] sm:$0xe] }
  0x4d   : > { %v370_v14 = vsel %vm2005_vm6, %v365_v63, %v369_v49  ;;  %v384_v20 = vrot.slane %v382_v9, 4  ;;  %v1805_v28 = vrot.slane %v1073_v18, 9  ;;  %v1165_v30 = vrot.slane %v224_v17, 5 }
  0x4e   : > { %v380_v16 = vsel %vm2005_vm6, %v375_v0, %v379_v3  ;;  %v1274_v4 = vpack.c.b16 %v1248_v8, %v1247_v5  ;;  %v638_v26 = vunpack.c.l.b16 %v370_v14  ;;  %v1164_v32 = vrot.slane %v1162_v6, 4 }
  0x4f   : > { %1694 = vmatmul.msk.bf16.gmra.mxu0 %vm694_vm4, %v663_v12  ;;  %v395_v12 = vshrl.u32 %v193_v61, 16  ;;  %v639_v27 = vunpack.c.l.b16 %v380_v16  ;;  %v401_v36 = vshll.u32 %v224_v17, 16  ;;  %v1163_v7 = vsel %vm1984_vm5, %v1805_v28, %v1162_v6  ;;  %v225_v61 = vld [vmem:[%s1975_s7 + $0x5c] sm:$0x1]  ;;  %v1079_v16 = vld [vmem:[%s1975_s7 + $0x90] sm:$0xe] }
  0x50   : > { %v1166_v38 = vsel %vm1984_vm5, %v1164_v32, %v1165_v30  ;;  %v1249_v47 = vunpack.c.l.b16 %v1163_v7  ;;  %v406_v51 = vshrl.u32 %v194_v46, 16  ;;  %v409_v52 = vshll.u32 %v194_v46, 16  ;;  %v1859_v28 = vld [vmem:[%s1975_s7 + $0x54] sm:$0xff] }
  0x51   : > { %v397_v23 = vrot.slane %v395_v12, 4  ;;  %v665_v37 = vpack.c.b16 %v639_v27, %v638_v26  ;;  %v403_v42 = vrot.slane %v401_v36, 5  ;;  %v1250_v48 = vunpack.c.l.b16 %v1166_v38 }
  0x52   : > { %v415_v53 = vshll.u32 %v195_v45, 16  ;;  %v1204_v55 = vrot.slane %v1993_v25, 5  ;;  %v408_v62 = vrot.slane %v406_v51, 4  ;;  %v1806_v5 = vrot.slane %v1074_v59, 9 }
  0x53   : > { %v1275_v56 = vpack.c.b16 %v1250_v48, %v1249_v47  ;;  %v1207_v8 = vrot.slane %v1998_v31, 5  ;;  %v1172_v25 = vrot.slane %v225_v61, 5  ;;  %v226_v47 = vld [vmem:[%s1975_s7 + $0x68] sm:$0x1]  ;;  %v1075_v48 = vld [vmem:[%s1975_s7 + $0x60] sm:$0xe] }
  0x54   : > { %1706 = vmatmul.msk.bf16.gmra.mxu3 %vm694_vm4, %v675_v21  ;;  %v387_v21 = vrot.slane %v385_v10, 5  ;;  %v417_v63 = vrot.slane %v415_v53, 5  ;;  %v1206_v3 = vrot.slane %v1204_v55, 4  ;;  %v425_v10 = vshll.u32 %v225_v61, 16 }
  0x55   : > { %v1807_v53 = vrot.slane %v1075_v48, 9  ;;  %v449_v59 = vshll.u32 %v226_v47, 16 }
  0x56   : > { %v388_v34 = vor.u32 %v387_v21, %v384_v20  ;;  %v427_v18 = vrot.slane %v425_v10, 5  ;;  %v1208_v20 = vsel %vm1984_vm5, %v1206_v3, %v1207_v8  ;;  %v1866_v21 = vld [vmem:[%s1975_s7 + $0xa8] sm:$0xff] }
  0x57   : > { %1787 = vmatmul.msk.bf16.gmra.mxu1 %vm694_vm4, %v1856_v22  ;;  %v393_v22 = vrot.slane %v391_v11, 5  ;;  %v1262_v27 = vunpack.c.l.b16 %v1208_v20  ;;  %v451_v8 = vrot.slane %v449_v59, 5  ;;  %v1076_v20 = vld [vmem:[%s1975_s7 + $0x6c] sm:$0xe] }
  0x58   : > { %v389_v39 = vrot.slane %v388_v34, 4  ;;  %v197_v34 = vld [vmem:[%s1975_s7 + $0x64] sm:$0xf] }
  0x59   : > { %v398_v35 = vor.u32 %v397_v23, %v393_v22 }
  0x5a   : > { %1837 = vmatmul.msk.bf16.gmra.mxu2 %vm694_vm4, %v1273_v41  ;;  %v394_v49 = vsel %vm2005_vm6, %v389_v39, %v393_v22 }
  0x5b   : > { %v399_v41 = vrot.slane %v398_v35, 4  ;;  %v640_v57 = vunpack.c.l.b16 %v394_v49  ;;  %v196_v35 = vld [vmem:[%s1975_s7 + $0x60] sm:$0xf] }
  0x5c   : > { %v430_v38 = vshrl.u32 %v196_v35, 16  ;;  %v433_v39 = vshll.u32 %v196_v35, 16 }
  0x5d   : > { %v404_v50 = vsel %vm2005_vm6, %v399_v41, %v403_v42  ;;  %v439_v41 = vshll.u32 %v197_v34, 16  ;;  %v443_v42 = vshrl.u32 %v197_v34, 16 }
  0x5e   : > { %v641_v58 = vunpack.c.l.b16 %v404_v50  ;;  %v432_v49 = vrot.slane %v430_v38, 4  ;;  %v435_v50 = vrot.slane %v433_v39, 5 }
  0x5f   : > { %1695 = vmatmul.msk.bf16.gmra.mxu0 %vm694_vm4, %v664_v54  ;;  %v419_v54 = vshrl.u32 %v195_v45, 16  ;;  %v441_v51 = vrot.slane %v439_v41, 5 }
  0x60   : > { %v666_v11 = vpack.c.b16 %v641_v58, %v640_v57  ;;  %v436_v57 = vor.u32 %v435_v50, %v432_v49 }
  0x61   : > { %v421_v0 = vrot.slane %v419_v54, 4 }
  0x62   : > { %v437_v3 = vrot.slane %v436_v57, 4  ;;  %v201_v57 = vld [vmem:[%s1975_s7 + $0x7c] sm:$0xf] }
  0x63   : > { %v422_v14 = vor.u32 %v421_v0, %v417_v63  ;;  %v1860_v0 = vld [vmem:[%s1975_s7 + $0x60] sm:$0xff] }
  0x64   : > { %1795 = vmatmul.msk.bf16.vlgmr.msrb.gmra.mxu3 %vm694_vm4, %v1864_v60  ;;  %v1169_v60 = vrot.slane %v195_v45, 5 }
  0x65   : > { %v423_v23 = vrot.slane %v422_v14, 4 }
  0x66   : > { %v1171_v9 = vrot.slane %v1169_v60, 4  ;;  %v1170_v17 = vsel %vm1984_vm5, %v1806_v5, %v1169_v60 }
  0x67   : > { %1788 = vmatmul.msk.bf16.gmra.mxu1 %vm694_vm4, %v1857_v1  ;;  %v411_v1 = vrot.slane %v409_v52, 5  ;;  %v1251_v30 = vunpack.c.l.b16 %v1170_v17  ;;  %v428_v7 = vsel %vm2005_vm6, %v423_v23, %v427_v18  ;;  %v445_v52 = vrot.slane %v443_v42, 4  ;;  %v227_v18 = vld [vmem:[%s1975_s7 + $0x74] sm:$0x1] }
  0x68   : > { %v1173_v6 = vsel %vm1984_vm5, %v1171_v9, %v1172_v25  ;;  %v643_v46 = vunpack.c.l.b16 %v428_v7  ;;  %v1186_v35 = vrot.slane %v227_v18, 5  ;;  %v473_v38 = vshll.u32 %v227_v18, 16 }
  0x69   : > { %v412_v12 = vor.u32 %v411_v1, %v408_v62  ;;  %v1252_v32 = vunpack.c.l.b16 %v1173_v6  ;;  %v446_v58 = vor.u32 %v445_v52, %v441_v51  ;;  %v1867_v62 = vld [vmem:[%s1975_s7 + $0xb4] sm:$0xff]  ;;  %v199_v1 = vld [vmem:[%s1975_s7 + $0x70] sm:$0xf]  ;;  %v1190_v18 = vrot.slane %v201_v57, 5 }
  0x6a   : > { %1838 = vmatmul.msk.bf16.gmra.mxu2 %vm694_vm4, %v1274_v4  ;;  %v1811_v4 = vrot.slane %v1079_v16, 9  ;;  %v463_v14 = vshll.u32 %v199_v1, 16  ;;  %v467_v16 = vshrl.u32 %v199_v1, 16  ;;  %v475_v50 = vrot.slane %v473_v38, 5 }
  0x6b   : > { %v413_v22 = vrot.slane %v412_v12, 4  ;;  %v447_v5 = vrot.slane %v446_v58, 4 }
  0x6c   : > { %v1205_v31 = vsel %vm1984_vm5, %v1811_v4, %v1204_v55  ;;  %v1179_v55 = vrot.slane %v226_v47, 5  ;;  %v442_v4 = vsel %vm2005_vm6, %v437_v3, %v441_v51  ;;  %v465_v23 = vrot.slane %v463_v14, 5  ;;  %v1080_v51 = vld [vmem:[%s1975_s7 + $0x9c] sm:$0xe] }
  0x6d   : > { %v1261_v26 = vunpack.c.l.b16 %v1205_v31  ;;  %v452_v17 = vsel %vm2005_vm6, %v447_v5, %v451_v8  ;;  %v1183_v31 = vrot.slane %v199_v1, 5  ;;  %v1211_v47 = vrot.slane %v2031_v19, 5 }
  0x6e   : > { %v1214_v19 = vrot.slane %v2038_v33, 5  ;;  %v487_v5 = vshll.u32 %v201_v57, 16  ;;  %v491_v8 = vshrl.u32 %v201_v57, 16  ;;  %v1862_v57 = vld [vmem:[%s1975_s7 + $0x78] sm:$0xff] }
  0x6f   : > { %1696 = vmatmul.msk.bf16.gmra.mxu0 %vm694_vm4, %v665_v37  ;;  %v2192_v36 = vpack.c.b16 %v1262_v27, %v1261_v26  ;;  %v418_v37 = vsel %vm2005_vm6, %v413_v22, %v417_v63  ;;  %v198_v63 = vld [vmem:[%s1975_s7 + $0x6c] sm:$0xf]  ;;  %v469_v26 = vrot.slane %v467_v16, 4  ;;  %v644_v27 = vunpack.c.l.b16 %v442_v4 }
  0x70   : > { %v642_v45 = vunpack.c.l.b16 %v418_v37  ;;  %v457_v12 = vshll.u32 %v198_v63, 16 }
  0x71   : > { %v470_v7 = vor.u32 %v469_v26, %v465_v23 }
  0x72   : > { %v459_v22 = vrot.slane %v457_v12, 5 }
  0x73   : > { %v471_v49 = vrot.slane %v470_v7, 4 }
  0x74   : > { %1796 = vmatmul.msk.bf16.gmra.mxu3 %vm694_vm4, %v1865_v43  ;;  %v1276_v43 = vpack.c.b16 %v1252_v32, %v1251_v30  ;;  %v1808_v32 = vrot.slane %v1076_v20, 9 }
  0x75   : > { %v476_v1 = vsel %vm2005_vm6, %v471_v49, %v475_v50 }
  0x76   : > { %v647_v4 = vunpack.c.l.b16 %v476_v1 }
  0x77   : > { %1789 = vmatmul.msk.bf16.gmra.mxu1 %vm694_vm4, %v1858_v44  ;;  %v1176_v44 = vrot.slane %v197_v34, 5  ;;  %v1185_v34 = vrot.slane %v1183_v31, 4 }
  0x79   : > { %v1178_v54 = vrot.slane %v1176_v44, 4  ;;  %v1177_v60 = vsel %vm1984_vm5, %v1807_v53, %v1176_v44  ;;  %v2224_v44 = vld [vmem:[%s2452_s2] ss:$0 sm:$0xff]  ;;  %v200_v53 = vld [vmem:[%s1975_s7 + $0x78] sm:$0xf] }
  0x7a   : > { %1839 = vmatmul.msk.bf16.gmra.mxu2 %vm694_vm4, %v1275_v56  ;;  %v667_v56 = vpack.c.b16 %v643_v46, %v642_v45  ;;  %v1253_v25 = vunpack.c.l.b16 %v1177_v60  ;;  %v1184_v45 = vsel %vm1984_vm5, %v1808_v32, %v1183_v31  ;;  %v1187_v46 = vsel %vm1984_vm5, %v1185_v34, %v1186_v35 }
  0x7b   : > { %v1180_v61 = vsel %vm1984_vm5, %v1178_v54, %v1179_v55  ;;  %v1861_v54 = vld [vmem:[%s1975_s7 + $0x6c] sm:$0xff]  ;;  %v1255_v55 = vunpack.c.l.b16 %v1184_v45  ;;  %v1812_v60 = vrot.slane %v1080_v51, 9  ;;  %v481_v3 = vshll.u32 %v200_v53, 16  ;;  %v1081_v51 = vld [vmem:[%s1975_s7 + $0xa8] sm:$0xe] }
  0x7c   : > { %v1254_v10 = vunpack.c.l.b16 %v1180_v61  ;;  %v1213_v61 = vrot.slane %v1211_v47, 4  ;;  %v1192_v35 = vrot.slane %v1190_v18, 4  ;;  %v1813_v1 = vrot.slane %v1081_v51, 9 }
  0x7e   : > { %v1277_v6 = vpack.c.b16 %v1254_v10, %v1253_v25  ;;  %v1215_v12 = vsel %vm1984_vm5, %v1213_v61, %v1214_v19  ;;  %v203_v19 = vld [vmem:[%s1975_s7 + $0x88] sm:$0xf] }
  0x7f   : > { %1697 = vmatmul.msk.bf16.gmra.mxu0 %vm694_vm4, %v666_v11  ;;  %v454_v11 = vshrl.u32 %v198_v63, 16  ;;  %v478_v63 = vshrl.u32 %v200_v53, 16 }
  0x81   : > { %v480_v31 = vrot.slane %v478_v63, 4 }
  0x84   : > { %1797 = vmatmul.msk.bf16.gmra.mxu3 %vm694_vm4, %v1866_v21  ;;  %v456_v21 = vrot.slane %v454_v11, 4 }
  0x86   : > { %v460_v37 = vor.u32 %v459_v22, %v456_v21  ;;  %v483_v21 = vrot.slane %v481_v3, 5  ;;  %v489_v22 = vrot.slane %v487_v5, 5  ;;  %v1221_v5 = vrot.slane %v2070_v24, 5 }
  0x87   : > { %1790 = vmatmul.msk.bf16.gmra.mxu1 %vm694_vm4, %v1859_v28  ;;  %v645_v28 = vunpack.c.l.b16 %v452_v17  ;;  %v228_v17 = vld [vmem:[%s1975_s7 + $0x80] sm:$0x1] }
  0x88   : > { %v461_v48 = vrot.slane %v460_v37, 4  ;;  %v1193_v37 = vrot.slane %v228_v17, 5  ;;  %v484_v38 = vor.u32 %v483_v21, %v480_v31  ;;  %v229_v21 = vld [vmem:[%s1975_s7 + $0x8c] sm:$0x1] }
  0x89   : > { %v668_v39 = vpack.c.b16 %v645_v28, %v644_v27  ;;  %v1264_v28 = vunpack.c.l.b16 %v1215_v12 }
  0x8a   : > { %1840 = vmatmul.msk.bf16.gmra.mxu2 %vm694_vm4, %v1276_v43  ;;  %v1194_v50 = vsel %vm1984_vm5, %v1192_v35, %v1193_v37  ;;  %v1200_v37 = vrot.slane %v229_v21, 5 }
  0x8b   : > { %v1258_v61 = vunpack.c.l.b16 %v1194_v50 }
  0x8f   : > { %1698 = vmatmul.msk.bf16.gmra.mxu0 %vm694_vm4, %v667_v56  ;;  %v1256_v56 = vunpack.c.l.b16 %v1187_v46 }
  0x91   : > { %v1278_v25 = vpack.c.b16 %v1256_v56, %v1255_v55 }
  0x94   : > { %v987_v9 = vpop.f32.mrf.mxu1  ;;  %1798 = vmatmul.msk.bf16.gmra.mxu3 %vm694_vm4, %v1867_v62  ;;  %v466_v62 = vsel %vm2005_vm6, %v461_v48, %v465_v23  ;;  %v493_v23 = vrot.slane %v491_v8, 4 }
  0x95   : > { %v646_v16 = vunpack.c.l.b16 %v466_v62  ;;  %v202_v62 = vld [vmem:[%s1975_s7 + $0x84] sm:$0xf] }
  0x97   : > { %1791 = vmatmul.msk.bf16.gmra.mxu1 %vm694_vm4, %v1860_v0  ;;  %v669_v32 = vpack.c.b16 %v647_v4, %v646_v16 }
  0x9a   : > { %1841 = vmatmul.msk.bf16.gmra.mxu2 %vm694_vm4, %v1277_v6  ;;  %v1077_v6 = vld [vmem:[%s1975_s7 + $0x78] sm:$0xe] }
  0x9b   : > { %v1809_v34 = vrot.slane %v1077_v6, 9  ;;  %v1197_v6 = vrot.slane %v203_v19, 5 }
  0x9c   : > { %v989_v30 = vpop.f32.mrf.mxu1  ;;  %v752_v41 = vpop.f32.mrf.mxu0 }
  0x9d   : > { %v1360_v42 = vpop.f32.mrf.mxu2  ;;  %v988_v43 = vadd.f32 %v987_v9, %v752_v41  ;;  %v497_v41 = vshll.u32 %v228_v17, 16  ;;  %v1191_v49 = vsel %vm1984_vm5, %v1809_v34, %v1190_v18  ;;  %v1199_v35 = vrot.slane %v1197_v6, 4 }
  0x9f   : > { %v1440_v52 = vadd.f32 %v1360_v42, %v988_v43  ;;  %1699 = vmatmul.msk.bf16.gmra.mxu0 %vm694_vm4, %v668_v39  ;;  %v494_v39 = vor.u32 %v493_v23, %v489_v22  ;;  %v499_v56 = vrot.slane %v497_v41, 5 }
  0xa1   : > { %v1476_v58 = vadd.f32 %v2224_v44, %v1440_v52  ;;  %v1218_v52 = vrot.slane %v2062_v15, 5  ;;  %v495_v55 = vrot.slane %v494_v39, 4 }
  0xa3   : > { %v1508_v0 = vmax.f32 %v1476_v58, 0.0  ;;  %v1220_v63 = vrot.slane %v1218_v52, 4  ;;  %v500_v3 = vsel %vm2005_vm6, %v495_v55, %v499_v56  ;;  %v1219_v17 = vsel %vm1984_vm5, %v1813_v1, %v1218_v52 }
  0xa4   : > { %v992_v59 = vpop.f32.mrf.mxu1  ;;  %1845 = vmatmul.msk.bf16.vlgmr.msra.gmra.mxu3 %vm694_vm4, %v2192_v36  ;;  %v754_v33 = vpop.f32.mrf.mxu0  ;;  %v1212_v36 = vsel %vm1984_vm5, %v1812_v60, %v1211_v47  ;;  %v1257_v60 = vunpack.c.l.b16 %v1191_v49  ;;  %v649_v31 = vunpack.c.l.b16 %v500_v3  ;;  %v1265_v39 = vunpack.c.l.b16 %v1219_v17 }
  0xa5   : > { %v1362_v9 = vpop.f32.mrf.mxu2  ;;  %v1540_v10 = vpack.c.bf16 %v1508_v0, %v1508_v0  ;;  %v990_v11 = vadd.f32 %v989_v30, %v754_v33  ;;  %v1263_v27 = vunpack.c.l.b16 %v1212_v36  ;;  %v1225_v56 = vrot.slane %v2091_v2, 5 }
  0xa6   : > { %v1279_v16 = vpack.c.b16 %v1258_v61, %v1257_v60  ;;  %v1082_v61 = vld [vmem:[%s1975_s7 + $0xb4] sm:$0xe] }
  0xa7   : > { %1792 = vmatmul.msk.bf16.gmra.mxu1 %vm694_vm4, %v1861_v54  ;;  %v2255_v14 = vpop.f32.mrf.mxu3  ;;  %1573 = vst.msk [vmem:[%s2248_s16] sm:$0xf] %vm1572_vm7, %v1540_v10  ;;  %v1441_v20 = vadd.f32 %v1362_v9, %v990_v11  ;;  %v1282_v48 = vpack.c.b16 %v1264_v28, %v1263_v27  ;;  %v485_v54 = vrot.slane %v484_v38, 4  ;;  %v502_v9 = vshrl.u32 %v202_v62, 16 }
  0xa8   : > { %v511_v10 = vshll.u32 %v203_v19, 16  ;;  %v515_v11 = vshrl.u32 %v203_v19, 16 }
  0xa9   : > { %v1477_v26 = vadd.f32 %v2224_v44, %v1441_v20  ;;  %v490_v15 = vsel %vm2005_vm6, %v485_v54, %v489_v22  ;;  %v1222_v20 = vsel %vm1984_vm5, %v1220_v63, %v1221_v5  ;;  %v1078_v22 = vld [vmem:[%s1975_s7 + $0x84] sm:$0xe]  ;;  %v504_v23 = vrot.slane %v502_v9, 4 }
  0xaa   : > { %1842 = vmatmul.msk.bf16.gmra.mxu2 %vm694_vm4, %v1278_v25  ;;  %v505_v25 = vshll.u32 %v202_v62, 16  ;;  %v648_v18 = vunpack.c.l.b16 %v490_v15  ;;  %v513_v27 = vrot.slane %v511_v10, 5  ;;  %v517_v28 = vrot.slane %v515_v11, 4 }
  0xab   : > { %v1509_v7 = vmax.f32 %v1477_v26, 0.0  ;;  %v1810_v34 = vrot.slane %v1078_v22, 9  ;;  %v1266_v41 = vunpack.c.l.b16 %v1222_v20  ;;  %v1814_v15 = vrot.slane %v1082_v61, 9 }
  0xac   : > { %v994_v30 = vpop.f32.mrf.mxu1  ;;  %v757_v42 = vpop.f32.mrf.mxu0  ;;  %v507_v26 = vrot.slane %v505_v25, 5  ;;  %v670_v38 = vpack.c.b16 %v649_v31, %v648_v18  ;;  %v1228_v9 = vrot.slane %v2099_v29, 5 }
  0xad   : > { %v1365_v43 = vpop.f32.mrf.mxu2  ;;  %v1541_v45 = vpack.c.bf16 %v1509_v7, %v1509_v7  ;;  %v993_v46 = vadd.f32 %v992_v59, %v757_v42  ;;  %v1198_v52 = vsel %vm1984_vm5, %v1810_v34, %v1197_v6  ;;  %v1283_v55 = vpack.c.b16 %v1266_v41, %v1265_v39 }
  0xae   : > { %v1259_v1 = vunpack.c.l.b16 %v1198_v52  ;;  %v1226_v6 = vsel %vm1984_vm5, %v1814_v15, %v1225_v56 }
  0xaf   : > { %v2263_v47 = vpop.f32.mrf.mxu3  ;;  %1574 = vst.msk [vmem:[%s2248_s16 + $0x4] sm:$0xf] %vm1572_vm7, %v1541_v45  ;;  %v1442_v53 = vadd.f32 %v1365_v43, %v993_v46  ;;  %1700 = vmatmul.msk.bf16.gmra.mxu0 %vm694_vm4, %v669_v32  ;;  %v508_v45 = vor.u32 %v507_v26, %v504_v23  ;;  %v518_v46 = vor.u32 %v517_v28, %v513_v27  ;;  %v1267_v20 = vunpack.c.l.b16 %v1226_v6 }
  0xb1   : > { %v1478_v58 = vadd.f32 %v2224_v44, %v1442_v53  ;;  %v1201_v53 = vsel %vm1984_vm5, %v1199_v35, %v1200_v37  ;;  %v519_v60 = vrot.slane %v518_v46, 4 }
  0xb2   : > { %v1260_v63 = vunpack.c.l.b16 %v1201_v53 }
  0xb3   : > { %v1510_v0 = vmax.f32 %v1478_v58, 0.0  ;;  %v509_v58 = vrot.slane %v508_v45, 4 }
  0xb4   : > { %v997_v59 = vpop.f32.mrf.mxu1  ;;  %1846 = vmatmul.msk.bf16.gmra.mxu3 %vm694_vm4, %v1282_v48  ;;  %v759_v8 = vpop.f32.mrf.mxu0  ;;  %v521_v48 = vshll.u32 %v229_v21, 16  ;;  %v1280_v11 = vpack.c.b16 %v1260_v63, %v1259_v1 }
  0xb5   : > { %v1367_v33 = vpop.f32.mrf.mxu2  ;;  %v1542_v36 = vpack.c.bf16 %v1510_v0, %v1510_v0  ;;  %v995_v12 = vadd.f32 %v994_v30, %v759_v8  ;;  %v514_v2 = vsel %vm2005_vm6, %v509_v58, %v513_v27 }
  0xb7   : > { %1793 = vmatmul.msk.bf16.gmra.mxu1 %vm694_vm4, %v1862_v57  ;;  %v2285_v4 = vpop.f32.mrf.mxu3  ;;  %1575 = vst.msk [vmem:[%s2248_s16 + $0x8] sm:$0xf] %vm1572_vm7, %v1542_v36  ;;  %v1443_v24 = vadd.f32 %v1367_v33, %v995_v12  ;;  %v1863_v57 = vld [vmem:[%s1975_s7 + $0x84] sm:$0xff]  ;;  %v1227_v33 = vrot.slane %v1225_v56, 4 }
  0xb9   : > { %v1479_v30 = vadd.f32 %v2224_v44, %v1443_v24  ;;  %v1229_v40 = vsel %vm1984_vm5, %v1227_v33, %v1228_v9 }
  0xba   : > { %1843 = vmatmul.msk.bf16.gmra.mxu2 %vm694_vm4, %v1279_v16  ;;  %v650_v16 = vunpack.c.l.b16 %v514_v2  ;;  %v1268_v21 = vunpack.c.l.b16 %v1229_v40 }
  0xbb   : > { %v1511_v7 = vmax.f32 %v1479_v30, 0.0 }
  0xbc   : > { %v999_v32 = vpop.f32.mrf.mxu1  ;;  %v762_v42 = vpop.f32.mrf.mxu0  ;;  %v1284_v30 = vpack.c.b16 %v1268_v21, %v1267_v20 }
  0xbd   : > { %v1370_v43 = vpop.f32.mrf.mxu2  ;;  %v1543_v49 = vpack.c.bf16 %v1511_v7, %v1511_v7  ;;  %v998_v50 = vadd.f32 %v997_v59, %v762_v42  ;;  %v523_v59 = vrot.slane %v521_v48, 5 }
  0xbf   : > { %v2297_v51 = vpop.f32.mrf.mxu3  ;;  %1576 = vst.msk [vmem:[%s2248_s16 + $0xc] sm:$0xf] %vm1572_vm7, %v1543_v49  ;;  %v1444_v54 = vadd.f32 %v1370_v43, %v998_v50  ;;  %1701 = vmatmul.msk.bf16.gmra.mxu0 %vm694_vm4, %v670_v38  ;;  %v524_v8 = vsel %vm2005_vm6, %v519_v60, %v523_v59 }
  0xc0   : > { %v651_v17 = vunpack.c.l.b16 %v524_v8 }
  0xc1   : > { %v1480_v19 = vadd.f32 %v2224_v44, %v1444_v54 }
  0xc2   : > { %v671_v31 = vpack.c.b16 %v651_v17, %v650_v16 }
  0xc3   : > { %v1512_v0 = vmax.f32 %v1480_v19, 0.0 }
  0xc4   : > { %v1002_v62 = vpop.f32.mrf.mxu1  ;;  %1847 = vmatmul.msk.bf16.gmra.mxu3 %vm694_vm4, %v1283_v55  ;;  %v764_v3 = vpop.f32.mrf.mxu0 }
  0xc5   : > { %v1372_v5 = vpop.f32.mrf.mxu2  ;;  %v1544_v25 = vpack.c.bf16 %v1512_v0, %v1512_v0  ;;  %v1000_v10 = vadd.f32 %v999_v32, %v764_v3 }
  0xc7   : > { %1794 = vmatmul.msk.bf16.gmra.mxu1 %vm694_vm4, %v1863_v57  ;;  %v2317_v36 = vpop.f32.mrf.mxu3  ;;  %1577 = vst.msk [vmem:[%s2248_s16 + $0x10] sm:$0xf] %vm1572_vm7, %v1544_v25  ;;  %v1445_v12 = vadd.f32 %v1372_v5, %v1000_v10 }
  0xc9   : > { %v1481_v24 = vadd.f32 %v2224_v44, %v1445_v12 }
  0xca   : > { %1844 = vmatmul.msk.bf16.gmra.mxu2 %vm694_vm4, %v1280_v11 }
  0xcb   : > { %v1513_v18 = vmax.f32 %v1481_v24, 0.0 }
  0xcc   : > { %v1004_v29 = vpop.f32.mrf.mxu1  ;;  %v767_v22 = vpop.f32.mrf.mxu0 }
  0xcd   : > { %v1375_v23 = vpop.f32.mrf.mxu2  ;;  %v1545_v26 = vpack.c.bf16 %v1513_v18, %v1513_v18  ;;  %v1003_v27 = vadd.f32 %v1002_v62, %v767_v22 }
  0xcf   : > { %v2327_v28 = vpop.f32.mrf.mxu3  ;;  %1578 = vst.msk [vmem:[%s2248_s16 + $0x14] sm:$0xf] %vm1572_vm7, %v1545_v26  ;;  %v1446_v13 = vadd.f32 %v1375_v23, %v1003_v27  ;;  %1702 = vmatmul.msk.bf16.gmra.mxu0 %vm694_vm4, %v671_v31 }
  0xd1   : > { %v1482_v32 = vadd.f32 %v2224_v44, %v1446_v13 }
  0xd3   : > { %v1514_v35 = vmax.f32 %v1482_v32, 0.0 }
  0xd4   : > { %v1007_v34 = vpop.f32.mrf.mxu1  ;;  %1848 = vmatmul.msk.bf16.gmra.mxu3 %vm694_vm4, %v1284_v30  ;;  %v769_v37 = vpop.f32.mrf.mxu0 }
  0xd5   : > { %v1377_v7 = vpop.f32.mrf.mxu2  ;;  %v1546_v38 = vpack.c.bf16 %v1514_v35, %v1514_v35  ;;  %v1005_v39 = vadd.f32 %v1004_v29, %v769_v37 }
  0xd7   : > { %v2334_v41 = vpop.f32.mrf.mxu3  ;;  %1579 = vst.msk [vmem:[%s2248_s16 + $0x18] sm:$0xf] %vm1572_vm7, %v1546_v38  ;;  %v1447_v42 = vadd.f32 %v1377_v7, %v1005_v39 }
  0xd9   : > { %v1483_v43 = vadd.f32 %v2224_v44, %v1447_v42 }
  0xdb   : > { %v1515_v46 = vmax.f32 %v1483_v43, 0.0 }
  0xdc   : > { %v1009_v45 = vpop.f32.mrf.mxu1  ;;  %v772_v48 = vpop.f32.mrf.mxu0 }
  0xdd   : > { %v1380_v49 = vpop.f32.mrf.mxu2  ;;  %v1547_v50 = vpack.c.bf16 %v1515_v46, %v1515_v46  ;;  %v1008_v52 = vadd.f32 %v1007_v34, %v772_v48 }
  0xdf   : > { %v2339_v53 = vpop.f32.mrf.mxu3  ;;  %1580 = vst.msk [vmem:[%s2248_s16 + $0x1c] sm:$0xf] %vm1572_vm7, %v1547_v50  ;;  %v1448_v54 = vadd.f32 %v1380_v49, %v1008_v52 }
  0xe1   : > { %v1484_v55 = vadd.f32 %v2224_v44, %v1448_v54 }
  0xe3   : > { %v1516_v57 = vmax.f32 %v1484_v55, 0.0 }
  0xe4   : > { %v1012_v56 = vpop.f32.mrf.mxu1  ;;  %v774_v58 = vpop.f32.mrf.mxu0 }
  0xe5   : > { %v1382_v60 = vpop.f32.mrf.mxu2  ;;  %v1548_v59 = vpack.c.bf16 %v1516_v57, %v1516_v57  ;;  %v1010_v61 = vadd.f32 %v1009_v45, %v774_v58 }
  0xe7   : > { %v2344_v19 = vpop.f32.mrf.mxu3  ;;  %1581 = vst.msk [vmem:[%s2248_s16 + $0x20] sm:$0xf] %vm1572_vm7, %v1548_v59  ;;  %v1449_v62 = vadd.f32 %v1382_v60, %v1010_v61 }
  0xe9   : > { %v1485_v1 = vadd.f32 %v2224_v44, %v1449_v62 }
  0xeb   : > { %v1517_v0 = vmax.f32 %v1485_v1, 0.0 }
  0xec   : > { %v1014_v63 = vpop.f32.mrf.mxu1  ;;  %v777_v15 = vpop.f32.mrf.mxu0 }
  0xed   : > { %v1385_v3 = vpop.f32.mrf.mxu2  ;;  %v1549_v5 = vpack.c.bf16 %v1517_v0, %v1517_v0  ;;  %v1013_v2 = vadd.f32 %v1012_v56, %v777_v15 }
  0xef   : > { %v2349_v8 = vpop.f32.mrf.mxu3  ;;  %1582 = vst.msk [vmem:[%s2248_s16 + $0x24] sm:$0xf] %vm1572_vm7, %v1549_v5  ;;  %v1450_v33 = vadd.f32 %v1385_v3, %v1013_v2 }
  0xf1   : > { %v1486_v9 = vadd.f32 %v2224_v44, %v1450_v33 }
  0xf3   : > { %v1518_v10 = vmax.f32 %v1486_v9, 0.0 }
  0xf4   : > { %v1017_v25 = vpop.f32.mrf.mxu1  ;;  %v779_v11 = vpop.f32.mrf.mxu0 }
  0xf5   : > { %v1387_v12 = vpop.f32.mrf.mxu2  ;;  %v1550_v16 = vpack.c.bf16 %v1518_v10, %v1518_v10  ;;  %v1015_v17 = vadd.f32 %v1014_v63, %v779_v11 }
  0xf7   : > { %v2354_v6 = vpop.f32.mrf.mxu3  ;;  %1583 = vst.msk [vmem:[%s2248_s16 + $0x28] sm:$0xf] %vm1572_vm7, %v1550_v16  ;;  %v1451_v40 = vadd.f32 %v1387_v12, %v1015_v17  ;;  %v1048_v17 = vadd.f32 %v2344_v19, %v2255_v14  ;;  %v1050_v14 = vadd.f32 %v2349_v8, %v2263_v47 }
  0xf8   : > { %v1053_v8 = vadd.f32 %v2354_v6, %v2285_v4 }
  0xf9   : > { %v1487_v24 = vadd.f32 %v2224_v44, %v1451_v40 }
  0xfb   : > { %v1519_v18 = vmax.f32 %v1487_v24, 0.0 }
  0xfc   : > { %v1019_v29 = vpop.f32.mrf.mxu1  ;;  %v782_v31 = vpop.f32.mrf.mxu0 }
  0xfd   : > { %v1390_v20 = vpop.f32.mrf.mxu2  ;;  %v1551_v21 = vpack.c.bf16 %v1519_v18, %v1519_v18  ;;  %v1018_v22 = vadd.f32 %v1017_v25, %v782_v31 }
  0xff   : > { %v2359_v23 = vpop.f32.mrf.mxu3  ;;  %1584 = vst.msk [vmem:[%s2248_s16 + $0x2c] sm:$0xf] %vm1572_vm7, %v1551_v21  ;;  %v1452_v26 = vadd.f32 %v1390_v20, %v1018_v22 }
 0x101   : > { %v1488_v27 = vadd.f32 %v2224_v44, %v1452_v26 }
 0x103   : > { %v1520_v30 = vmax.f32 %v1488_v27, 0.0 }
 0x104   : > { %v1022_v13 = vpop.f32.mrf.mxu1  ;;  %v784_v32 = vpop.f32.mrf.mxu0 }
 0x105   : > { %v1392_v34 = vpop.f32.mrf.mxu2  ;;  %v1552_v35 = vpack.c.bf16 %v1520_v30, %v1520_v30  ;;  %v1020_v37 = vadd.f32 %v1019_v29, %v784_v32 }
 0x107   : > { %v2364_v7 = vpop.f32.mrf.mxu3  ;;  %1585 = vst.msk [vmem:[%s2248_s16 + $0x30] sm:$0xf] %vm1572_vm7, %v1552_v35  ;;  %v1453_v38 = vadd.f32 %v1392_v34, %v1020_v37 }
 0x109   : > { %v1489_v39 = vadd.f32 %v2224_v44, %v1453_v38 }
 0x10b   : > { %v1521_v43 = vmax.f32 %v1489_v39, 0.0 }
 0x10c   : > { %v1024_v42 = vpop.f32.mrf.mxu1  ;;  %v787_v45 = vpop.f32.mrf.mxu0 }
 0x10d   : > { %v1395_v46 = vpop.f32.mrf.mxu2  ;;  %v1553_v48 = vpack.c.bf16 %v1521_v43, %v1521_v43  ;;  %v1023_v49 = vadd.f32 %v1022_v13, %v787_v45 }
 0x10f   : > { %v2369_v50 = vpop.f32.mrf.mxu3  ;;  %1586 = vst.msk [vmem:[%s2248_s16 + $0x34] sm:$0xf] %vm1572_vm7, %v1553_v48  ;;  %v1454_v52 = vadd.f32 %v1395_v46, %v1023_v49 }
 0x111   : > { %v1490_v54 = vadd.f32 %v2224_v44, %v1454_v52 }
 0x113   : > { %v1522_v56 = vmax.f32 %v1490_v54, 0.0 }
 0x114   : > { %v1027_v55 = vpop.f32.mrf.mxu1  ;;  %v789_v57 = vpop.f32.mrf.mxu0 }
 0x115   : > { %v1397_v58 = vpop.f32.mrf.mxu2  ;;  %v1554_v60 = vpack.c.bf16 %v1522_v56, %v1522_v56  ;;  %v1025_v59 = vadd.f32 %v1024_v42, %v789_v57 }
 0x117   : > { %v2374_v61 = vpop.f32.mrf.mxu3  ;;  %1587 = vst.msk [vmem:[%s2248_s16 + $0x38] sm:$0xf] %vm1572_vm7, %v1554_v60  ;;  %v1455_v62 = vadd.f32 %v1397_v58, %v1025_v59 }
 0x119   : > { %v1491_v1 = vadd.f32 %v2224_v44, %v1455_v62 }
 0x11b   : > { %v1523_v0 = vmax.f32 %v1491_v1, 0.0  ;;  %v1055_v1 = vadd.f32 %v2359_v23, %v2297_v51 }
 0x11c   : > { %v1029_v63 = vpop.f32.mrf.mxu1  ;;  %v792_v15 = vpop.f32.mrf.mxu0 }
 0x11d   : > { %v1400_v3 = vpop.f32.mrf.mxu2  ;;  %v1555_v5 = vpack.c.bf16 %v1523_v0, %v1523_v0  ;;  %v1028_v2 = vadd.f32 %v1027_v55, %v792_v15 }
 0x11f   : > { %v2379_v33 = vpop.f32.mrf.mxu3  ;;  %1588 = vst.msk [vmem:[%s2248_s16 + $0x3c] sm:$0xf] %vm1572_vm7, %v1555_v5  ;;  %v1456_v9 = vadd.f32 %v1400_v3, %v1028_v2 }
 0x121   : > { %v1492_v25 = vadd.f32 %v2224_v44, %v1456_v9 }
 0x123   : > { %v1524_v11 = vmax.f32 %v1492_v25, 0.0 }
 0x124   : > { %v1032_v10 = vpop.f32.mrf.mxu1  ;;  %v794_v12 = vpop.f32.mrf.mxu0 }
 0x125   : > { %v1402_v16 = vpop.f32.mrf.mxu2  ;;  %v1556_v40 = vpack.c.bf16 %v1524_v11, %v1524_v11  ;;  %v1030_v24 = vadd.f32 %v1029_v63, %v794_v12 }
 0x127   : > { %v1420_v29 = vpop.f32.mrf.mxu3  ;;  %1589 = vst.msk [vmem:[%s2248_s16 + $0x40] sm:$0xf] %vm1572_vm7, %v1556_v40  ;;  %v1457_v31 = vadd.f32 %v1402_v16, %v1030_v24  ;;  %v1058_v16 = vadd.f32 %v2364_v7, %v2317_v36 }
 0x128   : > { %v1464_v18 = vadd.f32 %v1420_v29, %v1048_v17 }
 0x129   : > { %v1493_v21 = vadd.f32 %v2224_v44, %v1457_v31 }
 0x12a   : > { %v1500_v20 = vadd.f32 %v2224_v44, %v1464_v18 }
 0x12b   : > { %v1525_v26 = vmax.f32 %v1493_v21, 0.0 }
 0x12c   : > { %v1532_v22 = vmax.f32 %v1500_v20, 0.0  ;;  %v1034_v27 = vpop.f32.mrf.mxu1  ;;  %v797_v13 = vpop.f32.mrf.mxu0 }
 0x12d   : > { %v1405_v30 = vpop.f32.mrf.mxu2  ;;  %v1557_v32 = vpack.c.bf16 %v1525_v26, %v1525_v26  ;;  %v1033_v34 = vadd.f32 %v1032_v10, %v797_v13  ;;  %v1060_v13 = vadd.f32 %v2369_v50, %v2327_v28 }
 0x12e   : > { %v1564_v19 = vpack.c.bf16 %v1532_v22, %v1532_v22 }
 0x12f   : > { %v1422_v35 = vpop.f32.mrf.mxu3  ;;  %v1458_v38 = vadd.f32 %v1405_v30, %v1033_v34  ;;  %1590 = vst.msk [vmem:[%s2248_s16 + $0x44] sm:$0xf] %vm1572_vm7, %v1557_v32 }
 0x130   : > { %1597 = vst.msk [vmem:[%s2248_s16 + $0x60] sm:$0xf] %vm1572_vm7, %v1564_v19  ;;  %v1465_v37 = vadd.f32 %v1422_v35, %v1050_v14 }
 0x131   : > { %v1494_v42 = vadd.f32 %v2224_v44, %v1458_v38 }
 0x132   : > { %v1501_v39 = vadd.f32 %v2224_v44, %v1465_v37 }
 0x133   : > { %v1526_v45 = vmax.f32 %v1494_v42, 0.0 }
 0x134   : > { %v1533_v43 = vmax.f32 %v1501_v39, 0.0  ;;  %v799_v46 = vpop.f32.mrf.mxu0  ;;  %v1037_v54 = vpop.f32.mrf.mxu1 }
 0x135   : > { %v1407_v47 = vpop.f32.mrf.mxu2  ;;  %v1558_v49 = vpack.c.bf16 %v1526_v45, %v1526_v45  ;;  %v1035_v52 = vadd.f32 %v1034_v27, %v799_v46  ;;  %v1063_v45 = vadd.f32 %v2374_v61, %v2334_v41  ;;  %v1065_v41 = vadd.f32 %v2379_v33, %v2339_v53 }
 0x136   : > { %v1565_v48 = vpack.c.bf16 %v1533_v43, %v1533_v43 }
 0x137   : > { %v1425_v55 = vpop.f32.mrf.mxu3  ;;  %v1459_v57 = vadd.f32 %v1407_v47, %v1035_v52  ;;  %1591 = vst.msk [vmem:[%s2248_s16 + $0x48] sm:$0xf] %vm1572_vm7, %v1558_v49 }
 0x138   : > { %1598 = vst.msk [vmem:[%s2248_s16 + $0x64] sm:$0xf] %vm1572_vm7, %v1565_v48  ;;  %v1466_v56 = vadd.f32 %v1425_v55, %v1053_v8 }
 0x139   : > { %v1495_v60 = vadd.f32 %v2224_v44, %v1459_v57 }
 0x13a   : > { %v1502_v58 = vadd.f32 %v2224_v44, %v1466_v56 }
 0x13b   : > { %v1527_v62 = vmax.f32 %v1495_v60, 0.0 }
 0x13c   : > { %v1534_v59 = vmax.f32 %v1502_v58, 0.0  ;;  %v802_v4 = vpop.f32.mrf.mxu0  ;;  %v1039_v9 = vpop.f32.mrf.mxu1 }
 0x13d   : > { %v1410_v6 = vpop.f32.mrf.mxu2  ;;  %v1559_v0 = vpack.c.bf16 %v1527_v62, %v1527_v62  ;;  %v1038_v15 = vadd.f32 %v1037_v54, %v802_v4 }
 0x13e   : > { %v1566_v63 = vpack.c.bf16 %v1534_v59, %v1534_v59 }
 0x13f   : > { %v1427_v3 = vpop.f32.mrf.mxu3  ;;  %v1460_v2 = vadd.f32 %v1410_v6, %v1038_v15  ;;  %1592 = vst.msk [vmem:[%s2248_s16 + $0x4c] sm:$0xf] %vm1572_vm7, %v1559_v0 }
 0x140   : > { %1599 = vst.msk [vmem:[%s2248_s16 + $0x68] sm:$0xf] %vm1572_vm7, %v1566_v63  ;;  %v1467_v5 = vadd.f32 %v1427_v3, %v1055_v1 }
 0x141   : > { %v1496_v10 = vadd.f32 %v2224_v44, %v1460_v2 }
 0x142   : > { %v1503_v25 = vadd.f32 %v2224_v44, %v1467_v5 }
 0x143   : > { %v1528_v12 = vmax.f32 %v1496_v10, 0.0 }
 0x144   : > { %v1535_v11 = vmax.f32 %v1503_v25, 0.0  ;;  %v804_v51 = vpop.f32.mrf.mxu0  ;;  %v1042_v22 = vpop.f32.mrf.mxu1 }
 0x145   : > { %v1412_v23 = vpop.f32.mrf.mxu2  ;;  %v1560_v40 = vpack.c.bf16 %v1528_v12, %v1528_v12  ;;  %v1040_v24 = vadd.f32 %v1039_v9, %v804_v51 }
 0x146   : > { %v1567_v17 = vpack.c.bf16 %v1535_v11, %v1535_v11 }
 0x147   : > { %v1430_v29 = vpop.f32.mrf.mxu3  ;;  %v1461_v31 = vadd.f32 %v1412_v23, %v1040_v24  ;;  %1593 = vst.msk [vmem:[%s2248_s16 + $0x50] sm:$0xf] %vm1572_vm7, %v1560_v40 }
 0x148   : > { %1600 = vst.msk [vmem:[%s2248_s16 + $0x6c] sm:$0xf] %vm1572_vm7, %v1567_v17  ;;  %v1468_v18 = vadd.f32 %v1430_v29, %v1058_v16 }
 0x149   : > { %v1497_v21 = vadd.f32 %v2224_v44, %v1461_v31 }
 0x14a   : > { %v1504_v20 = vadd.f32 %v2224_v44, %v1468_v18 }
 0x14b   : > { %v1529_v27 = vmax.f32 %v1497_v21, 0.0 }
 0x14c   : > { %v1536_v26 = vmax.f32 %v1504_v20, 0.0  ;;  %v807_v36 = vpop.f32.mrf.mxu0  ;;  %v1044_v43 = vpop.f32.mrf.mxu1 }
 0x14d   : > { %v1415_v7 = vpop.f32.mrf.mxu2  ;;  %v1561_v14 = vpack.c.bf16 %v1529_v27, %v1529_v27  ;;  %v1043_v19 = vadd.f32 %v1042_v22, %v807_v36 }
 0x14e   : > { %v1568_v30 = vpack.c.bf16 %v1536_v26, %v1536_v26 }
 0x14f   : > { %v1432_v32 = vpop.f32.mrf.mxu3  ;;  %v1462_v35 = vadd.f32 %v1415_v7, %v1043_v19  ;;  %1594 = vst.msk [vmem:[%s2248_s16 + $0x54] sm:$0xf] %vm1572_vm7, %v1561_v14 }
 0x150   : > { %1601 = vst.msk [vmem:[%s2248_s16 + $0x70] sm:$0xf] %vm1572_vm7, %v1568_v30  ;;  %v1469_v34 = vadd.f32 %v1432_v32, %v1060_v13 }
 0x151   : > { %v1498_v38 = vadd.f32 %v2224_v44, %v1462_v35 }
 0x152   : > { %v1505_v37 = vadd.f32 %v2224_v44, %v1469_v34 }
 0x153   : > { %v1530_v42 = vmax.f32 %v1498_v38, 0.0 }
 0x154   : > { %v1537_v39 = vmax.f32 %v1505_v37, 0.0  ;;  %v809_v28 = vpop.f32.mrf.mxu0 }
 0x155   : > { %v1417_v50 = vpop.f32.mrf.mxu2  ;;  %v1562_v47 = vpack.c.bf16 %v1530_v42, %v1530_v42  ;;  %v1045_v8 = vadd.f32 %v1044_v43, %v809_v28 }
 0x156   : > { %v1569_v46 = vpack.c.bf16 %v1537_v39, %v1537_v39 }
 0x157   : > { %v1435_v48 = vpop.f32.mrf.mxu3  ;;  %v1463_v52 = vadd.f32 %v1417_v50, %v1045_v8  ;;  %1595 = vst.msk [vmem:[%s2248_s16 + $0x58] sm:$0xf] %vm1572_vm7, %v1562_v47 }
 0x158   : > { %1602 = vst.msk [vmem:[%s2248_s16 + $0x74] sm:$0xf] %vm1572_vm7, %v1569_v46  ;;  %v1470_v49 = vadd.f32 %v1435_v48, %v1063_v45 }
 0x159   : > { %v1499_v55 = vadd.f32 %v2224_v44, %v1463_v52 }
 0x15a   : > { %v1506_v54 = vadd.f32 %v2224_v44, %v1470_v49 }
 0x15b   : > { %v1531_v57 = vmax.f32 %v1499_v55, 0.0 }
 0x15c   : > { %v1538_v56 = vmax.f32 %v1506_v54, 0.0 }
 0x15d   : > { %v1563_v58 = vpack.c.bf16 %v1531_v57, %v1531_v57 }
 0x15e   : > { %v1570_v61 = vpack.c.bf16 %v1538_v56, %v1538_v56 }
 0x15f   : > { %v1437_v60 = vpop.f32.mrf.mxu3  ;;  %1596 = vst.msk [vmem:[%s2248_s16 + $0x5c] sm:$0xf] %vm1572_vm7, %v1563_v58 }
 0x160   : > { %1603 = vst.msk [vmem:[%s2248_s16 + $0x78] sm:$0xf] %vm1572_vm7, %v1570_v61  ;;  %v1471_v59 = vadd.f32 %v1437_v60, %v1065_v41 }
 0x162   : > { %v1507_v62 = vadd.f32 %v2224_v44, %v1471_v59 }
 0x164   : > { %v1539_v4 = vmax.f32 %v1507_v62, 0.0 }
 0x166   : > { %v1571_v6 = vpack.c.bf16 %v1539_v4, %v1539_v4 }
 0x168   : > { %1604 = vst.msk [vmem:[%s2248_s16 + $0x7c] sm:$0xf] %vm1572_vm7, %v1571_v6 }
 0x169 PF: > { %s13_s12 = sadd.s32 1, %s1902_s12  }
 0x16a   : > { %p10_p4 = scmp.ge.s32.totalorder %s13_s12, 4  }
 0x16c   :  { %12 = sbr.rel (!%p10_p4) target bundleno = 1 (0x1), region = 64 }

// kernel: apply.6
= control target key start
LH: loop header
LB: loop body
LE: loop exit
PB: predicated region body
PF: predicated region fallthrough
CT: control target
= control target key end

     0   :  { %s1951_s12 = smov 0   ;;  %s2508_s0 = inlined_call_operand.vmem [shape: bf16[32,18,56], index: 0, kind: input, shape index: {}]   ;;  %s2509_s1 = inlined_call_operand.vmem [shape: bf16[3,56,64], index: 1, kind: input, shape index: {}]   ;;  %s2510_s2 = inlined_call_operand.vmem [shape: f32[1,64], index: 2, kind: input, shape index: {}]   ;;  %s2511_s3 = inlined_call_operand.vmem [shape: bf16[32,16,64], index: 3, kind: output, shape index: {}]  }
   0x1 LB: > { %s1685_s13 = sadd.s32 4294967295, %s1929_s12   ;;  %p1689_p0 = scmp.ge.s32.totalorder %s1929_s12, 1  ;;  %s1929_s12 = sphi %s1951_s12, %s13_s12  }
   0x2   : > { %p139_p1 = scmp.lt.s32.totalorder %s1929_s12, 3 }
   0x4   : > { %p140_p2 = pnand %p1689_p0, %p139_p1 }
   0x5   : > { %s1690_s20 = sshll.u32 (!%p140_p2), %s1685_s13, 4 }
   0x6   : > { %143 = sbr.rel (%p140_p2) target bundleno = 362 (0x16a), region = 32  ;;  %p166_p3 = scmp.lt.s32.totalorder (!%p140_p2), %s1690_s20, 31 }
   0xb   : > { %v218_v0 = vld [vmem:[%s2509_s1 + $0x18] sm:$0xf]  ;;  %v1844_v1 = vld [vmem:[%s2509_s1 + $0x50] sm:$0xf]  ;;  %v1701_v4 = vld [vmem:[%s2509_s1 + $0x34] sm:$0xf] }
   0xc   : > { %v934_v2 = vunpack.c.l.b16 %v218_v0  ;;  %v1314_v3 = vunpack.c.l.b16 %v1844_v1  ;;  %vm748_vm0 = vcmask 1043456   ;;  %v691_v5 = vunpack.c.l.b16 %v1701_v4  ;;  %s2517_s20 = smov (!%p166_p3, %s1690_s20), 31  ;;  %v1979_v12 = vld [vmem:[%s2509_s1 + $0x10] sm:$0xff]  ;;  %v1984_v13 = vld [vmem:[%s2509_s1 + $0x48] sm:$0xff]  ;;  %v1998_v16 = vld [vmem:[%s2509_s1 + $0x40] sm:$0xff] }
   0xd   : > { %s1913_s25 = smul.u32 12, %s2517_s20  ;;  %v1897_v14 = vld [vmem:[%s2509_s1 + $0x2c] sm:$0xff]  ;;  %vm1130_vm1 = vcmask 1042432   ;;  %vm1131_vm2 = vcmask 1046532   ;;  %vm235_vm3 = vsmask.f32 3328 }
   0xe   : > { %v938_v6 = vpack.c.b16 %v934_v2, %v934_v2  ;;  %v1318_v7 = vpack.c.b16 %v1314_v3, %v1314_v3  ;;  %v695_v8 = vpack.c.b16 %v691_v5, %v691_v5  ;;  %v1993_v15 = vld [vmem:[%s2509_s1 + $0x8] sm:$0xff]  ;;  %vm236_vm4 = vsmask.f32 7440  ;;  %vm2013_vm5 = vmor %vm1130_vm1, %vm1131_vm2  ;;  %v2032_v40 = vld [vmem:[%s2509_s1] sm:$0xff]  ;;  %s1875_s19 = sshll.u32 %s2517_s20, 3 }
   0xf   : > { %s2003_s7 = scalar_lea.vmem %s2508_s0, %s1913_s25  ;;  %v1896_v17 = vld [vmem:[%s2509_s1 + $0x24] sm:$0xff]  ;;  %v2037_v41 = vld [vmem:[%s2509_s1 + $0x38] sm:$0xff]  ;;  %vm2046_vm6 = vmor %vm235_vm3, %vm236_vm4  ;;  %vm699_vm7 = vcmask 457728   ;;  %s2297_s22 = scalar_lea.vmem %s2511_s3, %s1875_s19  ;;  %vm1594_vm8 = vcmask 519168  }
  0x10   : > { %v1970_v9 = vsel %vm748_vm0, %v938_v6, 0  ;;  %v1972_v10 = vsel %vm748_vm0, %v1318_v7, 0  ;;  %v750_v11 = vsel %vm748_vm0, %v695_v8, 0  ;;  %v181_v18 = vld [vmem:[%s2003_s7 + $0x4] sm:$0xf]  ;;  %v1895_v46 = vld [vmem:[%s2509_s1 + $0x1c] sm:$0xff] }
  0x11   : > { %997 = vmatpush.bf16.msra.mxu1 %v1970_v9  ;;  %1377 = vmatpush.bf16.msra.mxu2 %v1972_v10  ;;  %v219_v19 = vld [vmem:[%s2003_s7 + $0x8] sm:$0x1]  ;;  %v1082_v20 = vld [vmem:[%s2003_s7] sm:$0xe]  ;;  %v1135_v22 = vrot.slane %v181_v18, 5  ;;  %v248_v28 = vshll.u32 %v181_v18, 16 }
  0x12   : > { %756 = vmatpush.bf16.msra.mxu0 %v750_v11  ;;  %1901 = vmatpush.bf16.msra.mxu3 %v750_v11  ;;  %v1138_v23 = vrot.slane %v219_v19, 5  ;;  %v180_v24 = vld [vmem:[%s2003_s7] sm:$0xf]  ;;  %v1822_v25 = vrot.slane %v1082_v20, 9  ;;  %v204_v29 = vld [vmem:[%s2003_s7 + $0x90] sm:$0xf] }
  0x13   : > { %v239_v26 = vshrl.u32 %v180_v24, 16  ;;  %v242_v27 = vshll.u32 %v180_v24, 16  ;;  %v1137_v30 = vrot.slane %v1135_v22, 4  ;;  %v252_v31 = vshrl.u32 %v181_v18, 16  ;;  %v2020_v33 = vld [vmem:[%s2003_s7 + $0x94] sm:$0xf] }
  0x14   : > { %v258_v32 = vshll.u32 %v219_v19, 16  ;;  %v527_v34 = vshrl.u32 %v204_v29, 16  ;;  %v1136_v35 = vsel %vm2013_vm5, %v1822_v25, %v1135_v22  ;;  %v250_v38 = vrot.slane %v248_v28, 5  ;;  %v2025_v39 = vld [vmem:[%s2003_s7 + $0x98] sm:$0x1]  ;;  %v1876_v56 = vld [vmem:[%s2003_s7] sm:$0xff] }
  0x15   : > { %998 = vmatpush.bf16.msra.mxu1 %v1979_v12  ;;  %1378 = vmatpush.bf16.msra.mxu2 %v1984_v13  ;;  %v241_v36 = vrot.slane %v239_v26, 4  ;;  %v244_v37 = vrot.slane %v242_v27, 5  ;;  %v1139_v42 = vsel %vm2013_vm5, %v1137_v30, %v1138_v23  ;;  %v1253_v43 = vunpack.c.l.b16 %v1136_v35  ;;  %v1083_v60 = vld [vmem:[%s2003_s7 + $0xc] sm:$0xe]  ;;  %v220_v0 = vld [vmem:[%s2003_s7 + $0x14] sm:$0x1] }
  0x16   : > { %757 = vmatpush.bf16.msra.mxu0 %v1897_v14  ;;  %1902 = vmatpush.bf16.msra.mxu3 %v1897_v14  ;;  %v254_v44 = vrot.slane %v252_v31, 4  ;;  %v260_v45 = vrot.slane %v258_v32, 5  ;;  %v1254_v47 = vunpack.c.l.b16 %v1139_v42  ;;  %v529_v49 = vrot.slane %v527_v34, 4  ;;  %v183_v4 = vld [vmem:[%s2003_s7 + $0x10] sm:$0xf] }
  0x17   : > { %v245_v48 = vor.u32 %v244_v37, %v241_v36  ;;  %v530_v50 = vshll.u32 %v204_v29, 16  ;;  %v536_v53 = vshll.u32 %v2020_v33, 16  ;;  %v540_v54 = vshrl.u32 %v2020_v33, 16  ;;  %v182_v5 = vld [vmem:[%s2003_s7 + $0xc] sm:$0xf] }
  0x18   : > { %v255_v52 = vor.u32 %v254_v44, %v250_v38  ;;  %v546_v55 = vshll.u32 %v2025_v39, 16  ;;  %v1285_v57 = vpack.c.b16 %v1254_v47, %v1253_v43  ;;  %v1823_v11 = vrot.slane %v1083_v60, 9  ;;  %v206_v28 = vld [vmem:[%s2003_s7 + $0x9c] sm:$0xf]  ;;  %v2075_v34 = vld [vmem:[%s2003_s7 + $0xa0] sm:$0xf] }
  0x19   : > { %999 = vmatpush.bf16.msra.mxu1 %v1993_v15  ;;  %1379 = vmatpush.bf16.msra.mxu2 %v1998_v16  ;;  %v246_v58 = vrot.slane %v245_v48, 4  ;;  %v532_v59 = vrot.slane %v530_v50, 5  ;;  %v538_v62 = vrot.slane %v536_v53, 5  ;;  %v542_v63 = vrot.slane %v540_v54, 4  ;;  %v2082_v48 = vld [vmem:[%s2003_s7 + $0xa4] sm:$0x1] }
  0x1a   : > { %758 = vmatpush.bf16.msra.mxu0 %v1896_v17  ;;  %1903 = vmatpush.bf16.msra.mxu3 %v1896_v17  ;;  %v256_v61 = vrot.slane %v255_v52, 4  ;;  %v548_v3 = vrot.slane %v546_v55, 5  ;;  %v1142_v18 = vrot.slane %v183_v4, 5  ;;  %v1145_v19 = vrot.slane %v220_v0, 5  ;;  %v185_v53 = vld [vmem:[%s2003_s7 + $0x1c] sm:$0xf] }
  0x1b   : > { %v251_v1 = vsel %vm2046_vm6, %v246_v58, %v250_v38  ;;  %v533_v2 = vor.u32 %v532_v59, %v529_v49  ;;  %v543_v8 = vor.u32 %v542_v63, %v538_v62  ;;  %v263_v22 = vshrl.u32 %v182_v5, 16  ;;  %v221_v54 = vld [vmem:[%s2003_s7 + $0x20] sm:$0x1]  ;;  %v1084_v59 = vld [vmem:[%s2003_s7 + $0x18] sm:$0xe] }
  0x1c   : > { %v261_v6 = vsel %vm2046_vm6, %v256_v61, %v260_v45  ;;  %v630_v7 = vunpack.c.l.b16 %v251_v1  ;;  %v266_v23 = vshll.u32 %v182_v5, 16  ;;  %v272_v24 = vshll.u32 %v183_v4, 16 }
  0x1d   : > { %1000 = vmatpush.bf16.msra.mxu1 %v2032_v40  ;;  %1380 = vmatpush.bf16.msra.mxu2 %v2037_v41  ;;  %v631_v14 = vunpack.c.l.b16 %v261_v6  ;;  %v534_v17 = vrot.slane %v533_v2, 4  ;;  %v544_v20 = vrot.slane %v543_v8, 4  ;;  %v1144_v27 = vrot.slane %v1142_v18, 4  ;;  %v1877_v8 = vld [vmem:[%s2003_s7 + $0xc] sm:$0xff] }
  0x1e   : > { %759 = vmatpush.bf16.msra.mxu0 %v1895_v46  ;;  %1904 = vmatpush.bf16.msra.mxu3 %v1895_v46  ;;  %v265_v32 = vrot.slane %v263_v22, 4  ;;  %v268_v37 = vrot.slane %v266_v23, 5  ;;  %v274_v38 = vrot.slane %v272_v24, 5  ;;  %v276_v43 = vshrl.u32 %v183_v4, 16 }
  0x1f   : > { %v662_v25 = vpack.c.b16 %v631_v14, %v630_v7  ;;  %v539_v26 = vsel %vm2046_vm6, %v534_v17, %v538_v62  ;;  %v549_v29 = vsel %vm2046_vm6, %v544_v20, %v548_v3  ;;  %v1146_v36 = vsel %vm2013_vm5, %v1144_v27, %v1145_v19  ;;  %v184_v3 = vld [vmem:[%s2003_s7 + $0x18] sm:$0xf] }
  0x20   : > { %1806 = vmatmul.msk.bf16.vlgmr.msra.gmra.mxu1 %vm699_vm7, %v1876_v56  ;;  %1857 = vmatmul.msk.bf16.vlgmr.msra.gmra.mxu2 %vm699_vm7, %v1285_v57  ;;  %v654_v30 = vunpack.c.l.b16 %v539_v26  ;;  %v655_v35 = vunpack.c.l.b16 %v549_v29  ;;  %v1256_v42 = vunpack.c.l.b16 %v1146_v36  ;;  %v282_v44 = vshll.u32 %v220_v0, 16  ;;  %v208_v29 = vld [vmem:[%s2003_s7 + $0xa8] sm:$0xf] }
  0x21   : > { %1714 = vmatmul.msk.bf16.vlgmr.msra.gmra.mxu0 %vm699_vm7, %v662_v25  ;;  %v551_v45 = vshrl.u32 %v206_v28, 16  ;;  %v269_v47 = vor.u32 %v268_v37, %v265_v32  ;;  %v560_v49 = vshll.u32 %v2075_v34, 16  ;;  %v278_v50 = vrot.slane %v276_v43, 4 }
  0x22   : > { %1905 = vmatpush.bf16.msrb.mxu3 %v1970_v9  ;;  %v1143_v9 = vsel %vm2013_vm5, %v1823_v11, %v1142_v18  ;;  %v674_v46 = vpack.c.b16 %v655_v35, %v654_v30  ;;  %v564_v58 = vshrl.u32 %v2075_v34, 16  ;;  %v284_v61 = vrot.slane %v282_v44, 5  ;;  %v2116_v44 = vld [vmem:[%s2003_s7 + $0xb0] sm:$0x1] }
  0x23   : > { %v1255_v31 = vunpack.c.l.b16 %v1143_v9  ;;  %v553_v52 = vrot.slane %v551_v45, 4  ;;  %v270_v55 = vrot.slane %v269_v47, 4  ;;  %v562_v57 = vrot.slane %v560_v49, 5 }
  0x24   : > { %1726 = vmatmul.msk.bf16.vlgmr.msra.gmra.mxu3 %vm699_vm7, %v674_v46  ;;  %v279_v60 = vor.u32 %v278_v50, %v274_v38  ;;  %v570_v62 = vshll.u32 %v2082_v48, 16  ;;  %v1149_v63 = vrot.slane %v185_v53, 5  ;;  %v1824_v6 = vrot.slane %v1084_v59, 9 }
  0x25   : > { %v1286_v0 = vpack.c.b16 %v1256_v42, %v1255_v31  ;;  %v275_v1 = vsel %vm2046_vm6, %v270_v55, %v274_v38  ;;  %v1152_v7 = vrot.slane %v221_v54, 5  ;;  %v287_v20 = vshrl.u32 %v184_v3, 16 }
  0x26   : > { %1906 = vmatpush.bf16.msrb.mxu3 %v1979_v12  ;;  %v554_v12 = vshll.u32 %v206_v28, 16  ;;  %v280_v4 = vrot.slane %v279_v60, 4  ;;  %v632_v5 = vunpack.c.l.b16 %v275_v1  ;;  %v572_v17 = vrot.slane %v570_v62, 5  ;;  %v187_v1 = vld [vmem:[%s2003_s7 + $0x28] sm:$0xf] }
  0x27   : > { %v1151_v18 = vrot.slane %v1149_v63, 4  ;;  %v290_v22 = vshll.u32 %v184_v3, 16  ;;  %v296_v23 = vshll.u32 %v185_v53, 16  ;;  %v1150_v9 = vsel %vm2013_vm5, %v1824_v6, %v1149_v63  ;;  %v222_v6 = vld [vmem:[%s2003_s7 + $0x2c] sm:$0x1] }
  0x28   : > { %v556_v56 = vrot.slane %v554_v12, 5  ;;  %v285_v19 = vsel %vm2046_vm6, %v280_v4, %v284_v61  ;;  %v289_v27 = vrot.slane %v287_v20, 4  ;;  %v300_v35 = vshrl.u32 %v185_v53, 16 }
  0x29   : > { %v633_v24 = vunpack.c.l.b16 %v285_v19  ;;  %v292_v28 = vrot.slane %v290_v22, 5  ;;  %v298_v32 = vrot.slane %v296_v23, 5  ;;  %v1153_v37 = vsel %vm2013_vm5, %v1151_v18, %v1152_v7  ;;  %v210_v7 = vld [vmem:[%s2003_s7 + $0xb4] sm:$0xf]  ;;  %v2137_v23 = vld [vmem:[%s2003_s7 + $0xb8] sm:$0xf] }
  0x2a   : > { %1907 = vmatpush.bf16.msrb.mxu3 %v1993_v15  ;;  %v557_v2 = vor.u32 %v556_v56, %v553_v52  ;;  %v566_v15 = vrot.slane %v564_v58, 4  ;;  %v306_v42 = vshll.u32 %v221_v54, 16  ;;  %v302_v43 = vrot.slane %v300_v35, 4 }
  0x2b   : > { %v663_v30 = vpack.c.b16 %v633_v24, %v632_v5  ;;  %v293_v38 = vor.u32 %v292_v28, %v289_v27  ;;  %v575_v45 = vshrl.u32 %v208_v29, 16  ;;  %v578_v46 = vshll.u32 %v208_v29, 16  ;;  %v1878_v24 = vld [vmem:[%s2003_s7 + $0x18] sm:$0xff] }
  0x2c   : > { %v558_v11 = vrot.slane %v557_v2, 4  ;;  %v567_v14 = vor.u32 %v566_v15, %v562_v57  ;;  %v308_v50 = vrot.slane %v306_v42, 5  ;;  %v303_v53 = vor.u32 %v302_v43, %v298_v32 }
  0x2d   : > { %v294_v49 = vrot.slane %v293_v38, 4  ;;  %v577_v54 = vrot.slane %v575_v45, 4  ;;  %v580_v55 = vrot.slane %v578_v46, 5  ;;  %v594_v58 = vshll.u32 %v2116_v44, 16 }
  0x2e   : > { %1908 = vmatpush.bf16.msrb.mxu3 %v2032_v40  ;;  %v563_v25 = vsel %vm2046_vm6, %v558_v11, %v562_v57  ;;  %v568_v40 = vrot.slane %v567_v14, 4  ;;  %v304_v60 = vrot.slane %v303_v53, 4  ;;  %v1257_v62 = vunpack.c.l.b16 %v1150_v9  ;;  %v1085_v11 = vld [vmem:[%s2003_s7 + $0x24] sm:$0xe] }
  0x2f   : > { %v656_v26 = vunpack.c.l.b16 %v563_v25  ;;  %v299_v59 = vsel %vm2046_vm6, %v294_v49, %v298_v32  ;;  %v581_v61 = vor.u32 %v580_v55, %v577_v54  ;;  %v1258_v63 = vunpack.c.l.b16 %v1153_v37 }
  0x30   : > { %1807 = vmatmul.msk.bf16.gmra.mxu1 %vm699_vm7, %v1877_v8  ;;  %1858 = vmatmul.msk.bf16.gmra.mxu2 %vm699_vm7, %v1286_v0  ;;  %v573_v31 = vsel %vm2046_vm6, %v568_v40, %v572_v17  ;;  %v309_v15 = vsel %vm2046_vm6, %v304_v60, %v308_v50  ;;  %v634_v4 = vunpack.c.l.b16 %v299_v59  ;;  %v1156_v14 = vrot.slane %v187_v1, 5  ;;  %v188_v60 = vld [vmem:[%s2003_s7 + $0x30] sm:$0xf] }
  0x31   : > { %v657_v36 = vunpack.c.l.b16 %v573_v31  ;;  %1715 = vmatmul.msk.bf16.gmra.mxu0 %vm699_vm7, %v663_v30  ;;  %v582_v3 = vrot.slane %v581_v61, 4  ;;  %v635_v8 = vunpack.c.l.b16 %v309_v15  ;;  %v320_v18 = vshll.u32 %v187_v1, 16  ;;  %v189_v61 = vld [vmem:[%s2003_s7 + $0x34] sm:$0xf] }
  0x32   : > { %1909 = vmatpush.bf16.msra.mxu3 %v1972_v10  ;;  %v2106_v10 = vld [vmem:[%s2003_s7 + $0xac] sm:$0xf]  ;;  %v1287_v19 = vpack.c.b16 %v1258_v63, %v1257_v62  ;;  %v324_v9 = vshrl.u32 %v187_v1, 16  ;;  %v1159_v27 = vrot.slane %v222_v6, 5  ;;  %v599_v28 = vshrl.u32 %v210_v7, 16 }
  0x33   : > { %v584_v47 = vshll.u32 %v2106_v10, 16  ;;  %v675_v12 = vpack.c.b16 %v657_v36, %v656_v26  ;;  %v588_v52 = vshrl.u32 %v2106_v10, 16  ;;  %v322_v26 = vrot.slane %v320_v18, 5 }
  0x34   : > { %v602_v29 = vshll.u32 %v210_v7, 16  ;;  %v664_v30 = vpack.c.b16 %v635_v8, %v634_v4  ;;  %v1158_v31 = vrot.slane %v1156_v14, 4  ;;  %v326_v32 = vrot.slane %v324_v9, 4 }
  0x35   : > { %v586_v56 = vrot.slane %v584_v47, 5  ;;  %v590_v57 = vrot.slane %v588_v52, 4  ;;  %1727 = vmatmul.msk.bf16.gmra.mxu3 %vm699_vm7, %v675_v12  ;;  %v608_v35 = vshll.u32 %v2137_v23, 16  ;;  %v612_v42 = vshrl.u32 %v2137_v23, 16  ;;  %v2147_v12 = vld [vmem:[%s2003_s7 + $0xbc] sm:$0x1] }
  0x36   : > { %1910 = vmatpush.bf16.msra.mxu3 %v1984_v13  ;;  %v186_v13 = vld [vmem:[%s2003_s7 + $0x24] sm:$0xf]  ;;  %v327_v43 = vor.u32 %v326_v32, %v322_v26  ;;  %v330_v45 = vshll.u32 %v222_v6, 16  ;;  %v601_v46 = vrot.slane %v599_v28, 4  ;;  %v604_v47 = vrot.slane %v602_v29, 5 }
  0x37   : > { %v591_v0 = vor.u32 %v590_v57, %v586_v56  ;;  %v311_v2 = vshrl.u32 %v186_v13, 16  ;;  %v314_v17 = vshll.u32 %v186_v13, 16  ;;  %v587_v20 = vsel %vm2046_vm6, %v582_v3, %v586_v56 }
  0x38   : > { %v658_v36 = vunpack.c.l.b16 %v587_v20  ;;  %v610_v49 = vrot.slane %v608_v35, 5  ;;  %v614_v50 = vrot.slane %v612_v42, 4  ;;  %v1160_v54 = vsel %vm2013_vm5, %v1158_v31, %v1159_v27  ;;  %v1086_v20 = vld [vmem:[%s2003_s7 + $0x30] sm:$0xe] }
  0x39   : > { %v592_v5 = vrot.slane %v591_v0, 4  ;;  %v313_v22 = vrot.slane %v311_v2, 4  ;;  %v316_v40 = vrot.slane %v314_v17, 5  ;;  %v328_v56 = vrot.slane %v327_v43, 4 }
  0x3a   : > { %1911 = vmatpush.bf16.msra.mxu3 %v1998_v16  ;;  %v596_v16 = vrot.slane %v594_v58, 5  ;;  %v332_v13 = vrot.slane %v330_v45, 5  ;;  %v605_v57 = vor.u32 %v604_v47, %v601_v46  ;;  %v618_v58 = vshll.u32 %v2147_v12, 16  ;;  %v190_v46 = vld [vmem:[%s2003_s7 + $0x3c] sm:$0xf] }
  0x3b   : > { %v317_v38 = vor.u32 %v316_v40, %v313_v22  ;;  %v615_v59 = vor.u32 %v614_v50, %v610_v49  ;;  %v1260_v63 = vunpack.c.l.b16 %v1160_v54  ;;  %v335_v3 = vshrl.u32 %v188_v60, 16  ;;  %v191_v47 = vld [vmem:[%s2003_s7 + $0x40] sm:$0xf] }
  0x3c   : > { %v597_v25 = vsel %vm2046_vm6, %v592_v5, %v596_v16  ;;  %v333_v1 = vsel %vm2046_vm6, %v328_v56, %v332_v13  ;;  %v606_v2 = vrot.slane %v605_v57, 4  ;;  %v620_v15 = vrot.slane %v618_v58, 5  ;;  %v1880_v58 = vld [vmem:[%s2003_s7 + $0x30] sm:$0xff] }
  0x3d   : > { %v659_v37 = vunpack.c.l.b16 %v597_v25  ;;  %v318_v55 = vrot.slane %v317_v38, 4  ;;  %v616_v16 = vrot.slane %v615_v59, 4  ;;  %v338_v4 = vshll.u32 %v188_v60, 16 }
  0x3e   : > { %1912 = vmatpush.bf16.msra.mxu3 %v2037_v41  ;;  %v1825_v41 = vrot.slane %v1085_v11, 9  ;;  %v344_v5 = vshll.u32 %v189_v61, 16  ;;  %v348_v6 = vshrl.u32 %v189_v61, 16  ;;  %v1163_v8 = vrot.slane %v189_v61, 5  ;;  %v1879_v11 = vld [vmem:[%s2003_s7 + $0x24] sm:$0xff] }
  0x3f   : > { %v676_v52 = vpack.c.b16 %v659_v37, %v658_v36  ;;  %v323_v0 = vsel %vm2046_vm6, %v318_v55, %v322_v26  ;;  %v637_v17 = vunpack.c.l.b16 %v333_v1  ;;  %v611_v18 = vsel %vm2046_vm6, %v606_v2, %v610_v49 }
  0x40   : > { %1808 = vmatmul.msk.bf16.gmra.mxu1 %vm699_vm7, %v1878_v24  ;;  %1859 = vmatmul.msk.bf16.gmra.mxu2 %vm699_vm7, %v1287_v19  ;;  %v1157_v53 = vsel %vm2013_vm5, %v1825_v41, %v1156_v14  ;;  %v636_v14 = vunpack.c.l.b16 %v323_v0  ;;  %v223_v19 = vld [vmem:[%s2003_s7 + $0x38] sm:$0x1]  ;;  %v337_v22 = vrot.slane %v335_v3, 4  ;;  %v621_v24 = vsel %vm2046_vm6, %v616_v16, %v620_v15  ;;  %v224_v15 = vld [vmem:[%s2003_s7 + $0x44] sm:$0x1] }
  0x41   : > { %1716 = vmatmul.msk.bf16.gmra.mxu0 %vm699_vm7, %v664_v30  ;;  %v1259_v62 = vunpack.c.l.b16 %v1157_v53  ;;  %v340_v25 = vrot.slane %v338_v4, 5  ;;  %v346_v40 = vrot.slane %v344_v5, 5  ;;  %v350_v26 = vrot.slane %v348_v6, 4 }
  0x42   : > { %v1826_v9 = vrot.slane %v1086_v20, 9  ;;  %v1166_v41 = vrot.slane %v223_v19, 5  ;;  %v665_v27 = vpack.c.b16 %v637_v17, %v636_v14  ;;  %v660_v28 = vunpack.c.l.b16 %v611_v18 }
  0x43   : > { %v1288_v7 = vpack.c.b16 %v1260_v63, %v1259_v62  ;;  %v661_v29 = vunpack.c.l.b16 %v621_v24  ;;  %v1165_v30 = vrot.slane %v1163_v8, 4  ;;  %v341_v31 = vor.u32 %v340_v25, %v337_v22  ;;  %v1087_v63 = vld [vmem:[%s2003_s7 + $0x3c] sm:$0xe]  ;;  %v192_v22 = vld [vmem:[%s2003_s7 + $0x48] sm:$0xf] }
  0x44   : > { %v351_v32 = vor.u32 %v350_v26, %v346_v40  ;;  %v354_v35 = vshll.u32 %v223_v19, 16  ;;  %v1164_v37 = vsel %vm2013_vm5, %v1826_v9, %v1163_v8  ;;  %v362_v53 = vshll.u32 %v190_v46, 16  ;;  %v193_v24 = vld [vmem:[%s2003_s7 + $0x4c] sm:$0xf] }
  0x45   : > { %1728 = vmatmul.msk.bf16.gmra.mxu3 %vm699_vm7, %v676_v52  ;;  %v677_v36 = vpack.c.b16 %v661_v29, %v660_v28  ;;  %v1167_v38 = vsel %vm2013_vm5, %v1165_v30, %v1166_v41  ;;  %v342_v42 = vrot.slane %v341_v31, 4  ;;  %v1261_v49 = vunpack.c.l.b16 %v1164_v37  ;;  %v1881_v31 = vld [vmem:[%s2003_s7 + $0x3c] sm:$0xff] }
  0x46   : > { %v352_v43 = vrot.slane %v351_v32, 4  ;;  %v356_v45 = vrot.slane %v354_v35, 5  ;;  %v1262_v50 = vunpack.c.l.b16 %v1167_v38  ;;  %v359_v52 = vshrl.u32 %v190_v46, 16  ;;  %v1088_v38 = vld [vmem:[%s2003_s7 + $0x48] sm:$0xe] }
  0x47   : > { %v347_v54 = vsel %vm2046_vm6, %v342_v42, %v346_v40  ;;  %v368_v56 = vshll.u32 %v191_v47, 16  ;;  %v372_v13 = vshrl.u32 %v191_v47, 16  ;;  %v364_v62 = vrot.slane %v362_v53, 5  ;;  %v225_v46 = vld [vmem:[%s2003_s7 + $0x50] sm:$0x1] }
  0x48   : > { %v357_v55 = vsel %vm2046_vm6, %v352_v43, %v356_v45  ;;  %v1289_v57 = vpack.c.b16 %v1262_v50, %v1261_v49  ;;  %v638_v59 = vunpack.c.l.b16 %v347_v54  ;;  %v361_v61 = vrot.slane %v359_v52, 4 }
  0x49   : > { %v639_v60 = vunpack.c.l.b16 %v357_v55  ;;  %v1170_v0 = vrot.slane %v191_v47, 5  ;;  %v370_v1 = vrot.slane %v368_v56, 5  ;;  %v374_v2 = vrot.slane %v372_v13, 4  ;;  %v1889_v56 = vld [vmem:[%s2003_s7 + $0x9c] sm:$0xff] }
  0x4a   : > { %v1827_v16 = vrot.slane %v1087_v63, 9  ;;  %v365_v4 = vor.u32 %v364_v62, %v361_v61  ;;  %v1173_v6 = vrot.slane %v224_v15, 5  ;;  %v378_v8 = vshll.u32 %v224_v15, 16  ;;  %v195_v62 = vld [vmem:[%s2003_s7 + $0x58] sm:$0xf] }
  0x4b   : > { %v666_v3 = vpack.c.b16 %v639_v60, %v638_v59  ;;  %v1172_v5 = vrot.slane %v1170_v0, 4  ;;  %v383_v9 = vshrl.u32 %v192_v22, 16  ;;  %v386_v41 = vshll.u32 %v192_v22, 16 }
  0x4c   : > { %v1171_v14 = vsel %vm2013_vm5, %v1827_v16, %v1170_v0  ;;  %v366_v17 = vrot.slane %v365_v4, 4  ;;  %v380_v20 = vrot.slane %v378_v8, 5  ;;  %v392_v28 = vshll.u32 %v193_v24, 16 }
  0x4d   : > { %v1174_v18 = vsel %vm2013_vm5, %v1172_v5, %v1173_v6  ;;  %v1263_v25 = vunpack.c.l.b16 %v1171_v14  ;;  %v396_v29 = vshrl.u32 %v193_v24, 16  ;;  %v388_v37 = vrot.slane %v386_v41, 5 }
  0x4e   : > { %v1264_v40 = vunpack.c.l.b16 %v1174_v18  ;;  %v371_v26 = vsel %vm2046_vm6, %v366_v17, %v370_v1  ;;  %v1177_v42 = vrot.slane %v193_v24, 5  ;;  %v394_v43 = vrot.slane %v392_v28, 5  ;;  %v226_v24 = vld [vmem:[%s2003_s7 + $0x5c] sm:$0x1] }
  0x4f   : > { %v640_v30 = vunpack.c.l.b16 %v371_v26  ;;  %v398_v45 = vrot.slane %v396_v29, 4  ;;  %v1828_v49 = vrot.slane %v1088_v38, 9  ;;  %v1180_v53 = vrot.slane %v225_v46, 5 }
  0x50   : > { %1809 = vmatmul.msk.bf16.gmra.mxu1 %vm699_vm7, %v1879_v11  ;;  %1860 = vmatmul.msk.bf16.gmra.mxu2 %vm699_vm7, %v1288_v7  ;;  %v375_v7 = vor.u32 %v374_v2, %v370_v1  ;;  %v1888_v11 = vld [vmem:[%s2003_s7 + $0x90] sm:$0xff]  ;;  %v1290_v32 = vpack.c.b16 %v1264_v40, %v1263_v25  ;;  %v1179_v52 = vrot.slane %v1177_v42, 4  ;;  %v402_v55 = vshll.u32 %v225_v46, 16 }
  0x51   : > { %1717 = vmatmul.msk.bf16.gmra.mxu0 %vm699_vm7, %v665_v27  ;;  %v399_v54 = vor.u32 %v398_v45, %v394_v43  ;;  %v1178_v13 = vsel %vm2013_vm5, %v1828_v49, %v1177_v42  ;;  %v420_v16 = vshrl.u32 %v195_v62, 16  ;;  %v1219_v5 = vrot.slane %v2020_v33, 5  ;;  %v196_v45 = vld [vmem:[%s2003_s7 + $0x60] sm:$0xf]  ;;  %v197_v49 = vld [vmem:[%s2003_s7 + $0x64] sm:$0xf] }
  0x52   : > { %v376_v19 = vrot.slane %v375_v7, 4  ;;  %v1181_v59 = vsel %vm2013_vm5, %v1179_v52, %v1180_v53  ;;  %v404_v61 = vrot.slane %v402_v55, 5  ;;  %v1265_v63 = vunpack.c.l.b16 %v1178_v13 }
  0x53   : > { %v400_v60 = vrot.slane %v399_v54, 4  ;;  %v1266_v2 = vunpack.c.l.b16 %v1181_v59  ;;  %v1184_v22 = vrot.slane %v195_v62, 5  ;;  %v1221_v25 = vrot.slane %v1219_v5, 4 }
  0x54   : > { %v381_v27 = vsel %vm2046_vm6, %v376_v19, %v380_v20  ;;  %v422_v19 = vrot.slane %v420_v16, 4  ;;  %v1089_v20 = vld [vmem:[%s2003_s7 + $0x54] sm:$0xe]  ;;  %v1222_v26 = vrot.slane %v2025_v39, 5  ;;  %v1187_v29 = vrot.slane %v226_v24, 5 }
  0x55   : > { %1729 = vmatmul.msk.bf16.gmra.mxu3 %vm699_vm7, %v677_v36  ;;  %v641_v35 = vunpack.c.l.b16 %v381_v27  ;;  %v385_v36 = vrot.slane %v383_v9, 4  ;;  %v405_v4 = vsel %vm2046_vm6, %v400_v60, %v404_v61  ;;  %v1291_v14 = vpack.c.b16 %v1266_v2, %v1265_v63  ;;  %v1094_v27 = vld [vmem:[%s2003_s7 + $0x90] sm:$0xe]  ;;  %v1883_v60 = vld [vmem:[%s2003_s7 + $0x54] sm:$0xff]  ;;  %v227_v16 = vld [vmem:[%s2003_s7 + $0x68] sm:$0x1] }
  0x56   : > { %v643_v17 = vunpack.c.l.b16 %v405_v4  ;;  %v1829_v9 = vrot.slane %v1089_v20, 9  ;;  %v1186_v28 = vrot.slane %v1184_v22, 4  ;;  %v1223_v38 = vsel %vm2013_vm5, %v1221_v25, %v1222_v26 }
  0x57   : > { %v667_v47 = vpack.c.b16 %v641_v35, %v640_v30  ;;  %v389_v50 = vor.u32 %v388_v37, %v385_v36  ;;  %v426_v30 = vshll.u32 %v226_v24, 16  ;;  %v1890_v35 = vld [vmem:[%s2003_s7 + $0xa8] sm:$0xff]  ;;  %v431_v55 = vshrl.u32 %v196_v45, 16 }
  0x58   : > { %v1185_v39 = vsel %vm2013_vm5, %v1829_v9, %v1184_v22  ;;  %v1188_v42 = vsel %vm2013_vm5, %v1186_v28, %v1187_v29  ;;  %v1191_v2 = vrot.slane %v197_v49, 5 }
  0x59   : > { %v1268_v53 = vunpack.c.l.b16 %v1188_v42  ;;  %v433_v63 = vrot.slane %v431_v55, 4 }
  0x60   : > { %1810 = vmatmul.msk.bf16.gmra.mxu1 %vm699_vm7, %v1880_v58  ;;  %1861 = vmatmul.msk.bf16.gmra.mxu2 %vm699_vm7, %v1289_v57  ;;  %v390_v57 = vrot.slane %v389_v50, 4  ;;  %v194_v58 = vld [vmem:[%s2003_s7 + $0x54] sm:$0xf]  ;;  %v1267_v50 = vunpack.c.l.b16 %v1185_v39  ;;  %v1884_v39 = vld [vmem:[%s2003_s7 + $0x60] sm:$0xff] }
  0x61   : > { %1718 = vmatmul.msk.bf16.gmra.mxu0 %vm699_vm7, %v666_v3  ;;  %v407_v0 = vshrl.u32 %v194_v58, 16  ;;  %v410_v1 = vshll.u32 %v194_v58, 16  ;;  %v416_v3 = vshll.u32 %v195_v62, 16  ;;  %v444_v58 = vshrl.u32 %v197_v49, 16 }
  0x62   : > { %v395_v15 = vsel %vm2046_vm6, %v390_v57, %v394_v43  ;;  %v428_v43 = vrot.slane %v426_v30, 5  ;;  %v440_v57 = vshll.u32 %v197_v49, 16  ;;  %v1292_v61 = vpack.c.b16 %v1268_v53, %v1267_v50 }
  0x63   : > { %v642_v6 = vunpack.c.l.b16 %v395_v15  ;;  %v409_v7 = vrot.slane %v407_v0, 4  ;;  %v412_v8 = vrot.slane %v410_v1, 5  ;;  %v418_v18 = vrot.slane %v416_v3, 5  ;;  %v1090_v1 = vld [vmem:[%s2003_s7 + $0x60] sm:$0xe] }
  0x64   : > { %v442_v15 = vrot.slane %v440_v57, 5  ;;  %v446_v3 = vrot.slane %v444_v58, 4 }
  0x65   : > { %1818 = vmatmul.msk.bf16.vlgmr.msrb.gmra.mxu3 %vm699_vm7, %v1888_v11  ;;  %v1882_v11 = vld [vmem:[%s2003_s7 + $0x48] sm:$0xff]  ;;  %v413_v40 = vor.u32 %v412_v8, %v409_v7  ;;  %v668_v33 = vpack.c.b16 %v643_v17, %v642_v6  ;;  %v423_v41 = vor.u32 %v422_v19, %v418_v18  ;;  %v1193_v7 = vrot.slane %v1191_v2, 4 }
  0x66   : > { %v1194_v8 = vrot.slane %v227_v16, 5  ;;  %v198_v17 = vld [vmem:[%s2003_s7 + $0x6c] sm:$0xf] }
  0x67   : > { %v424_v36 = vrot.slane %v423_v41, 4  ;;  %v455_v26 = vshrl.u32 %v198_v17, 16 }
  0x68   : > { %v1195_v22 = vsel %vm2013_vm5, %v1193_v7, %v1194_v8 }
  0x69   : > { %v429_v13 = vsel %vm2046_vm6, %v424_v36, %v428_v43  ;;  %v1270_v41 = vunpack.c.l.b16 %v1195_v22 }
  0x6a   : > { %v645_v62 = vunpack.c.l.b16 %v429_v13 }
  0x70   : > { %1811 = vmatmul.msk.bf16.gmra.mxu1 %vm699_vm7, %v1881_v31  ;;  %1862 = vmatmul.msk.bf16.gmra.mxu2 %vm699_vm7, %v1290_v32  ;;  %v1834_v31 = vrot.slane %v1094_v27, 9  ;;  %v414_v32 = vrot.slane %v413_v40, 4  ;;  %v199_v40 = vld [vmem:[%s2003_s7 + $0x70] sm:$0xf] }
  0x71   : > { %1719 = vmatmul.msk.bf16.gmra.mxu0 %vm699_vm7, %v667_v47  ;;  %v1278_v47 = vunpack.c.l.b16 %v1223_v38  ;;  %v464_v28 = vshll.u32 %v199_v40, 16  ;;  %v468_v29 = vshrl.u32 %v199_v40, 16 }
  0x72   : > { %v1220_v37 = vsel %vm2013_vm5, %v1834_v31, %v1219_v5  ;;  %v419_v54 = vsel %vm2046_vm6, %v414_v32, %v418_v18  ;;  %v1830_v5 = vrot.slane %v1090_v1, 9  ;;  %v1891_v18 = vld [vmem:[%s2003_s7 + $0xb4] sm:$0xff]  ;;  %v457_v31 = vrot.slane %v455_v26, 4 }
  0x73   : > { %v1277_v46 = vunpack.c.l.b16 %v1220_v37  ;;  %v644_v59 = vunpack.c.l.b16 %v419_v54  ;;  %v466_v38 = vrot.slane %v464_v28, 5  ;;  %v470_v42 = vrot.slane %v468_v29, 4  ;;  %v229_v28 = vld [vmem:[%s2003_s7 + $0x80] sm:$0x1] }
  0x74   : > { %v1192_v19 = vsel %vm2013_vm5, %v1830_v5, %v1191_v2  ;;  %v2278_v2 = vld [vmem:[%s2003_s7 + $0x7c] sm:$0xf] }
  0x75   : > { %1819 = vmatmul.msk.bf16.gmra.mxu3 %vm699_vm7, %v1889_v56  ;;  %v2239_v52 = vpack.c.b16 %v1278_v47, %v1277_v46  ;;  %v434_v56 = vshll.u32 %v196_v45, 16  ;;  %v669_v4 = vpack.c.b16 %v645_v62, %v644_v59  ;;  %v1269_v9 = vunpack.c.l.b16 %v1192_v19  ;;  %v228_v46 = vld [vmem:[%s2003_s7 + $0x74] sm:$0x1]  ;;  %v1091_v47 = vld [vmem:[%s2003_s7 + $0x6c] sm:$0xe] }
  0x76   : > { %v1198_v45 = vrot.slane %v199_v40, 5  ;;  %v471_v53 = vor.u32 %v470_v42, %v466_v38  ;;  %v1831_v55 = vrot.slane %v1091_v47, 9  ;;  %v1201_v13 = vrot.slane %v228_v46, 5  ;;  %v2272_v59 = vld [vmem:[%s2510_s2] ss:$0 sm:$0xff] }
  0x77   : > { %v436_v0 = vrot.slane %v434_v56, 5  ;;  %v1293_v36 = vpack.c.b16 %v1270_v41, %v1269_v9  ;;  %v474_v57 = vshll.u32 %v228_v46, 16  ;;  %v1226_v62 = vrot.slane %v2075_v34, 5 }
  0x78   : > { %v1200_v56 = vrot.slane %v1198_v45, 4  ;;  %v472_v1 = vrot.slane %v471_v53, 4  ;;  %v492_v19 = vshrl.u32 %v2278_v2, 16  ;;  %v1205_v42 = vrot.slane %v2278_v2, 5 }
  0x79   : > { %v437_v6 = vor.u32 %v436_v0, %v433_v63  ;;  %v476_v5 = vrot.slane %v474_v57, 5  ;;  %v1228_v8 = vrot.slane %v1226_v62, 4  ;;  %v1208_v57 = vrot.slane %v229_v28, 5 }
  0x7b   : > { %v438_v20 = vrot.slane %v437_v6, 4 }
  0x7d   : > { %v443_v27 = vsel %vm2046_vm6, %v438_v20, %v442_v15 }
  0x80   : > { %1812 = vmatmul.msk.bf16.gmra.mxu1 %vm699_vm7, %v1882_v11  ;;  %1863 = vmatmul.msk.bf16.gmra.mxu2 %vm699_vm7, %v1291_v14  ;;  %v447_v11 = vor.u32 %v446_v3, %v442_v15  ;;  %v450_v14 = vshll.u32 %v227_v16, 16  ;;  %v200_v15 = vld [vmem:[%s2003_s7 + $0x78] sm:$0xf]  ;;  %v1199_v16 = vsel %vm2013_vm5, %v1831_v55, %v1198_v45 }
  0x81   : > { %1720 = vmatmul.msk.bf16.gmra.mxu0 %vm699_vm7, %v668_v33  ;;  %v458_v33 = vshll.u32 %v198_v17, 16  ;;  %v482_v17 = vshll.u32 %v200_v15, 16  ;;  %v1271_v22 = vunpack.c.l.b16 %v1199_v16 }
  0x82   : > { %v448_v24 = vrot.slane %v447_v11, 4  ;;  %v452_v25 = vrot.slane %v450_v14, 5  ;;  %v1229_v11 = vrot.slane %v2082_v48, 5  ;;  %v479_v14 = vshrl.u32 %v200_v15, 16 }
  0x83   : > { %v460_v32 = vrot.slane %v458_v33, 5 }
  0x84   : > { %v453_v30 = vsel %vm2046_vm6, %v448_v24, %v452_v25  ;;  %v477_v25 = vsel %vm2046_vm6, %v472_v1, %v476_v5  ;;  %v1230_v9 = vsel %vm2013_vm5, %v1228_v8, %v1229_v11  ;;  %v481_v29 = vrot.slane %v479_v14, 4  ;;  %v2329_v8 = vld [vmem:[%s2003_s7 + $0x88] sm:$0xf] }
  0x85   : > { %1820 = vmatmul.msk.bf16.gmra.mxu3 %vm699_vm7, %v1890_v35  ;;  %v646_v35 = vunpack.c.l.b16 %v443_v27  ;;  %v647_v37 = vunpack.c.l.b16 %v453_v30  ;;  %v461_v49 = vor.u32 %v460_v32, %v457_v31  ;;  %v484_v30 = vrot.slane %v482_v17, 5 }
  0x86   : > { %v494_v32 = vrot.slane %v492_v19, 4  ;;  %v1280_v47 = vunpack.c.l.b16 %v1230_v9 }
  0x87   : > { %v670_v50 = vpack.c.b16 %v647_v37, %v646_v35  ;;  %v649_v37 = vunpack.c.l.b16 %v477_v25  ;;  %v516_v25 = vshrl.u32 %v2329_v8, 16 }
  0x90   : > { %1813 = vmatmul.msk.bf16.gmra.mxu1 %vm699_vm7, %v1883_v60  ;;  %1864 = vmatmul.msk.bf16.gmra.mxu2 %vm699_vm7, %v1292_v61  ;;  %v462_v60 = vrot.slane %v461_v49, 4  ;;  %v1095_v61 = vld [vmem:[%s2003_s7 + $0x9c] sm:$0xe] }
  0x91   : > { %1721 = vmatmul.msk.bf16.gmra.mxu0 %vm699_vm7, %v669_v4  ;;  %v1202_v4 = vsel %vm2013_vm5, %v1200_v56, %v1201_v13  ;;  %v1835_v6 = vrot.slane %v1095_v61, 9  ;;  %v1207_v13 = vrot.slane %v1205_v42, 4 }
  0x92   : > { %v467_v7 = vsel %vm2046_vm6, %v462_v60, %v466_v38  ;;  %v1272_v24 = vunpack.c.l.b16 %v1202_v4  ;;  %v1092_v38 = vld [vmem:[%s2003_s7 + $0x78] sm:$0xe] }
  0x93   : > { %v648_v40 = vunpack.c.l.b16 %v467_v7  ;;  %v1832_v49 = vrot.slane %v1092_v38, 9  ;;  %v1209_v5 = vsel %vm2013_vm5, %v1207_v13, %v1208_v57  ;;  %v1233_v7 = vrot.slane %v2106_v10, 5 }
  0x94   : > { %v512_v10 = vshll.u32 %v2329_v8, 16  ;;  %v518_v38 = vrot.slane %v516_v25, 4  ;;  %v1243_v25 = vrot.slane %v2147_v12, 5 }
  0x95   : > { %1821 = vmatmul.msk.bf16.gmra.mxu3 %vm699_vm7, %v1891_v18  ;;  %v488_v18 = vshll.u32 %v2278_v2, 16  ;;  %v671_v56 = vpack.c.b16 %v649_v37, %v648_v40 }
  0x97   : > { %v490_v31 = vrot.slane %v488_v18, 5  ;;  %v1274_v18 = vunpack.c.l.b16 %v1209_v5  ;;  %v1240_v5 = vrot.slane %v2137_v23, 5 }
  0x99   : > { %v495_v53 = vor.u32 %v494_v32, %v490_v31 }
  0x9b   : > { %v496_v2 = vrot.slane %v495_v53, 4 }
  0x9d   : > { %v1002_v43 = vpop.f32.mrf.mxu1 }
  0x9e   : > { %v761_v54 = vpop.f32.mrf.mxu0 }
  0x9f   : > { %v1003_v58 = vadd.f32 %v1002_v43, %v761_v54  ;;  %v498_v54 = vshll.u32 %v229_v28, 16 }
  0xa0   : > { %1814 = vmatmul.msk.bf16.gmra.mxu1 %vm699_vm7, %v1884_v39  ;;  %1865 = vmatmul.msk.bf16.gmra.mxu2 %vm699_vm7, %v1293_v36  ;;  %v1885_v39 = vld [vmem:[%s2003_s7 + $0x6c] sm:$0xff]  ;;  %v1294_v36 = vpack.c.b16 %v1272_v24, %v1271_v22 }
  0xa1   : > { %1722 = vmatmul.msk.bf16.gmra.mxu0 %vm699_vm7, %v670_v50  ;;  %v485_v50 = vor.u32 %v484_v30, %v481_v29  ;;  %v500_v15 = vrot.slane %v498_v54, 5 }
  0xa3   : > { %v1382_v63 = vpop.f32.mrf.mxu2  ;;  %v486_v1 = vrot.slane %v485_v50, 4 }
  0xa4   : > { %v1462_v0 = vadd.f32 %v1382_v63, %v1003_v58 }
  0xa5   : > { %v1004_v3 = vpop.f32.mrf.mxu1  ;;  %1869 = vmatmul.msk.bf16.vlgmr.msra.gmra.mxu3 %vm699_vm7, %v2239_v52  ;;  %v1227_v52 = vsel %vm2013_vm5, %v1835_v6, %v1226_v62  ;;  %v202_v6 = vld [vmem:[%s2003_s7 + $0x84] sm:$0xf]  ;;  %v491_v19 = vsel %vm2046_vm6, %v486_v1, %v490_v31 }
  0xa6   : > { %v1498_v34 = vadd.f32 %v2272_v59, %v1462_v0  ;;  %v763_v48 = vpop.f32.mrf.mxu0  ;;  %v1279_v46 = vunpack.c.l.b16 %v1227_v52  ;;  %v1206_v0 = vsel %vm2013_vm5, %v1832_v49, %v1205_v42  ;;  %v503_v22 = vshrl.u32 %v202_v6, 16  ;;  %v1093_v49 = vld [vmem:[%s2003_s7 + $0x84] sm:$0xe] }
  0xa7   : > { %v1005_v33 = vadd.f32 %v1004_v3, %v763_v48  ;;  %v2305_v41 = vpop.f32.mrf.mxu3  ;;  %v1096_v3 = vld [vmem:[%s2003_s7 + $0xa8] sm:$0xe]  ;;  %v1273_v14 = vunpack.c.l.b16 %v1206_v0  ;;  %v506_v48 = vshll.u32 %v202_v6, 16 }
  0xa8   : > { %v1530_v20 = vmax.f32 %v1498_v34, 0.0  ;;  %v1298_v16 = vpack.c.b16 %v1280_v47, %v1279_v46  ;;  %v1836_v17 = vrot.slane %v1096_v3, 9  ;;  %v230_v47 = vld [vmem:[%s2003_s7 + $0x8c] sm:$0x1] }
  0xa9   : > { %v1295_v30 = vpack.c.b16 %v1274_v18, %v1273_v14  ;;  %v508_v37 = vrot.slane %v506_v48, 5  ;;  %v1097_v14 = vld [vmem:[%s2003_s7 + $0xb4] sm:$0xe] }
  0xaa   : > { %v1562_v26 = vpack.c.bf16 %v1530_v20, %v1530_v20  ;;  %v501_v20 = vsel %vm2046_vm6, %v496_v2, %v500_v15  ;;  %v1234_v32 = vsel %vm2013_vm5, %v1836_v17, %v1233_v7  ;;  %v1837_v23 = vrot.slane %v1097_v14, 9 }
  0xab   : > { %v1384_v27 = vpop.f32.mrf.mxu2  ;;  %v651_v31 = vunpack.c.l.b16 %v501_v20  ;;  %v1281_v53 = vunpack.c.l.b16 %v1234_v32 }
  0xac   : > { %1595 = vst.msk [vmem:[%s2297_s22] sm:$0xf] %vm1594_vm8, %v1562_v26  ;;  %v1463_v35 = vadd.f32 %v1384_v27, %v1005_v33  ;;  %v1235_v26 = vrot.slane %v1233_v7, 4  ;;  %v1236_v33 = vrot.slane %v2116_v44, 5  ;;  %v650_v27 = vunpack.c.l.b16 %v491_v19 }
  0xad   : > { %v1007_v43 = vpop.f32.mrf.mxu1  ;;  %v514_v44 = vrot.slane %v512_v10, 5  ;;  %v1242_v10 = vrot.slane %v1240_v5, 4  ;;  %v1241_v51 = vsel %vm2013_vm5, %v1837_v23, %v1240_v5 }
  0xae   : > { %v1499_v45 = vadd.f32 %v2272_v59, %v1463_v35  ;;  %v766_v58 = vpop.f32.mrf.mxu0  ;;  %v505_v35 = vrot.slane %v503_v22, 4  ;;  %v672_v50 = vpack.c.b16 %v651_v31, %v650_v27  ;;  %v1887_v27 = vld [vmem:[%s2003_s7 + $0x84] sm:$0xff] }
  0xaf   : > { %v1008_v61 = vadd.f32 %v1007_v43, %v766_v58  ;;  %v2316_v62 = vpop.f32.mrf.mxu3  ;;  %v1237_v43 = vsel %vm2013_vm5, %v1235_v26, %v1236_v33  ;;  %v519_v13 = vor.u32 %v518_v38, %v514_v44  ;;  %v1833_v58 = vrot.slane %v1093_v49, 9 }
  0xb0   : > { %v1531_v55 = vmax.f32 %v1499_v45, 0.0  ;;  %1815 = vmatmul.msk.bf16.gmra.mxu1 %vm699_vm7, %v1885_v39  ;;  %1866 = vmatmul.msk.bf16.gmra.mxu2 %vm699_vm7, %v1294_v36  ;;  %v1886_v36 = vld [vmem:[%s2003_s7 + $0x78] sm:$0xff]  ;;  %v1212_v45 = vrot.slane %v2329_v8, 5  ;;  %v1244_v12 = vsel %vm2013_vm5, %v1242_v10, %v1243_v25 }
  0xb1   : > { %1723 = vmatmul.msk.bf16.gmra.mxu0 %vm699_vm7, %v671_v56  ;;  %v509_v56 = vor.u32 %v508_v37, %v505_v35  ;;  %v520_v8 = vrot.slane %v519_v13, 4  ;;  %v1283_v37 = vunpack.c.l.b16 %v1241_v51 }
  0xb2   : > { %v1563_v60 = vpack.c.bf16 %v1531_v55, %v1531_v55  ;;  %v1282_v55 = vunpack.c.l.b16 %v1237_v43 }
  0xb3   : > { %v1387_v63 = vpop.f32.mrf.mxu2 }
  0xb4   : > { %1596 = vst.msk [vmem:[%s2297_s22 + $0x4] sm:$0xf] %vm1594_vm8, %v1563_v60  ;;  %v1464_v4 = vadd.f32 %v1387_v63, %v1008_v61  ;;  %v1214_v60 = vrot.slane %v1212_v45, 4  ;;  %v1215_v61 = vrot.slane %v230_v47, 5  ;;  %v522_v63 = vshll.u32 %v230_v47, 16 }
  0xb5   : > { %v1009_v34 = vpop.f32.mrf.mxu1  ;;  %1870 = vmatmul.msk.bf16.gmra.mxu3 %vm699_vm7, %v1298_v16  ;;  %v1299_v3 = vpack.c.b16 %v1282_v55, %v1281_v53 }
  0xb6   : > { %v1500_v11 = vadd.f32 %v2272_v59, %v1464_v4  ;;  %v768_v40 = vpop.f32.mrf.mxu0  ;;  %v510_v4 = vrot.slane %v509_v56, 4  ;;  %v1216_v7 = vsel %vm2013_vm5, %v1214_v60, %v1215_v61 }
  0xb7   : > { %v1010_v9 = vadd.f32 %v1009_v34, %v768_v40  ;;  %v1213_v34 = vsel %vm2013_vm5, %v1833_v58, %v1212_v45  ;;  %v1276_v20 = vunpack.c.l.b16 %v1216_v7 }
  0xb8   : > { %v1532_v24 = vmax.f32 %v1500_v11, 0.0  ;;  %v2340_v28 = vpop.f32.mrf.mxu3  ;;  %v524_v11 = vrot.slane %v522_v63, 5  ;;  %v1275_v19 = vunpack.c.l.b16 %v1213_v34 }
  0xba   : > { %v1564_v52 = vpack.c.bf16 %v1532_v24, %v1532_v24  ;;  %v515_v24 = vsel %vm2046_vm6, %v510_v4, %v514_v44  ;;  %v525_v48 = vsel %vm2046_vm6, %v520_v8, %v524_v11  ;;  %v1284_v44 = vunpack.c.l.b16 %v1244_v12 }
  0xbb   : > { %v1389_v29 = vpop.f32.mrf.mxu2  ;;  %v653_v31 = vunpack.c.l.b16 %v525_v48 }
  0xbc   : > { %1597 = vst.msk [vmem:[%s2297_s22 + $0x8] sm:$0xf] %vm1594_vm8, %v1564_v52  ;;  %v1465_v39 = vadd.f32 %v1389_v29, %v1010_v9  ;;  %v1296_v29 = vpack.c.b16 %v1276_v20, %v1275_v19  ;;  %v1300_v21 = vpack.c.b16 %v1284_v44, %v1283_v37 }
  0xbd   : > { %v1012_v42 = vpop.f32.mrf.mxu1 }
  0xbe   : > { %v1501_v46 = vadd.f32 %v2272_v59, %v1465_v39  ;;  %v771_v57 = vpop.f32.mrf.mxu0 }
  0xbf   : > { %v1013_v1 = vadd.f32 %v1012_v42, %v771_v57 }
  0xc0   : > { %v1533_v54 = vmax.f32 %v1501_v46, 0.0  ;;  %1816 = vmatmul.msk.bf16.gmra.mxu1 %vm699_vm7, %v1886_v36  ;;  %1867 = vmatmul.msk.bf16.gmra.mxu2 %vm699_vm7, %v1295_v30  ;;  %v2355_v2 = vpop.f32.mrf.mxu3  ;;  %v652_v30 = vunpack.c.l.b16 %v515_v24 }
  0xc1   : > { %1724 = vmatmul.msk.bf16.gmra.mxu0 %vm699_vm7, %v672_v50 }
  0xc2   : > { %v1565_v0 = vpack.c.bf16 %v1533_v54, %v1533_v54  ;;  %v673_v36 = vpack.c.b16 %v653_v31, %v652_v30 }
  0xc3   : > { %v1392_v15 = vpop.f32.mrf.mxu2 }
  0xc4   : > { %1598 = vst.msk [vmem:[%s2297_s22 + $0xc] sm:$0xf] %vm1594_vm8, %v1565_v0  ;;  %v1466_v16 = vadd.f32 %v1392_v15, %v1013_v1 }
  0xc5   : > { %v1014_v6 = vpop.f32.mrf.mxu1  ;;  %1871 = vmatmul.msk.bf16.gmra.mxu3 %vm699_vm7, %v1299_v3 }
  0xc6   : > { %v1502_v17 = vadd.f32 %v2272_v59, %v1466_v16  ;;  %v773_v22 = vpop.f32.mrf.mxu0 }
  0xc7   : > { %v1015_v26 = vadd.f32 %v1014_v6, %v773_v22 }
  0xc8   : > { %v1534_v18 = vmax.f32 %v1502_v17, 0.0  ;;  %v2373_v33 = vpop.f32.mrf.mxu3 }
  0xca   : > { %v1566_v40 = vpack.c.bf16 %v1534_v18, %v1534_v18 }
  0xcb   : > { %v1394_v52 = vpop.f32.mrf.mxu2 }
  0xcc   : > { %1599 = vst.msk [vmem:[%s2297_s22 + $0x10] sm:$0xf] %vm1594_vm8, %v1566_v40  ;;  %v1467_v9 = vadd.f32 %v1394_v52, %v1015_v26 }
  0xcd   : > { %v1017_v32 = vpop.f32.mrf.mxu1 }
  0xce   : > { %v1503_v35 = vadd.f32 %v2272_v59, %v1467_v9  ;;  %v776_v38 = vpop.f32.mrf.mxu0 }
  0xcf   : > { %v1018_v43 = vadd.f32 %v1017_v32, %v776_v38 }
  0xd0   : > { %v1535_v39 = vmax.f32 %v1503_v35, 0.0  ;;  %1817 = vmatmul.msk.bf16.gmra.mxu1 %vm699_vm7, %v1887_v27  ;;  %1868 = vmatmul.msk.bf16.gmra.mxu2 %vm699_vm7, %v1296_v29  ;;  %v2385_v45 = vpop.f32.mrf.mxu3 }
  0xd1   : > { %1725 = vmatmul.msk.bf16.gmra.mxu0 %vm699_vm7, %v673_v36 }
  0xd2   : > { %v1567_v42 = vpack.c.bf16 %v1535_v39, %v1535_v39 }
  0xd3   : > { %v1397_v46 = vpop.f32.mrf.mxu2 }
  0xd4   : > { %1600 = vst.msk [vmem:[%s2297_s22 + $0x14] sm:$0xf] %vm1594_vm8, %v1567_v42  ;;  %v1468_v47 = vadd.f32 %v1397_v46, %v1018_v43 }
  0xd5   : > { %v1019_v49 = vpop.f32.mrf.mxu1  ;;  %1872 = vmatmul.msk.bf16.gmra.mxu3 %vm699_vm7, %v1300_v21 }
  0xd6   : > { %v1504_v50 = vadd.f32 %v2272_v59, %v1468_v47  ;;  %v778_v54 = vpop.f32.mrf.mxu0 }
  0xd7   : > { %v1020_v56 = vadd.f32 %v1019_v49, %v778_v54 }
  0xd8   : > { %v1536_v53 = vmax.f32 %v1504_v50, 0.0  ;;  %v2392_v13 = vpop.f32.mrf.mxu3 }
  0xda   : > { %v1568_v55 = vpack.c.bf16 %v1536_v53, %v1536_v53 }
  0xdb   : > { %v1399_v57 = vpop.f32.mrf.mxu2 }
  0xdc   : > { %1601 = vst.msk [vmem:[%s2297_s22 + $0x18] sm:$0xf] %vm1594_vm8, %v1568_v55  ;;  %v1469_v58 = vadd.f32 %v1399_v57, %v1020_v56 }
  0xdd   : > { %v1022_v60 = vpop.f32.mrf.mxu1 }
  0xde   : > { %v1505_v61 = vadd.f32 %v2272_v59, %v1469_v58  ;;  %v781_v0 = vpop.f32.mrf.mxu0 }
  0xdf   : > { %v1023_v15 = vadd.f32 %v1022_v60, %v781_v0 }
  0xe0   : > { %v1537_v63 = vmax.f32 %v1505_v61, 0.0  ;;  %v2397_v3 = vpop.f32.mrf.mxu3 }
  0xe2   : > { %v1569_v1 = vpack.c.bf16 %v1537_v63, %v1537_v63 }
  0xe3   : > { %v1402_v16 = vpop.f32.mrf.mxu2 }
  0xe4   : > { %1602 = vst.msk [vmem:[%s2297_s22 + $0x1c] sm:$0xf] %vm1594_vm8, %v1569_v1  ;;  %v1470_v4 = vadd.f32 %v1402_v16, %v1023_v15 }
  0xe5   : > { %v1024_v5 = vpop.f32.mrf.mxu1 }
  0xe6   : > { %v1506_v6 = vadd.f32 %v2272_v59, %v1470_v4  ;;  %v783_v7 = vpop.f32.mrf.mxu0 }
  0xe7   : > { %v1025_v11 = vadd.f32 %v1024_v5, %v783_v7 }
  0xe8   : > { %v1538_v34 = vmax.f32 %v1506_v6, 0.0  ;;  %v2402_v14 = vpop.f32.mrf.mxu3 }
  0xea   : > { %v1570_v8 = vpack.c.bf16 %v1538_v34, %v1538_v34 }
  0xeb   : > { %v1404_v17 = vpop.f32.mrf.mxu2 }
  0xec   : > { %1603 = vst.msk [vmem:[%s2297_s22 + $0x20] sm:$0xf] %vm1594_vm8, %v1570_v8  ;;  %v1471_v18 = vadd.f32 %v1404_v17, %v1025_v11 }
  0xed   : > { %v1027_v19 = vpop.f32.mrf.mxu1 }
  0xee   : > { %v1507_v20 = vadd.f32 %v2272_v59, %v1471_v18  ;;  %v786_v22 = vpop.f32.mrf.mxu0 }
  0xef   : > { %v1028_v48 = vadd.f32 %v1027_v19, %v786_v22 }
  0xf0   : > { %v1539_v23 = vmax.f32 %v1507_v20, 0.0  ;;  %v2407_v10 = vpop.f32.mrf.mxu3 }
  0xf2   : > { %v1571_v24 = vpack.c.bf16 %v1539_v23, %v1539_v23 }
  0xf3   : > { %v1407_v25 = vpop.f32.mrf.mxu2 }
  0xf4   : > { %1604 = vst.msk [vmem:[%s2297_s22 + $0x24] sm:$0xf] %vm1594_vm8, %v1571_v24  ;;  %v1472_v40 = vadd.f32 %v1407_v25, %v1028_v48 }
  0xf5   : > { %v1029_v26 = vpop.f32.mrf.mxu1 }
  0xf6   : > { %v1508_v52 = vadd.f32 %v2272_v59, %v1472_v40  ;;  %v788_v27 = vpop.f32.mrf.mxu0 }
  0xf7   : > { %v1030_v30 = vadd.f32 %v1029_v26, %v788_v27 }
  0xf8   : > { %v1540_v9 = vmax.f32 %v1508_v52, 0.0  ;;  %v2412_v31 = vpop.f32.mrf.mxu3 }
  0xfa   : > { %v1572_v29 = vpack.c.bf16 %v1540_v9, %v1540_v9 }
  0xfb   : > { %v1409_v32 = vpop.f32.mrf.mxu2 }
  0xfc   : > { %1605 = vst.msk [vmem:[%s2297_s22 + $0x28] sm:$0xf] %vm1594_vm8, %v1572_v29  ;;  %v1473_v51 = vadd.f32 %v1409_v32, %v1030_v30  ;;  %v1063_v30 = vadd.f32 %v2402_v14, %v2305_v41  ;;  %v1065_v41 = vadd.f32 %v2407_v10, %v2316_v62 }
  0xfd   : > { %v1032_v12 = vpop.f32.mrf.mxu1 }
  0xfe   : > { %v1509_v35 = vadd.f32 %v2272_v59, %v1473_v51  ;;  %v791_v36 = vpop.f32.mrf.mxu0 }
  0xff   : > { %v1033_v44 = vadd.f32 %v1032_v12, %v791_v36 }
 0x100   : > { %v1541_v39 = vmax.f32 %v1509_v35, 0.0  ;;  %v2417_v38 = vpop.f32.mrf.mxu3 }
 0x102   : > { %v1573_v37 = vpack.c.bf16 %v1541_v39, %v1541_v39 }
 0x103   : > { %v1412_v42 = vpop.f32.mrf.mxu2 }
 0x104   : > { %1606 = vst.msk [vmem:[%s2297_s22 + $0x2c] sm:$0xf] %vm1594_vm8, %v1573_v37  ;;  %v1474_v43 = vadd.f32 %v1412_v42, %v1033_v44 }
 0x105   : > { %v1034_v46 = vpop.f32.mrf.mxu1 }
 0x106   : > { %v1510_v21 = vadd.f32 %v2272_v59, %v1474_v43  ;;  %v793_v49 = vpop.f32.mrf.mxu0 }
 0x107   : > { %v1035_v53 = vadd.f32 %v1034_v46, %v793_v49 }
 0x108   : > { %v1542_v47 = vmax.f32 %v1510_v21, 0.0  ;;  %v2422_v54 = vpop.f32.mrf.mxu3 }
 0x10a   : > { %v1574_v50 = vpack.c.bf16 %v1542_v47, %v1542_v47 }
 0x10b   : > { %v1414_v55 = vpop.f32.mrf.mxu2 }
 0x10c   : > { %1607 = vst.msk [vmem:[%s2297_s22 + $0x30] sm:$0xf] %vm1594_vm8, %v1574_v50  ;;  %v1475_v56 = vadd.f32 %v1414_v55, %v1035_v53 }
 0x10d   : > { %v1037_v57 = vpop.f32.mrf.mxu1 }
 0x10e   : > { %v1511_v58 = vadd.f32 %v2272_v59, %v1475_v56  ;;  %v796_v61 = vpop.f32.mrf.mxu0 }
 0x10f   : > { %v1038_v0 = vadd.f32 %v1037_v57, %v796_v61 }
 0x110   : > { %v1543_v60 = vmax.f32 %v1511_v58, 0.0  ;;  %v2427_v1 = vpop.f32.mrf.mxu3 }
 0x112   : > { %v1575_v63 = vpack.c.bf16 %v1543_v60, %v1543_v60 }
 0x113   : > { %v1417_v15 = vpop.f32.mrf.mxu2 }
 0x114   : > { %1608 = vst.msk [vmem:[%s2297_s22 + $0x34] sm:$0xf] %vm1594_vm8, %v1575_v63  ;;  %v1476_v16 = vadd.f32 %v1417_v15, %v1038_v0  ;;  %v1068_v63 = vadd.f32 %v2412_v31, %v2340_v28 }
 0x115   : > { %v1039_v4 = vpop.f32.mrf.mxu1 }
 0x116   : > { %v1512_v5 = vadd.f32 %v2272_v59, %v1476_v16  ;;  %v798_v34 = vpop.f32.mrf.mxu0 }
 0x117   : > { %v1040_v8 = vadd.f32 %v1039_v4, %v798_v34 }
 0x118   : > { %v1544_v6 = vmax.f32 %v1512_v5, 0.0  ;;  %v2432_v11 = vpop.f32.mrf.mxu3 }
 0x11a   : > { %v1576_v7 = vpack.c.bf16 %v1544_v6, %v1544_v6 }
 0x11b   : > { %v1419_v17 = vpop.f32.mrf.mxu2 }
 0x11c   : > { %1609 = vst.msk [vmem:[%s2297_s22 + $0x38] sm:$0xf] %vm1594_vm8, %v1576_v7  ;;  %v1477_v18 = vadd.f32 %v1419_v17, %v1040_v8 }
 0x11d   : > { %v1042_v19 = vpop.f32.mrf.mxu1 }
 0x11e   : > { %v1513_v20 = vadd.f32 %v2272_v59, %v1477_v18  ;;  %v801_v22 = vpop.f32.mrf.mxu0 }
 0x11f   : > { %v1043_v48 = vadd.f32 %v1042_v19, %v801_v22  ;;  %v1070_v19 = vadd.f32 %v2417_v38, %v2355_v2 }
 0x120   : > { %v1545_v23 = vmax.f32 %v1513_v20, 0.0  ;;  %v2437_v25 = vpop.f32.mrf.mxu3 }
 0x122   : > { %v1577_v24 = vpack.c.bf16 %v1545_v23, %v1545_v23 }
 0x123   : > { %v1422_v40 = vpop.f32.mrf.mxu2 }
 0x124   : > { %1610 = vst.msk [vmem:[%s2297_s22 + $0x3c] sm:$0xf] %vm1594_vm8, %v1577_v24  ;;  %v1478_v26 = vadd.f32 %v1422_v40, %v1043_v48 }
 0x125   : > { %v1044_v52 = vpop.f32.mrf.mxu1 }
 0x126   : > { %v1514_v9 = vadd.f32 %v2272_v59, %v1478_v26  ;;  %v803_v29 = vpop.f32.mrf.mxu0 }
 0x127   : > { %v1045_v51 = vadd.f32 %v1044_v52, %v803_v29 }
 0x128   : > { %v1546_v27 = vmax.f32 %v1514_v9, 0.0  ;;  %v1442_v12 = vpop.f32.mrf.mxu3 }
 0x129   : > { %v1486_v39 = vadd.f32 %v1442_v12, %v1063_v30  ;;  %v1073_v30 = vadd.f32 %v2422_v54, %v2373_v33 }
 0x12a   : > { %v1578_v32 = vpack.c.bf16 %v1546_v27, %v1546_v27 }
 0x12b   : > { %v1424_v35 = vpop.f32.mrf.mxu2  ;;  %v1522_v44 = vadd.f32 %v2272_v59, %v1486_v39 }
 0x12c   : > { %1611 = vst.msk [vmem:[%s2297_s22 + $0x40] sm:$0xf] %vm1594_vm8, %v1578_v32  ;;  %v1479_v36 = vadd.f32 %v1424_v35, %v1045_v51 }
 0x12d   : > { %v1047_v37 = vpop.f32.mrf.mxu1  ;;  %v1554_v43 = vmax.f32 %v1522_v44, 0.0 }
 0x12e   : > { %v1515_v42 = vadd.f32 %v2272_v59, %v1479_v36  ;;  %v806_v21 = vpop.f32.mrf.mxu0 }
 0x12f   : > { %v1586_v14 = vpack.c.bf16 %v1554_v43, %v1554_v43  ;;  %v1048_v49 = vadd.f32 %v1047_v37, %v806_v21  ;;  %v1075_v21 = vadd.f32 %v2427_v1, %v2385_v45 }
 0x130   : > { %v1547_v46 = vmax.f32 %v1515_v42, 0.0  ;;  %v1444_v50 = vpop.f32.mrf.mxu3 }
 0x131   : > { %1619 = vst.msk [vmem:[%s2297_s22 + $0x60] sm:$0xf] %vm1594_vm8, %v1586_v14  ;;  %v1487_v55 = vadd.f32 %v1444_v50, %v1065_v41 }
 0x132   : > { %v1579_v47 = vpack.c.bf16 %v1547_v46, %v1547_v46 }
 0x133   : > { %v1427_v53 = vpop.f32.mrf.mxu2  ;;  %v1523_v58 = vadd.f32 %v2272_v59, %v1487_v55 }
 0x134   : > { %v1480_v56 = vadd.f32 %v1427_v53, %v1048_v49  ;;  %1612 = vst.msk [vmem:[%s2297_s22 + $0x44] sm:$0xf] %vm1594_vm8, %v1579_v47 }
 0x135   : > { %v1049_v57 = vpop.f32.mrf.mxu1  ;;  %v1555_v61 = vmax.f32 %v1523_v58, 0.0 }
 0x136   : > { %v1516_v60 = vadd.f32 %v2272_v59, %v1480_v56  ;;  %v808_v10 = vpop.f32.mrf.mxu0 }
 0x137   : > { %v1587_v0 = vpack.c.bf16 %v1555_v61, %v1555_v61  ;;  %v1050_v16 = vadd.f32 %v1049_v57, %v808_v10  ;;  %v1078_v61 = vadd.f32 %v2432_v11, %v2392_v13  ;;  %v1080_v11 = vadd.f32 %v2437_v25, %v2397_v3 }
 0x138   : > { %v1548_v62 = vmax.f32 %v1516_v60, 0.0  ;;  %v1447_v4 = vpop.f32.mrf.mxu3 }
 0x139   : > { %1620 = vst.msk [vmem:[%s2297_s22 + $0x64] sm:$0xf] %vm1594_vm8, %v1587_v0  ;;  %v1488_v6 = vadd.f32 %v1447_v4, %v1068_v63 }
 0x13a   : > { %v1580_v15 = vpack.c.bf16 %v1548_v62, %v1548_v62 }
 0x13b   : > { %v1429_v5 = vpop.f32.mrf.mxu2  ;;  %v1524_v8 = vadd.f32 %v2272_v59, %v1488_v6 }
 0x13c   : > { %v1481_v34 = vadd.f32 %v1429_v5, %v1050_v16  ;;  %1613 = vst.msk [vmem:[%s2297_s22 + $0x48] sm:$0xf] %vm1594_vm8, %v1580_v15 }
 0x13d   : > { %v1052_v7 = vpop.f32.mrf.mxu1  ;;  %v1556_v18 = vmax.f32 %v1524_v8, 0.0 }
 0x13e   : > { %v1517_v17 = vadd.f32 %v2272_v59, %v1481_v34  ;;  %v811_v31 = vpop.f32.mrf.mxu0 }
 0x13f   : > { %v1588_v20 = vpack.c.bf16 %v1556_v18, %v1556_v18  ;;  %v1053_v22 = vadd.f32 %v1052_v7, %v811_v31 }
 0x140   : > { %v1549_v28 = vmax.f32 %v1517_v17, 0.0  ;;  %v1449_v24 = vpop.f32.mrf.mxu3 }
 0x141   : > { %1621 = vst.msk [vmem:[%s2297_s22 + $0x68] sm:$0xf] %vm1594_vm8, %v1588_v20  ;;  %v1489_v40 = vadd.f32 %v1449_v24, %v1070_v19 }
 0x142   : > { %v1581_v23 = vpack.c.bf16 %v1549_v28, %v1549_v28 }
 0x143   : > { %v1432_v48 = vpop.f32.mrf.mxu2  ;;  %v1525_v9 = vadd.f32 %v2272_v59, %v1489_v40 }
 0x144   : > { %v1482_v26 = vadd.f32 %v1432_v48, %v1053_v22  ;;  %1614 = vst.msk [vmem:[%s2297_s22 + $0x4c] sm:$0xf] %vm1594_vm8, %v1581_v23 }
 0x145   : > { %v1054_v52 = vpop.f32.mrf.mxu1  ;;  %v1557_v29 = vmax.f32 %v1525_v9, 0.0 }
 0x146   : > { %v1518_v27 = vadd.f32 %v2272_v59, %v1482_v26  ;;  %v813_v38 = vpop.f32.mrf.mxu0 }
 0x147   : > { %v1589_v32 = vpack.c.bf16 %v1557_v29, %v1557_v29  ;;  %v1055_v12 = vadd.f32 %v1054_v52, %v813_v38 }
 0x148   : > { %v1550_v2 = vmax.f32 %v1518_v27, 0.0  ;;  %v1452_v35 = vpop.f32.mrf.mxu3 }
 0x149   : > { %1622 = vst.msk [vmem:[%s2297_s22 + $0x6c] sm:$0xf] %vm1594_vm8, %v1589_v32  ;;  %v1490_v36 = vadd.f32 %v1452_v35, %v1073_v30 }
 0x14a   : > { %v1582_v51 = vpack.c.bf16 %v1550_v2, %v1550_v2 }
 0x14b   : > { %v1434_v39 = vpop.f32.mrf.mxu2  ;;  %v1526_v42 = vadd.f32 %v2272_v59, %v1490_v36 }
 0x14c   : > { %v1483_v37 = vadd.f32 %v1434_v39, %v1055_v12  ;;  %1615 = vst.msk [vmem:[%s2297_s22 + $0x50] sm:$0xf] %vm1594_vm8, %v1582_v51 }
 0x14d   : > { %v1057_v44 = vpop.f32.mrf.mxu1  ;;  %v1558_v46 = vmax.f32 %v1526_v42, 0.0 }
 0x14e   : > { %v1519_v43 = vadd.f32 %v2272_v59, %v1483_v37  ;;  %v816_v54 = vpop.f32.mrf.mxu0 }
 0x14f   : > { %v1590_v41 = vpack.c.bf16 %v1558_v46, %v1558_v46  ;;  %v1058_v47 = vadd.f32 %v1057_v44, %v816_v54 }
 0x150   : > { %v1551_v33 = vmax.f32 %v1519_v43, 0.0  ;;  %v1454_v49 = vpop.f32.mrf.mxu3 }
 0x151   : > { %1623 = vst.msk [vmem:[%s2297_s22 + $0x70] sm:$0xf] %vm1594_vm8, %v1590_v41  ;;  %v1491_v53 = vadd.f32 %v1454_v49, %v1075_v21 }
 0x152   : > { %v1583_v14 = vpack.c.bf16 %v1551_v33, %v1551_v33 }
 0x153   : > { %v1437_v50 = vpop.f32.mrf.mxu2  ;;  %v1527_v56 = vadd.f32 %v2272_v59, %v1491_v53 }
 0x154   : > { %v1484_v55 = vadd.f32 %v1437_v50, %v1058_v47  ;;  %1616 = vst.msk [vmem:[%s2297_s22 + $0x54] sm:$0xf] %vm1594_vm8, %v1583_v14 }
 0x155   : > { %v1059_v58 = vpop.f32.mrf.mxu1  ;;  %v1559_v60 = vmax.f32 %v1527_v56, 0.0 }
 0x156   : > { %v1520_v57 = vadd.f32 %v2272_v59, %v1484_v55  ;;  %v818_v1 = vpop.f32.mrf.mxu0 }
 0x157   : > { %v1591_v62 = vpack.c.bf16 %v1559_v60, %v1559_v60  ;;  %v1060_v63 = vadd.f32 %v1059_v58, %v818_v1 }
 0x158   : > { %v1552_v45 = vmax.f32 %v1520_v57, 0.0  ;;  %v1457_v0 = vpop.f32.mrf.mxu3 }
 0x159   : > { %1624 = vst.msk [vmem:[%s2297_s22 + $0x74] sm:$0xf] %vm1594_vm8, %v1591_v62  ;;  %v1492_v16 = vadd.f32 %v1457_v0, %v1078_v61 }
 0x15a   : > { %v1584_v10 = vpack.c.bf16 %v1552_v45, %v1552_v45 }
 0x15b   : > { %v1439_v15 = vpop.f32.mrf.mxu2  ;;  %v1528_v5 = vadd.f32 %v2272_v59, %v1492_v16 }
 0x15c   : > { %v1485_v4 = vadd.f32 %v1439_v15, %v1060_v63  ;;  %1617 = vst.msk [vmem:[%s2297_s22 + $0x58] sm:$0xf] %vm1594_vm8, %v1584_v10 }
 0x15d   : > { %v1560_v34 = vmax.f32 %v1528_v5, 0.0 }
 0x15e   : > { %v1521_v6 = vadd.f32 %v2272_v59, %v1485_v4 }
 0x15f   : > { %v1592_v7 = vpack.c.bf16 %v1560_v34, %v1560_v34 }
 0x160   : > { %v1553_v13 = vmax.f32 %v1521_v6, 0.0  ;;  %v1459_v17 = vpop.f32.mrf.mxu3 }
 0x161   : > { %1625 = vst.msk [vmem:[%s2297_s22 + $0x78] sm:$0xf] %vm1594_vm8, %v1592_v7  ;;  %v1493_v18 = vadd.f32 %v1459_v17, %v1080_v11 }
 0x162   : > { %v1585_v8 = vpack.c.bf16 %v1553_v13, %v1553_v13 }
 0x163   : > { %v1529_v28 = vadd.f32 %v2272_v59, %v1493_v18 }
 0x164   : > { %1618 = vst.msk [vmem:[%s2297_s22 + $0x5c] sm:$0xf] %vm1594_vm8, %v1585_v8 }
 0x165   : > { %v1561_v31 = vmax.f32 %v1529_v28, 0.0 }
 0x167   : > { %v1593_v19 = vpack.c.bf16 %v1561_v31, %v1561_v31 }
 0x169   : > { %1626 = vst.msk [vmem:[%s2297_s22 + $0x7c] sm:$0xf] %vm1594_vm8, %v1593_v19 }
 0x16a PF: > { %s13_s12 = sadd.s32 1, %s1929_s12  }
 0x16b   : > { %p10_p4 = scmp.ge.s32.totalorder %s13_s12, 4  }
 0x16d   :  { %12 = sbr.rel (!%p10_p4) target bundleno = 1 (0x1), region = 64 }

// kernel: apply.7
= control target key start
LH: loop header
LB: loop body
LE: loop exit
PB: predicated region body
PF: predicated region fallthrough
CT: control target
= control target key end

     0   :  { %9 = vsyncpa [#allocation3], 0  ;;  %s3880_s0 = inlined_call_operand.vmem [shape: bf16[512,112], index: 0, kind: input, shape index: {}]   ;;  %s3881_s1 = inlined_call_operand.vmem [shape: bf16[112,640], index: 1, kind: input, shape index: {}]   ;;  %s3882_s2 = inlined_call_operand.vmem [shape: f32[1,640], index: 2, kind: input, shape index: {}]   ;;  %s3883_s3 = inlined_call_operand.vmem [shape: bf16[512,640], index: 3, kind: input, shape index: {}]   ;;  %s3884_s4 = inlined_call_operand.hbm [shape: f32[512,640], index: 4, kind: output, shape index: {}]  }
   0x1   :  { %11 = vsyncpa [#allocation3 + $0x1], 0  ;;  %s2900_s15 = smov 0   ;;  %s2902_s16 = smov 0  }
   0x2   :  { %s2904_s17 = smov 0   ;;  %s2906_s18 = smov 0  }
   0x3   :  { %s2908_s19 = smov 0   ;;  %s2910_s20 = smov 0  }
   0x4 LB: > { %s2332_s21 = sadd.s32 4294967295, %s2871_s20   ;;  %s2333_s22 = sadd.s32 4294967294, %s2871_s20   ;;  %s2871_s20 = sphi %s2910_s20, %s17_s20   ;;  %s2867_s19 = sphi %s2908_s19, %s3891_s19   ;;  %s2863_s18 = sphi %s2906_s18, %s3890_s18   ;;  %s2859_s17 = sphi %s2904_s17, %s3889_s17   ;;  %s2855_s16 = sphi %s2902_s16, %s3888_s16   ;;  %s2851_s15 = sphi %s2900_s15, %s3887_s15  }
   0x5   : > { %s29_s23 = sadd.s32 1, %s2867_s19  ;;  %s144_s24 = sadd.s32 1, %s2859_s17 }
   0x6   : > { %p31_p0 = scmp.ge.s32.totalorder %s29_s23, 2  ;;  %p154_p1 = scmp.ne.s32.totalorder %s2859_s17, %s2855_s16 }
   0x7   : > { %p155_p2 = scmp.eq.s32.totalorder %s2332_s21, 1  ;;  %p160_p3 = scmp.ne.s32.totalorder %s2855_s16, %s2851_s15 }
   0x8   : > { %s3893_s23 = smov (%p31_p0, %s29_s23), 0  ;;  %p161_p5 = scmp.eq.s32.totalorder %s2333_s22, 1 }
   0x9   : > { %p2940_p4 = por %p155_p2, %p154_p1  ;;  %s139_s26 = ssub.s32 %s2867_s19, %s3893_s23 }
   0xa   : > { %p2338_p6 = scmp.ge.s32.totalorder %s2871_s20, 1  ;;  %p142_p7 = scmp.eq.s32.totalorder %s139_s26, 0 }
   0xb   : > { %p2947_p8 = por %p161_p5, %p160_p3  ;;  %p220_p9 = scmp.lt.s32.totalorder %s2871_s20, 3 }
   0xc   : > { %s2953_s28 = scalar_select %p142_p7, %s2859_s17, %s144_s24  }
   0xd   : > { %p221_p10 = pnand %p2338_p6, %p220_p9 }
   0xe   : > { %s2339_s29 = sshll.u32 (!%p221_p10), %s2863_s18, 5  ;;  %s2813_s7 = scalar_lea.hbm (!%p221_p10), %s3884_s4, 2560 }
   0xf   : > { %224 = sbr.rel (%p221_p10) target bundleno = 510 (0x1fe), region = 36  ;;  %p266_p11 = scmp.lt.s32.totalorder (!%p221_p10), %s2339_s29, 63 }
  0x14   : > { %v2529_v0 = vld [vmem:[%s3881_s1 + $0xf0] sm:$0xf]  ;;  %v2680_v1 = vld [vmem:[%s3881_s1 + $0x100] sm:$0xf0]  ;;  %v2509_v2 = vld [vmem:[%s3881_s1 + $0xc8] sm:$0xf] }
  0x15   : > { %v2530_v3 = vor.u32 %v2680_v1, %v2529_v0  ;;  %v2675_v4 = vld [vmem:[%s3881_s1 + $0xd8] sm:$0xf0]  ;;  %v2489_v6 = vld [vmem:[%s3881_s1 + $0xa0] sm:$0xf]  ;;  %v2670_v7 = vld [vmem:[%s3881_s1 + $0xb0] sm:$0xf0] }
  0x16   : > { %v2510_v5 = vor.u32 %v2675_v4, %v2509_v2  ;;  %v2490_v8 = vor.u32 %v2670_v7, %v2489_v6  ;;  %v2469_v9 = vld [vmem:[%s3881_s1 + $0x78] sm:$0xf]  ;;  %v2665_v10 = vld [vmem:[%s3881_s1 + $0x88] sm:$0xf0]  ;;  %v2449_v12 = vld [vmem:[%s3881_s1 + $0x50] sm:$0xf] }
  0x17   : > { %695 = vmatpush.bf16.msra.mxu0 %v2530_v3  ;;  %2683 = vmatpush.bf16.msra.mxu1 %v2530_v3  ;;  %v2470_v11 = vor.u32 %v2665_v10, %v2469_v9  ;;  %v2660_v13 = vld [vmem:[%s3881_s1 + $0x60] sm:$0xf0]  ;;  %v2429_v15 = vld [vmem:[%s3881_s1 + $0x28] sm:$0xf]  ;;  %v2655_v16 = vld [vmem:[%s3881_s1 + $0x38] sm:$0xf0] }
  0x18   : > { %2684 = vmatpush.bf16.msra.mxu2 %v2530_v3  ;;  %2685 = vmatpush.bf16.msra.mxu3 %v2530_v3  ;;  %v2450_v14 = vor.u32 %v2660_v13, %v2449_v12  ;;  %s3895_s29 = smov (!%p266_p11, %s2339_s29), 63  ;;  %v2430_v17 = vor.u32 %v2655_v16, %v2429_v15  ;;  %v2409_v18 = vld [vmem:[%s3881_s1] sm:$0xf]  ;;  %v2650_v19 = vld [vmem:[%s3881_s1 + $0x10] sm:$0xf0]  ;;  %vm645_vm0 = vcmask 916480  }
  0x19   : > { %s2340_s22 = sshll.u32 %s3895_s29, 2  ;;  %v2537_v20 = vld [vmem:[%s3881_s1 + $0xf8] sm:$0xf]  ;;  %v2681_v21 = vld [vmem:[%s3881_s1 + $0x108] sm:$0xf0]  ;;  %v2410_v24 = vor.u32 %v2650_v19, %v2409_v18 }
  0x1a   : > { %v2679_v22 = vld [vmem:[%s3881_s1 + $0xfc] sm:$0xf]  ;;  %v2539_v23 = vld [vmem:[%s3881_s1 + $0x10c] sm:$0xf0]  ;;  %s3016_s12 = scalar_lea.vmem %s3880_s0, %s2340_s22  ;;  %v2678_v25 = vld [vmem:[%s3881_s1 + $0xf4] sm:$0xf]  ;;  %v2538_v29 = vor.u32 %v2681_v21, %v2537_v20 }
  0x1b   : > { %696 = vmatpush.bf16.msra.mxu0 %v2510_v5  ;;  %2686 = vmatpush.bf16.msra.mxu1 %v2510_v5  ;;  %v2531_v26 = vld [vmem:[%s3881_s1 + $0x104] sm:$0xf0]  ;;  %v2545_v27 = vld [vmem:[%s3881_s1 + $0x100] sm:$0xf]  ;;  %v2682_v28 = vld [vmem:[%s3881_s1 + $0x110] sm:$0xf0]  ;;  %v2542_v30 = vor.u32 %v2679_v22, %v2539_v23 }
  0x1c   : > { %2687 = vmatpush.bf16.msra.mxu2 %v2510_v5  ;;  %2688 = vmatpush.bf16.msra.mxu3 %v2510_v5  ;;  %v2517_v31 = vld [vmem:[%s3881_s1 + $0xd0] sm:$0xf]  ;;  %v2676_v32 = vld [vmem:[%s3881_s1 + $0xe0] sm:$0xf0]  ;;  %v2674_v33 = vld [vmem:[%s3881_s1 + $0xd4] sm:$0xf]  ;;  %v2534_v39 = vor.u32 %v2678_v25, %v2531_v26  ;;  %v2546_v40 = vor.u32 %v2682_v28, %v2545_v27 }
  0x1d   : > { %v3040_v34 = vld [vmem:[%s3016_s12] sm:$0xff]  ;;  %v2519_v36 = vld [vmem:[%s3881_s1 + $0xe4] sm:$0xf0]  ;;  %v2673_v41 = vld [vmem:[%s3881_s1 + $0xcc] sm:$0xf]  ;;  %v2518_v43 = vor.u32 %v2676_v32, %v2517_v31  ;;  %s2705_s22 = smul.u32 20, %s3895_s29 }
  0x1e   : > { %v3043_v35 = vld [vmem:[%s3016_s12 + $0x20] sm:$0xff]  ;;  %v2522_v44 = vor.u32 %v2674_v33, %v2519_v36  ;;  %v2525_v45 = vld [vmem:[%s3881_s1 + $0xd8] sm:$0xf]  ;;  %v2677_v46 = vld [vmem:[%s3881_s1 + $0xe8] sm:$0xf0]  ;;  %s262_s29 = sand.u32 1, %s2855_s16  }
  0x1f   : > { %697 = vmatpush.bf16.msra.mxu0 %v2490_v8  ;;  %2689 = vmatpush.bf16.msra.mxu1 %v2490_v8  ;;  %v3049_v37 = vld [vmem:[%s3016_s12 + $0x40] sm:$0xff]  ;;  %v2497_v47 = vld [vmem:[%s3881_s1 + $0xa8] sm:$0xf]  ;;  %v2671_v48 = vld [vmem:[%s3881_s1 + $0xb8] sm:$0xf0]  ;;  %v2526_v52 = vor.u32 %v2677_v46, %v2525_v45  ;;  %s3266_s9 = scalar_lea.vmem %s3883_s3, %s2705_s22  ;;  %s2704_s10 = smul.u32 1280, %s262_s29 }
  0x20   : > { %2690 = vmatpush.bf16.msra.mxu2 %v2490_v8  ;;  %2691 = vmatpush.bf16.msra.mxu3 %v2490_v8  ;;  %v2644_v38 = vld [vmem:[%s3016_s12 + $0x60] sm:$0xff]  ;;  %v2669_v49 = vld [vmem:[%s3881_s1 + $0xac] sm:$0xf]  ;;  %v2491_v54 = vld [vmem:[%s3881_s1 + $0xb4] sm:$0xf0]  ;;  %v2498_v55 = vor.u32 %v2671_v48, %v2497_v47  ;;  %s2196_s26 = scalar_lea.sflag [#allocation3], %s262_s29 }
  0x21   : > { %v2511_v42 = vld [vmem:[%s3881_s1 + $0xdc] sm:$0xf0]  ;;  %v2668_v53 = vld [vmem:[%s3881_s1 + $0xa4] sm:$0xf]  ;;  %v2505_v57 = vld [vmem:[%s3881_s1 + $0xb0] sm:$0xf] }
  0x22   : > { %v2499_v50 = vld [vmem:[%s3881_s1 + $0xbc] sm:$0xf0]  ;;  %v2514_v51 = vor.u32 %v2673_v41, %v2511_v42  ;;  %v2672_v58 = vld [vmem:[%s3881_s1 + $0xc0] sm:$0xf0]  ;;  %v2666_v60 = vld [vmem:[%s3881_s1 + $0x90] sm:$0xf0]  ;;  %v2494_v63 = vor.u32 %v2668_v53, %v2491_v54 }
  0x23   : > { %698 = vmatpush.bf16.msra.mxu0 %v2470_v11  ;;  %2692 = vmatpush.bf16.msra.mxu1 %v2470_v11  ;;  %v2502_v56 = vor.u32 %v2669_v49, %v2499_v50  ;;  %v2477_v59 = vld [vmem:[%s3881_s1 + $0x80] sm:$0xf]  ;;  %v2664_v61 = vld [vmem:[%s3881_s1 + $0x84] sm:$0xf]  ;;  %v2479_v62 = vld [vmem:[%s3881_s1 + $0x94] sm:$0xf0]  ;;  %v2506_v0 = vor.u32 %v2672_v58, %v2505_v57 }
  0x24   : > { %2693 = vmatpush.bf16.msra.mxu2 %v2470_v11  ;;  %2694 = vmatpush.bf16.msra.mxu3 %v2470_v11  ;;  %v2663_v1 = vld [vmem:[%s3881_s1 + $0x7c] sm:$0xf]  ;;  %v2471_v2 = vld [vmem:[%s3881_s1 + $0x8c] sm:$0xf0]  ;;  %v2478_v3 = vor.u32 %v2666_v60, %v2477_v59  ;;  %v2482_v4 = vor.u32 %v2664_v61, %v2479_v62  ;;  %v2485_v5 = vld [vmem:[%s3881_s1 + $0x88] sm:$0xf] }
  0x25   : > { %v2667_v6 = vld [vmem:[%s3881_s1 + $0x98] sm:$0xf0]  ;;  %v2457_v7 = vld [vmem:[%s3881_s1 + $0x58] sm:$0xf]  ;;  %v2661_v8 = vld [vmem:[%s3881_s1 + $0x68] sm:$0xf0]  ;;  %v2474_v13 = vor.u32 %v2663_v1, %v2471_v2 }
  0x26   : > { %v2659_v9 = vld [vmem:[%s3881_s1 + $0x5c] sm:$0xf]  ;;  %v2459_v10 = vld [vmem:[%s3881_s1 + $0x6c] sm:$0xf0]  ;;  %v3132_v11 = vld [vmem:[%s3016_s12 + $0x8] sm:$0xff]  ;;  %s3299_s11 = scalar_lea.vmem [#allocation2], %s2704_s10 }
  0x27   : > { %699 = vmatpush.bf16.msra.mxu0 %v2450_v14  ;;  %2695 = vmatpush.bf16.msra.mxu1 %v2450_v14  ;;  %v3135_v12 = vld [vmem:[%s3016_s12 + $0x28] sm:$0xff]  ;;  %v2658_v15 = vld [vmem:[%s3881_s1 + $0x54] sm:$0xf]  ;;  %v2462_v18 = vor.u32 %v2659_v9, %v2459_v10  ;;  %v2465_v19 = vld [vmem:[%s3881_s1 + $0x60] sm:$0xf]  ;;  %s2211_s21 = sshll.u32 %s3299_s11, 4  ;;  %s2212_s21 = int_to_ptr.vmem [resolvable:$true] %s2211_s21 }
  0x28   : > { %2696 = vmatpush.bf16.msra.mxu2 %v2450_v14  ;;  %2697 = vmatpush.bf16.msra.mxu3 %v2450_v14  ;;  %v2486_v14 = vor.u32 %v2667_v6, %v2485_v5  ;;  %v2451_v16 = vld [vmem:[%s3881_s1 + $0x64] sm:$0xf0]  ;;  %v2662_v20 = vld [vmem:[%s3881_s1 + $0x70] sm:$0xf0]  ;;  %v2437_v21 = vld [vmem:[%s3881_s1 + $0x30] sm:$0xf] }
  0x29   : > { %v2656_v22 = vld [vmem:[%s3881_s1 + $0x40] sm:$0xf0]  ;;  %v2654_v23 = vld [vmem:[%s3881_s1 + $0x34] sm:$0xf]  ;;  %v3162_v25 = vld [vmem:[%s3016_s12 + $0x48] sm:$0xff]  ;;  %v2454_v27 = vor.u32 %v2658_v15, %v2451_v16  ;;  %v2466_v28 = vor.u32 %v2662_v20, %v2465_v19 }
  0x2a   : > { %v2645_v26 = vld [vmem:[%s3016_s12 + $0x68] sm:$0xff]  ;;  %v2431_v32 = vld [vmem:[%s3881_s1 + $0x3c] sm:$0xf0]  ;;  %v2445_v33 = vld [vmem:[%s3881_s1 + $0x38] sm:$0xf] }
  0x2b   : > { %700 = vmatpush.bf16.msra.mxu0 %v2430_v17  ;;  %2698 = vmatpush.bf16.msra.mxu1 %v2430_v17  ;;  %v2653_v31 = vld [vmem:[%s3881_s1 + $0x2c] sm:$0xf]  ;;  %v2648_v45 = vld [vmem:[%s3881_s1 + $0x4] sm:$0xf]  ;;  %v2411_v47 = vld [vmem:[%s3881_s1 + $0x14] sm:$0xf0] }
  0x2c   : > { %2699 = vmatpush.bf16.msra.mxu2 %v2430_v17  ;;  %2700 = vmatpush.bf16.msra.mxu3 %v2430_v17  ;;  %v2458_v17 = vor.u32 %v2661_v8, %v2457_v7  ;;  %v2434_v36 = vor.u32 %v2653_v31, %v2431_v32  ;;  %v2425_v48 = vld [vmem:[%s3881_s1 + $0x10] sm:$0xf]  ;;  %v2652_v49 = vld [vmem:[%s3881_s1 + $0x20] sm:$0xf0]  ;;  %v2414_v50 = vor.u32 %v2648_v45, %v2411_v47  ;;  %v3224_v57 = vld [vmem:[%s3016_s12 + $0x38] sm:$0xff] }
  0x2d   : > { %v3210_v53 = vld [vmem:[%s3016_s12 + $0x30] sm:$0xff]  ;;  %v2643_v58 = vld [vmem:[%s3016_s12 + $0x58] sm:$0xff]  ;;  %v3272_v62 = vld [vmem:[%s3266_s9] sm:$0xff] }
  0x2e   : > { %v3213_v54 = vld [vmem:[%s3016_s12 + $0x50] sm:$0xff]  ;;  %v2647_v59 = vld [vmem:[%s3016_s12 + $0x78] sm:$0xff]  ;;  %v1371_v15 = vld [vmem:[%s3266_s9 + $0x1e0] sm:$0xff] }
  0x2f   : > { %701 = vmatpush.bf16.msra.mxu0 %v2410_v24  ;;  %2701 = vmatpush.bf16.msra.mxu1 %v2410_v24  ;;  %v3294_v19 = vld [vmem:[%s3266_s9 + $0x14] sm:$0xff] }
  0x30   : > { %2702 = vmatpush.bf16.msra.mxu2 %v2410_v24  ;;  %2703 = vmatpush.bf16.msra.mxu3 %v2410_v24  ;;  %v2439_v24 = vld [vmem:[%s3881_s1 + $0x44] sm:$0xf0]  ;;  %v1400_v31 = vunpack.c.l.bf16 %v3294_v19 }
  0x32   : > { %2547 = vmatmul.msk.bf16.vlgmr.msra.gmra.mxu0 %vm645_vm0, %v3040_v34  ;;  %2551 = vmatmul.msk.bf16.vlgmr.msra.gmra.mxu1 %vm645_vm0, %v3043_v35 }
  0x33   : > { %2555 = vmatmul.msk.bf16.vlgmr.msra.gmra.mxu2 %vm645_vm0, %v3049_v37  ;;  %2559 = vmatmul.msk.bf16.vlgmr.msra.gmra.mxu3 %vm645_vm0, %v2644_v38  ;;  %v2657_v38 = vld [vmem:[%s3881_s1 + $0x48] sm:$0xf0] }
  0x34   : > { %873 = vmatpush.bf16.msrb.mxu2 %v2538_v29  ;;  %962 = vmatpush.bf16.msrb.mxu3 %v2542_v30  ;;  %v2438_v29 = vor.u32 %v2656_v22, %v2437_v21  ;;  %v2442_v30 = vor.u32 %v2654_v23, %v2439_v24  ;;  %v2446_v41 = vor.u32 %v2657_v38, %v2445_v33  ;;  %v1326_v21 = vld [vmem:[%s3266_s9 + $0xb4] sm:$0xff] }
  0x35   : > { %784 = vmatpush.bf16.msrb.mxu1 %v2534_v39  ;;  %1051 = vmatpush.bf16.msrb.mxu0 %v2546_v40  ;;  %v2417_v39 = vld [vmem:[%s3881_s1 + $0x8] sm:$0xf]  ;;  %v2651_v40 = vld [vmem:[%s3881_s1 + $0x18] sm:$0xf0]  ;;  %v1440_v33 = vunpack.c.l.bf16 %v1326_v21 }
  0x36   : > { %v2418_v42 = vor.u32 %v2651_v40, %v2417_v39  ;;  %v1353_v21 = vld [vmem:[%s3266_s9 + $0x168] sm:$0xff] }
  0x38   : > { %874 = vmatpush.bf16.msrb.mxu2 %v2518_v43  ;;  %963 = vmatpush.bf16.msrb.mxu3 %v2522_v44  ;;  %v2649_v43 = vld [vmem:[%s3881_s1 + $0xc] sm:$0xf]  ;;  %v2419_v44 = vld [vmem:[%s3881_s1 + $0x1c] sm:$0xf0] }
  0x39   : > { %785 = vmatpush.bf16.msrb.mxu1 %v2514_v51  ;;  %1052 = vmatpush.bf16.msrb.mxu0 %v2526_v52  ;;  %v2422_v46 = vor.u32 %v2649_v43, %v2419_v44  ;;  %v2426_v51 = vor.u32 %v2652_v49, %v2425_v48  ;;  %v2634_v52 = vld [vmem:[%s3016_s12 + $0x10] sm:$0xff] }
  0x3a   : > { %v1374_v48 = vld [vmem:[%s3266_s9 + $0x1f4] sm:$0xff] }
  0x3c   : > { %875 = vmatpush.bf16.msrb.mxu2 %v2498_v55  ;;  %964 = vmatpush.bf16.msrb.mxu3 %v2502_v56  ;;  %v2646_v55 = vld [vmem:[%s3016_s12 + $0x70] sm:$0xff]  ;;  %v2635_v56 = vld [vmem:[%s3016_s12 + $0x18] sm:$0xff] }
  0x3d   : > { %786 = vmatpush.bf16.msrb.mxu1 %v2494_v63  ;;  %1053 = vmatpush.bf16.msrb.mxu0 %v2506_v0  ;;  %v1323_v0 = vld [vmem:[%s3266_s9 + $0xa0] sm:$0xff] }
  0x3e   : > { %v1435_v6 = vunpack.c.l.bf16 %v1323_v0 }
  0x40   : > { %876 = vmatpush.bf16.msrb.mxu2 %v2478_v3  ;;  %965 = vmatpush.bf16.msrb.mxu3 %v2482_v4  ;;  %v1395_v4 = vunpack.c.l.bf16 %v3272_v62 }
  0x41   : > { %787 = vmatpush.bf16.msrb.mxu1 %v2474_v13  ;;  %1054 = vmatpush.bf16.msrb.mxu0 %v2486_v14  ;;  %v1347_v13 = vld [vmem:[%s3266_s9 + $0x140] sm:$0xff] }
  0x42   : > { %2548 = vmatmul.msk.bf16.gmra.mxu0 %vm645_vm0, %v3132_v11  ;;  %2552 = vmatmul.msk.bf16.gmra.mxu1 %vm645_vm0, %v3135_v12 }
  0x43   : > { %2556 = vmatmul.msk.bf16.gmra.mxu2 %vm645_vm0, %v3162_v25  ;;  %2560 = vmatmul.msk.bf16.gmra.mxu3 %vm645_vm0, %v2645_v26 }
  0x44   : > { %877 = vmatpush.bf16.msrb.mxu2 %v2458_v17  ;;  %966 = vmatpush.bf16.msrb.mxu3 %v2462_v18 }
  0x45   : > { %788 = vmatpush.bf16.msrb.mxu1 %v2454_v27  ;;  %1055 = vmatpush.bf16.msrb.mxu0 %v2466_v28  ;;  %v1475_v27 = vunpack.c.l.bf16 %v1347_v13 }
  0x48   : > { %878 = vmatpush.bf16.msrb.mxu2 %v2438_v29  ;;  %967 = vmatpush.bf16.msrb.mxu3 %v2442_v30  ;;  %v1515_v29 = vunpack.c.l.bf16 %v1371_v15 }
  0x49   : > { %789 = vmatpush.bf16.msrb.mxu1 %v2434_v36  ;;  %1056 = vmatpush.bf16.msrb.mxu0 %v2446_v41 }
  0x4c   : > { %879 = vmatpush.bf16.msrb.mxu2 %v2418_v42  ;;  %968 = vmatpush.bf16.msrb.mxu3 %v2422_v46  ;;  %v1350_v46 = vld [vmem:[%s3266_s9 + $0x154] sm:$0xff] }
  0x4d   : > { %790 = vmatpush.bf16.msrb.mxu1 %v2414_v50  ;;  %1057 = vmatpush.bf16.msrb.mxu0 %v2426_v51 }
  0x52   : > { %2549 = vmatmul.msk.bf16.gmra.mxu0 %vm645_vm0, %v2634_v52  ;;  %2553 = vmatmul.msk.bf16.gmra.mxu1 %vm645_vm0, %v3210_v53 }
  0x53   : > { %2557 = vmatmul.msk.bf16.gmra.mxu2 %vm645_vm0, %v3213_v54  ;;  %2561 = vmatmul.msk.bf16.gmra.mxu3 %vm645_vm0, %v2646_v55 }
  0x62   : > { %2550 = vmatmul.msk.bf16.gmra.mxu0 %vm645_vm0, %v2635_v56  ;;  %2554 = vmatmul.msk.bf16.gmra.mxu1 %vm645_vm0, %v3224_v57 }
  0x63   : > { %2558 = vmatmul.msk.bf16.gmra.mxu2 %vm645_vm0, %v2643_v58  ;;  %2562 = vmatmul.msk.bf16.gmra.mxu3 %vm645_vm0, %v2647_v59  ;;  %v1329_v59 = vld [vmem:[%s3266_s9 + $0xc8] sm:$0xff] }
  0x72   : > { %2563 = vmatmul.msk.bf16.vlgmr.msrb.gmra.mxu1 %vm645_vm0, %v3040_v34  ;;  %2611 = vmatmul.msk.bf16.vlgmr.msrb.gmra.mxu0 %vm645_vm0, %v3040_v34 }
  0x73   : > { %2579 = vmatmul.msk.bf16.vlgmr.msrb.gmra.mxu2 %vm645_vm0, %v3040_v34  ;;  %2595 = vmatmul.msk.bf16.vlgmr.msrb.gmra.mxu3 %vm645_vm0, %v3040_v34  ;;  %v3261_v34 = vld [vmem:[%s3882_s2] sm:$0x1f] }
  0x74   : > { %v3269_v60 = vperm.slane %v3261_v34, 0 }
  0x82   : > { %2564 = vmatmul.msk.bf16.gmra.mxu1 %vm645_vm0, %v3132_v11  ;;  %2612 = vmatmul.msk.bf16.gmra.mxu0 %vm645_vm0, %v3132_v11 }
  0x83   : > { %2580 = vmatmul.msk.bf16.gmra.mxu2 %vm645_vm0, %v3132_v11  ;;  %2596 = vmatmul.msk.bf16.gmra.mxu3 %vm645_vm0, %v3132_v11 }
  0x92   : > { %2565 = vmatmul.msk.bf16.gmra.mxu1 %vm645_vm0, %v2634_v52  ;;  %2613 = vmatmul.msk.bf16.gmra.mxu0 %vm645_vm0, %v2634_v52 }
  0x93   : > { %2581 = vmatmul.msk.bf16.gmra.mxu2 %vm645_vm0, %v2634_v52  ;;  %2597 = vmatmul.msk.bf16.gmra.mxu3 %vm645_vm0, %v2634_v52 }
  0xa2   : > { %2566 = vmatmul.msk.bf16.gmra.mxu1 %vm645_vm0, %v2635_v56  ;;  %2614 = vmatmul.msk.bf16.gmra.mxu0 %vm645_vm0, %v2635_v56 }
  0xa3   : > { %2582 = vmatmul.msk.bf16.gmra.mxu2 %vm645_vm0, %v2635_v56  ;;  %2598 = vmatmul.msk.bf16.gmra.mxu3 %vm645_vm0, %v2635_v56  ;;  %v3309_v56 = vld [vmem:[%s3266_s9 + $0x28] sm:$0xff] }
  0xaf   : > { %v703_v61 = vpop.f32.mrf.mxu0  ;;  %v723_v63 = vpop.f32.mrf.mxu1 }
  0xb0   : > { %v704_v1 = vadd.f32 %v703_v61, %v3269_v60  ;;  %v724_v2 = vadd.f32 %v723_v63, %v3269_v60 }
  0xb2   : > { %v1139_v3 = vmax.f32 %v704_v1, 0.0  ;;  %v1179_v5 = vmax.f32 %v724_v2, 0.0  ;;  %2567 = vmatmul.msk.bf16.gmra.mxu1 %vm645_vm0, %v3043_v35  ;;  %2615 = vmatmul.msk.bf16.gmra.mxu0 %vm645_vm0, %v3043_v35 }
  0xb3   : > { %2583 = vmatmul.msk.bf16.gmra.mxu2 %vm645_vm0, %v3043_v35  ;;  %2599 = vmatmul.msk.bf16.gmra.mxu3 %vm645_vm0, %v3043_v35 }
  0xb4   : > { %v1555_v7 = vmul.f32 0.1, %v1139_v3  ;;  %v1595_v8 = vmul.f32 0.1, %v1179_v5  ;;  %v1480_v3 = vunpack.c.l.bf16 %v1350_v46  ;;  %v1520_v5 = vunpack.c.l.bf16 %v1374_v48 }
  0xb6   : > { %v1715_v9 = vadd.f32 %v1555_v7, %v1395_v4  ;;  %v1755_v10 = vadd.f32 %v1595_v8, %v1435_v6  ;;  %v743_v11 = vpop.f32.mrf.mxu2  ;;  %v763_v14 = vpop.f32.mrf.mxu3  ;;  %v1405_v7 = vunpack.c.l.bf16 %v3309_v56 }
  0xb7   : > { %v744_v16 = vadd.f32 %v743_v11, %v3269_v60  ;;  %v764_v17 = vadd.f32 %v763_v14, %v3269_v60  ;;  %v705_v18 = vpop.f32.mrf.mxu0  ;;  %v725_v20 = vpop.f32.mrf.mxu1 }
  0xb8   : > { %v1875_v22 = vmax.f32 %v1715_v9, 0.0  ;;  %v1915_v23 = vmax.f32 %v1755_v10, 0.0  ;;  %v706_v35 = vadd.f32 %v705_v18, %v3269_v60  ;;  %v726_v24 = vadd.f32 %v725_v20, %v3269_v60 }
  0xb9   : > { %v1219_v26 = vmax.f32 %v744_v16, 0.0  ;;  %v1259_v28 = vmax.f32 %v764_v17, 0.0  ;;  %v1445_v9 = vunpack.c.l.bf16 %v1329_v59  ;;  %v1356_v59 = vld [vmem:[%s3266_s9 + $0x17c] sm:$0xff] }
  0xba   : > { %2035 = vst [vmem:[%s3299_s11] sm:$0xff] %v1875_v22  ;;  %v1144_v30 = vmax.f32 %v706_v35, 0.0  ;;  %v1184_v32 = vmax.f32 %v726_v24, 0.0 }
  0xbb   : > { %2075 = vst [vmem:[%s3299_s11 + $0x140] sm:$0xff] %v1915_v23  ;;  %v1635_v36 = vmul.f32 0.1, %v1219_v26  ;;  %v1675_v38 = vmul.f32 0.1, %v1259_v28  ;;  %v1377_v23 = vld [vmem:[%s3266_s9 + $0x208] sm:$0xff] }
  0xbc   : > { %v1560_v39 = vmul.f32 0.1, %v1144_v30  ;;  %v1600_v40 = vmul.f32 0.1, %v1184_v32  ;;  %v3332_v28 = vld [vmem:[%s3266_s9 + $0x3c] sm:$0xff] }
  0xbd   : > { %v1795_v41 = vadd.f32 %v1635_v36, %v1475_v27  ;;  %v1835_v42 = vadd.f32 %v1675_v38, %v1515_v29  ;;  %v1332_v30 = vld [vmem:[%s3266_s9 + $0xdc] sm:$0xff] }
  0xbe   : > { %v1720_v43 = vadd.f32 %v1560_v39, %v1400_v31  ;;  %v1760_v44 = vadd.f32 %v1600_v40, %v1440_v33  ;;  %v745_v45 = vpop.f32.mrf.mxu2  ;;  %v765_v47 = vpop.f32.mrf.mxu3  ;;  %v1485_v39 = vunpack.c.l.bf16 %v1353_v21 }
  0xbf   : > { %v1955_v49 = vmax.f32 %v1795_v41, 0.0  ;;  %v1995_v50 = vmax.f32 %v1835_v42, 0.0  ;;  %v746_v51 = vadd.f32 %v745_v45, %v3269_v60  ;;  %v766_v52 = vadd.f32 %v765_v47, %v3269_v60  ;;  %v708_v55 = vpop.f32.mrf.mxu0  ;;  %v728_v58 = vpop.f32.mrf.mxu1 }
  0xc0   : > { %v1880_v61 = vmax.f32 %v1720_v43, 0.0  ;;  %v1920_v63 = vmax.f32 %v1760_v44, 0.0  ;;  %v709_v0 = vadd.f32 %v708_v55, %v3269_v60  ;;  %v729_v1 = vadd.f32 %v728_v58, %v3269_v60 }
  0xc1   : > { %2115 = vst [vmem:[%s3299_s11 + $0x280] sm:$0xff] %v1955_v49  ;;  %v1224_v2 = vmax.f32 %v746_v51, 0.0  ;;  %v1264_v4 = vmax.f32 %v766_v52, 0.0  ;;  %v1525_v41 = vunpack.c.l.bf16 %v1377_v23  ;;  %v1410_v43 = vunpack.c.l.bf16 %v3332_v28 }
  0xc2   : > { %2155 = vst [vmem:[%s3299_s11 + $0x3c0] sm:$0xff] %v1995_v50  ;;  %v1149_v6 = vmax.f32 %v709_v0, 0.0  ;;  %v1189_v8 = vmax.f32 %v729_v1, 0.0  ;;  %2568 = vmatmul.msk.bf16.gmra.mxu1 %vm645_vm0, %v3135_v12  ;;  %2616 = vmatmul.msk.bf16.gmra.mxu0 %vm645_vm0, %v3135_v12  ;;  %v1450_v45 = vunpack.c.l.bf16 %v1332_v30 }
  0xc3   : > { %2040 = vst [vmem:[%s3299_s11 + $0x28] sm:$0xff] %v1880_v61  ;;  %v1640_v10 = vmul.f32 0.1, %v1224_v2  ;;  %v1680_v11 = vmul.f32 0.1, %v1264_v4  ;;  %2584 = vmatmul.msk.bf16.gmra.mxu2 %vm645_vm0, %v3135_v12  ;;  %2600 = vmatmul.msk.bf16.gmra.mxu3 %vm645_vm0, %v3135_v12 }
  0xc4   : > { %2080 = vst [vmem:[%s3299_s11 + $0x168] sm:$0xff] %v1920_v63  ;;  %v1565_v13 = vmul.f32 0.1, %v1149_v6  ;;  %v1605_v14 = vmul.f32 0.1, %v1189_v8  ;;  %v1380_v63 = vld [vmem:[%s3266_s9 + $0x21c] sm:$0xff] }
  0xc5   : > { %v1800_v15 = vadd.f32 %v1640_v10, %v1480_v3  ;;  %v1840_v16 = vadd.f32 %v1680_v11, %v1520_v5  ;;  %v3347_v5 = vld [vmem:[%s3266_s9 + $0x50] sm:$0xff] }
  0xc6   : > { %v1725_v17 = vadd.f32 %v1565_v13, %v1405_v7  ;;  %v1765_v18 = vadd.f32 %v1605_v14, %v1445_v9  ;;  %v748_v20 = vpop.f32.mrf.mxu2  ;;  %v768_v22 = vpop.f32.mrf.mxu3  ;;  %v1335_v7 = vld [vmem:[%s3266_s9 + $0xf0] sm:$0xff]  ;;  %v1490_v14 = vunpack.c.l.bf16 %v1356_v59 }
  0xc7   : > { %v1960_v35 = vmax.f32 %v1800_v15, 0.0  ;;  %v2000_v24 = vmax.f32 %v1840_v16, 0.0  ;;  %v749_v26 = vadd.f32 %v748_v20, %v3269_v60  ;;  %v769_v12 = vadd.f32 %v768_v22, %v3269_v60  ;;  %v710_v27 = vpop.f32.mrf.mxu0  ;;  %v730_v29 = vpop.f32.mrf.mxu1 }
  0xc8   : > { %v1885_v31 = vmax.f32 %v1725_v17, 0.0  ;;  %v1925_v32 = vmax.f32 %v1765_v18, 0.0  ;;  %v711_v33 = vadd.f32 %v710_v27, %v3269_v60  ;;  %v731_v36 = vadd.f32 %v730_v29, %v3269_v60 }
  0xc9   : > { %2120 = vst [vmem:[%s3299_s11 + $0x2a8] sm:$0xff] %v1960_v35  ;;  %v1229_v38 = vmax.f32 %v749_v26, 0.0  ;;  %v1269_v40 = vmax.f32 %v769_v12, 0.0  ;;  %v1530_v16 = vunpack.c.l.bf16 %v1380_v63  ;;  %v1415_v18 = vunpack.c.l.bf16 %v3347_v5 }
  0xca   : > { %2160 = vst [vmem:[%s3299_s11 + $0x3e8] sm:$0xff] %v2000_v24  ;;  %v1154_v42 = vmax.f32 %v711_v33, 0.0  ;;  %v1194_v44 = vmax.f32 %v731_v36, 0.0  ;;  %v1455_v21 = vunpack.c.l.bf16 %v1335_v7  ;;  %v1383_v33 = vld [vmem:[%s3266_s9 + $0x230] sm:$0xff] }
  0xcb   : > { %2045 = vst [vmem:[%s3299_s11 + $0x50] sm:$0xff] %v1885_v31  ;;  %v1645_v46 = vmul.f32 0.1, %v1229_v38  ;;  %v1685_v47 = vmul.f32 0.1, %v1269_v40  ;;  %v1359_v31 = vld [vmem:[%s3266_s9 + $0x190] sm:$0xff] }
  0xcc   : > { %2085 = vst [vmem:[%s3299_s11 + $0x190] sm:$0xff] %v1925_v32  ;;  %v1570_v48 = vmul.f32 0.1, %v1154_v42  ;;  %v1610_v49 = vmul.f32 0.1, %v1194_v44 }
  0xcd   : > { %v1805_v50 = vadd.f32 %v1645_v46, %v1485_v39  ;;  %v1845_v51 = vadd.f32 %v1685_v47, %v1525_v41  ;;  %v3370_v41 = vld [vmem:[%s3266_s9 + $0x64] sm:$0xff] }
  0xce   : > { %v1730_v52 = vadd.f32 %v1570_v48, %v1410_v43  ;;  %v1770_v55 = vadd.f32 %v1610_v49, %v1450_v45  ;;  %v750_v58 = vpop.f32.mrf.mxu2  ;;  %v770_v61 = vpop.f32.mrf.mxu3  ;;  %v1338_v43 = vld [vmem:[%s3266_s9 + $0x104] sm:$0xff]  ;;  %v1495_v49 = vunpack.c.l.bf16 %v1359_v31 }
  0xcf   : > { %v1965_v0 = vmax.f32 %v1805_v50, 0.0  ;;  %v2005_v1 = vmax.f32 %v1845_v51, 0.0  ;;  %v751_v2 = vadd.f32 %v750_v58, %v3269_v60  ;;  %v771_v3 = vadd.f32 %v770_v61, %v3269_v60  ;;  %v713_v4 = vpop.f32.mrf.mxu0  ;;  %v733_v6 = vpop.f32.mrf.mxu1 }
  0xd0   : > { %v1890_v8 = vmax.f32 %v1730_v52, 0.0  ;;  %v1930_v9 = vmax.f32 %v1770_v55, 0.0  ;;  %v714_v10 = vadd.f32 %v713_v4, %v3269_v60  ;;  %v734_v11 = vadd.f32 %v733_v6, %v3269_v60 }
  0xd1   : > { %2125 = vst [vmem:[%s3299_s11 + $0x2d0] sm:$0xff] %v1965_v0  ;;  %v1234_v13 = vmax.f32 %v751_v2, 0.0  ;;  %v1274_v15 = vmax.f32 %v771_v3, 0.0  ;;  %v1535_v51 = vunpack.c.l.bf16 %v1383_v33  ;;  %v1420_v55 = vunpack.c.l.bf16 %v3370_v41 }
  0xd2   : > { %2165 = vst [vmem:[%s3299_s11 + $0x410] sm:$0xff] %v2005_v1  ;;  %v1159_v17 = vmax.f32 %v714_v10, 0.0  ;;  %v1199_v20 = vmax.f32 %v734_v11, 0.0  ;;  %2569 = vmatmul.msk.bf16.gmra.mxu1 %vm645_vm0, %v3210_v53  ;;  %2617 = vmatmul.msk.bf16.gmra.mxu0 %vm645_vm0, %v3210_v53  ;;  %v1460_v59 = vunpack.c.l.bf16 %v1338_v43  ;;  %v1386_v10 = vld [vmem:[%s3266_s9 + $0x244] sm:$0xff] }
  0xd3   : > { %2050 = vst [vmem:[%s3299_s11 + $0x78] sm:$0xff] %v1890_v8  ;;  %v1650_v22 = vmul.f32 0.1, %v1234_v13  ;;  %v1690_v23 = vmul.f32 0.1, %v1274_v15  ;;  %2585 = vmatmul.msk.bf16.gmra.mxu2 %vm645_vm0, %v3210_v53  ;;  %2601 = vmatmul.msk.bf16.gmra.mxu3 %vm645_vm0, %v3210_v53  ;;  %v1362_v8 = vld [vmem:[%s3266_s9 + $0x1a4] sm:$0xff] }
  0xd4   : > { %2090 = vst [vmem:[%s3299_s11 + $0x1b8] sm:$0xff] %v1930_v9  ;;  %v1575_v35 = vmul.f32 0.1, %v1159_v17  ;;  %v1615_v24 = vmul.f32 0.1, %v1199_v20  ;;  %v3385_v17 = vld [vmem:[%s3266_s9 + $0x78] sm:$0xff] }
  0xd5   : > { %v1810_v26 = vadd.f32 %v1650_v22, %v1490_v14  ;;  %v1850_v12 = vadd.f32 %v1690_v23, %v1530_v16  ;;  %v1341_v20 = vld [vmem:[%s3266_s9 + $0x118] sm:$0xff] }
  0xd6   : > { %v1735_v27 = vadd.f32 %v1575_v35, %v1415_v18  ;;  %v1775_v29 = vadd.f32 %v1615_v24, %v1455_v21  ;;  %v753_v30 = vpop.f32.mrf.mxu2  ;;  %v773_v32 = vpop.f32.mrf.mxu3 }
  0xd7   : > { %v1970_v36 = vmax.f32 %v1810_v26, 0.0  ;;  %v2010_v38 = vmax.f32 %v1850_v12, 0.0  ;;  %v754_v39 = vadd.f32 %v753_v30, %v3269_v60  ;;  %v774_v53 = vadd.f32 %v773_v32, %v3269_v60  ;;  %v715_v40 = vpop.f32.mrf.mxu0  ;;  %v735_v42 = vpop.f32.mrf.mxu1 }
  0xd8   : > { %v1895_v44 = vmax.f32 %v1735_v27, 0.0  ;;  %v1935_v45 = vmax.f32 %v1775_v29, 0.0  ;;  %v716_v46 = vadd.f32 %v715_v40, %v3269_v60  ;;  %v736_v47 = vadd.f32 %v735_v42, %v3269_v60 }
  0xd9   : > { %2130 = vst [vmem:[%s3299_s11 + $0x2f8] sm:$0xff] %v1970_v36  ;;  %v1239_v48 = vmax.f32 %v754_v39, 0.0  ;;  %v1279_v50 = vmax.f32 %v774_v53, 0.0  ;;  %v1500_v26 = vunpack.c.l.bf16 %v1362_v8  ;;  %v1540_v27 = vunpack.c.l.bf16 %v1386_v10  ;;  %v1368_v10 = vld [vmem:[%s3266_s9 + $0x1cc] sm:$0xff] }
  0xda   : > { %2170 = vst [vmem:[%s3299_s11 + $0x438] sm:$0xff] %v2010_v38  ;;  %v1164_v52 = vmax.f32 %v716_v46, 0.0  ;;  %v1204_v58 = vmax.f32 %v736_v47, 0.0  ;;  %v1425_v30 = vunpack.c.l.bf16 %v3385_v17  ;;  %v1465_v32 = vunpack.c.l.bf16 %v1341_v20  ;;  %v1389_v47 = vld [vmem:[%s3266_s9 + $0x258] sm:$0xff] }
  0xdb   : > { %2055 = vst [vmem:[%s3299_s11 + $0xa0] sm:$0xff] %v1895_v44  ;;  %v1655_v61 = vmul.f32 0.1, %v1239_v48  ;;  %v1695_v63 = vmul.f32 0.1, %v1279_v50 }
  0xdc   : > { %2095 = vst [vmem:[%s3299_s11 + $0x1e0] sm:$0xff] %v1935_v45  ;;  %v1580_v0 = vmul.f32 0.1, %v1164_v52  ;;  %v1620_v1 = vmul.f32 0.1, %v1204_v58  ;;  %v1365_v45 = vld [vmem:[%s3266_s9 + $0x1b8] sm:$0xff] }
  0xdd   : > { %v1815_v2 = vadd.f32 %v1655_v61, %v1495_v49  ;;  %v1855_v3 = vadd.f32 %v1695_v63, %v1535_v51  ;;  %v3408_v52 = vld [vmem:[%s3266_s9 + $0x8c] sm:$0xff] }
  0xde   : > { %v1740_v4 = vadd.f32 %v1580_v0, %v1420_v55  ;;  %v1780_v6 = vadd.f32 %v1620_v1, %v1460_v59  ;;  %v755_v7 = vpop.f32.mrf.mxu2  ;;  %v775_v9 = vpop.f32.mrf.mxu3  ;;  %v1344_v58 = vld [vmem:[%s3266_s9 + $0x12c] sm:$0xff] }
  0xdf   : > { %v1975_v11 = vmax.f32 %v1815_v2, 0.0  ;;  %v2015_v13 = vmax.f32 %v1855_v3, 0.0  ;;  %v756_v14 = vadd.f32 %v755_v7, %v3269_v60  ;;  %v776_v15 = vadd.f32 %v775_v9, %v3269_v60  ;;  %v718_v16 = vpop.f32.mrf.mxu0  ;;  %v738_v18 = vpop.f32.mrf.mxu1 }
  0xe0   : > { %v1900_v21 = vmax.f32 %v1740_v4, 0.0  ;;  %v1940_v22 = vmax.f32 %v1780_v6, 0.0  ;;  %v719_v23 = vadd.f32 %v718_v16, %v3269_v60  ;;  %v739_v35 = vadd.f32 %v738_v18, %v3269_v60 }
  0xe1   : > { %2135 = vst [vmem:[%s3299_s11 + $0x320] sm:$0xff] %v1975_v11  ;;  %v1244_v24 = vmax.f32 %v756_v14, 0.0  ;;  %v1284_v12 = vmax.f32 %v776_v15, 0.0  ;;  %v1505_v2 = vunpack.c.l.bf16 %v1365_v45  ;;  %v1545_v4 = vunpack.c.l.bf16 %v1389_v47 }
  0xe2   : > { %2175 = vst [vmem:[%s3299_s11 + $0x460] sm:$0xff] %v2015_v13  ;;  %v1169_v29 = vmax.f32 %v719_v23, 0.0  ;;  %v1209_v31 = vmax.f32 %v739_v35, 0.0  ;;  %2570 = vmatmul.msk.bf16.gmra.mxu1 %vm645_vm0, %v3224_v57  ;;  %2618 = vmatmul.msk.bf16.gmra.mxu0 %vm645_vm0, %v3224_v57  ;;  %v1430_v7 = vunpack.c.l.bf16 %v3408_v52  ;;  %v1470_v9 = vunpack.c.l.bf16 %v1344_v58 }
  0xe3   : > { %2060 = vst [vmem:[%s3299_s11 + $0xc8] sm:$0xff] %v1900_v21  ;;  %v1660_v33 = vmul.f32 0.1, %v1244_v24  ;;  %v1700_v36 = vmul.f32 0.1, %v1284_v12  ;;  %2586 = vmatmul.msk.bf16.gmra.mxu2 %vm645_vm0, %v3224_v57  ;;  %2602 = vmatmul.msk.bf16.gmra.mxu3 %vm645_vm0, %v3224_v57  ;;  %v3419_v14 = vperm.slane %v3261_v34, 1  ;;  %v1510_v24 = vunpack.c.l.bf16 %v1368_v10 }
  0xe4   : > { %2100 = vst [vmem:[%s3299_s11 + $0x208] sm:$0xff] %v1940_v22  ;;  %v1585_v38 = vmul.f32 0.1, %v1169_v29  ;;  %v1625_v39 = vmul.f32 0.1, %v1209_v31  ;;  %v3423_v18 = vperm.slane %v3261_v34, 4 }
  0xe5   : > { %v1820_v53 = vadd.f32 %v1660_v33, %v1500_v26  ;;  %v1860_v40 = vadd.f32 %v1700_v36, %v1540_v27  ;;  %v1392_v12 = vld [vmem:[%s3266_s9 + $0x26c] sm:$0xff]  ;;  %v3433_v45 = vperm.slane %v3261_v34, 2 }
  0xe6   : > { %v1745_v42 = vadd.f32 %v1585_v38, %v1425_v30  ;;  %v1785_v43 = vadd.f32 %v1625_v39, %v1465_v32  ;;  %v758_v44 = vpop.f32.mrf.mxu2  ;;  %v778_v46 = vpop.f32.mrf.mxu3  ;;  %v1301_v36 = vld [vmem:[%s3266_s9 + $0x10] sm:$0xf] }
  0xe7   : > { %v1980_v48 = vmax.f32 %v1820_v53, 0.0  ;;  %v2020_v49 = vmax.f32 %v1860_v40, 0.0  ;;  %v759_v50 = vadd.f32 %v758_v44, %v3269_v60  ;;  %v779_v57 = vadd.f32 %v778_v46, %v3269_v60  ;;  %v720_v51 = vpop.f32.mrf.mxu0  ;;  %v740_v55 = vpop.f32.mrf.mxu1 }
  0xe8   : > { %v1905_v59 = vmax.f32 %v1745_v42, 0.0  ;;  %v1945_v61 = vmax.f32 %v1785_v43, 0.0  ;;  %v721_v63 = vadd.f32 %v720_v51, %v3269_v60  ;;  %v741_v0 = vadd.f32 %v740_v55, %v3269_v60 }
  0xe9   : > { %2140 = vst [vmem:[%s3299_s11 + $0x348] sm:$0xff] %v1980_v48  ;;  %v1249_v1 = vmax.f32 %v759_v50, 0.0  ;;  %v1289_v3 = vmax.f32 %v779_v57, 0.0  ;;  %v1550_v44 = vunpack.c.l.bf16 %v1392_v12  ;;  %v1396_v46 = vunpack.c.h.bf16 %v3272_v62 }
  0xea   : > { %2180 = vst [vmem:[%s3299_s11 + $0x488] sm:$0xff] %v2020_v49  ;;  %v1174_v6 = vmax.f32 %v721_v63, 0.0  ;;  %v1214_v8 = vmax.f32 %v741_v0, 0.0  ;;  %v1399_v48 = vunpack.c.l.bf16 %v1301_v36  ;;  %v3447_v62 = vperm.slane %v3261_v34, 3  ;;  %v1300_v0 = vld [vmem:[%s3266_s9 + $0x8] sm:$0xff]  ;;  %v1303_v36 = vld [vmem:[%s3266_s9 + $0x1c] sm:$0xff] }
  0xeb   : > { %2065 = vst [vmem:[%s3299_s11 + $0xf0] sm:$0xff] %v1905_v59  ;;  %v1665_v11 = vmul.f32 0.1, %v1249_v1  ;;  %v1705_v13 = vmul.f32 0.1, %v1289_v3 }
  0xec   : > { %2105 = vst [vmem:[%s3299_s11 + $0x230] sm:$0xff] %v1945_v61  ;;  %v1590_v15 = vmul.f32 0.1, %v1174_v6  ;;  %v1630_v16 = vmul.f32 0.1, %v1214_v8 }
  0xed   : > { %v1825_v20 = vadd.f32 %v1665_v11, %v1505_v2  ;;  %v1865_v21 = vadd.f32 %v1705_v13, %v1545_v4 }
  0xee   : > { %v1750_v22 = vadd.f32 %v1590_v15, %v1430_v7  ;;  %v1790_v23 = vadd.f32 %v1630_v16, %v1470_v9  ;;  %v760_v35 = vpop.f32.mrf.mxu2  ;;  %v780_v26 = vpop.f32.mrf.mxu3  ;;  %v1304_v7 = vld [vmem:[%s3266_s9 + $0x24] sm:$0xf]  ;;  %v1397_v15 = vunpack.c.l.bf16 %v1300_v0 }
  0xef   : > { %v1985_v27 = vmax.f32 %v1825_v20, 0.0  ;;  %v2025_v29 = vmax.f32 %v1865_v21, 0.0  ;;  %v761_v30 = vadd.f32 %v760_v35, %v3269_v60  ;;  %v781_v31 = vadd.f32 %v780_v26, %v3269_v60  ;;  %v792_v32 = vpop.f32.mrf.mxu1  ;;  %v1059_v33 = vpop.f32.mrf.mxu0 }
  0xf0   : > { %v1910_v38 = vmax.f32 %v1750_v22, 0.0  ;;  %v1950_v39 = vmax.f32 %v1790_v23, 0.0  ;;  %v793_v53 = vadd.f32 %v792_v32, %v3419_v14  ;;  %v1060_v40 = vadd.f32 %v1059_v33, %v3423_v18 }
  0xf1   : > { %2145 = vst [vmem:[%s3299_s11 + $0x370] sm:$0xff] %v1985_v27  ;;  %v1254_v42 = vmax.f32 %v761_v30, 0.0  ;;  %v1294_v43 = vmax.f32 %v781_v31, 0.0  ;;  %v1398_v20 = vunpack.c.h.bf16 %v1300_v0  ;;  %v1401_v22 = vunpack.c.h.bf16 %v3294_v19 }
  0xf2   : > { %2185 = vst [vmem:[%s3299_s11 + $0x4b0] sm:$0xff] %v2025_v29  ;;  %v1140_v60 = vmax.f32 %v793_v53, 0.0  ;;  %v1143_v47 = vmax.f32 %v1060_v40, 0.0  ;;  %2571 = vmatmul.msk.bf16.gmra.mxu1 %vm645_vm0, %v3049_v37  ;;  %2619 = vmatmul.msk.bf16.gmra.mxu0 %vm645_vm0, %v3049_v37  ;;  %v1404_v35 = vunpack.c.l.bf16 %v1304_v7 }
  0xf3   : > { %2070 = vst [vmem:[%s3299_s11 + $0x118] sm:$0xff] %v1910_v38  ;;  %v1670_v49 = vmul.f32 0.1, %v1254_v42  ;;  %v1710_v50 = vmul.f32 0.1, %v1294_v43  ;;  %2587 = vmatmul.msk.bf16.gmra.mxu2 %vm645_vm0, %v3049_v37  ;;  %2603 = vmatmul.msk.bf16.gmra.mxu3 %vm645_vm0, %v3049_v37 }
  0xf4   : > { %2110 = vst [vmem:[%s3299_s11 + $0x258] sm:$0xff] %v1950_v39  ;;  %v1556_v57 = vmul.f32 0.1, %v1140_v60  ;;  %v1559_v51 = vmul.f32 0.1, %v1143_v47 }
  0xf5   : > { %v1830_v55 = vadd.f32 %v1670_v49, %v1510_v24  ;;  %v1870_v58 = vadd.f32 %v1710_v50, %v1550_v44  ;;  %v1307_v44 = vld [vmem:[%s3266_s9 + $0x38] sm:$0xf]  ;;  %v1402_v50 = vunpack.c.l.bf16 %v1303_v36 }
  0xf6   : > { %v1716_v59 = vadd.f32 %v1556_v57, %v1396_v46  ;;  %v1719_v61 = vadd.f32 %v1559_v51, %v1399_v48  ;;  %v881_v63 = vpop.f32.mrf.mxu2  ;;  %v970_v1 = vpop.f32.mrf.mxu3  ;;  %v1403_v51 = vunpack.c.h.bf16 %v1303_v36 }
  0xf7   : > { %v1990_v2 = vmax.f32 %v1830_v55, 0.0  ;;  %v2030_v3 = vmax.f32 %v1870_v58, 0.0  ;;  %v882_v37 = vadd.f32 %v881_v63, %v3433_v45  ;;  %v971_v34 = vadd.f32 %v970_v1, %v3447_v62  ;;  %v794_v4 = vpop.f32.mrf.mxu1  ;;  %v1061_v6 = vpop.f32.mrf.mxu0 }
  0xf8   : > { %v1876_v8 = vmax.f32 %v1716_v59, 0.0  ;;  %v1879_v9 = vmax.f32 %v1719_v61, 0.0  ;;  %v795_v10 = vadd.f32 %v794_v4, %v3419_v14  ;;  %v1062_v11 = vadd.f32 %v1061_v6, %v3423_v18  ;;  %v1306_v6 = vld [vmem:[%s3266_s9 + $0x30] sm:$0xff] }
  0xf9   : > { %2150 = vst [vmem:[%s3299_s11 + $0x398] sm:$0xff] %v1990_v2  ;;  %v1141_v13 = vmax.f32 %v882_v37, 0.0  ;;  %v1142_v16 = vmax.f32 %v971_v34, 0.0  ;;  %v1406_v58 = vunpack.c.h.bf16 %v3309_v56  ;;  %v1409_v61 = vunpack.c.l.bf16 %v1307_v44 }
  0xfa   : > { %2190 = vst [vmem:[%s3299_s11 + $0x4d8] sm:$0xff] %v2030_v3  ;;  %v1145_v21 = vmax.f32 %v795_v10, 0.0  ;;  %v1148_v23 = vmax.f32 %v1062_v11, 0.0 }
  0xfb   : > { %2036 = vst [vmem:[%s3299_s11 + $0x8] sm:$0xff] %v1876_v8  ;;  %v1557_v24 = vmul.f32 0.1, %v1141_v13  ;;  %v1558_v26 = vmul.f32 0.1, %v1142_v16 }
  0xfc   : > { %2039 = vst [vmem:[%s3299_s11 + $0x20] sm:$0xff] %v1879_v9  ;;  %v1561_v12 = vmul.f32 0.1, %v1145_v21  ;;  %v1564_v27 = vmul.f32 0.1, %v1148_v23 }
  0xfd   : > { %v1717_v29 = vadd.f32 %v1557_v24, %v1397_v15  ;;  %v1718_v30 = vadd.f32 %v1558_v26, %v1398_v20  ;;  %v1310_v15 = vld [vmem:[%s3266_s9 + $0x4c] sm:$0xf]  ;;  %v1408_v26 = vunpack.c.h.bf16 %v1306_v6 }
  0xfe   : > { %v1721_v31 = vadd.f32 %v1561_v12, %v1401_v22  ;;  %v1724_v32 = vadd.f32 %v1564_v27, %v1404_v35  ;;  %v883_v33 = vpop.f32.mrf.mxu2  ;;  %v972_v38 = vpop.f32.mrf.mxu3  ;;  %v1407_v35 = vunpack.c.l.bf16 %v1306_v6  ;;  %v1411_v27 = vunpack.c.h.bf16 %v3332_v28 }
  0xff   : > { %v1877_v39 = vmax.f32 %v1717_v29, 0.0  ;;  %v1878_v19 = vmax.f32 %v1718_v30, 0.0  ;;  %v884_v53 = vadd.f32 %v883_v33, %v3433_v45  ;;  %v973_v40 = vadd.f32 %v972_v38, %v3447_v62  ;;  %v797_v42 = vpop.f32.mrf.mxu1  ;;  %v1064_v43 = vpop.f32.mrf.mxu0 }
 0x100   : > { %v1881_v60 = vmax.f32 %v1721_v31, 0.0  ;;  %v1884_v46 = vmax.f32 %v1724_v32, 0.0  ;;  %v798_v47 = vadd.f32 %v797_v42, %v3419_v14  ;;  %v1065_v48 = vadd.f32 %v1064_v43, %v3423_v18  ;;  %v1309_v42 = vld [vmem:[%s3266_s9 + $0x44] sm:$0xff] }
 0x101   : > { %2037 = vst [vmem:[%s3299_s11 + $0x10] sm:$0xff] %v1877_v39  ;;  %v1146_v49 = vmax.f32 %v884_v53, 0.0  ;;  %v1147_v57 = vmax.f32 %v973_v40, 0.0  ;;  %v1414_v30 = vunpack.c.l.bf16 %v1310_v15 }
 0x102   : > { %2038 = vst [vmem:[%s3299_s11 + $0x18] sm:$0xff] %v1878_v19  ;;  %v1150_v55 = vmax.f32 %v798_v47, 0.0  ;;  %v1153_v59 = vmax.f32 %v1065_v48, 0.0  ;;  %2572 = vmatmul.msk.bf16.gmra.mxu1 %vm645_vm0, %v3162_v25  ;;  %2620 = vmatmul.msk.bf16.gmra.mxu0 %vm645_vm0, %v3162_v25 }
 0x103   : > { %2041 = vst [vmem:[%s3299_s11 + $0x30] sm:$0xff] %v1881_v60  ;;  %v1562_v63 = vmul.f32 0.1, %v1146_v49  ;;  %v1563_v0 = vmul.f32 0.1, %v1147_v57  ;;  %2588 = vmatmul.msk.bf16.gmra.mxu2 %vm645_vm0, %v3162_v25  ;;  %2604 = vmatmul.msk.bf16.gmra.mxu3 %vm645_vm0, %v3162_v25 }
 0x104   : > { %2044 = vst [vmem:[%s3299_s11 + $0x48] sm:$0xff] %v1884_v46  ;;  %v1566_v56 = vmul.f32 0.1, %v1150_v55  ;;  %v1569_v1 = vmul.f32 0.1, %v1153_v59  ;;  %v1412_v59 = vunpack.c.l.bf16 %v1309_v42 }
 0x105   : > { %v1722_v2 = vadd.f32 %v1562_v63, %v1402_v50  ;;  %v1723_v3 = vadd.f32 %v1563_v0, %v1403_v51  ;;  %v1313_v49 = vld [vmem:[%s3266_s9 + $0x60] sm:$0xf]  ;;  %v1413_v63 = vunpack.c.h.bf16 %v1309_v42 }
 0x106   : > { %v1726_v37 = vadd.f32 %v1566_v56, %v1406_v58  ;;  %v1729_v34 = vadd.f32 %v1569_v1, %v1409_v61  ;;  %v886_v4 = vpop.f32.mrf.mxu2  ;;  %v975_v7 = vpop.f32.mrf.mxu3  ;;  %v1416_v56 = vunpack.c.h.bf16 %v3347_v5 }
 0x107   : > { %v1882_v8 = vmax.f32 %v1722_v2, 0.0  ;;  %v1883_v9 = vmax.f32 %v1723_v3, 0.0  ;;  %v887_v10 = vadd.f32 %v886_v4, %v3433_v45  ;;  %v976_v11 = vadd.f32 %v975_v7, %v3447_v62  ;;  %v799_v25 = vpop.f32.mrf.mxu1  ;;  %v1066_v13 = vpop.f32.mrf.mxu0 }
 0x108   : > { %v1886_v16 = vmax.f32 %v1726_v37, 0.0  ;;  %v1889_v20 = vmax.f32 %v1729_v34, 0.0  ;;  %v800_v21 = vadd.f32 %v799_v25, %v3419_v14  ;;  %v1067_v22 = vadd.f32 %v1066_v13, %v3423_v18 }
 0x109   : > { %2042 = vst [vmem:[%s3299_s11 + $0x38] sm:$0xff] %v1882_v8  ;;  %v1151_v23 = vmax.f32 %v887_v10, 0.0  ;;  %v1152_v24 = vmax.f32 %v976_v11, 0.0  ;;  %v1419_v2 = vunpack.c.l.bf16 %v1313_v49  ;;  %v1312_v10 = vld [vmem:[%s3266_s9 + $0x58] sm:$0xff] }
 0x10a   : > { %2043 = vst [vmem:[%s3299_s11 + $0x40] sm:$0xff] %v1883_v9  ;;  %v1155_v12 = vmax.f32 %v800_v21, 0.0  ;;  %v1158_v29 = vmax.f32 %v1067_v22, 0.0  ;;  %v1316_v21 = vld [vmem:[%s3266_s9 + $0x74] sm:$0xf] }
 0x10b   : > { %2046 = vst [vmem:[%s3299_s11 + $0x58] sm:$0xff] %v1886_v16  ;;  %v1567_v31 = vmul.f32 0.1, %v1151_v23  ;;  %v1568_v32 = vmul.f32 0.1, %v1152_v24 }
 0x10c   : > { %2049 = vst [vmem:[%s3299_s11 + $0x70] sm:$0xff] %v1889_v20  ;;  %v1571_v33 = vmul.f32 0.1, %v1155_v12  ;;  %v1574_v36 = vmul.f32 0.1, %v1158_v29  ;;  %v1417_v12 = vunpack.c.l.bf16 %v1312_v10  ;;  %v1418_v29 = vunpack.c.h.bf16 %v1312_v10 }
 0x10d   : > { %v1727_v38 = vadd.f32 %v1567_v31, %v1407_v35  ;;  %v1728_v39 = vadd.f32 %v1568_v32, %v1408_v26  ;;  %v1421_v31 = vunpack.c.h.bf16 %v3370_v41 }
 0x10e   : > { %v1731_v19 = vadd.f32 %v1571_v33, %v1411_v27  ;;  %v1734_v53 = vadd.f32 %v1574_v36, %v1414_v30  ;;  %v888_v40 = vpop.f32.mrf.mxu2  ;;  %v977_v43 = vpop.f32.mrf.mxu3  ;;  %v1424_v33 = vunpack.c.l.bf16 %v1316_v21 }
 0x10f   : > { %v1887_v44 = vmax.f32 %v1727_v38, 0.0  ;;  %v1888_v28 = vmax.f32 %v1728_v39, 0.0  ;;  %v889_v60 = vadd.f32 %v888_v40, %v3433_v45  ;;  %v978_v46 = vadd.f32 %v977_v43, %v3447_v62  ;;  %v802_v47 = vpop.f32.mrf.mxu1  ;;  %v1069_v48 = vpop.f32.mrf.mxu0 }
 0x110   : > { %v1891_v50 = vmax.f32 %v1731_v19, 0.0  ;;  %v1894_v57 = vmax.f32 %v1734_v53, 0.0  ;;  %v803_v51 = vadd.f32 %v802_v47, %v3419_v14  ;;  %v1070_v55 = vadd.f32 %v1069_v48, %v3423_v18 }
 0x111   : > { %2047 = vst [vmem:[%s3299_s11 + $0x60] sm:$0xff] %v1887_v44  ;;  %v1156_v58 = vmax.f32 %v889_v60, 0.0  ;;  %v1157_v61 = vmax.f32 %v978_v46, 0.0 }
 0x112   : > { %2048 = vst [vmem:[%s3299_s11 + $0x68] sm:$0xff] %v1888_v28  ;;  %v1160_v0 = vmax.f32 %v803_v51, 0.0  ;;  %v1163_v1 = vmax.f32 %v1070_v55, 0.0  ;;  %2573 = vmatmul.msk.bf16.gmra.mxu1 %vm645_vm0, %v3213_v54  ;;  %2621 = vmatmul.msk.bf16.gmra.mxu0 %vm645_vm0, %v3213_v54  ;;  %v1315_v28 = vld [vmem:[%s3266_s9 + $0x6c] sm:$0xff] }
 0x113   : > { %2051 = vst [vmem:[%s3299_s11 + $0x80] sm:$0xff] %v1891_v50  ;;  %v1572_v3 = vmul.f32 0.1, %v1156_v58  ;;  %v1573_v37 = vmul.f32 0.1, %v1157_v61  ;;  %2589 = vmatmul.msk.bf16.gmra.mxu2 %vm645_vm0, %v3213_v54  ;;  %2605 = vmatmul.msk.bf16.gmra.mxu3 %vm645_vm0, %v3213_v54 }
 0x114   : > { %2054 = vst [vmem:[%s3299_s11 + $0x98] sm:$0xff] %v1894_v57  ;;  %v1576_v5 = vmul.f32 0.1, %v1160_v0  ;;  %v1579_v34 = vmul.f32 0.1, %v1163_v1 }
 0x115   : > { %v1732_v4 = vadd.f32 %v1572_v3, %v1412_v59  ;;  %v1733_v6 = vadd.f32 %v1573_v37, %v1413_v63  ;;  %v1319_v57 = vld [vmem:[%s3266_s9 + $0x88] sm:$0xf]  ;;  %v1422_v63 = vunpack.c.l.bf16 %v1315_v28 }
 0x116   : > { %v1736_v7 = vadd.f32 %v1576_v5, %v1416_v56  ;;  %v1739_v8 = vadd.f32 %v1579_v34, %v1419_v2  ;;  %v891_v9 = vpop.f32.mrf.mxu2  ;;  %v980_v11 = vpop.f32.mrf.mxu3  ;;  %v1423_v56 = vunpack.c.h.bf16 %v1315_v28  ;;  %v1426_v2 = vunpack.c.h.bf16 %v3385_v17  ;;  %v2764_v5 = vld [vmem:[%s3016_s12 + $0x58] sm:$0xff] }
 0x117   : > { %v1892_v25 = vmax.f32 %v1732_v4, 0.0  ;;  %v1893_v13 = vmax.f32 %v1733_v6, 0.0  ;;  %v892_v15 = vadd.f32 %v891_v9, %v3433_v45  ;;  %v981_v16 = vadd.f32 %v980_v11, %v3447_v62  ;;  %v804_v54 = vpop.f32.mrf.mxu1  ;;  %v1071_v20 = vpop.f32.mrf.mxu0 }
 0x118   : > { %v1896_v22 = vmax.f32 %v1736_v7, 0.0  ;;  %v1899_v23 = vmax.f32 %v1739_v8, 0.0  ;;  %v805_v35 = vadd.f32 %v804_v54, %v3419_v14  ;;  %v1072_v24 = vadd.f32 %v1071_v20, %v3423_v18 }
 0x119   : > { %2052 = vst [vmem:[%s3299_s11 + $0x88] sm:$0xff] %v1892_v25  ;;  %v1161_v26 = vmax.f32 %v892_v15, 0.0  ;;  %v1162_v27 = vmax.f32 %v981_v16, 0.0  ;;  %v1429_v37 = vunpack.c.l.bf16 %v1319_v57  ;;  %v1318_v25 = vld [vmem:[%s3266_s9 + $0x80] sm:$0xff] }
 0x11a   : > { %2053 = vst [vmem:[%s3299_s11 + $0x90] sm:$0xff] %v1893_v13  ;;  %v1165_v30 = vmax.f32 %v805_v35, 0.0  ;;  %v1168_v32 = vmax.f32 %v1072_v24, 0.0 }
 0x11b   : > { %2056 = vst [vmem:[%s3299_s11 + $0xa8] sm:$0xff] %v1896_v22  ;;  %v1577_v36 = vmul.f32 0.1, %v1161_v26  ;;  %v1578_v38 = vmul.f32 0.1, %v1162_v27 }
 0x11c   : > { %2059 = vst [vmem:[%s3299_s11 + $0xc0] sm:$0xff] %v1899_v23  ;;  %v1581_v39 = vmul.f32 0.1, %v1165_v30  ;;  %v1584_v19 = vmul.f32 0.1, %v1168_v32 }
 0x11d   : > { %v1737_v53 = vadd.f32 %v1577_v36, %v1417_v12  ;;  %v1738_v40 = vadd.f32 %v1578_v38, %v1418_v29  ;;  %v1322_v23 = vld [vmem:[%s3266_s9 + $0x9c] sm:$0xf]  ;;  %v1427_v29 = vunpack.c.l.bf16 %v1318_v25 }
 0x11e   : > { %v1741_v42 = vadd.f32 %v1581_v39, %v1421_v31  ;;  %v1744_v43 = vadd.f32 %v1584_v19, %v1424_v33  ;;  %v893_v44 = vpop.f32.mrf.mxu2  ;;  %v982_v60 = vpop.f32.mrf.mxu3  ;;  %v1428_v31 = vunpack.c.h.bf16 %v1318_v25  ;;  %v1431_v33 = vunpack.c.h.bf16 %v3408_v52 }
 0x11f   : > { %v1897_v46 = vmax.f32 %v1737_v53, 0.0  ;;  %v1898_v41 = vmax.f32 %v1738_v40, 0.0  ;;  %v894_v47 = vadd.f32 %v893_v44, %v3433_v45  ;;  %v983_v48 = vadd.f32 %v982_v60, %v3447_v62  ;;  %v807_v49 = vpop.f32.mrf.mxu1  ;;  %v1074_v50 = vpop.f32.mrf.mxu0 }
 0x120   : > { %v1901_v51 = vmax.f32 %v1741_v42, 0.0  ;;  %v1904_v55 = vmax.f32 %v1744_v43, 0.0  ;;  %v808_v58 = vadd.f32 %v807_v49, %v3419_v14  ;;  %v1075_v59 = vadd.f32 %v1074_v50, %v3423_v18 }
 0x121   : > { %2057 = vst [vmem:[%s3299_s11 + $0xb0] sm:$0xff] %v1897_v46  ;;  %v1166_v61 = vmax.f32 %v894_v47, 0.0  ;;  %v1167_v0 = vmax.f32 %v983_v48, 0.0  ;;  %v1434_v38 = vunpack.c.l.bf16 %v1322_v23  ;;  %v1321_v46 = vld [vmem:[%s3266_s9 + $0x94] sm:$0xff] }
 0x122   : > { %2058 = vst [vmem:[%s3299_s11 + $0xb8] sm:$0xff] %v1898_v41  ;;  %v1170_v1 = vmax.f32 %v808_v58, 0.0  ;;  %v1173_v3 = vmax.f32 %v1075_v59, 0.0  ;;  %2574 = vmatmul.msk.bf16.gmra.mxu1 %vm645_vm0, %v2764_v5  ;;  %2622 = vmatmul.msk.bf16.gmra.mxu0 %vm645_vm0, %v2764_v5 }
 0x123   : > { %2061 = vst [vmem:[%s3299_s11 + $0xd0] sm:$0xff] %v1901_v51  ;;  %v1582_v34 = vmul.f32 0.1, %v1166_v61  ;;  %v1583_v4 = vmul.f32 0.1, %v1167_v0  ;;  %2590 = vmatmul.msk.bf16.gmra.mxu2 %vm645_vm0, %v2764_v5  ;;  %2606 = vmatmul.msk.bf16.gmra.mxu3 %vm645_vm0, %v2764_v5  ;;  %v1432_v0 = vunpack.c.l.bf16 %v1321_v46 }
 0x124   : > { %2064 = vst [vmem:[%s3299_s11 + $0xe8] sm:$0xff] %v1904_v55  ;;  %v1586_v6 = vmul.f32 0.1, %v1170_v1  ;;  %v1589_v7 = vmul.f32 0.1, %v1173_v3  ;;  %v1433_v1 = vunpack.c.h.bf16 %v1321_v46  ;;  %v2765_v3 = vld [vmem:[%s3266_s9 + $0xa0] sm:$0xff] }
 0x125   : > { %v1742_v17 = vadd.f32 %v1582_v34, %v1422_v63  ;;  %v1743_v8 = vadd.f32 %v1583_v4, %v1423_v56  ;;  %v1325_v51 = vld [vmem:[%s3266_s9 + $0xb0] sm:$0xf]  ;;  %v2766_v4 = vld [vmem:[%s3016_s12 + $0x60] sm:$0xff] }
 0x126   : > { %v1746_v9 = vadd.f32 %v1586_v6, %v1426_v2  ;;  %v1749_v10 = vadd.f32 %v1589_v7, %v1429_v37  ;;  %v896_v11 = vpop.f32.mrf.mxu2  ;;  %v985_v13 = vpop.f32.mrf.mxu3  ;;  %v1436_v37 = vunpack.c.h.bf16 %v2765_v3  ;;  %v1439_v34 = vunpack.c.l.bf16 %v1325_v51 }
 0x127   : > { %v1902_v15 = vmax.f32 %v1742_v17, 0.0  ;;  %v1903_v16 = vmax.f32 %v1743_v8, 0.0  ;;  %v897_v54 = vadd.f32 %v896_v11, %v3433_v45  ;;  %v986_v20 = vadd.f32 %v985_v13, %v3447_v62  ;;  %v809_v21 = vpop.f32.mrf.mxu1  ;;  %v1076_v22 = vpop.f32.mrf.mxu0 }
 0x128   : > { %v1906_v35 = vmax.f32 %v1746_v9, 0.0  ;;  %v1909_v24 = vmax.f32 %v1749_v10, 0.0  ;;  %v810_v26 = vadd.f32 %v809_v21, %v3419_v14  ;;  %v1077_v12 = vadd.f32 %v1076_v22, %v3423_v18 }
 0x129   : > { %2062 = vst [vmem:[%s3299_s11 + $0xd8] sm:$0xff] %v1902_v15  ;;  %v1171_v27 = vmax.f32 %v897_v54, 0.0  ;;  %v1172_v30 = vmax.f32 %v986_v20, 0.0  ;;  %v1324_v15 = vld [vmem:[%s3266_s9 + $0xa8] sm:$0xff] }
 0x12a   : > { %2063 = vst [vmem:[%s3299_s11 + $0xe0] sm:$0xff] %v1903_v16  ;;  %v1175_v32 = vmax.f32 %v810_v26, 0.0  ;;  %v1178_v36 = vmax.f32 %v1077_v12, 0.0 }
 0x12b   : > { %2066 = vst [vmem:[%s3299_s11 + $0xf8] sm:$0xff] %v1906_v35  ;;  %v1587_v39 = vmul.f32 0.1, %v1171_v27  ;;  %v1588_v19 = vmul.f32 0.1, %v1172_v30 }
 0x12c   : > { %2069 = vst [vmem:[%s3299_s11 + $0x110] sm:$0xff] %v1909_v24  ;;  %v1591_v53 = vmul.f32 0.1, %v1175_v32  ;;  %v1594_v40 = vmul.f32 0.1, %v1178_v36 }
 0x12d   : > { %v1747_v42 = vadd.f32 %v1587_v39, %v1427_v29  ;;  %v1748_v43 = vadd.f32 %v1588_v19, %v1428_v31  ;;  %v1328_v24 = vld [vmem:[%s3266_s9 + $0xc4] sm:$0xf]  ;;  %v1437_v31 = vunpack.c.l.bf16 %v1324_v15 }
 0x12e   : > { %v1751_v44 = vadd.f32 %v1591_v53, %v1431_v33  ;;  %v1754_v28 = vadd.f32 %v1594_v40, %v1434_v38  ;;  %v898_v60 = vpop.f32.mrf.mxu2  ;;  %v987_v41 = vpop.f32.mrf.mxu3  ;;  %v1438_v33 = vunpack.c.h.bf16 %v1324_v15  ;;  %v2767_v38 = vld [vmem:[%s3266_s9 + $0xb4] sm:$0xff]  ;;  %v1444_v53 = vunpack.c.l.bf16 %v1328_v24 }
 0x12f   : > { %v1907_v47 = vmax.f32 %v1747_v42, 0.0  ;;  %v1908_v52 = vmax.f32 %v1748_v43, 0.0  ;;  %v899_v48 = vadd.f32 %v898_v60, %v3433_v45  ;;  %v988_v49 = vadd.f32 %v987_v41, %v3447_v62  ;;  %v812_v50 = vpop.f32.mrf.mxu1  ;;  %v1079_v57 = vpop.f32.mrf.mxu0 }
 0x130   : > { %v1911_v55 = vmax.f32 %v1751_v44, 0.0  ;;  %v1914_v58 = vmax.f32 %v1754_v28, 0.0  ;;  %v813_v59 = vadd.f32 %v812_v50, %v3419_v14  ;;  %v1080_v61 = vadd.f32 %v1079_v57, %v3423_v18 }
 0x131   : > { %2067 = vst [vmem:[%s3299_s11 + $0x100] sm:$0xff] %v1907_v47  ;;  %v1176_v63 = vmax.f32 %v899_v48, 0.0  ;;  %v1177_v56 = vmax.f32 %v988_v49, 0.0  ;;  %v1441_v39 = vunpack.c.h.bf16 %v2767_v38 }
 0x132   : > { %2068 = vst [vmem:[%s3299_s11 + $0x108] sm:$0xff] %v1908_v52  ;;  %v1180_v2 = vmax.f32 %v813_v59, 0.0  ;;  %v1183_v5 = vmax.f32 %v1080_v61, 0.0  ;;  %2575 = vmatmul.msk.bf16.gmra.mxu1 %vm645_vm0, %v2766_v4  ;;  %2623 = vmatmul.msk.bf16.gmra.mxu0 %vm645_vm0, %v2766_v4  ;;  %v1327_v52 = vld [vmem:[%s3266_s9 + $0xbc] sm:$0xff]  ;;  %v1331_v59 = vld [vmem:[%s3266_s9 + $0xd8] sm:$0xf] }
 0x133   : > { %2071 = vst [vmem:[%s3299_s11 + $0x120] sm:$0xff] %v1911_v55  ;;  %v1592_v6 = vmul.f32 0.1, %v1176_v63  ;;  %v1593_v7 = vmul.f32 0.1, %v1177_v56  ;;  %2591 = vmatmul.msk.bf16.gmra.mxu2 %vm645_vm0, %v2766_v4  ;;  %2607 = vmatmul.msk.bf16.gmra.mxu3 %vm645_vm0, %v2766_v4 }
 0x134   : > { %2074 = vst [vmem:[%s3299_s11 + $0x138] sm:$0xff] %v1914_v58  ;;  %v1596_v17 = vmul.f32 0.1, %v1180_v2  ;;  %v1599_v8 = vmul.f32 0.1, %v1183_v5  ;;  %v1442_v2 = vunpack.c.l.bf16 %v1327_v52 }
 0x135   : > { %v1752_v9 = vadd.f32 %v1592_v6, %v1432_v0  ;;  %v1753_v10 = vadd.f32 %v1593_v7, %v1433_v1  ;;  %v1449_v7 = vunpack.c.l.bf16 %v1331_v59 }
 0x136   : > { %v1756_v11 = vadd.f32 %v1596_v17, %v1436_v37  ;;  %v1759_v25 = vadd.f32 %v1599_v8, %v1439_v34  ;;  %v901_v13 = vpop.f32.mrf.mxu2  ;;  %v990_v16 = vpop.f32.mrf.mxu3  ;;  %v1443_v37 = vunpack.c.h.bf16 %v1327_v52  ;;  %v2768_v34 = vld [vmem:[%s3266_s9 + $0xc8] sm:$0xff] }
 0x137   : > { %v1912_v54 = vmax.f32 %v1752_v9, 0.0  ;;  %v1913_v20 = vmax.f32 %v1753_v10, 0.0  ;;  %v902_v21 = vadd.f32 %v901_v13, %v3433_v45  ;;  %v991_v22 = vadd.f32 %v990_v16, %v3447_v62  ;;  %v814_v23 = vpop.f32.mrf.mxu1  ;;  %v1081_v35 = vpop.f32.mrf.mxu0  ;;  %v2769_v17 = vld [vmem:[%s3016_s12 + $0x68] sm:$0xff] }
 0x138   : > { %v1916_v26 = vmax.f32 %v1756_v11, 0.0  ;;  %v1919_v12 = vmax.f32 %v1759_v25, 0.0  ;;  %v815_v27 = vadd.f32 %v814_v23, %v3419_v14  ;;  %v1082_v29 = vadd.f32 %v1081_v35, %v3423_v18 }
 0x139   : > { %2072 = vst [vmem:[%s3299_s11 + $0x128] sm:$0xff] %v1912_v54  ;;  %v1181_v30 = vmax.f32 %v902_v21, 0.0  ;;  %v1182_v32 = vmax.f32 %v991_v22, 0.0  ;;  %v1446_v4 = vunpack.c.h.bf16 %v2768_v34 }
 0x13a   : > { %2073 = vst [vmem:[%s3299_s11 + $0x130] sm:$0xff] %v1913_v20  ;;  %v1185_v36 = vmax.f32 %v815_v27, 0.0  ;;  %v1188_v19 = vmax.f32 %v1082_v29, 0.0  ;;  %v1330_v20 = vld [vmem:[%s3266_s9 + $0xd0] sm:$0xff]  ;;  %v1334_v27 = vld [vmem:[%s3266_s9 + $0xec] sm:$0xf] }
 0x13b   : > { %2076 = vst [vmem:[%s3299_s11 + $0x148] sm:$0xff] %v1916_v26  ;;  %v1597_v40 = vmul.f32 0.1, %v1181_v30  ;;  %v1598_v42 = vmul.f32 0.1, %v1182_v32 }
 0x13c   : > { %2079 = vst [vmem:[%s3299_s11 + $0x160] sm:$0xff] %v1919_v12  ;;  %v1601_v43 = vmul.f32 0.1, %v1185_v36  ;;  %v1604_v44 = vmul.f32 0.1, %v1188_v19  ;;  %v1447_v36 = vunpack.c.l.bf16 %v1330_v20 }
 0x13d   : > { %v1757_v28 = vadd.f32 %v1597_v40, %v1437_v31  ;;  %v1758_v60 = vadd.f32 %v1598_v42, %v1438_v33 }
 0x13e   : > { %v1761_v46 = vadd.f32 %v1601_v43, %v1441_v39  ;;  %v1764_v41 = vadd.f32 %v1604_v44, %v1444_v53  ;;  %v903_v47 = vpop.f32.mrf.mxu2  ;;  %v992_v48 = vpop.f32.mrf.mxu3  ;;  %v1448_v39 = vunpack.c.h.bf16 %v1330_v20  ;;  %v2770_v53 = vld [vmem:[%s3266_s9 + $0xdc] sm:$0xff]  ;;  %v1454_v43 = vunpack.c.l.bf16 %v1334_v27 }
 0x13f   : > { %v1917_v49 = vmax.f32 %v1757_v28, 0.0  ;;  %v1918_v50 = vmax.f32 %v1758_v60, 0.0  ;;  %v904_v57 = vadd.f32 %v903_v47, %v3433_v45  ;;  %v993_v51 = vadd.f32 %v992_v48, %v3447_v62  ;;  %v817_v55 = vpop.f32.mrf.mxu1  ;;  %v1084_v58 = vpop.f32.mrf.mxu0 }
 0x140   : > { %v1921_v61 = vmax.f32 %v1761_v46, 0.0  ;;  %v1924_v63 = vmax.f32 %v1764_v41, 0.0  ;;  %v818_v0 = vadd.f32 %v817_v55, %v3419_v14  ;;  %v1085_v56 = vadd.f32 %v1084_v58, %v3423_v18 }
 0x141   : > { %2077 = vst [vmem:[%s3299_s11 + $0x150] sm:$0xff] %v1917_v49  ;;  %v1186_v1 = vmax.f32 %v904_v57, 0.0  ;;  %v1187_v3 = vmax.f32 %v993_v51, 0.0  ;;  %v1451_v40 = vunpack.c.h.bf16 %v2770_v53 }
 0x142   : > { %2078 = vst [vmem:[%s3299_s11 + $0x158] sm:$0xff] %v1918_v50  ;;  %v1190_v5 = vmax.f32 %v818_v0, 0.0  ;;  %v1193_v6 = vmax.f32 %v1085_v56, 0.0  ;;  %2576 = vmatmul.msk.bf16.gmra.mxu1 %vm645_vm0, %v2769_v17  ;;  %2624 = vmatmul.msk.bf16.gmra.mxu0 %vm645_vm0, %v2769_v17  ;;  %v1333_v50 = vld [vmem:[%s3266_s9 + $0xe4] sm:$0xff]  ;;  %v1337_v0 = vld [vmem:[%s3266_s9 + $0x100] sm:$0xf] }
 0x143   : > { %2081 = vst [vmem:[%s3299_s11 + $0x170] sm:$0xff] %v1921_v61  ;;  %v1602_v8 = vmul.f32 0.1, %v1186_v1  ;;  %v1603_v9 = vmul.f32 0.1, %v1187_v3  ;;  %2592 = vmatmul.msk.bf16.gmra.mxu2 %vm645_vm0, %v2769_v17  ;;  %2608 = vmatmul.msk.bf16.gmra.mxu3 %vm645_vm0, %v2769_v17 }
 0x144   : > { %2084 = vst [vmem:[%s3299_s11 + $0x188] sm:$0xff] %v1924_v63  ;;  %v1606_v10 = vmul.f32 0.1, %v1190_v5  ;;  %v1609_v11 = vmul.f32 0.1, %v1193_v6  ;;  %v1452_v5 = vunpack.c.l.bf16 %v1333_v50 }
 0x145   : > { %v1762_v25 = vadd.f32 %v1602_v8, %v1442_v2  ;;  %v1763_v13 = vadd.f32 %v1603_v9, %v1443_v37  ;;  %v1459_v9 = vunpack.c.l.bf16 %v1337_v0 }
 0x146   : > { %v1766_v15 = vadd.f32 %v1606_v10, %v1446_v4  ;;  %v1769_v16 = vadd.f32 %v1609_v11, %v1449_v7  ;;  %v906_v54 = vpop.f32.mrf.mxu2  ;;  %v995_v21 = vpop.f32.mrf.mxu3  ;;  %v1453_v4 = vunpack.c.h.bf16 %v1333_v50  ;;  %v2771_v7 = vld [vmem:[%s3266_s9 + $0xf0] sm:$0xff] }
 0x147   : > { %v1922_v22 = vmax.f32 %v1762_v25, 0.0  ;;  %v1923_v23 = vmax.f32 %v1763_v13, 0.0  ;;  %v907_v35 = vadd.f32 %v906_v54, %v3433_v45  ;;  %v996_v24 = vadd.f32 %v995_v21, %v3447_v62  ;;  %v819_v26 = vpop.f32.mrf.mxu1  ;;  %v1086_v12 = vpop.f32.mrf.mxu0  ;;  %v2772_v10 = vld [vmem:[%s3016_s12 + $0x70] sm:$0xff] }
 0x148   : > { %v1926_v29 = vmax.f32 %v1766_v15, 0.0  ;;  %v1929_v30 = vmax.f32 %v1769_v16, 0.0  ;;  %v820_v31 = vadd.f32 %v819_v26, %v3419_v14  ;;  %v1087_v32 = vadd.f32 %v1086_v12, %v3423_v18 }
 0x149   : > { %2082 = vst [vmem:[%s3299_s11 + $0x178] sm:$0xff] %v1922_v22  ;;  %v1191_v33 = vmax.f32 %v907_v35, 0.0  ;;  %v1192_v38 = vmax.f32 %v996_v24, 0.0  ;;  %v1456_v17 = vunpack.c.h.bf16 %v2771_v7 }
 0x14a   : > { %2083 = vst [vmem:[%s3299_s11 + $0x180] sm:$0xff] %v1923_v23  ;;  %v1195_v19 = vmax.f32 %v820_v31, 0.0  ;;  %v1198_v42 = vmax.f32 %v1087_v32, 0.0  ;;  %v1336_v23 = vld [vmem:[%s3266_s9 + $0xf8] sm:$0xff]  ;;  %v1340_v31 = vld [vmem:[%s3266_s9 + $0x114] sm:$0xf] }
 0x14b   : > { %2086 = vst [vmem:[%s3299_s11 + $0x198] sm:$0xff] %v1926_v29  ;;  %v1607_v44 = vmul.f32 0.1, %v1191_v33  ;;  %v1608_v28 = vmul.f32 0.1, %v1192_v38 }
 0x14c   : > { %2089 = vst [vmem:[%s3299_s11 + $0x1b0] sm:$0xff] %v1929_v30  ;;  %v1611_v60 = vmul.f32 0.1, %v1195_v19  ;;  %v1614_v46 = vmul.f32 0.1, %v1198_v42  ;;  %v1457_v19 = vunpack.c.l.bf16 %v1336_v23 }
 0x14d   : > { %v1767_v41 = vadd.f32 %v1607_v44, %v1447_v36  ;;  %v1768_v47 = vadd.f32 %v1608_v28, %v1448_v39 }
 0x14e   : > { %v1771_v52 = vadd.f32 %v1611_v60, %v1451_v40  ;;  %v1774_v48 = vadd.f32 %v1614_v46, %v1454_v43  ;;  %v908_v49 = vpop.f32.mrf.mxu2  ;;  %v997_v57 = vpop.f32.mrf.mxu3  ;;  %v1458_v40 = vunpack.c.h.bf16 %v1336_v23  ;;  %v2773_v43 = vld [vmem:[%s3266_s9 + $0x104] sm:$0xff]  ;;  %v1464_v60 = vunpack.c.l.bf16 %v1340_v31 }
 0x14f   : > { %v1927_v51 = vmax.f32 %v1767_v41, 0.0  ;;  %v1928_v55 = vmax.f32 %v1768_v47, 0.0  ;;  %v909_v58 = vadd.f32 %v908_v49, %v3433_v45  ;;  %v998_v59 = vadd.f32 %v997_v57, %v3447_v62  ;;  %v822_v61 = vpop.f32.mrf.mxu1  ;;  %v1089_v63 = vpop.f32.mrf.mxu0 }
 0x150   : > { %v1931_v56 = vmax.f32 %v1771_v52, 0.0  ;;  %v1934_v1 = vmax.f32 %v1774_v48, 0.0  ;;  %v823_v2 = vadd.f32 %v822_v61, %v3419_v14  ;;  %v1090_v3 = vadd.f32 %v1089_v63, %v3423_v18 }
 0x151   : > { %2087 = vst [vmem:[%s3299_s11 + $0x1a0] sm:$0xff] %v1927_v51  ;;  %v1196_v37 = vmax.f32 %v909_v58, 0.0  ;;  %v1197_v34 = vmax.f32 %v998_v59, 0.0  ;;  %v1461_v44 = vunpack.c.h.bf16 %v2773_v43 }
 0x152   : > { %2088 = vst [vmem:[%s3299_s11 + $0x1a8] sm:$0xff] %v1928_v55  ;;  %v1200_v6 = vmax.f32 %v823_v2, 0.0  ;;  %v1203_v8 = vmax.f32 %v1090_v3, 0.0  ;;  %2577 = vmatmul.msk.bf16.gmra.mxu1 %vm645_vm0, %v2772_v10  ;;  %2625 = vmatmul.msk.bf16.gmra.mxu0 %vm645_vm0, %v2772_v10  ;;  %v1339_v55 = vld [vmem:[%s3266_s9 + $0x10c] sm:$0xff]  ;;  %v1343_v2 = vld [vmem:[%s3266_s9 + $0x128] sm:$0xf] }
 0x153   : > { %2091 = vst [vmem:[%s3299_s11 + $0x1c0] sm:$0xff] %v1931_v56  ;;  %v1612_v11 = vmul.f32 0.1, %v1196_v37  ;;  %v1613_v25 = vmul.f32 0.1, %v1197_v34  ;;  %2593 = vmatmul.msk.bf16.gmra.mxu2 %vm645_vm0, %v2772_v10  ;;  %2609 = vmatmul.msk.bf16.gmra.mxu3 %vm645_vm0, %v2772_v10 }
 0x154   : > { %2094 = vst [vmem:[%s3299_s11 + $0x1d8] sm:$0xff] %v1934_v1  ;;  %v1616_v13 = vmul.f32 0.1, %v1200_v6  ;;  %v1619_v15 = vmul.f32 0.1, %v1203_v8  ;;  %v1462_v6 = vunpack.c.l.bf16 %v1339_v55 }
 0x155   : > { %v1772_v16 = vadd.f32 %v1612_v11, %v1452_v5  ;;  %v1773_v54 = vadd.f32 %v1613_v25, %v1453_v4  ;;  %v1469_v25 = vunpack.c.l.bf16 %v1343_v2 }
 0x156   : > { %v1776_v20 = vadd.f32 %v1616_v13, %v1456_v17  ;;  %v1779_v21 = vadd.f32 %v1619_v15, %v1459_v9  ;;  %v911_v22 = vpop.f32.mrf.mxu2  ;;  %v1000_v35 = vpop.f32.mrf.mxu3  ;;  %v1463_v17 = vunpack.c.h.bf16 %v1339_v55  ;;  %v2774_v9 = vld [vmem:[%s3266_s9 + $0x118] sm:$0xff] }
 0x157   : > { %v1932_v24 = vmax.f32 %v1772_v16, 0.0  ;;  %v1933_v26 = vmax.f32 %v1773_v54, 0.0  ;;  %v912_v12 = vadd.f32 %v911_v22, %v3433_v45  ;;  %v1001_v27 = vadd.f32 %v1000_v35, %v3447_v62  ;;  %v824_v29 = vpop.f32.mrf.mxu1  ;;  %v1091_v30 = vpop.f32.mrf.mxu0  ;;  %v2775_v13 = vld [vmem:[%s3016_s12 + $0x78] sm:$0xff]  ;;  %s2706_s12 = smul.u32 1280, %s2863_s18 }
 0x158   : > { %v1936_v32 = vmax.f32 %v1776_v20, 0.0  ;;  %v1939_v33 = vmax.f32 %v1779_v21, 0.0  ;;  %v825_v36 = vadd.f32 %v824_v29, %v3419_v14  ;;  %v1092_v38 = vadd.f32 %v1091_v30, %v3423_v18 }
 0x159   : > { %2092 = vst [vmem:[%s3299_s11 + $0x1c8] sm:$0xff] %v1932_v24  ;;  %v1201_v39 = vmax.f32 %v912_v12, 0.0  ;;  %v1202_v53 = vmax.f32 %v1001_v27, 0.0  ;;  %v1466_v10 = vunpack.c.h.bf16 %v2774_v9  ;;  %s2210_s14 = scalar_lea.hbm %s3884_s4, %s2706_s12 }
 0x15a   : > { %2093 = vst [vmem:[%s3299_s11 + $0x1d0] sm:$0xff] %v1933_v26  ;;  %v1205_v42 = vmax.f32 %v825_v36, 0.0  ;;  %v1208_v28 = vmax.f32 %v1092_v38, 0.0  ;;  %v1342_v26 = vld [vmem:[%s3266_s9 + $0x120] sm:$0xff]  ;;  %v1346_v36 = vld [vmem:[%s3266_s9 + $0x13c] sm:$0xf] }
 0x15b   : > { %2096 = vst [vmem:[%s3299_s11 + $0x1e8] sm:$0xff] %v1936_v32  ;;  %v1617_v46 = vmul.f32 0.1, %v1201_v39  ;;  %v1618_v41 = vmul.f32 0.1, %v1202_v53  ;;  %s2213_s24 = sshll.u32 %s2210_s14, 4  ;;  %s2214_s24 = int_to_ptr.hbm [resolvable:$true] %s2213_s24 }
 0x15c   : > { %2099 = vst [vmem:[%s3299_s11 + $0x200] sm:$0xff] %v1939_v33  ;;  %v1621_v47 = vmul.f32 0.1, %v1205_v42  ;;  %v1624_v52 = vmul.f32 0.1, %v1208_v28  ;;  %v1467_v42 = vunpack.c.l.bf16 %v1342_v26  ;;  %s2807_s30 = sshra.s32 %s2214_s24, 4  ;;  %s2808_s30 = int_to_ptr.hbm [resolvable:$true] %s2807_s30 }
 0x15d   : > { %v1777_v48 = vadd.f32 %v1617_v46, %v1457_v19  ;;  %v1778_v49 = vadd.f32 %v1618_v41, %v1458_v40  ;;  %s2809_s22 = scalar_lea.hbm %s2808_s30, 1280  ;;  %p2814_p1 = scmp.lt.s32.totalorder %s2808_s30, %s3884_s4 }
 0x15e   : > { %v1781_v50 = vadd.f32 %v1621_v47, %v1461_v44  ;;  %v1784_v57 = vadd.f32 %v1624_v52, %v1464_v60  ;;  %v913_v51 = vpop.f32.mrf.mxu2  ;;  %v1002_v58 = vpop.f32.mrf.mxu3  ;;  %v1468_v44 = vunpack.c.h.bf16 %v1342_v26  ;;  %v2776_v60 = vld [vmem:[%s3266_s9 + $0x12c] sm:$0xff]  ;;  %v1474_v47 = vunpack.c.l.bf16 %v1346_v36  ;;  %p2810_p12 = scmp.ne.s32.totalorder %s2808_s30, %s2809_s22  ;;  %p2815_p2 = scmp.lt.s32.totalorder %s2813_s7, %s2809_s22 }
 0x15f   : > { %v1937_v59 = vmax.f32 %v1777_v48, 0.0  ;;  %v1938_v61 = vmax.f32 %v1778_v49, 0.0  ;;  %v914_v63 = vadd.f32 %v913_v51, %v3433_v45  ;;  %v1003_v0 = vadd.f32 %v1002_v58, %v3447_v62  ;;  %v827_v56 = vpop.f32.mrf.mxu1  ;;  %v1094_v1 = vpop.f32.mrf.mxu0 }
 0x160   : > { %v1941_v3 = vmax.f32 %v1781_v50, 0.0  ;;  %v1944_v37 = vmax.f32 %v1784_v57, 0.0  ;;  %v828_v5 = vadd.f32 %v827_v56, %v3419_v14  ;;  %v1095_v34 = vadd.f32 %v1094_v1, %v3423_v18  ;;  %p2811_p13 = pnand %p2810_p12, %p2940_p4  ;;  %p2816_p3 = por %p2815_p2, %p2814_p1 }
 0x161   : > { %2097 = vst [vmem:[%s3299_s11 + $0x1f0] sm:$0xff] %v1937_v59  ;;  %v1206_v4 = vmax.f32 %v914_v63, 0.0  ;;  %v1207_v7 = vmax.f32 %v1003_v0, 0.0  ;;  %v1471_v46 = vunpack.c.h.bf16 %v2776_v60 }
 0x162   : > { %2098 = vst [vmem:[%s3299_s11 + $0x1f8] sm:$0xff] %v1938_v61  ;;  %v1210_v8 = vmax.f32 %v828_v5, 0.0  ;;  %v1213_v11 = vmax.f32 %v1095_v34, 0.0  ;;  %2578 = vmatmul.msk.bf16.gmra.mxu1 %vm645_vm0, %v2775_v13  ;;  %2626 = vmatmul.msk.bf16.gmra.mxu0 %vm645_vm0, %v2775_v13  ;;  %v1345_v61 = vld [vmem:[%s3266_s9 + $0x134] sm:$0xff]  ;;  %v1349_v5 = vld [vmem:[%s3266_s9 + $0x150] sm:$0xf]  ;;  %p2812_p0 = pneg %p2811_p13 }
 0x163   : > { %2101 = vst [vmem:[%s3299_s11 + $0x210] sm:$0xff] %v1941_v3  ;;  %v1622_v15 = vmul.f32 0.1, %v1206_v4  ;;  %v1623_v16 = vmul.f32 0.1, %v1207_v7  ;;  %2594 = vmatmul.msk.bf16.gmra.mxu2 %vm645_vm0, %v2775_v13  ;;  %2610 = vmatmul.msk.bf16.gmra.mxu3 %vm645_vm0, %v2775_v13 }
 0x164   : > { %2104 = vst [vmem:[%s3299_s11 + $0x228] sm:$0xff] %v1944_v37  ;;  %v1626_v54 = vmul.f32 0.1, %v1210_v8  ;;  %v1629_v20 = vmul.f32 0.1, %v1213_v11  ;;  %v1472_v8 = vunpack.c.l.bf16 %v1345_v61  ;;  %p2817_p5 = pnand %p2816_p3, %p2812_p0 }
 0x165   : > { %v1782_v21 = vadd.f32 %v1622_v15, %v1462_v6  ;;  %v1783_v22 = vadd.f32 %v1623_v16, %v1463_v17  ;;  %v1479_v16 = vunpack.c.l.bf16 %v1349_v5 }
 0x166   : > { %v1786_v23 = vadd.f32 %v1626_v54, %v1466_v10  ;;  %v1789_v35 = vadd.f32 %v1629_v20, %v1469_v25  ;;  %v916_v24 = vpop.f32.mrf.mxu2  ;;  %v1005_v12 = vpop.f32.mrf.mxu3  ;;  %v1473_v10 = vunpack.c.h.bf16 %v1345_v61  ;;  %v2777_v25 = vld [vmem:[%s3266_s9 + $0x140] sm:$0xff] }
 0x167   : > { %v1942_v27 = vmax.f32 %v1782_v21, 0.0  ;;  %v1943_v29 = vmax.f32 %v1783_v22, 0.0  ;;  %v917_v30 = vadd.f32 %v916_v24, %v3433_v45  ;;  %v1006_v31 = vadd.f32 %v1005_v12, %v3447_v62  ;;  %v829_v32 = vpop.f32.mrf.mxu1  ;;  %v1096_v33 = vpop.f32.mrf.mxu0 }
 0x168   : > { %v1946_v38 = vmax.f32 %v1786_v23, 0.0  ;;  %v1949_v39 = vmax.f32 %v1789_v35, 0.0  ;;  %v830_v19 = vadd.f32 %v829_v32, %v3419_v14  ;;  %v1097_v53 = vadd.f32 %v1096_v33, %v3423_v18 }
 0x169   : > { %2102 = vst [vmem:[%s3299_s11 + $0x218] sm:$0xff] %v1942_v27  ;;  %v1211_v40 = vmax.f32 %v917_v30, 0.0  ;;  %v1212_v43 = vmax.f32 %v1006_v31, 0.0  ;;  %v1476_v13 = vunpack.c.h.bf16 %v2777_v25  ;;  %v1348_v27 = vld [vmem:[%s3266_s9 + $0x148] sm:$0xff] }
 0x16a   : > { %2103 = vst [vmem:[%s3299_s11 + $0x220] sm:$0xff] %v1943_v29  ;;  %v1215_v28 = vmax.f32 %v830_v19, 0.0  ;;  %v1218_v41 = vmax.f32 %v1097_v53, 0.0  ;;  %v1478_v60 = vunpack.c.h.bf16 %v1348_v27 }
 0x16b   : > { %2106 = vst [vmem:[%s3299_s11 + $0x238] sm:$0xff] %v1946_v38  ;;  %v1627_v52 = vmul.f32 0.1, %v1211_v40  ;;  %v1628_v48 = vmul.f32 0.1, %v1212_v43 }
 0x16c   : > { %2109 = vst [vmem:[%s3299_s11 + $0x250] sm:$0xff] %v1949_v39  ;;  %v1631_v49 = vmul.f32 0.1, %v1215_v28  ;;  %v1634_v50 = vmul.f32 0.1, %v1218_v41  ;;  %v2778_v41 = vld [vmem:[%s3266_s9 + $0x154] sm:$0xff] }
 0x16d   : > { %v1787_v57 = vadd.f32 %v1627_v52, %v1467_v42  ;;  %v1788_v51 = vadd.f32 %v1628_v48, %v1468_v44  ;;  %v1352_v39 = vld [vmem:[%s3266_s9 + $0x164] sm:$0xf]  ;;  %v1477_v44 = vunpack.c.l.bf16 %v1348_v27 }
 0x16e   : > { %v1791_v55 = vadd.f32 %v1631_v49, %v1471_v46  ;;  %v1794_v58 = vadd.f32 %v1634_v50, %v1474_v47  ;;  %v918_v59 = vpop.f32.mrf.mxu2  ;;  %v1007_v63 = vpop.f32.mrf.mxu3  ;;  %v1481_v47 = vunpack.c.h.bf16 %v2778_v41  ;;  %v1484_v48 = vunpack.c.l.bf16 %v1352_v39 }
 0x16f   : > { %v1947_v0 = vmax.f32 %v1787_v57, 0.0  ;;  %v1948_v56 = vmax.f32 %v1788_v51, 0.0  ;;  %v919_v1 = vadd.f32 %v918_v59, %v3433_v45  ;;  %v1008_v2 = vadd.f32 %v1007_v63, %v3447_v62  ;;  %v832_v3 = vpop.f32.mrf.mxu1  ;;  %v1099_v37 = vpop.f32.mrf.mxu0 }
 0x170   : > { %v1951_v34 = vmax.f32 %v1791_v55, 0.0  ;;  %v1954_v4 = vmax.f32 %v1794_v58, 0.0  ;;  %v833_v6 = vadd.f32 %v832_v3, %v3419_v14  ;;  %v1100_v7 = vadd.f32 %v1099_v37, %v3423_v18 }
 0x171   : > { %2107 = vst [vmem:[%s3299_s11 + $0x240] sm:$0xff] %v1947_v0  ;;  %v1216_v17 = vmax.f32 %v919_v1, 0.0  ;;  %v1217_v9 = vmax.f32 %v1008_v2, 0.0  ;;  %v1351_v0 = vld [vmem:[%s3266_s9 + $0x15c] sm:$0xff] }
 0x172   : > { %2108 = vst [vmem:[%s3299_s11 + $0x248] sm:$0xff] %v1948_v56  ;;  %v1220_v11 = vmax.f32 %v833_v6, 0.0  ;;  %v1223_v15 = vmax.f32 %v1100_v7, 0.0  ;;  %v1483_v25 = vunpack.c.h.bf16 %v1351_v0 }
 0x173   : > { %2111 = vst [vmem:[%s3299_s11 + $0x260] sm:$0xff] %v1951_v34  ;;  %v1632_v54 = vmul.f32 0.1, %v1216_v17  ;;  %v1633_v20 = vmul.f32 0.1, %v1217_v9 }
 0x174   : > { %2114 = vst [vmem:[%s3299_s11 + $0x278] sm:$0xff] %v1954_v4  ;;  %v1636_v21 = vmul.f32 0.1, %v1220_v11  ;;  %v1639_v22 = vmul.f32 0.1, %v1223_v15  ;;  %v2779_v15 = vld [vmem:[%s3266_s9 + $0x168] sm:$0xff] }
 0x175   : > { %v1792_v23 = vadd.f32 %v1632_v54, %v1472_v8  ;;  %v1793_v35 = vadd.f32 %v1633_v20, %v1473_v10  ;;  %v1355_v4 = vld [vmem:[%s3266_s9 + $0x178] sm:$0xf]  ;;  %v1482_v10 = vunpack.c.l.bf16 %v1351_v0 }
 0x176   : > { %v1796_v24 = vadd.f32 %v1636_v21, %v1476_v13  ;;  %v1799_v26 = vadd.f32 %v1639_v22, %v1479_v16  ;;  %v921_v12 = vpop.f32.mrf.mxu2  ;;  %v1010_v29 = vpop.f32.mrf.mxu3  ;;  %v1486_v16 = vunpack.c.h.bf16 %v2779_v15  ;;  %v1489_v20 = vunpack.c.l.bf16 %v1355_v4 }
 0x177   : > { %v1952_v30 = vmax.f32 %v1792_v23, 0.0  ;;  %v1953_v31 = vmax.f32 %v1793_v35, 0.0  ;;  %v922_v32 = vadd.f32 %v921_v12, %v3433_v45  ;;  %v1011_v33 = vadd.f32 %v1010_v29, %v3447_v62  ;;  %v834_v36 = vpop.f32.mrf.mxu1  ;;  %v1101_v38 = vpop.f32.mrf.mxu0 }
 0x178   : > { %v1956_v19 = vmax.f32 %v1796_v24, 0.0  ;;  %v1959_v53 = vmax.f32 %v1799_v26, 0.0  ;;  %v835_v40 = vadd.f32 %v834_v36, %v3419_v14  ;;  %v1102_v42 = vadd.f32 %v1101_v38, %v3423_v18 }
 0x179   : > { %2112 = vst [vmem:[%s3299_s11 + $0x268] sm:$0xff] %v1952_v30  ;;  %v1221_v43 = vmax.f32 %v922_v32, 0.0  ;;  %v1222_v28 = vmax.f32 %v1011_v33, 0.0  ;;  %v1354_v30 = vld [vmem:[%s3266_s9 + $0x170] sm:$0xff] }
 0x17a   : > { %2113 = vst [vmem:[%s3299_s11 + $0x270] sm:$0xff] %v1953_v31  ;;  %v1225_v46 = vmax.f32 %v835_v40, 0.0  ;;  %v1228_v52 = vmax.f32 %v1102_v42, 0.0  ;;  %v1488_v41 = vunpack.c.h.bf16 %v1354_v30 }
 0x17b   : > { %2116 = vst [vmem:[%s3299_s11 + $0x288] sm:$0xff] %v1956_v19  ;;  %v1637_v49 = vmul.f32 0.1, %v1221_v43  ;;  %v1638_v50 = vmul.f32 0.1, %v1222_v28 }
 0x17c   : > { %2119 = vst [vmem:[%s3299_s11 + $0x2a0] sm:$0xff] %v1959_v53  ;;  %v1641_v57 = vmul.f32 0.1, %v1225_v46  ;;  %v1644_v51 = vmul.f32 0.1, %v1228_v52  ;;  %v2780_v52 = vld [vmem:[%s3266_s9 + $0x17c] sm:$0xff] }
 0x17d   : > { %v1797_v55 = vadd.f32 %v1637_v49, %v1477_v44  ;;  %v1798_v58 = vadd.f32 %v1638_v50, %v1478_v60  ;;  %v1358_v53 = vld [vmem:[%s3266_s9 + $0x18c] sm:$0xf]  ;;  %v1487_v60 = vunpack.c.l.bf16 %v1354_v30 }
 0x17e   : > { %v1801_v59 = vadd.f32 %v1641_v57, %v1481_v47  ;;  %v1804_v61 = vadd.f32 %v1644_v51, %v1484_v48  ;;  %v923_v63 = vpop.f32.mrf.mxu2  ;;  %v1012_v56 = vpop.f32.mrf.mxu3  ;;  %v1491_v48 = vunpack.c.h.bf16 %v2780_v52  ;;  %v1494_v50 = vunpack.c.l.bf16 %v1358_v53 }
 0x17f   : > { %v1957_v1 = vmax.f32 %v1797_v55, 0.0  ;;  %v1958_v2 = vmax.f32 %v1798_v58, 0.0  ;;  %v924_v3 = vadd.f32 %v923_v63, %v3433_v45  ;;  %v1013_v37 = vadd.f32 %v1012_v56, %v3447_v62  ;;  %v837_v5 = vpop.f32.mrf.mxu1  ;;  %v1104_v34 = vpop.f32.mrf.mxu0 }
 0x180   : > { %v1961_v6 = vmax.f32 %v1801_v59, 0.0  ;;  %v1964_v7 = vmax.f32 %v1804_v61, 0.0  ;;  %v838_v17 = vadd.f32 %v837_v5, %v3419_v14  ;;  %v1105_v8 = vadd.f32 %v1104_v34, %v3423_v18 }
 0x181   : > { %2117 = vst [vmem:[%s3299_s11 + $0x290] sm:$0xff] %v1957_v1  ;;  %v1226_v9 = vmax.f32 %v924_v3, 0.0  ;;  %v1227_v11 = vmax.f32 %v1013_v37, 0.0  ;;  %v1357_v1 = vld [vmem:[%s3266_s9 + $0x184] sm:$0xff] }
 0x182   : > { %2118 = vst [vmem:[%s3299_s11 + $0x298] sm:$0xff] %v1958_v2  ;;  %v1230_v13 = vmax.f32 %v838_v17, 0.0  ;;  %v1233_v54 = vmax.f32 %v1105_v8, 0.0  ;;  %v1493_v15 = vunpack.c.h.bf16 %v1357_v1 }
 0x183   : > { %2121 = vst [vmem:[%s3299_s11 + $0x2b0] sm:$0xff] %v1961_v6  ;;  %v1642_v21 = vmul.f32 0.1, %v1226_v9  ;;  %v1643_v22 = vmul.f32 0.1, %v1227_v11 }
 0x184   : > { %2124 = vst [vmem:[%s3299_s11 + $0x2c8] sm:$0xff] %v1964_v7  ;;  %v1646_v23 = vmul.f32 0.1, %v1230_v13  ;;  %v1649_v35 = vmul.f32 0.1, %v1233_v54  ;;  %v2781_v54 = vld [vmem:[%s3266_s9 + $0x190] sm:$0xff] }
 0x185   : > { %v1802_v24 = vadd.f32 %v1642_v21, %v1482_v10  ;;  %v1803_v26 = vadd.f32 %v1643_v22, %v1483_v25  ;;  %v1361_v7 = vld [vmem:[%s3266_s9 + $0x1a0] sm:$0xf]  ;;  %v1492_v25 = vunpack.c.l.bf16 %v1357_v1 }
 0x186   : > { %v1806_v12 = vadd.f32 %v1646_v23, %v1486_v16  ;;  %v1809_v27 = vadd.f32 %v1649_v35, %v1489_v20  ;;  %v926_v29 = vpop.f32.mrf.mxu2  ;;  %v1015_v31 = vpop.f32.mrf.mxu3  ;;  %v1496_v20 = vunpack.c.h.bf16 %v2781_v54  ;;  %v1499_v22 = vunpack.c.l.bf16 %v1361_v7 }
 0x187   : > { %v1962_v32 = vmax.f32 %v1802_v24, 0.0  ;;  %v1963_v33 = vmax.f32 %v1803_v26, 0.0  ;;  %v927_v36 = vadd.f32 %v926_v29, %v3433_v45  ;;  %v1016_v38 = vadd.f32 %v1015_v31, %v3447_v62  ;;  %v839_v39 = vpop.f32.mrf.mxu1  ;;  %v1106_v19 = vpop.f32.mrf.mxu0 }
 0x188   : > { %v1966_v40 = vmax.f32 %v1806_v12, 0.0  ;;  %v1969_v42 = vmax.f32 %v1809_v27, 0.0  ;;  %v840_v43 = vadd.f32 %v839_v39, %v3419_v14  ;;  %v1107_v44 = vadd.f32 %v1106_v19, %v3423_v18 }
 0x189   : > { %2122 = vst [vmem:[%s3299_s11 + $0x2b8] sm:$0xff] %v1962_v32  ;;  %v1231_v28 = vmax.f32 %v927_v36, 0.0  ;;  %v1232_v46 = vmax.f32 %v1016_v38, 0.0  ;;  %v1360_v32 = vld [vmem:[%s3266_s9 + $0x198] sm:$0xff] }
 0x18a   : > { %2123 = vst [vmem:[%s3299_s11 + $0x2c0] sm:$0xff] %v1963_v33  ;;  %v1235_v47 = vmax.f32 %v840_v43, 0.0  ;;  %v1238_v49 = vmax.f32 %v1107_v44, 0.0  ;;  %v1498_v52 = vunpack.c.h.bf16 %v1360_v32 }
 0x18b   : > { %2126 = vst [vmem:[%s3299_s11 + $0x2d8] sm:$0xff] %v1966_v40  ;;  %v1647_v57 = vmul.f32 0.1, %v1231_v28  ;;  %v1648_v51 = vmul.f32 0.1, %v1232_v46 }
 0x18c   : > { %2129 = vst [vmem:[%s3299_s11 + $0x2f0] sm:$0xff] %v1969_v42  ;;  %v1651_v55 = vmul.f32 0.1, %v1235_v47  ;;  %v1654_v58 = vmul.f32 0.1, %v1238_v49  ;;  %v2782_v49 = vld [vmem:[%s3266_s9 + $0x1a4] sm:$0xff] }
 0x18d   : > { %v1807_v59 = vadd.f32 %v1647_v57, %v1487_v60  ;;  %v1808_v61 = vadd.f32 %v1648_v51, %v1488_v41  ;;  %v1364_v42 = vld [vmem:[%s3266_s9 + $0x1b4] sm:$0xf]  ;;  %v1497_v41 = vunpack.c.l.bf16 %v1360_v32 }
 0x18e   : > { %v1811_v63 = vadd.f32 %v1651_v55, %v1491_v48  ;;  %v1814_v0 = vadd.f32 %v1654_v58, %v1494_v50  ;;  %v928_v56 = vpop.f32.mrf.mxu2  ;;  %v1017_v2 = vpop.f32.mrf.mxu3  ;;  %v1501_v50 = vunpack.c.h.bf16 %v2782_v49  ;;  %v1504_v51 = vunpack.c.l.bf16 %v1364_v42 }
 0x18f   : > { %v1967_v3 = vmax.f32 %v1807_v59, 0.0  ;;  %v1968_v37 = vmax.f32 %v1808_v61, 0.0  ;;  %v929_v5 = vadd.f32 %v928_v56, %v3433_v45  ;;  %v1018_v34 = vadd.f32 %v1017_v2, %v3447_v62  ;;  %v842_v4 = vpop.f32.mrf.mxu1  ;;  %v1109_v6 = vpop.f32.mrf.mxu0 }
 0x190   : > { %v1971_v17 = vmax.f32 %v1811_v63, 0.0  ;;  %v1974_v8 = vmax.f32 %v1814_v0, 0.0  ;;  %v843_v9 = vadd.f32 %v842_v4, %v3419_v14  ;;  %v1110_v10 = vadd.f32 %v1109_v6, %v3423_v18 }
 0x191   : > { %2127 = vst [vmem:[%s3299_s11 + $0x2e0] sm:$0xff] %v1967_v3  ;;  %v1236_v11 = vmax.f32 %v929_v5, 0.0  ;;  %v1237_v13 = vmax.f32 %v1018_v34, 0.0  ;;  %v1363_v3 = vld [vmem:[%s3266_s9 + $0x1ac] sm:$0xff] }
 0x192   : > { %2128 = vst [vmem:[%s3299_s11 + $0x2e8] sm:$0xff] %v1968_v37  ;;  %v1240_v16 = vmax.f32 %v843_v9, 0.0  ;;  %v1243_v21 = vmax.f32 %v1110_v10, 0.0  ;;  %v1503_v54 = vunpack.c.h.bf16 %v1363_v3 }
 0x193   : > { %2131 = vst [vmem:[%s3299_s11 + $0x300] sm:$0xff] %v1971_v17  ;;  %v1652_v23 = vmul.f32 0.1, %v1236_v11  ;;  %v1653_v35 = vmul.f32 0.1, %v1237_v13 }
 0x194   : > { %2134 = vst [vmem:[%s3299_s11 + $0x318] sm:$0xff] %v1974_v8  ;;  %v1656_v24 = vmul.f32 0.1, %v1240_v16  ;;  %v1659_v26 = vmul.f32 0.1, %v1243_v21  ;;  %v2783_v21 = vld [vmem:[%s3266_s9 + $0x1b8] sm:$0xff] }
 0x195   : > { %v1812_v12 = vadd.f32 %v1652_v23, %v1492_v25  ;;  %v1813_v27 = vadd.f32 %v1653_v35, %v1493_v15  ;;  %v1367_v8 = vld [vmem:[%s3266_s9 + $0x1c8] sm:$0xf]  ;;  %v1502_v15 = vunpack.c.l.bf16 %v1363_v3 }
 0x196   : > { %v1816_v29 = vadd.f32 %v1656_v24, %v1496_v20  ;;  %v1819_v30 = vadd.f32 %v1659_v26, %v1499_v22  ;;  %v931_v31 = vpop.f32.mrf.mxu2  ;;  %v1020_v33 = vpop.f32.mrf.mxu3  ;;  %v1506_v22 = vunpack.c.h.bf16 %v2783_v21  ;;  %v1509_v35 = vunpack.c.l.bf16 %v1367_v8 }
 0x197   : > { %v1972_v36 = vmax.f32 %v1812_v12, 0.0  ;;  %v1973_v38 = vmax.f32 %v1813_v27, 0.0  ;;  %v932_v39 = vadd.f32 %v931_v31, %v3433_v45  ;;  %v1021_v19 = vadd.f32 %v1020_v33, %v3447_v62  ;;  %v844_v53 = vpop.f32.mrf.mxu1  ;;  %v1111_v40 = vpop.f32.mrf.mxu0 }
 0x198   : > { %v1976_v43 = vmax.f32 %v1816_v29, 0.0  ;;  %v1979_v44 = vmax.f32 %v1819_v30, 0.0  ;;  %v845_v28 = vadd.f32 %v844_v53, %v3419_v14  ;;  %v1112_v60 = vadd.f32 %v1111_v40, %v3423_v18 }
 0x199   : > { %2132 = vst [vmem:[%s3299_s11 + $0x308] sm:$0xff] %v1972_v36  ;;  %v1241_v46 = vmax.f32 %v932_v39, 0.0  ;;  %v1242_v47 = vmax.f32 %v1021_v19, 0.0  ;;  %v1366_v36 = vld [vmem:[%s3266_s9 + $0x1c0] sm:$0xff] }
 0x19a   : > { %2133 = vst [vmem:[%s3299_s11 + $0x310] sm:$0xff] %v1973_v38  ;;  %v1245_v48 = vmax.f32 %v845_v28, 0.0  ;;  %v1248_v57 = vmax.f32 %v1112_v60, 0.0  ;;  %v1508_v49 = vunpack.c.h.bf16 %v1366_v36 }
 0x19b   : > { %2136 = vst [vmem:[%s3299_s11 + $0x328] sm:$0xff] %v1976_v43  ;;  %v1657_v55 = vmul.f32 0.1, %v1241_v46  ;;  %v1658_v58 = vmul.f32 0.1, %v1242_v47 }
 0x19c   : > { %2139 = vst [vmem:[%s3299_s11 + $0x340] sm:$0xff] %v1979_v44  ;;  %v1661_v59 = vmul.f32 0.1, %v1245_v48  ;;  %v1664_v61 = vmul.f32 0.1, %v1248_v57  ;;  %v2784_v57 = vld [vmem:[%s3266_s9 + $0x1cc] sm:$0xff] }
 0x19d   : > { %v1817_v63 = vadd.f32 %v1657_v55, %v1497_v41  ;;  %v1818_v0 = vadd.f32 %v1658_v58, %v1498_v52  ;;  %v1370_v44 = vld [vmem:[%s3266_s9 + $0x1dc] sm:$0xf]  ;;  %v1507_v52 = vunpack.c.l.bf16 %v1366_v36 }
 0x19e   : > { %v1821_v56 = vadd.f32 %v1661_v59, %v1501_v50  ;;  %v1824_v1 = vadd.f32 %v1664_v61, %v1504_v51  ;;  %v933_v2 = vpop.f32.mrf.mxu2  ;;  %v1022_v37 = vpop.f32.mrf.mxu3  ;;  %v1511_v51 = vunpack.c.h.bf16 %v2784_v57  ;;  %v1514_v58 = vunpack.c.l.bf16 %v1370_v44 }
 0x19f   : > { %v1977_v5 = vmax.f32 %v1817_v63, 0.0  ;;  %v1978_v34 = vmax.f32 %v1818_v0, 0.0  ;;  %v934_v4 = vadd.f32 %v933_v2, %v3433_v45  ;;  %v1023_v6 = vadd.f32 %v1022_v37, %v3447_v62  ;;  %v847_v7 = vpop.f32.mrf.mxu1  ;;  %v1114_v17 = vpop.f32.mrf.mxu0 }
 0x1a0   : > { %v1981_v9 = vmax.f32 %v1821_v56, 0.0  ;;  %v1984_v10 = vmax.f32 %v1824_v1, 0.0  ;;  %v848_v11 = vadd.f32 %v847_v7, %v3419_v14  ;;  %v1115_v25 = vadd.f32 %v1114_v17, %v3423_v18 }
 0x1a1   : > { %2137 = vst [vmem:[%s3299_s11 + $0x330] sm:$0xff] %v1977_v5  ;;  %v1246_v13 = vmax.f32 %v934_v4, 0.0  ;;  %v1247_v16 = vmax.f32 %v1023_v6, 0.0  ;;  %v1369_v5 = vld [vmem:[%s3266_s9 + $0x1d4] sm:$0xff] }
 0x1a2   : > { %2138 = vst [vmem:[%s3299_s11 + $0x338] sm:$0xff] %v1978_v34  ;;  %v1250_v20 = vmax.f32 %v848_v11, 0.0  ;;  %v1253_v23 = vmax.f32 %v1115_v25, 0.0  ;;  %v1513_v21 = vunpack.c.h.bf16 %v1369_v5 }
 0x1a3   : > { %2141 = vst [vmem:[%s3299_s11 + $0x350] sm:$0xff] %v1981_v9  ;;  %v1662_v24 = vmul.f32 0.1, %v1246_v13  ;;  %v1663_v26 = vmul.f32 0.1, %v1247_v16 }
 0x1a4   : > { %2144 = vst [vmem:[%s3299_s11 + $0x368] sm:$0xff] %v1984_v10  ;;  %v1666_v12 = vmul.f32 0.1, %v1250_v20  ;;  %v1669_v27 = vmul.f32 0.1, %v1253_v23  ;;  %v2785_v23 = vld [vmem:[%s3266_s9 + $0x1e0] sm:$0xff] }
 0x1a5   : > { %v1822_v29 = vadd.f32 %v1662_v24, %v1502_v15  ;;  %v1823_v30 = vadd.f32 %v1663_v26, %v1503_v54  ;;  %v1373_v10 = vld [vmem:[%s3266_s9 + $0x1f0] sm:$0xf]  ;;  %v1512_v54 = vunpack.c.l.bf16 %v1369_v5 }
 0x1a6   : > { %v1826_v31 = vadd.f32 %v1666_v12, %v1506_v22  ;;  %v1829_v32 = vadd.f32 %v1669_v27, %v1509_v35  ;;  %v936_v33 = vpop.f32.mrf.mxu2  ;;  %v1025_v38 = vpop.f32.mrf.mxu3  ;;  %v1516_v35 = vunpack.c.h.bf16 %v2785_v23  ;;  %v1519_v26 = vunpack.c.l.bf16 %v1373_v10 }
 0x1a7   : > { %v1982_v39 = vmax.f32 %v1822_v29, 0.0  ;;  %v1983_v19 = vmax.f32 %v1823_v30, 0.0  ;;  %v937_v53 = vadd.f32 %v936_v33, %v3433_v45  ;;  %v1026_v40 = vadd.f32 %v1025_v38, %v3447_v62  ;;  %v849_v42 = vpop.f32.mrf.mxu1  ;;  %v1116_v43 = vpop.f32.mrf.mxu0 }
 0x1a8   : > { %v1986_v28 = vmax.f32 %v1826_v31, 0.0  ;;  %v1989_v60 = vmax.f32 %v1829_v32, 0.0  ;;  %v850_v46 = vadd.f32 %v849_v42, %v3419_v14  ;;  %v1117_v41 = vadd.f32 %v1116_v43, %v3423_v18 }
 0x1a9   : > { %2142 = vst [vmem:[%s3299_s11 + $0x358] sm:$0xff] %v1982_v39  ;;  %v1251_v47 = vmax.f32 %v937_v53, 0.0  ;;  %v1252_v48 = vmax.f32 %v1026_v40, 0.0  ;;  %v1372_v39 = vld [vmem:[%s3266_s9 + $0x1e8] sm:$0xff] }
 0x1aa   : > { %2143 = vst [vmem:[%s3299_s11 + $0x360] sm:$0xff] %v1983_v19  ;;  %v1255_v50 = vmax.f32 %v850_v46, 0.0  ;;  %v1258_v55 = vmax.f32 %v1117_v41, 0.0  ;;  %v1518_v57 = vunpack.c.h.bf16 %v1372_v39 }
 0x1ab   : > { %2146 = vst [vmem:[%s3299_s11 + $0x378] sm:$0xff] %v1986_v28  ;;  %v1667_v59 = vmul.f32 0.1, %v1251_v47  ;;  %v1668_v61 = vmul.f32 0.1, %v1252_v48 }
 0x1ac   : > { %2149 = vst [vmem:[%s3299_s11 + $0x390] sm:$0xff] %v1989_v60  ;;  %v1671_v63 = vmul.f32 0.1, %v1255_v50  ;;  %v1674_v0 = vmul.f32 0.1, %v1258_v55  ;;  %v2786_v55 = vld [vmem:[%s3266_s9 + $0x1f4] sm:$0xff] }
 0x1ad   : > { %v1827_v56 = vadd.f32 %v1667_v59, %v1507_v52  ;;  %v1828_v1 = vadd.f32 %v1668_v61, %v1508_v49  ;;  %v1376_v60 = vld [vmem:[%s3266_s9 + $0x204] sm:$0xf]  ;;  %v1517_v49 = vunpack.c.l.bf16 %v1372_v39 }
 0x1ae   : > { %v1831_v2 = vadd.f32 %v1671_v63, %v1511_v51  ;;  %v1834_v3 = vadd.f32 %v1674_v0, %v1514_v58  ;;  %v938_v37 = vpop.f32.mrf.mxu2  ;;  %v1027_v34 = vpop.f32.mrf.mxu3  ;;  %v1521_v58 = vunpack.c.h.bf16 %v2786_v55  ;;  %v1524_v61 = vunpack.c.l.bf16 %v1376_v60 }
 0x1af   : > { %v1987_v4 = vmax.f32 %v1827_v56, 0.0  ;;  %v1988_v6 = vmax.f32 %v1828_v1, 0.0  ;;  %v939_v7 = vadd.f32 %v938_v37, %v3433_v45  ;;  %v1028_v17 = vadd.f32 %v1027_v34, %v3447_v62  ;;  %v852_v8 = vpop.f32.mrf.mxu1  ;;  %v1119_v9 = vpop.f32.mrf.mxu0 }
 0x1b0   : > { %v1991_v11 = vmax.f32 %v1831_v2, 0.0  ;;  %v1994_v25 = vmax.f32 %v1834_v3, 0.0  ;;  %v853_v13 = vadd.f32 %v852_v8, %v3419_v14  ;;  %v1120_v15 = vadd.f32 %v1119_v9, %v3423_v18 }
 0x1b1   : > { %2147 = vst [vmem:[%s3299_s11 + $0x380] sm:$0xff] %v1987_v4  ;;  %v1256_v16 = vmax.f32 %v939_v7, 0.0  ;;  %v1257_v20 = vmax.f32 %v1028_v17, 0.0  ;;  %v1375_v4 = vld [vmem:[%s3266_s9 + $0x1fc] sm:$0xff] }
 0x1b2   : > { %2148 = vst [vmem:[%s3299_s11 + $0x388] sm:$0xff] %v1988_v6  ;;  %v1260_v22 = vmax.f32 %v853_v13, 0.0  ;;  %v1263_v24 = vmax.f32 %v1120_v15, 0.0  ;;  %v1523_v23 = vunpack.c.h.bf16 %v1375_v4 }
 0x1b3   : > { %2151 = vst [vmem:[%s3299_s11 + $0x3a0] sm:$0xff] %v1991_v11  ;;  %v1672_v12 = vmul.f32 0.1, %v1256_v16  ;;  %v1673_v27 = vmul.f32 0.1, %v1257_v20 }
 0x1b4   : > { %2154 = vst [vmem:[%s3299_s11 + $0x3b8] sm:$0xff] %v1994_v25  ;;  %v1676_v29 = vmul.f32 0.1, %v1260_v22  ;;  %v1679_v30 = vmul.f32 0.1, %v1263_v24  ;;  %v2787_v24 = vld [vmem:[%s3266_s9 + $0x208] sm:$0xff] }
 0x1b5   : > { %v1832_v31 = vadd.f32 %v1672_v12, %v1512_v54  ;;  %v1833_v32 = vadd.f32 %v1673_v27, %v1513_v21  ;;  %v1379_v25 = vld [vmem:[%s3266_s9 + $0x218] sm:$0xf]  ;;  %v1522_v21 = vunpack.c.l.bf16 %v1375_v4 }
 0x1b6   : > { %v1836_v33 = vadd.f32 %v1676_v29, %v1516_v35  ;;  %v1839_v36 = vadd.f32 %v1679_v30, %v1519_v26  ;;  %v941_v38 = vpop.f32.mrf.mxu2  ;;  %v1030_v19 = vpop.f32.mrf.mxu3  ;;  %v1526_v26 = vunpack.c.h.bf16 %v2787_v24  ;;  %v1529_v27 = vunpack.c.l.bf16 %v1379_v25 }
 0x1b7   : > { %v1992_v53 = vmax.f32 %v1832_v31, 0.0  ;;  %v1993_v40 = vmax.f32 %v1833_v32, 0.0  ;;  %v942_v42 = vadd.f32 %v941_v38, %v3433_v45  ;;  %v1031_v43 = vadd.f32 %v1030_v19, %v3447_v62  ;;  %v854_v44 = vpop.f32.mrf.mxu1  ;;  %v1121_v28 = vpop.f32.mrf.mxu0 }
 0x1b8   : > { %v1996_v46 = vmax.f32 %v1836_v33, 0.0  ;;  %v1999_v41 = vmax.f32 %v1839_v36, 0.0  ;;  %v855_v47 = vadd.f32 %v854_v44, %v3419_v14  ;;  %v1122_v52 = vadd.f32 %v1121_v28, %v3423_v18 }
 0x1b9   : > { %2152 = vst [vmem:[%s3299_s11 + $0x3a8] sm:$0xff] %v1992_v53  ;;  %v1261_v48 = vmax.f32 %v942_v42, 0.0  ;;  %v1262_v50 = vmax.f32 %v1031_v43, 0.0  ;;  %v1378_v53 = vld [vmem:[%s3266_s9 + $0x210] sm:$0xff] }
 0x1ba   : > { %2153 = vst [vmem:[%s3299_s11 + $0x3b0] sm:$0xff] %v1993_v40  ;;  %v1265_v51 = vmax.f32 %v855_v47, 0.0  ;;  %v1268_v59 = vmax.f32 %v1122_v52, 0.0  ;;  %v1528_v55 = vunpack.c.h.bf16 %v1378_v53 }
 0x1bb   : > { %2156 = vst [vmem:[%s3299_s11 + $0x3c8] sm:$0xff] %v1996_v46  ;;  %v1677_v63 = vmul.f32 0.1, %v1261_v48  ;;  %v1678_v0 = vmul.f32 0.1, %v1262_v50 }
 0x1bc   : > { %2159 = vst [vmem:[%s3299_s11 + $0x3e0] sm:$0xff] %v1999_v41  ;;  %v1681_v56 = vmul.f32 0.1, %v1265_v51  ;;  %v1684_v1 = vmul.f32 0.1, %v1268_v59  ;;  %v2788_v59 = vld [vmem:[%s3266_s9 + $0x21c] sm:$0xff] }
 0x1bd   : > { %v1837_v2 = vadd.f32 %v1677_v63, %v1517_v49  ;;  %v1838_v3 = vadd.f32 %v1678_v0, %v1518_v57  ;;  %v1382_v41 = vld [vmem:[%s3266_s9 + $0x22c] sm:$0xf]  ;;  %v1527_v57 = vunpack.c.l.bf16 %v1378_v53 }
 0x1be   : > { %v1841_v37 = vadd.f32 %v1681_v56, %v1521_v58  ;;  %v1844_v5 = vadd.f32 %v1684_v1, %v1524_v61  ;;  %v943_v34 = vpop.f32.mrf.mxu2  ;;  %v1032_v6 = vpop.f32.mrf.mxu3  ;;  %v1531_v61 = vunpack.c.h.bf16 %v2788_v59  ;;  %v1534_v0 = vunpack.c.l.bf16 %v1382_v41 }
 0x1bf   : > { %v1997_v7 = vmax.f32 %v1837_v2, 0.0  ;;  %v1998_v17 = vmax.f32 %v1838_v3, 0.0  ;;  %v944_v8 = vadd.f32 %v943_v34, %v3433_v45  ;;  %v1033_v9 = vadd.f32 %v1032_v6, %v3447_v62  ;;  %v857_v10 = vpop.f32.mrf.mxu1  ;;  %v1124_v11 = vpop.f32.mrf.mxu0 }
 0x1c0   : > { %v2001_v13 = vmax.f32 %v1841_v37, 0.0  ;;  %v2004_v15 = vmax.f32 %v1844_v5, 0.0  ;;  %v858_v16 = vadd.f32 %v857_v10, %v3419_v14  ;;  %v1125_v54 = vadd.f32 %v1124_v11, %v3423_v18 }
 0x1c1   : > { %2157 = vst [vmem:[%s3299_s11 + $0x3d0] sm:$0xff] %v1997_v7  ;;  %v1266_v20 = vmax.f32 %v944_v8, 0.0  ;;  %v1267_v22 = vmax.f32 %v1033_v9, 0.0  ;;  %v1381_v7 = vld [vmem:[%s3266_s9 + $0x224] sm:$0xff] }
 0x1c2   : > { %2158 = vst [vmem:[%s3299_s11 + $0x3d8] sm:$0xff] %v1998_v17  ;;  %v1270_v35 = vmax.f32 %v858_v16, 0.0  ;;  %v1273_v12 = vmax.f32 %v1125_v54, 0.0  ;;  %v1533_v24 = vunpack.c.h.bf16 %v1381_v7 }
 0x1c3   : > { %2161 = vst [vmem:[%s3299_s11 + $0x3f0] sm:$0xff] %v2001_v13  ;;  %v1682_v29 = vmul.f32 0.1, %v1266_v20  ;;  %v1683_v30 = vmul.f32 0.1, %v1267_v22 }
 0x1c4   : > { %2164 = vst [vmem:[%s3299_s11 + $0x408] sm:$0xff] %v2004_v15  ;;  %v1686_v31 = vmul.f32 0.1, %v1270_v35  ;;  %v1689_v32 = vmul.f32 0.1, %v1273_v12  ;;  %v2789_v12 = vld [vmem:[%s3266_s9 + $0x230] sm:$0xff] }
 0x1c5   : > { %v1842_v33 = vadd.f32 %v1682_v29, %v1522_v21  ;;  %v1843_v36 = vadd.f32 %v1683_v30, %v1523_v23  ;;  %v1385_v15 = vld [vmem:[%s3266_s9 + $0x240] sm:$0xf]  ;;  %v1532_v23 = vunpack.c.l.bf16 %v1381_v7 }
 0x1c6   : > { %v1846_v38 = vadd.f32 %v1686_v31, %v1526_v26  ;;  %v1849_v39 = vadd.f32 %v1689_v32, %v1529_v27  ;;  %v946_v19 = vpop.f32.mrf.mxu2  ;;  %v1035_v40 = vpop.f32.mrf.mxu3  ;;  %v1536_v27 = vunpack.c.h.bf16 %v2789_v12  ;;  %v1539_v30 = vunpack.c.l.bf16 %v1385_v15 }
 0x1c7   : > { %v2002_v42 = vmax.f32 %v1842_v33, 0.0  ;;  %v2003_v43 = vmax.f32 %v1843_v36, 0.0  ;;  %v947_v44 = vadd.f32 %v946_v19, %v3433_v45  ;;  %v1036_v28 = vadd.f32 %v1035_v40, %v3447_v62  ;;  %v859_v60 = vpop.f32.mrf.mxu1  ;;  %v1126_v46 = vpop.f32.mrf.mxu0 }
 0x1c8   : > { %v2006_v47 = vmax.f32 %v1846_v38, 0.0  ;;  %v2009_v52 = vmax.f32 %v1849_v39, 0.0  ;;  %v860_v48 = vadd.f32 %v859_v60, %v3419_v14  ;;  %v1127_v49 = vadd.f32 %v1126_v46, %v3423_v18 }
 0x1c9   : > { %2162 = vst [vmem:[%s3299_s11 + $0x3f8] sm:$0xff] %v2002_v42  ;;  %v1271_v50 = vmax.f32 %v947_v44, 0.0  ;;  %v1272_v51 = vmax.f32 %v1036_v28, 0.0  ;;  %v1384_v42 = vld [vmem:[%s3266_s9 + $0x238] sm:$0xff] }
 0x1ca   : > { %2163 = vst [vmem:[%s3299_s11 + $0x400] sm:$0xff] %v2003_v43  ;;  %v1275_v58 = vmax.f32 %v860_v48, 0.0  ;;  %v1278_v63 = vmax.f32 %v1127_v49, 0.0  ;;  %v1538_v59 = vunpack.c.h.bf16 %v1384_v42 }
 0x1cb   : > { %2166 = vst [vmem:[%s3299_s11 + $0x418] sm:$0xff] %v2006_v47  ;;  %v1687_v56 = vmul.f32 0.1, %v1271_v50  ;;  %v1688_v1 = vmul.f32 0.1, %v1272_v51 }
 0x1cc   : > { %2169 = vst [vmem:[%s3299_s11 + $0x430] sm:$0xff] %v2009_v52  ;;  %v1691_v2 = vmul.f32 0.1, %v1275_v58  ;;  %v1694_v3 = vmul.f32 0.1, %v1278_v63  ;;  %v2790_v63 = vld [vmem:[%s3266_s9 + $0x244] sm:$0xff] }
 0x1cd   : > { %v1847_v37 = vadd.f32 %v1687_v56, %v1527_v57  ;;  %v1848_v5 = vadd.f32 %v1688_v1, %v1528_v55  ;;  %v1388_v52 = vld [vmem:[%s3266_s9 + $0x254] sm:$0xf]  ;;  %v1537_v55 = vunpack.c.l.bf16 %v1384_v42 }
 0x1ce   : > { %v1851_v34 = vadd.f32 %v1691_v2, %v1531_v61  ;;  %v1854_v4 = vadd.f32 %v1694_v3, %v1534_v0  ;;  %v948_v6 = vpop.f32.mrf.mxu2  ;;  %v1037_v17 = vpop.f32.mrf.mxu3  ;;  %v1541_v0 = vunpack.c.h.bf16 %v2790_v63  ;;  %v1544_v1 = vunpack.c.l.bf16 %v1388_v52 }
 0x1cf   : > { %v2007_v8 = vmax.f32 %v1847_v37, 0.0  ;;  %v2008_v9 = vmax.f32 %v1848_v5, 0.0  ;;  %v949_v10 = vadd.f32 %v948_v6, %v3433_v45  ;;  %v1038_v11 = vadd.f32 %v1037_v17, %v3447_v62  ;;  %v862_v25 = vpop.f32.mrf.mxu1  ;;  %v1129_v13 = vpop.f32.mrf.mxu0 }
 0x1d0   : > { %v2011_v16 = vmax.f32 %v1851_v34, 0.0  ;;  %v2014_v54 = vmax.f32 %v1854_v4, 0.0  ;;  %v863_v20 = vadd.f32 %v862_v25, %v3419_v14  ;;  %v1130_v21 = vadd.f32 %v1129_v13, %v3423_v18 }
 0x1d1   : > { %2167 = vst [vmem:[%s3299_s11 + $0x420] sm:$0xff] %v2007_v8  ;;  %v1276_v22 = vmax.f32 %v949_v10, 0.0  ;;  %v1277_v35 = vmax.f32 %v1038_v11, 0.0  ;;  %v1387_v8 = vld [vmem:[%s3266_s9 + $0x24c] sm:$0xff] }
 0x1d2   : > { %2168 = vst [vmem:[%s3299_s11 + $0x428] sm:$0xff] %v2008_v9  ;;  %v1280_v26 = vmax.f32 %v863_v20, 0.0  ;;  %v1283_v29 = vmax.f32 %v1130_v21, 0.0  ;;  %v1543_v12 = vunpack.c.h.bf16 %v1387_v8 }
 0x1d3   : > { %2171 = vst [vmem:[%s3299_s11 + $0x440] sm:$0xff] %v2011_v16  ;;  %v1692_v31 = vmul.f32 0.1, %v1276_v22  ;;  %v1693_v32 = vmul.f32 0.1, %v1277_v35 }
 0x1d4   : > { %2174 = vst [vmem:[%s3299_s11 + $0x458] sm:$0xff] %v2014_v54  ;;  %v1696_v33 = vmul.f32 0.1, %v1280_v26  ;;  %v1699_v36 = vmul.f32 0.1, %v1283_v29  ;;  %v2791_v29 = vld [vmem:[%s3266_s9 + $0x258] sm:$0xff] }
 0x1d5   : > { %v1852_v38 = vadd.f32 %v1692_v31, %v1532_v23  ;;  %v1853_v39 = vadd.f32 %v1693_v32, %v1533_v24  ;;  %v1391_v54 = vld [vmem:[%s3266_s9 + $0x268] sm:$0xf]  ;;  %v1542_v24 = vunpack.c.l.bf16 %v1387_v8  ;;  %v1393_v8 = vld [vmem:[%s3266_s9 + $0x274] sm:$0xff] }
 0x1d6   : > { %v1856_v19 = vadd.f32 %v1696_v33, %v1536_v27  ;;  %v1859_v53 = vadd.f32 %v1699_v36, %v1539_v30  ;;  %v951_v40 = vpop.f32.mrf.mxu2  ;;  %v1040_v43 = vpop.f32.mrf.mxu3  ;;  %v1546_v30 = vunpack.c.h.bf16 %v2791_v29  ;;  %v1549_v32 = vunpack.c.l.bf16 %v1391_v54 }
 0x1d7   : > { %v2012_v44 = vmax.f32 %v1852_v38, 0.0  ;;  %v2013_v28 = vmax.f32 %v1853_v39, 0.0  ;;  %v952_v60 = vadd.f32 %v951_v40, %v3433_v45  ;;  %v1041_v46 = vadd.f32 %v1040_v43, %v3447_v62  ;;  %v864_v41 = vpop.f32.mrf.mxu1  ;;  %v1131_v47 = vpop.f32.mrf.mxu0 }
 0x1d8   : > { %v2016_v48 = vmax.f32 %v1856_v19, 0.0  ;;  %v2019_v49 = vmax.f32 %v1859_v53, 0.0  ;;  %v865_v50 = vadd.f32 %v864_v41, %v3419_v14  ;;  %v1132_v57 = vadd.f32 %v1131_v47, %v3423_v18 }
 0x1d9   : > { %2172 = vst [vmem:[%s3299_s11 + $0x448] sm:$0xff] %v2012_v44  ;;  %v1281_v51 = vmax.f32 %v952_v60, 0.0  ;;  %v1282_v58 = vmax.f32 %v1041_v46, 0.0  ;;  %v1390_v44 = vld [vmem:[%s3266_s9 + $0x260] sm:$0xff] }
 0x1da   : > { %2173 = vst [vmem:[%s3299_s11 + $0x450] sm:$0xff] %v2013_v28  ;;  %v1285_v61 = vmax.f32 %v865_v50, 0.0  ;;  %v1288_v56 = vmax.f32 %v1132_v57, 0.0  ;;  %v1548_v63 = vunpack.c.h.bf16 %v1390_v44 }
 0x1db   : > { %2176 = vst [vmem:[%s3299_s11 + $0x468] sm:$0xff] %v2016_v48  ;;  %v1697_v2 = vmul.f32 0.1, %v1281_v51  ;;  %v1698_v3 = vmul.f32 0.1, %v1282_v58 }
 0x1dc   : > { %2179 = vst [vmem:[%s3299_s11 + $0x480] sm:$0xff] %v2019_v49  ;;  %v1701_v37 = vmul.f32 0.1, %v1285_v61  ;;  %v1704_v5 = vmul.f32 0.1, %v1288_v56  ;;  %v2792_v56 = vld [vmem:[%s3266_s9 + $0x26c] sm:$0xff] }
 0x1dd   : > { %v1857_v34 = vadd.f32 %v1697_v2, %v1537_v55  ;;  %v1858_v4 = vadd.f32 %v1698_v3, %v1538_v59  ;;  %v1394_v49 = vld [vmem:[%s3266_s9 + $0x27c] sm:$0xf]  ;;  %v1547_v59 = vunpack.c.l.bf16 %v1390_v44 }
 0x1de   : > { %v1861_v6 = vadd.f32 %v1701_v37, %v1541_v0  ;;  %v1864_v7 = vadd.f32 %v1704_v5, %v1544_v1  ;;  %v953_v17 = vpop.f32.mrf.mxu2  ;;  %v1042_v9 = vpop.f32.mrf.mxu3  ;;  %v1551_v1 = vunpack.c.h.bf16 %v2792_v56  ;;  %v1554_v3 = vunpack.c.l.bf16 %v1394_v49 }
 0x1df   : > { %v2017_v10 = vmax.f32 %v1857_v34, 0.0  ;;  %v2018_v11 = vmax.f32 %v1858_v4, 0.0  ;;  %v954_v25 = vadd.f32 %v953_v17, %v3433_v45  ;;  %v1043_v13 = vadd.f32 %v1042_v9, %v3447_v62  ;;  %v867_v15 = vpop.f32.mrf.mxu1  ;;  %v1134_v16 = vpop.f32.mrf.mxu0 }
 0x1e0   : > { %v2021_v20 = vmax.f32 %v1861_v6, 0.0  ;;  %v2024_v21 = vmax.f32 %v1864_v7, 0.0  ;;  %v868_v22 = vadd.f32 %v867_v15, %v3419_v14  ;;  %v1135_v23 = vadd.f32 %v1134_v16, %v3423_v18 }
 0x1e1   : > { %2177 = vst [vmem:[%s3299_s11 + $0x470] sm:$0xff] %v2017_v10  ;;  %v1286_v35 = vmax.f32 %v954_v25, 0.0  ;;  %v1287_v26 = vmax.f32 %v1043_v13, 0.0 }
 0x1e2   : > { %2178 = vst [vmem:[%s3299_s11 + $0x478] sm:$0xff] %v2018_v11  ;;  %v1290_v27 = vmax.f32 %v868_v22, 0.0  ;;  %v1293_v31 = vmax.f32 %v1135_v23, 0.0  ;;  %v1553_v22 = vunpack.c.h.bf16 %v1393_v8 }
 0x1e3   : > { %2181 = vst [vmem:[%s3299_s11 + $0x490] sm:$0xff] %v2021_v20  ;;  %v1702_v33 = vmul.f32 0.1, %v1286_v35  ;;  %v1703_v36 = vmul.f32 0.1, %v1287_v26  ;;  %v1552_v20 = vunpack.c.l.bf16 %v1393_v8 }
 0x1e4   : > { %2184 = vst [vmem:[%s3299_s11 + $0x4a8] sm:$0xff] %v2024_v21  ;;  %v1706_v38 = vmul.f32 0.1, %v1290_v27  ;;  %v1709_v39 = vmul.f32 0.1, %v1293_v31 }
 0x1e5   : > { %v1862_v19 = vadd.f32 %v1702_v33, %v1542_v24  ;;  %v1863_v53 = vadd.f32 %v1703_v36, %v1543_v12 }
 0x1e6   : > { %v1866_v40 = vadd.f32 %v1706_v38, %v1546_v30  ;;  %v1869_v42 = vadd.f32 %v1709_v39, %v1549_v32  ;;  %v956_v43 = vpop.f32.mrf.mxu2  ;;  %v1045_v28 = vpop.f32.mrf.mxu3 }
 0x1e7   : > { %v2022_v60 = vmax.f32 %v1862_v19, 0.0  ;;  %v2023_v46 = vmax.f32 %v1863_v53, 0.0  ;;  %v957_v41 = vadd.f32 %v956_v43, %v3433_v45  ;;  %v1046_v47 = vadd.f32 %v1045_v28, %v3447_v62  ;;  %v869_v52 = vpop.f32.mrf.mxu1  ;;  %v1136_v48 = vpop.f32.mrf.mxu0 }
 0x1e8   : > { %v2026_v50 = vmax.f32 %v1866_v40, 0.0  ;;  %v2029_v57 = vmax.f32 %v1869_v42, 0.0  ;;  %v870_v51 = vadd.f32 %v869_v52, %v3419_v14  ;;  %v1137_v55 = vadd.f32 %v1136_v48, %v3423_v18 }
 0x1e9   : > { %2182 = vst [vmem:[%s3299_s11 + $0x498] sm:$0xff] %v2022_v60  ;;  %v1291_v58 = vmax.f32 %v957_v41, 0.0  ;;  %v1292_v61 = vmax.f32 %v1046_v47, 0.0 }
 0x1ea   : > { %2183 = vst [vmem:[%s3299_s11 + $0x4a0] sm:$0xff] %v2023_v46  ;;  %v1295_v0 = vmax.f32 %v870_v51, 0.0  ;;  %v1298_v2 = vmax.f32 %v1137_v55, 0.0 }
 0x1eb   : > { %2186 = vst [vmem:[%s3299_s11 + $0x4b8] sm:$0xff] %v2026_v50  ;;  %v1707_v37 = vmul.f32 0.1, %v1291_v58  ;;  %v1708_v5 = vmul.f32 0.1, %v1292_v61 }
 0x1ec   : > { %2189 = vst [vmem:[%s3299_s11 + $0x4d0] sm:$0xff] %v2029_v57  ;;  %v1711_v14 = vmul.f32 0.1, %v1295_v0  ;;  %v1714_v18 = vmul.f32 0.1, %v1298_v2 }
 0x1ed   : > { %v1867_v34 = vadd.f32 %v1707_v37, %v1547_v59  ;;  %v1868_v4 = vadd.f32 %v1708_v5, %v1548_v63 }
 0x1ee   : > { %v1871_v6 = vadd.f32 %v1711_v14, %v1551_v1  ;;  %v1874_v7 = vadd.f32 %v1714_v18, %v1554_v3  ;;  %v958_v17 = vpop.f32.mrf.mxu2  ;;  %v1047_v9 = vpop.f32.mrf.mxu3 }
 0x1ef   : > { %v2027_v10 = vmax.f32 %v1867_v34, 0.0  ;;  %v2028_v11 = vmax.f32 %v1868_v4, 0.0  ;;  %v959_v25 = vadd.f32 %v958_v17, %v3433_v45  ;;  %v1048_v13 = vadd.f32 %v1047_v9, %v3447_v62 }
 0x1f0   : > { %v2031_v15 = vmax.f32 %v1871_v6, 0.0  ;;  %v2034_v16 = vmax.f32 %v1874_v7, 0.0 }
 0x1f1   : > { %2187 = vst [vmem:[%s3299_s11 + $0x4c0] sm:$0xff] %v2027_v10  ;;  %v1296_v54 = vmax.f32 %v959_v25, 0.0  ;;  %v1297_v21 = vmax.f32 %v1048_v13, 0.0 }
 0x1f2   : > { %2188 = vst [vmem:[%s3299_s11 + $0x4c8] sm:$0xff] %v2028_v11 }
 0x1f3   : > { %2191 = vst [vmem:[%s3299_s11 + $0x4e0] sm:$0xff] %v2031_v15  ;;  %v1712_v23 = vmul.f32 0.1, %v1296_v54  ;;  %v1713_v45 = vmul.f32 0.1, %v1297_v21 }
 0x1f4   : > { %2194 = vst [vmem:[%s3299_s11 + $0x4f8] sm:$0xff] %v2034_v16 }
 0x1f5   : > { %v1872_v62 = vadd.f32 %v1712_v23, %v1552_v20  ;;  %v1873_v35 = vadd.f32 %v1713_v45, %v1553_v22 }
 0x1f7   : > { %v2032_v24 = vmax.f32 %v1872_v62, 0.0  ;;  %v2033_v26 = vmax.f32 %v1873_v35, 0.0 }
 0x1f9   : > { %2192 = vst [vmem:[%s3299_s11 + $0x4e8] sm:$0xff] %v2032_v24 }
 0x1fa   : > { %2193 = vst [vmem:[%s3299_s11 + $0x4f0] sm:$0xff] %v2033_v26 }
 0x1fb   : > { %2820 = shalt.err (!%p2817_p5)
}
 0x1fc   : > { %s2873_s29 = smov 640   ;;  %s2874_s10 = smov 40  }
 0x1fd   : > { %2707 = dma.vmem_to_hbm [thread:$0]  (%p2940_p4), %s2212_s21, 20480, %s2214_s24, %s2196_s26, %s2873_s29, %s2873_s29, %s2874_s10  }
 0x1fe PF: > { %p2713_p6 = scmp.ge.s32.totalorder %s2871_s20, 2  ;;  %s2228_s11 = sand.u32 1, %s2851_s15  }
 0x1ff   : > { %s2229_s12 = scalar_lea.sflag [#allocation3], %s2228_s11 }
 0x200   : > { %p2710_p7 = pnand %p2713_p6, %p2947_p8 }
 0x202   : > { %p2711_p9 = pneg %p2710_p7 }
 0x204   : > { %2846 = dma.done.wait (%p2711_p9), %s2229_s12, 20480  }
 0x205   : > { %2848 = vsyncadd (%p2711_p9), %s2229_s12, 4294946816  ;;  %s17_s20 = sadd.s32 1, %s2871_s20   ;;  %s3887_s15 = smov %s2855_s16 }
 0x206   : > { %p14_p10 = scmp.ge.s32.totalorder %s17_s20, 4   ;;  %s3888_s16 = smov %s2859_s17 }
 0x207   : > { %s3889_s17 = smov %s2953_s28  ;;  %s3890_s18 = smov %s2867_s19 }
 0x208   : > { %s3891_s19 = smov %s3893_s23  ;;  %16 = sbr.rel (!%p14_p10) target bundleno = 4 (0x4), region = 80 }
 0x20d   :  { %2235 = vsyncpa [#allocation3], 1 }
 0x20e   :  { %2237 = vsyncpa [#allocation3 + $0x1], 1 }

</bundles_post_ra>
